<compile_context>
chip_gen: v6e
topology: v6e:2x2x1
jax: 0.10.0
libtpu: 0.0.40
codegen_flags: <defaults>
</compile_context>

<pallas_src>
import functools

import jax
import jax.numpy as jnp
from jax.experimental import pallas as pl
from jax.experimental.pallas import tpu as pltpu

COMPUTE_DTYPE = jnp.bfloat16            # MXU-native input dtype (acc stays f32)
_VMEM_LIMIT = 32 * 1024 * 1024          # safe on v5e/v6e/v7x


def _round_up(x, m):
    return ((x + m - 1) // m) * m


# ---------------------------------------------------------------------------
# Pallas kernel: out = relu?(X @ W + b)   -- full-K block, no reduction axis
# ---------------------------------------------------------------------------
def _matmul_bias_kernel(x_ref, w_ref, b_ref, o_ref, *, apply_relu):
    acc = jnp.dot(x_ref[...], w_ref[...], preferred_element_type=jnp.float32)
    acc = acc + b_ref[...]
    if apply_relu:
        acc = jnp.maximum(acc, 0.0)
    o_ref[...] = acc.astype(o_ref.dtype)


def _choose_m_tiling(M, *, tm_cap=1024, single_tile_max=2048):
    """Pick (tm, Mp): tm is a multiple of 16 (bf16 sublane pack)."""
    mp_min = _round_up(M, 16)
    if mp_min <= single_tile_max:
        return mp_min, mp_min          # one tile covers all rows
    return tm_cap, _round_up(M, tm_cap)


def pallas_linear(x, w, b, *, relu=False, tm_cap=1024, out_dtype=None):
    """x: [M, K], w: [K, N] (already [in, out] layout), b: [N] -> [M, N]."""
    M, K = x.shape
    Kw, N = w.shape
    assert K == Kw, (K, Kw)
    out_dtype = out_dtype if out_dtype is not None else x.dtype

    # Lane-dense output tiles (multiple of 128); K is never tiled.
    if N <= 512:
        tn = _round_up(N, 128)
        Np = tn
    else:
        tn = 512
        Np = _round_up(N, tn)
    tm, Mp = _choose_m_tiling(M, tm_cap=tm_cap)

    xp = x if Mp == M else jnp.pad(x, ((0, Mp - M), (0, 0)))
    wp = w if Np == N else jnp.pad(w, ((0, 0), (0, Np - N)))
    bp = jnp.asarray(b, jnp.float32).reshape(1, N)
    if Np != N:
        bp = jnp.pad(bp, ((0, 0), (0, Np - N)))

    grid = (Mp // tm, Np // tn)
    out = pl.pallas_call(
        functools.partial(_matmul_bias_kernel, apply_relu=relu),
        out_shape=jax.ShapeDtypeStruct((Mp, Np), out_dtype),
        grid_spec=pltpu.PrefetchScalarGridSpec(
            num_scalar_prefetch=0,
            grid=grid,
            in_specs=[
                pl.BlockSpec((tm, K), lambda i, j: (i, 0)),
                pl.BlockSpec((K, tn), lambda i, j: (0, j)),
                pl.BlockSpec((1, tn), lambda i, j: (0, j)),
            ],
            out_specs=pl.BlockSpec((tm, tn), lambda i, j: (i, j)),
        ),
        compiler_params=pltpu.CompilerParams(
            dimension_semantics=("parallel", "parallel"),
            vmem_limit_bytes=_VMEM_LIMIT,
        ),
    )(xp, wp, bp)

    if Mp == M and Np == N:
        return out
    return out[:M, :N]


# ---------------------------------------------------------------------------
# Fused head kernel: out = (X @ W1 + b1) @ W2 + b2     (linear -> actor|critic)
# ---------------------------------------------------------------------------
def _fused_head_kernel(x_ref, w1_ref, b1_ref, w2_ref, b2_ref, o_ref):
    h = jnp.dot(x_ref[...], w1_ref[...], preferred_element_type=jnp.float32)
    h = h + b1_ref[...]                      # nn.Linear(1920, 512): no ReLU
    h = h.astype(w2_ref.dtype)
    out = jnp.dot(h, w2_ref[...], preferred_element_type=jnp.float32)
    out = out + b2_ref[...]
    o_ref[...] = out.astype(o_ref.dtype)


def pallas_fused_heads(feat, w1, b1, w2, b2):
    """feat:[M,1920] -> [M, Np_head] f32 (actor|critic columns, N pre-padded)."""
    M, _ = feat.shape
    Mp = _round_up(M, 16)
    featp = feat if Mp == M else jnp.pad(feat, ((0, Mp - M), (0, 0)))
    N2p = w2.shape[1]
    out = pl.pallas_call(
        _fused_head_kernel,   # everything fits in VMEM: whole-array blocks
        out_shape=jax.ShapeDtypeStruct((Mp, N2p), jnp.float32),
        compiler_params=pltpu.CompilerParams(vmem_limit_bytes=_VMEM_LIMIT),
    )(featp, w1, b1, w2, b2)
    return out[:M]


# ---------------------------------------------------------------------------
# Conv2d (valid padding, square kernel/stride) via im2col + Pallas matmul
# ---------------------------------------------------------------------------
def _im2col(x_nhwc, k, s):
    N, H, W, C = x_nhwc.shape
    Ho = (H - k) // s + 1
    Wo = (W - k) // s + 1
    cols = []
    for kh in range(k):
        for kw in range(k):
            cols.append(
                x_nhwc[:, kh : kh + (Ho - 1) * s + 1 : s,
                          kw : kw + (Wo - 1) * s + 1 : s, :]
            )
    patches = jnp.stack(cols, axis=3)                  # [N, Ho, Wo, k*k, C]
    return patches.reshape(N * Ho * Wo, k * k * C), Ho, Wo


def conv2d_pallas(x_nhwc, w_mat, b, *, ksize, stride, relu, tm_cap=2048):
    """w_mat: [k*k*Cin, Cout] in ((kh, kw), cin) row order, compute dtype."""
    N = x_nhwc.shape[0]
    Cout = w_mat.shape[1]
    patches, Ho, Wo = _im2col(x_nhwc, ksize, stride)
    y = pallas_linear(patches, w_mat, b, relu=relu, tm_cap=tm_cap,
                      out_dtype=x_nhwc.dtype)
    return y.reshape(N, Ho, Wo, Cout)


# ---------------------------------------------------------------------------
# PPO model
# ---------------------------------------------------------------------------
def init_params(key, output_dim):
    # Note: not PyTorch's kaiming-uniform init; benchmark-only weights.
    def dense(k, shape, fan_in):
        return jax.random.normal(k, shape, jnp.float32) / jnp.sqrt(
            jnp.float32(fan_in)
        )

    ks = jax.random.split(key, 14)
    return {
        "c1_w": dense(ks[0], (32, 3, 4, 4), 3 * 4 * 4),
        "c1_b": dense(ks[1], (32,), 3 * 4 * 4),
        "c2_w": dense(ks[2], (64, 32, 4, 4), 32 * 4 * 4),
        "c2_b": dense(ks[3], (64,), 32 * 4 * 4),
        "c3_w": dense(ks[4], (64, 64, 3, 3), 64 * 3 * 3),
        "c3_b": dense(ks[5], (64,), 64 * 3 * 3),
        "c4_w": dense(ks[6], (64, 64, 3, 3), 64 * 3 * 3),
        "c4_b": dense(ks[7], (64,), 64 * 3 * 3),
        "lin_w": dense(ks[8], (512, 1920), 1920),      # PyTorch [out, in]
        "lin_b": dense(ks[9], (512,), 1920),
        "act_w": dense(ks[10], (output_dim, 512), 512),
        "act_b": dense(ks[11], (output_dim,), 512),
        "cri_w": dense(ks[12], (1, 512), 512),
        "cri_b": dense(ks[13], (1,), 512),
    }


def prepare_params(params, output_dim):
    """One-time weight prep: reshape/transpose/pad/cast OUTSIDE the hot path."""
    def conv_mat(w_oihw):
        cout, cin, k, _ = w_oihw.shape
        # match im2col column order ((kh, kw), cin)
        return (jnp.transpose(w_oihw, (2, 3, 1, 0))
                .reshape(k * k * cin, cout).astype(COMPUTE_DTYPE))

    n_head = output_dim + 1
    np_head = _round_up(n_head, 128)
    head_w = jnp.concatenate([params["act_w"].T, params["cri_w"].T], axis=1)
    head_w = jnp.pad(head_w, ((0, 0), (0, np_head - n_head))).astype(COMPUTE_DTYPE)
    head_b = jnp.concatenate([params["act_b"], params["cri_b"]])
    head_b = jnp.pad(head_b, ((0, np_head - n_head),)).reshape(1, np_head)
    head_b = head_b.astype(jnp.float32)

    return {
        "c1_w": conv_mat(params["c1_w"]), "c1_b": params["c1_b"].astype(jnp.float32),
        "c2_w": conv_mat(params["c2_w"]), "c2_b": params["c2_b"].astype(jnp.float32),
        "c3_w": conv_mat(params["c3_w"]), "c3_b": params["c3_b"].astype(jnp.float32),
        "c4_w": conv_mat(params["c4_w"]), "c4_b": params["c4_b"].astype(jnp.float32),
        "lin_w": params["lin_w"].T.astype(COMPUTE_DTYPE),            # [1920, 512]
        "lin_b": params["lin_b"].reshape(1, 512).astype(jnp.float32),
        "head_w": head_w,                                            # [512, 128]
        "head_b": head_b,                                            # [1, 128]
    }


@functools.partial(jax.jit, static_argnames=("output_dim",))
def ppo_forward(prep, x_nchw, *, output_dim):
    # PyTorch input is NCHW; convert once to NHWC + compute dtype for the trunk.
    x = jnp.transpose(x_nchw, (0, 2, 3, 1)).astype(COMPUTE_DTYPE)
    x = conv2d_pallas(x, prep["c1_w"], prep["c1_b"], ksize=4, stride=3,
                      relu=True, tm_cap=1024)          # M=11480: >=2 parallel tiles
    x = conv2d_pallas(x, prep["c2_w"], prep["c2_b"], ksize=4, stride=3, relu=True)
    x = conv2d_pallas(x, prep["c3_w"], prep["c3_b"], ksize=3, stride=2, relu=True)
    x = conv2d_pallas(x, prep["c4_w"], prep["c4_b"], ksize=3, stride=2, relu=False)
    # flatten in PyTorch NCHW order -> [N, 64*H*W] == [N, 1920]
    n = x.shape[0]
    feat = jnp.transpose(x, (0, 3, 1, 2)).reshape(n, -1)
    # fused: linear(1920->512) -> [actor | critic] in one kernel
    out = pallas_fused_heads(feat, prep["lin_w"], prep["lin_b"],
                             prep["head_w"], prep["head_b"])
    policy = out[:, :output_dim]
    value = out[:, output_dim:output_dim + 1]
    return policy, value


if __name__ == "__main__":
    # The architecture hard-codes Linear(1920, 512): the conv trunk must emit
    # 64 x 6 x 5 features, which forces a 247 x 211 input (smallest size).
    OUTPUT_DIM = 6
    BATCH = 2

    key = jax.random.PRNGKey(0)
    k_param, k_x = jax.random.split(key)
    params = init_params(k_param, OUTPUT_DIM)
    prep = prepare_params(params, OUTPUT_DIM)   # one-time weight prep (outside jit)
    x = jax.random.normal(k_x, (BATCH, 3, 247, 211), jnp.float32)

    policy, value = ppo_forward(prep, x, output_dim=OUTPUT_DIM)
    policy, value = jax.block_until_ready((policy, value))

    assert policy.shape == (BATCH, OUTPUT_DIM), policy.shape
    assert value.shape == (BATCH, 1), value.shape
    print("KERNEL_OK")
</pallas_src>

<mosaic_0001>
module attributes {stable_mosaic.version = 11 : i64} {
  func.func @_matmul_bias_kernel(%arg0: i32, %arg1: i32, %arg2: memref<1024x48xbf16, #tpu.memory_space<vmem>>, %arg3: memref<48x128xbf16, #tpu.memory_space<vmem>>, %arg4: memref<1x128xf32, #tpu.memory_space<vmem>>, %arg5: memref<1024x128xbf16, #tpu.memory_space<vmem>>) attributes {dimension_semantics = [#tpu.dimension_semantics<parallel>, #tpu.dimension_semantics<parallel>], iteration_bounds = array<i64: 12, 1>, scalar_prefetch = 0 : i64, scratch_operands = 0 : i64, tpu.core_type = #tpu.core_type<tc>, window_params = [{transform_indices = @transform_0, window_bounds = array<i64: 1024, 48>}, {transform_indices = @transform_1, window_bounds = array<i64: 48, 128>}, {transform_indices = @transform_2, window_bounds = array<i64: 1, 128>}, {transform_indices = @transform_3, window_bounds = array<i64: 1024, 128>}]} {
    %c0 = arith.constant 0 : index
    %c0_0 = arith.constant 0 : index
    %0 = vector.load %arg2[%c0, %c0_0] : memref<1024x48xbf16, #tpu.memory_space<vmem>>, vector<1024x48xbf16>
    %c0_1 = arith.constant 0 : index
    %c0_2 = arith.constant 0 : index
    %1 = vector.load %arg3[%c0_1, %c0_2] : memref<48x128xbf16, #tpu.memory_space<vmem>>, vector<48x128xbf16>
    %cst = arith.constant dense<0.000000e+00> : vector<1024x128xf32>
    %2 = tpu.matmul %0, %1, %cst {dimension_numbers = #tpu.dot_dimension_numbers<[1], [0], [0], [1], [0, 0, 1, 1], [], []>} : vector<1024x48xbf16>, vector<48x128xbf16>, vector<1024x128xf32> -> vector<1024x128xf32>
    %c0_3 = arith.constant 0 : index
    %c0_4 = arith.constant 0 : index
    %3 = vector.load %arg4[%c0_3, %c0_4] : memref<1x128xf32, #tpu.memory_space<vmem>>, vector<1x128xf32>
    %4 = vector.broadcast %3 : vector<1x128xf32> to vector<1024x128xf32>
    %5 = arith.addf %2, %4 : vector<1024x128xf32>
    %cst_5 = arith.constant 0.000000e+00 : f32
    %6 = vector.broadcast %cst_5 : f32 to vector<1024x128xf32>
    %7 = arith.maximumf %5, %6 : vector<1024x128xf32>
    %8 = arith.truncf %7 : vector<1024x128xf32> to vector<1024x128xbf16>
    %c0_6 = arith.constant 0 : index
    %c0_7 = arith.constant 0 : index
    %9 = vector.load %arg5[%c0_6, %c0_7] : memref<1024x128xbf16, #tpu.memory_space<vmem>>, vector<1024x128xbf16>
    tpu.vector_store %arg5[%c0_6, %c0_7], %8 {strides = array<i32>} : memref<1024x128xbf16, #tpu.memory_space<vmem>>, vector<1024x128xbf16>,
    return
  }
  func.func @transform_0(%arg0: i32, %arg1: i32) -> (i32, i32) {
    %c0_i32 = arith.constant 0 : i32
    %c0_i32_0 = arith.constant 0 : i32
    return %arg0, %c0_i32 : i32, i32
  }
  func.func @transform_1(%arg0: i32, %arg1: i32) -> (i32, i32) {
    %c0_i32 = arith.constant 0 : i32
    %c0_i32_0 = arith.constant 0 : i32
    return %c0_i32, %arg1 : i32, i32
  }
  func.func @transform_2(%arg0: i32, %arg1: i32) -> (i32, i32) {
    %c0_i32 = arith.constant 0 : i32
    %c0_i32_0 = arith.constant 0 : i32
    return %c0_i32, %arg1 : i32, i32
  }
  func.func @transform_3(%arg0: i32, %arg1: i32) -> (i32, i32) {
    %c0_i32 = arith.constant 0 : i32
    return %arg0, %arg1 : i32, i32
  }
}

module attributes {stable_mosaic.version = 11 : i64} {
  func.func @_matmul_bias_kernel(%arg0: i32, %arg1: i32, %arg2: memref<1248x512xbf16, #tpu.memory_space<vmem>>, %arg3: memref<512x128xbf16, #tpu.memory_space<vmem>>, %arg4: memref<1x128xf32, #tpu.memory_space<vmem>>, %arg5: memref<1248x128xbf16, #tpu.memory_space<vmem>>) attributes {dimension_semantics = [#tpu.dimension_semantics<parallel>, #tpu.dimension_semantics<parallel>], iteration_bounds = array<i64: 1, 1>, scalar_prefetch = 0 : i64, scratch_operands = 0 : i64, tpu.core_type = #tpu.core_type<tc>, window_params = [{transform_indices = @transform_0, window_bounds = array<i64: 1248, 512>}, {transform_indices = @transform_1, window_bounds = array<i64: 512, 128>}, {transform_indices = @transform_2, window_bounds = array<i64: 1, 128>}, {transform_indices = @transform_3, window_bounds = array<i64: 1248, 128>}]} {
    %c0 = arith.constant 0 : index
    %c0_0 = arith.constant 0 : index
    %0 = vector.load %arg2[%c0, %c0_0] : memref<1248x512xbf16, #tpu.memory_space<vmem>>, vector<1248x512xbf16>
    %c0_1 = arith.constant 0 : index
    %c0_2 = arith.constant 0 : index
    %1 = vector.load %arg3[%c0_1, %c0_2] : memref<512x128xbf16, #tpu.memory_space<vmem>>, vector<512x128xbf16>
    %cst = arith.constant dense<0.000000e+00> : vector<1248x128xf32>
    %2 = tpu.matmul %0, %1, %cst {dimension_numbers = #tpu.dot_dimension_numbers<[1], [0], [0], [1], [0, 0, 1, 1], [], []>} : vector<1248x512xbf16>, vector<512x128xbf16>, vector<1248x128xf32> -> vector<1248x128xf32>
    %c0_3 = arith.constant 0 : index
    %c0_4 = arith.constant 0 : index
    %3 = vector.load %arg4[%c0_3, %c0_4] : memref<1x128xf32, #tpu.memory_space<vmem>>, vector<1x128xf32>
    %4 = vector.broadcast %3 : vector<1x128xf32> to vector<1248x128xf32>
    %5 = arith.addf %2, %4 : vector<1248x128xf32>
    %cst_5 = arith.constant 0.000000e+00 : f32
    %6 = vector.broadcast %cst_5 : f32 to vector<1248x128xf32>
    %7 = arith.maximumf %5, %6 : vector<1248x128xf32>
    %8 = arith.truncf %7 : vector<1248x128xf32> to vector<1248x128xbf16>
    %c0_6 = arith.constant 0 : index
    %c0_7 = arith.constant 0 : index
    %9 = vector.load %arg5[%c0_6, %c0_7] : memref<1248x128xbf16, #tpu.memory_space<vmem>>, vector<1248x128xbf16>
    tpu.vector_store %arg5[%c0_6, %c0_7], %8 {strides = array<i32>} : memref<1248x128xbf16, #tpu.memory_space<vmem>>, vector<1248x128xbf16>,
    return
  }
  func.func @transform_0(%arg0: i32, %arg1: i32) -> (i32, i32) {
    %c0_i32 = arith.constant 0 : i32
    %c0_i32_0 = arith.constant 0 : i32
    return %arg0, %c0_i32 : i32, i32
  }
  func.func @transform_1(%arg0: i32, %arg1: i32) -> (i32, i32) {
    %c0_i32 = arith.constant 0 : i32
    %c0_i32_0 = arith.constant 0 : i32
    return %c0_i32, %arg1 : i32, i32
  }
  func.func @transform_2(%arg0: i32, %arg1: i32) -> (i32, i32) {
    %c0_i32 = arith.constant 0 : i32
    %c0_i32_0 = arith.constant 0 : i32
    return %c0_i32, %arg1 : i32, i32
  }
  func.func @transform_3(%arg0: i32, %arg1: i32) -> (i32, i32) {
    %c0_i32 = arith.constant 0 : i32
    return %arg0, %arg1 : i32, i32
  }
}

module attributes {stable_mosaic.version = 11 : i64} {
  func.func @_matmul_bias_kernel(%arg0: i32, %arg1: i32, %arg2: memref<288x576xbf16, #tpu.memory_space<vmem>>, %arg3: memref<576x128xbf16, #tpu.memory_space<vmem>>, %arg4: memref<1x128xf32, #tpu.memory_space<vmem>>, %arg5: memref<288x128xbf16, #tpu.memory_space<vmem>>) attributes {dimension_semantics = [#tpu.dimension_semantics<parallel>, #tpu.dimension_semantics<parallel>], iteration_bounds = array<i64: 1, 1>, scalar_prefetch = 0 : i64, scratch_operands = 0 : i64, tpu.core_type = #tpu.core_type<tc>, window_params = [{transform_indices = @transform_0, window_bounds = array<i64: 288, 576>}, {transform_indices = @transform_1, window_bounds = array<i64: 576, 128>}, {transform_indices = @transform_2, window_bounds = array<i64: 1, 128>}, {transform_indices = @transform_3, window_bounds = array<i64: 288, 128>}]} {
    %c0 = arith.constant 0 : index
    %c0_0 = arith.constant 0 : index
    %0 = vector.load %arg2[%c0, %c0_0] : memref<288x576xbf16, #tpu.memory_space<vmem>>, vector<288x576xbf16>
    %c0_1 = arith.constant 0 : index
    %c0_2 = arith.constant 0 : index
    %1 = vector.load %arg3[%c0_1, %c0_2] : memref<576x128xbf16, #tpu.memory_space<vmem>>, vector<576x128xbf16>
    %cst = arith.constant dense<0.000000e+00> : vector<288x128xf32>
    %2 = tpu.matmul %0, %1, %cst {dimension_numbers = #tpu.dot_dimension_numbers<[1], [0], [0], [1], [0, 0, 1, 1], [], []>} : vector<288x576xbf16>, vector<576x128xbf16>, vector<288x128xf32> -> vector<288x128xf32>
    %c0_3 = arith.constant 0 : index
    %c0_4 = arith.constant 0 : index
    %3 = vector.load %arg4[%c0_3, %c0_4] : memref<1x128xf32, #tpu.memory_space<vmem>>, vector<1x128xf32>
    %4 = vector.broadcast %3 : vector<1x128xf32> to vector<288x128xf32>
    %5 = arith.addf %2, %4 : vector<288x128xf32>
    %cst_5 = arith.constant 0.000000e+00 : f32
    %6 = vector.broadcast %cst_5 : f32 to vector<288x128xf32>
    %7 = arith.maximumf %5, %6 : vector<288x128xf32>
    %8 = arith.truncf %7 : vector<288x128xf32> to vector<288x128xbf16>
    %c0_6 = arith.constant 0 : index
    %c0_7 = arith.constant 0 : index
    %9 = vector.load %arg5[%c0_6, %c0_7] : memref<288x128xbf16, #tpu.memory_space<vmem>>, vector<288x128xbf16>
    tpu.vector_store %arg5[%c0_6, %c0_7], %8 {strides = array<i32>} : memref<288x128xbf16, #tpu.memory_space<vmem>>, vector<288x128xbf16>,
    return
  }
  func.func @transform_0(%arg0: i32, %arg1: i32) -> (i32, i32) {
    %c0_i32 = arith.constant 0 : i32
    %c0_i32_0 = arith.constant 0 : i32
    return %arg0, %c0_i32 : i32, i32
  }
  func.func @transform_1(%arg0: i32, %arg1: i32) -> (i32, i32) {
    %c0_i32 = arith.constant 0 : i32
    %c0_i32_0 = arith.constant 0 : i32
    return %c0_i32, %arg1 : i32, i32
  }
  func.func @transform_2(%arg0: i32, %arg1: i32) -> (i32, i32) {
    %c0_i32 = arith.constant 0 : i32
    %c0_i32_0 = arith.constant 0 : i32
    return %c0_i32, %arg1 : i32, i32
  }
  func.func @transform_3(%arg0: i32, %arg1: i32) -> (i32, i32) {
    %c0_i32 = arith.constant 0 : i32
    return %arg0, %arg1 : i32, i32
  }
}

module attributes {stable_mosaic.version = 11 : i64} {
  func.func @_matmul_bias_kernel(%arg0: i32, %arg1: i32, %arg2: memref<64x576xbf16, #tpu.memory_space<vmem>>, %arg3: memref<576x128xbf16, #tpu.memory_space<vmem>>, %arg4: memref<1x128xf32, #tpu.memory_space<vmem>>, %arg5: memref<64x128xbf16, #tpu.memory_space<vmem>>) attributes {dimension_semantics = [#tpu.dimension_semantics<parallel>, #tpu.dimension_semantics<parallel>], iteration_bounds = array<i64: 1, 1>, scalar_prefetch = 0 : i64, scratch_operands = 0 : i64, tpu.core_type = #tpu.core_type<tc>, window_params = [{transform_indices = @transform_0, window_bounds = array<i64: 64, 576>}, {transform_indices = @transform_1, window_bounds = array<i64: 576, 128>}, {transform_indices = @transform_2, window_bounds = array<i64: 1, 128>}, {transform_indices = @transform_3, window_bounds = array<i64: 64, 128>}]} {
    %c0 = arith.constant 0 : index
    %c0_0 = arith.constant 0 : index
    %0 = vector.load %arg2[%c0, %c0_0] : memref<64x576xbf16, #tpu.memory_space<vmem>>, vector<64x576xbf16>
    %c0_1 = arith.constant 0 : index
    %c0_2 = arith.constant 0 : index
    %1 = vector.load %arg3[%c0_1, %c0_2] : memref<576x128xbf16, #tpu.memory_space<vmem>>, vector<576x128xbf16>
    %cst = arith.constant dense<0.000000e+00> : vector<64x128xf32>
    %2 = tpu.matmul %0, %1, %cst {dimension_numbers = #tpu.dot_dimension_numbers<[1], [0], [0], [1], [0, 0, 1, 1], [], []>} : vector<64x576xbf16>, vector<576x128xbf16>, vector<64x128xf32> -> vector<64x128xf32>
    %c0_3 = arith.constant 0 : index
    %c0_4 = arith.constant 0 : index
    %3 = vector.load %arg4[%c0_3, %c0_4] : memref<1x128xf32, #tpu.memory_space<vmem>>, vector<1x128xf32>
    %4 = vector.broadcast %3 : vector<1x128xf32> to vector<64x128xf32>
    %5 = arith.addf %2, %4 : vector<64x128xf32>
    %6 = arith.truncf %5 : vector<64x128xf32> to vector<64x128xbf16>
    %c0_5 = arith.constant 0 : index
    %c0_6 = arith.constant 0 : index
    %7 = vector.load %arg5[%c0_5, %c0_6] : memref<64x128xbf16, #tpu.memory_space<vmem>>, vector<64x128xbf16>
    tpu.vector_store %arg5[%c0_5, %c0_6], %6 {strides = array<i32>} : memref<64x128xbf16, #tpu.memory_space<vmem>>, vector<64x128xbf16>,
    return
  }
  func.func @transform_0(%arg0: i32, %arg1: i32) -> (i32, i32) {
    %c0_i32 = arith.constant 0 : i32
    %c0_i32_0 = arith.constant 0 : i32
    return %arg0, %c0_i32 : i32, i32
  }
  func.func @transform_1(%arg0: i32, %arg1: i32) -> (i32, i32) {
    %c0_i32 = arith.constant 0 : i32
    %c0_i32_0 = arith.constant 0 : i32
    return %c0_i32, %arg1 : i32, i32
  }
  func.func @transform_2(%arg0: i32, %arg1: i32) -> (i32, i32) {
    %c0_i32 = arith.constant 0 : i32
    %c0_i32_0 = arith.constant 0 : i32
    return %c0_i32, %arg1 : i32, i32
  }
  func.func @transform_3(%arg0: i32, %arg1: i32) -> (i32, i32) {
    %c0_i32 = arith.constant 0 : i32
    return %arg0, %arg1 : i32, i32
  }
}

module attributes {stable_mosaic.version = 11 : i64} {
  func.func @_fused_head_kernel(%arg0: memref<16x1920xbf16, #tpu.memory_space<vmem>>, %arg1: memref<1920x512xbf16, #tpu.memory_space<vmem>>, %arg2: memref<1x512xf32, #tpu.memory_space<vmem>>, %arg3: memref<512x128xbf16, #tpu.memory_space<vmem>>, %arg4: memref<1x128xf32, #tpu.memory_space<vmem>>, %arg5: memref<16x128xf32, #tpu.memory_space<vmem>>) attributes {dimension_semantics = [], scalar_prefetch = 0 : i64, scratch_operands = 0 : i64, tpu.core_type = #tpu.core_type<tc>} {
    %c0 = arith.constant 0 : index
    %c0_0 = arith.constant 0 : index
    %0 = vector.load %arg0[%c0, %c0_0] : memref<16x1920xbf16, #tpu.memory_space<vmem>>, vector<16x1920xbf16>
    %c0_1 = arith.constant 0 : index
    %c0_2 = arith.constant 0 : index
    %1 = vector.load %arg1[%c0_1, %c0_2] : memref<1920x512xbf16, #tpu.memory_space<vmem>>, vector<1920x512xbf16>
    %cst = arith.constant dense<0.000000e+00> : vector<16x512xf32>
    %2 = tpu.matmul %0, %1, %cst {dimension_numbers = #tpu.dot_dimension_numbers<[1], [0], [0], [1], [0, 0, 1, 1], [], []>} : vector<16x1920xbf16>, vector<1920x512xbf16>, vector<16x512xf32> -> vector<16x512xf32>
    %c0_3 = arith.constant 0 : index
    %c0_4 = arith.constant 0 : index
    %3 = vector.load %arg2[%c0_3, %c0_4] : memref<1x512xf32, #tpu.memory_space<vmem>>, vector<1x512xf32>
    %4 = vector.broadcast %3 : vector<1x512xf32> to vector<16x512xf32>
    %5 = arith.addf %2, %4 : vector<16x512xf32>
    %6 = arith.truncf %5 : vector<16x512xf32> to vector<16x512xbf16>
    %c0_5 = arith.constant 0 : index
    %c0_6 = arith.constant 0 : index
    %7 = vector.load %arg3[%c0_5, %c0_6] : memref<512x128xbf16, #tpu.memory_space<vmem>>, vector<512x128xbf16>
    %cst_7 = arith.constant dense<0.000000e+00> : vector<16x128xf32>
    %8 = tpu.matmul %6, %7, %cst_7 {dimension_numbers = #tpu.dot_dimension_numbers<[1], [0], [0], [1], [0, 0, 1, 1], [], []>} : vector<16x512xbf16>, vector<512x128xbf16>, vector<16x128xf32> -> vector<16x128xf32>
    %c0_8 = arith.constant 0 : index
    %c0_9 = arith.constant 0 : index
    %9 = vector.load %arg4[%c0_8, %c0_9] : memref<1x128xf32, #tpu.memory_space<vmem>>, vector<1x128xf32>
    %10 = vector.broadcast %9 : vector<1x128xf32> to vector<16x128xf32>
    %11 = arith.addf %8, %10 : vector<16x128xf32>
    %c0_10 = arith.constant 0 : index
    %c0_11 = arith.constant 0 : index
    %12 = vector.load %arg5[%c0_10, %c0_11] : memref<16x128xf32, #tpu.memory_space<vmem>>, vector<16x128xf32>
    tpu.vector_store %arg5[%c0_10, %c0_11], %11 {strides = array<i32>} : memref<16x128xf32, #tpu.memory_space<vmem>>, vector<16x128xf32>,
    return
  }
}

</mosaic_0001>

<bundles_post_ra>
// kernel: ppo_forward.5
= control target key start
LH: loop header
LB: loop body
LE: loop exit
PB: predicated region body
PF: predicated region fallthrough
CT: control target
= control target key end

     0   :  { %s3439_s12 = smov 0   ;;  %s3441_s13 = smov 0   ;;  %s3817_s0 = inlined_call_operand.vmem [shape: bf16[12288,48], index: 0, kind: input, shape index: {}]   ;;  %s3818_s1 = inlined_call_operand.vmem [shape: bf16[48,128], index: 1, kind: input, shape index: {}]   ;;  %s3819_s2 = inlined_call_operand.vmem [shape: f32[1,128], index: 2, kind: input, shape index: {}]   ;;  %s3820_s3 = inlined_call_operand.vmem [shape: bf16[12288,128], index: 3, kind: output, shape index: {}]  }
   0x1   :  { %s3443_s14 = smov 0  }
   0x2 LB: > { %s25_s15 = sadd.s32 1, %s3413_s13  ;;  %p2319_p0 = scmp.ge.s32.totalorder %s3417_s14, 1  ;;  %s3417_s14 = sphi %s3443_s14, %s13_s14   ;;  %s3413_s13 = sphi %s3441_s13, %s3822_s13   ;;  %s3409_s12 = sphi %s3439_s12, %s3821_s12  }
   0x3   : > { %p27_p1 = scmp.ge.s32.totalorder %s25_s15, 12  ;;  %p169_p2 = scmp.lt.s32.totalorder %s3417_s14, 13 }
   0x5   : > { %s3824_s15 = smov (%p27_p1, %s25_s15), 0  ;;  %p170_p3 = pnand %p2319_p0, %p169_p2 }
   0x6   : > { %s2320_s18 = sshll.u32 (!%p170_p3), %s3409_s12, 7 }
   0x7   : > { %173 = sbr.rel (%p170_p3) target bundleno = 351 (0x15f), region = 32  ;;  %p204_p4 = scmp.lt.s32.totalorder (!%p170_p3), %s2320_s18, 1535 }
   0xc   : > { %v3328_v0 = vld [vmem:[%s3818_s1 + $0x10] sm:$0xff]   ;;  %v3329_v1 = vld [vmem:[%s3818_s1 + $0x8] sm:$0xff]   ;;  %s3826_s18 = smov (!%p204_p4, %s2320_s18), 1535  ;;  %v3330_v2 = vld [vmem:[%s3818_s1] sm:$0xff]   ;;  %vm705_vm0 = vcmask 392192  }
   0xd   : > { %3164 = vmatprep.subr.bf16.mxu0 %v3328_v0  ;;  %3298 = vmatprep.subr.bf16.mxu1 %v3328_v0  ;;  %s2321_s23 = sshll.u32 %s3826_s18, 2 }
   0xe   : > { %3165 = vmatpush3.bf16.msra.mxu0 %v3328_v0  ;;  %3301 = vmatpush3.bf16.msra.mxu1 %v3328_v0  ;;  %s3474_s26 = scalar_lea.vmem %s3817_s0, %s2321_s23  ;;  %s3622_s4 = scalar_lea.vmem %s3820_s3, %s2321_s23 }
   0xf   : > { %3166 = vmatprep.subr.bf16.mxu0 %v3329_v1  ;;  %3299 = vmatprep.subr.bf16.mxu1 %v3329_v1  ;;  %v3331_v3 = vld [vmem:[%s3474_s26] sm:$0xff]   ;;  %v3333_v5 = vld [vmem:[%s3474_s26 + $0x8] sm:$0xff]   ;;  %v3335_v7 = vld [vmem:[%s3474_s26 + $0x10] sm:$0xff]  }
  0x10   : > { %v3332_v4 = vld [vmem:[%s3474_s26 + $0x100] sm:$0xff]   ;;  %3170 = vmatprep.mubr.msk.bf16.mxu0 %vm705_vm0, %v3331_v3  ;;  %v3334_v6 = vld [vmem:[%s3474_s26 + $0x108] sm:$0xff]   ;;  %v3336_v8 = vld [vmem:[%s3474_s26 + $0x110] sm:$0xff]  }
  0x11   : > { %3234 = vmatprep.mubr.msk.bf16.mxu1 %vm705_vm0, %v3332_v4  ;;  %v3337_v9 = vld [vmem:[%s3474_s26 + $0x18] sm:$0xff]   ;;  %v3339_v11 = vld [vmem:[%s3474_s26 + $0x20] sm:$0xff]   ;;  %v3341_v13 = vld [vmem:[%s3474_s26 + $0x28] sm:$0xff]  }
  0x12   : > { %3167 = vmatpush3.bf16.msra.mxu0 %v3329_v1  ;;  %3302 = vmatpush3.bf16.msra.mxu1 %v3329_v1  ;;  %v3338_v10 = vld [vmem:[%s3474_s26 + $0x118] sm:$0xff]   ;;  %v3340_v12 = vld [vmem:[%s3474_s26 + $0x120] sm:$0xff]   ;;  %v3342_v14 = vld [vmem:[%s3474_s26 + $0x128] sm:$0xff]  }
  0x13   : > { %3168 = vmatprep.subr.bf16.mxu0 %v3330_v2  ;;  %3300 = vmatprep.subr.bf16.mxu1 %v3330_v2  ;;  %v3343_v15 = vld [vmem:[%s3474_s26 + $0x30] sm:$0xff]   ;;  %v3345_v17 = vld [vmem:[%s3474_s26 + $0x38] sm:$0xff]   ;;  %v3347_v19 = vld [vmem:[%s3474_s26 + $0x40] sm:$0xff]  }
  0x14   : > { %v3344_v16 = vld [vmem:[%s3474_s26 + $0x130] sm:$0xff]   ;;  %v3346_v18 = vld [vmem:[%s3474_s26 + $0x138] sm:$0xff]   ;;  %v3348_v20 = vld [vmem:[%s3474_s26 + $0x140] sm:$0xff]  }
  0x15   : > { %v3349_v21 = vld [vmem:[%s3474_s26 + $0x48] sm:$0xff]   ;;  %v3351_v23 = vld [vmem:[%s3474_s26 + $0x50] sm:$0xff]   ;;  %v3353_v25 = vld [vmem:[%s3474_s26 + $0x58] sm:$0xff]  }
  0x16   : > { %3169 = vmatpush3.bf16.msra.mxu0 %v3330_v2  ;;  %3303 = vmatpush3.bf16.msra.mxu1 %v3330_v2  ;;  %v3350_v22 = vld [vmem:[%s3474_s26 + $0x148] sm:$0xff]   ;;  %v3352_v24 = vld [vmem:[%s3474_s26 + $0x150] sm:$0xff]   ;;  %v3354_v26 = vld [vmem:[%s3474_s26 + $0x158] sm:$0xff]  }
  0x17   : > { %v3355_v27 = vld [vmem:[%s3474_s26 + $0x60] sm:$0xff]   ;;  %v3357_v29 = vld [vmem:[%s3474_s26 + $0x68] sm:$0xff]   ;;  %v3359_v31 = vld [vmem:[%s3474_s26 + $0x70] sm:$0xff]  }
  0x18   : > { %v3356_v28 = vld [vmem:[%s3474_s26 + $0x160] sm:$0xff]   ;;  %v3358_v30 = vld [vmem:[%s3474_s26 + $0x168] sm:$0xff]   ;;  %v3360_v32 = vld [vmem:[%s3474_s26 + $0x170] sm:$0xff]  }
  0x19   : > { %3171 = vmatmul.mubr.msk.bf16.vlgmr.msra.gmra.mxu0 %vm705_vm0, %v3333_v5  ;;  %3235 = vmatmul.mubr.msk.bf16.vlgmr.msra.gmra.mxu1 %vm705_vm0, %v3334_v6  ;;  %v3361_v33 = vld [vmem:[%s3474_s26 + $0x78] sm:$0xff]   ;;  %v3363_v35 = vld [vmem:[%s3474_s26 + $0x80] sm:$0xff]   ;;  %v3365_v37 = vld [vmem:[%s3474_s26 + $0x88] sm:$0xff]  }
  0x1a   : > { %3174 = vmatprep.mubr.msk.bf16.mxu0 %vm705_vm0, %v3335_v7  ;;  %3238 = vmatprep.mubr.msk.bf16.mxu1 %vm705_vm0, %v3336_v8  ;;  %v3362_v34 = vld [vmem:[%s3474_s26 + $0x178] sm:$0xff]   ;;  %v3364_v36 = vld [vmem:[%s3474_s26 + $0x180] sm:$0xff]   ;;  %v3366_v38 = vld [vmem:[%s3474_s26 + $0x188] sm:$0xff]  }
  0x1b   : > { %v3367_v39 = vld [vmem:[%s3474_s26 + $0x90] sm:$0xff]   ;;  %v3369_v41 = vld [vmem:[%s3474_s26 + $0x98] sm:$0xff]   ;;  %v3371_v43 = vld [vmem:[%s3474_s26 + $0xa0] sm:$0xff]  }
  0x1c   : > { %v3368_v40 = vld [vmem:[%s3474_s26 + $0x190] sm:$0xff]   ;;  %v3370_v42 = vld [vmem:[%s3474_s26 + $0x198] sm:$0xff]   ;;  %v3372_v44 = vld [vmem:[%s3474_s26 + $0x1a0] sm:$0xff]  }
  0x1d   : > { %v3373_v45 = vld [vmem:[%s3474_s26 + $0xa8] sm:$0xff]   ;;  %v3375_v47 = vld [vmem:[%s3474_s26 + $0xb0] sm:$0xff]   ;;  %v3377_v49 = vld [vmem:[%s3474_s26 + $0xb8] sm:$0xff]  }
  0x1e   : > { %v3374_v46 = vld [vmem:[%s3474_s26 + $0x1a8] sm:$0xff]   ;;  %v3376_v48 = vld [vmem:[%s3474_s26 + $0x1b0] sm:$0xff]   ;;  %v3378_v50 = vld [vmem:[%s3474_s26 + $0x1b8] sm:$0xff]  }
  0x1f   : > { %v3379_v51 = vld [vmem:[%s3474_s26 + $0xc0] sm:$0xff]   ;;  %v3381_v53 = vld [vmem:[%s3474_s26 + $0xc8] sm:$0xff]   ;;  %v3383_v55 = vld [vmem:[%s3474_s26 + $0xd0] sm:$0xff]  }
  0x20   : > { %v3380_v52 = vld [vmem:[%s3474_s26 + $0x1c0] sm:$0xff]   ;;  %v3382_v54 = vld [vmem:[%s3474_s26 + $0x1c8] sm:$0xff]   ;;  %v3384_v56 = vld [vmem:[%s3474_s26 + $0x1d0] sm:$0xff]  }
  0x21   : > { %3175 = vmatmul.mubr.msk.bf16.gmra.mxu0 %vm705_vm0, %v3337_v9  ;;  %3239 = vmatmul.mubr.msk.bf16.gmra.mxu1 %vm705_vm0, %v3338_v10  ;;  %v3385_v57 = vld [vmem:[%s3474_s26 + $0xd8] sm:$0xff]   ;;  %v3387_v59 = vld [vmem:[%s3474_s26 + $0xe0] sm:$0xff]   ;;  %v3389_v61 = vld [vmem:[%s3474_s26 + $0xe8] sm:$0xff]  }
  0x22   : > { %3178 = vmatprep.mubr.msk.bf16.mxu0 %vm705_vm0, %v3339_v11  ;;  %3242 = vmatprep.mubr.msk.bf16.mxu1 %vm705_vm0, %v3340_v12  ;;  %v3386_v58 = vld [vmem:[%s3474_s26 + $0x1d8] sm:$0xff]   ;;  %v3388_v60 = vld [vmem:[%s3474_s26 + $0x1e0] sm:$0xff]   ;;  %v3390_v62 = vld [vmem:[%s3474_s26 + $0x1e8] sm:$0xff]  }
  0x23   : > { %v3391_v63 = vld [vmem:[%s3474_s26 + $0xf0] sm:$0xff]   ;;  %v3393_v1 = vld [vmem:[%s3474_s26 + $0xf8] sm:$0xff]   ;;  %v3607_v3 = vld [vmem:[%s3819_s2] ss:$0 sm:$0xff] }
  0x24   : > { %v3392_v0 = vld [vmem:[%s3474_s26 + $0x1f0] sm:$0xff]   ;;  %v3394_v2 = vld [vmem:[%s3474_s26 + $0x1f8] sm:$0xff]  }
  0x29   : > { %3179 = vmatmul.mubr.msk.bf16.gmra.mxu0 %vm705_vm0, %v3341_v13  ;;  %3243 = vmatmul.mubr.msk.bf16.gmra.mxu1 %vm705_vm0, %v3342_v14 }
  0x2a   : > { %3182 = vmatprep.mubr.msk.bf16.mxu0 %vm705_vm0, %v3343_v15  ;;  %3246 = vmatprep.mubr.msk.bf16.mxu1 %vm705_vm0, %v3344_v16 }
  0x31   : > { %3183 = vmatmul.mubr.msk.bf16.gmra.mxu0 %vm705_vm0, %v3345_v17  ;;  %3247 = vmatmul.mubr.msk.bf16.gmra.mxu1 %vm705_vm0, %v3346_v18 }
  0x32   : > { %3186 = vmatprep.mubr.msk.bf16.mxu0 %vm705_vm0, %v3347_v19  ;;  %3250 = vmatprep.mubr.msk.bf16.mxu1 %vm705_vm0, %v3348_v20 }
  0x39   : > { %3187 = vmatmul.mubr.msk.bf16.gmra.mxu0 %vm705_vm0, %v3349_v21  ;;  %3251 = vmatmul.mubr.msk.bf16.gmra.mxu1 %vm705_vm0, %v3350_v22 }
  0x3a   : > { %3190 = vmatprep.mubr.msk.bf16.mxu0 %vm705_vm0, %v3351_v23  ;;  %3254 = vmatprep.mubr.msk.bf16.mxu1 %vm705_vm0, %v3352_v24 }
  0x41   : > { %3191 = vmatmul.mubr.msk.bf16.gmra.mxu0 %vm705_vm0, %v3353_v25  ;;  %3255 = vmatmul.mubr.msk.bf16.gmra.mxu1 %vm705_vm0, %v3354_v26 }
  0x42   : > { %3194 = vmatprep.mubr.msk.bf16.mxu0 %vm705_vm0, %v3355_v27  ;;  %3258 = vmatprep.mubr.msk.bf16.mxu1 %vm705_vm0, %v3356_v28 }
  0x49   : > { %3195 = vmatmul.mubr.msk.bf16.gmra.mxu0 %vm705_vm0, %v3357_v29  ;;  %3259 = vmatmul.mubr.msk.bf16.gmra.mxu1 %vm705_vm0, %v3358_v30 }
  0x4a   : > { %3198 = vmatprep.mubr.msk.bf16.mxu0 %vm705_vm0, %v3359_v31  ;;  %3262 = vmatprep.mubr.msk.bf16.mxu1 %vm705_vm0, %v3360_v32 }
  0x51   : > { %3199 = vmatmul.mubr.msk.bf16.gmra.mxu0 %vm705_vm0, %v3361_v33  ;;  %3263 = vmatmul.mubr.msk.bf16.gmra.mxu1 %vm705_vm0, %v3362_v34 }
  0x52   : > { %3202 = vmatprep.mubr.msk.bf16.mxu0 %vm705_vm0, %v3363_v35  ;;  %3266 = vmatprep.mubr.msk.bf16.mxu1 %vm705_vm0, %v3364_v36 }
  0x59   : > { %3203 = vmatmul.mubr.msk.bf16.gmra.mxu0 %vm705_vm0, %v3365_v37  ;;  %3267 = vmatmul.mubr.msk.bf16.gmra.mxu1 %vm705_vm0, %v3366_v38 }
  0x5a   : > { %3206 = vmatprep.mubr.msk.bf16.mxu0 %vm705_vm0, %v3367_v39  ;;  %3270 = vmatprep.mubr.msk.bf16.mxu1 %vm705_vm0, %v3368_v40 }
  0x61   : > { %3207 = vmatmul.mubr.msk.bf16.gmra.mxu0 %vm705_vm0, %v3369_v41  ;;  %3271 = vmatmul.mubr.msk.bf16.gmra.mxu1 %vm705_vm0, %v3370_v42 }
  0x62   : > { %3210 = vmatprep.mubr.msk.bf16.mxu0 %vm705_vm0, %v3371_v43  ;;  %3274 = vmatprep.mubr.msk.bf16.mxu1 %vm705_vm0, %v3372_v44 }
  0x69   : > { %3211 = vmatmul.mubr.msk.bf16.gmra.mxu0 %vm705_vm0, %v3373_v45  ;;  %3275 = vmatmul.mubr.msk.bf16.gmra.mxu1 %vm705_vm0, %v3374_v46 }
  0x6a   : > { %3214 = vmatprep.mubr.msk.bf16.mxu0 %vm705_vm0, %v3375_v47  ;;  %3278 = vmatprep.mubr.msk.bf16.mxu1 %vm705_vm0, %v3376_v48 }
  0x71   : > { %3215 = vmatmul.mubr.msk.bf16.gmra.mxu0 %vm705_vm0, %v3377_v49  ;;  %3279 = vmatmul.mubr.msk.bf16.gmra.mxu1 %vm705_vm0, %v3378_v50 }
  0x72   : > { %3218 = vmatprep.mubr.msk.bf16.mxu0 %vm705_vm0, %v3379_v51  ;;  %3282 = vmatprep.mubr.msk.bf16.mxu1 %vm705_vm0, %v3380_v52 }
  0x79   : > { %3219 = vmatmul.mubr.msk.bf16.gmra.mxu0 %vm705_vm0, %v3381_v53  ;;  %3283 = vmatmul.mubr.msk.bf16.gmra.mxu1 %vm705_vm0, %v3382_v54 }
  0x7a   : > { %3222 = vmatprep.mubr.msk.bf16.mxu0 %vm705_vm0, %v3383_v55  ;;  %3286 = vmatprep.mubr.msk.bf16.mxu1 %vm705_vm0, %v3384_v56 }
  0x81   : > { %3223 = vmatmul.mubr.msk.bf16.gmra.mxu0 %vm705_vm0, %v3385_v57  ;;  %3287 = vmatmul.mubr.msk.bf16.gmra.mxu1 %vm705_vm0, %v3386_v58 }
  0x82   : > { %3226 = vmatprep.mubr.msk.bf16.mxu0 %vm705_vm0, %v3387_v59  ;;  %3290 = vmatprep.mubr.msk.bf16.mxu1 %vm705_vm0, %v3388_v60 }
  0x89   : > { %3227 = vmatmul.mubr.msk.bf16.gmra.mxu0 %vm705_vm0, %v3389_v61  ;;  %3291 = vmatmul.mubr.msk.bf16.gmra.mxu1 %vm705_vm0, %v3390_v62 }
  0x8a   : > { %3230 = vmatprep.mubr.msk.bf16.mxu0 %vm705_vm0, %v3391_v63  ;;  %3294 = vmatprep.mubr.msk.bf16.mxu1 %vm705_vm0, %v3392_v0 }
  0x91   : > { %3231 = vmatmul.mubr.msk.bf16.gmra.mxu0 %vm705_vm0, %v3393_v1  ;;  %3295 = vmatmul.mubr.msk.bf16.gmra.mxu1 %vm705_vm0, %v3394_v2 }
  0xd9   : > { %v3172_v4 = vpop.f32.mrf.mxu0  ;;  %v3236_v5 = vpop.f32.mrf.mxu1 }
  0xda   : > { %v941_v6 = vadd.f32 %v3172_v4, %v3607_v3  ;;  %v1197_v7 = vadd.f32 %v3236_v5, %v3607_v3 }
  0xdb   : > { %v932_v8 = vpop.f32.mrf.mxu0  ;;  %v1188_v9 = vpop.f32.mrf.mxu1 }
  0xdc   : > { %v933_v10 = vadd.f32 %v3607_v3, %v932_v8  ;;  %v1189_v11 = vadd.f32 %v3607_v3, %v1188_v9  ;;  %v1445_v16 = vmax.f32 %v941_v6, 0.0  ;;  %v1509_v17 = vmax.f32 %v1197_v7, 0.0 }
  0xdd   : > { %v3173_v12 = vpop.f32.mrf.mxu0  ;;  %v3237_v13 = vpop.f32.mrf.mxu1 }
  0xde   : > { %v944_v14 = vadd.f32 %v3173_v12, %v3607_v3  ;;  %v1200_v15 = vadd.f32 %v3237_v13, %v3607_v3  ;;  %v1443_v24 = vmax.f32 %v933_v10, 0.0  ;;  %v1507_v25 = vmax.f32 %v1189_v11, 0.0 }
  0xdf   : > { %v935_v18 = vpop.f32.mrf.mxu0  ;;  %v1191_v19 = vpop.f32.mrf.mxu1 }
  0xe0   : > { %v1446_v20 = vmax.f32 %v944_v14, 0.0  ;;  %v1510_v21 = vmax.f32 %v1200_v15, 0.0  ;;  %v936_v22 = vadd.f32 %v3607_v3, %v935_v18  ;;  %v1192_v23 = vadd.f32 %v3607_v3, %v1191_v19 }
  0xe1   : > { %v3176_v26 = vpop.f32.mrf.mxu0  ;;  %v3240_v27 = vpop.f32.mrf.mxu1 }
  0xe2   : > { %v2722_v28 = vpack.c.bf16 %v1446_v20, %v1445_v16  ;;  %v2882_v29 = vpack.c.bf16 %v1510_v21, %v1509_v17  ;;  %v1444_v30 = vmax.f32 %v936_v22, 0.0  ;;  %v1508_v31 = vmax.f32 %v1192_v23, 0.0 }
  0xe3   : > { %v957_v32 = vadd.f32 %v3176_v26, %v3607_v3  ;;  %v1213_v33 = vadd.f32 %v3240_v27, %v3607_v3  ;;  %v948_v34 = vpop.f32.mrf.mxu0  ;;  %v1204_v35 = vpop.f32.mrf.mxu1 }
  0xe4   : > { %3034 = vst [vmem:[%s3622_s4 + $0x8] sm:$0xff] %v2722_v28   ;;  %3066 = vst [vmem:[%s3622_s4 + $0x108] sm:$0xff] %v2882_v29   ;;  %v2717_v36 = vpack.c.bf16 %v1444_v30, %v1443_v24  ;;  %v2877_v37 = vpack.c.bf16 %v1508_v31, %v1507_v25  ;;  %v949_v38 = vadd.f32 %v3607_v3, %v948_v34 }
  0xe5   : > { %v1205_v39 = vadd.f32 %v3607_v3, %v1204_v35  ;;  %v3177_v40 = vpop.f32.mrf.mxu0  ;;  %v3241_v41 = vpop.f32.mrf.mxu1  ;;  %v1449_v44 = vmax.f32 %v957_v32, 0.0  ;;  %v1513_v45 = vmax.f32 %v1213_v33, 0.0 }
  0xe6   : > { %2718 = vst [vmem:[%s3622_s4] sm:$0xff] %v2717_v36   ;;  %3065 = vst [vmem:[%s3622_s4 + $0x100] sm:$0xff] %v2877_v37   ;;  %v960_v42 = vadd.f32 %v3177_v40, %v3607_v3  ;;  %v1216_v43 = vadd.f32 %v3241_v41, %v3607_v3  ;;  %v1447_v52 = vmax.f32 %v949_v38, 0.0 }
  0xe7   : > { %v951_v46 = vpop.f32.mrf.mxu0  ;;  %v1207_v47 = vpop.f32.mrf.mxu1  ;;  %v1511_v53 = vmax.f32 %v1205_v39, 0.0 }
  0xe8   : > { %v1450_v48 = vmax.f32 %v960_v42, 0.0  ;;  %v1514_v49 = vmax.f32 %v1216_v43, 0.0  ;;  %v952_v50 = vadd.f32 %v3607_v3, %v951_v46  ;;  %v1208_v51 = vadd.f32 %v3607_v3, %v1207_v47 }
  0xe9   : > { %v3180_v54 = vpop.f32.mrf.mxu0  ;;  %v3244_v55 = vpop.f32.mrf.mxu1 }
  0xea   : > { %v2732_v56 = vpack.c.bf16 %v1450_v48, %v1449_v44  ;;  %v2892_v57 = vpack.c.bf16 %v1514_v49, %v1513_v45  ;;  %v1448_v58 = vmax.f32 %v952_v50, 0.0  ;;  %v1512_v59 = vmax.f32 %v1208_v51, 0.0 }
  0xeb   : > { %v973_v60 = vadd.f32 %v3180_v54, %v3607_v3  ;;  %v1229_v61 = vadd.f32 %v3244_v55, %v3607_v3  ;;  %v964_v62 = vpop.f32.mrf.mxu0  ;;  %v1220_v63 = vpop.f32.mrf.mxu1 }
  0xec   : > { %3036 = vst [vmem:[%s3622_s4 + $0x18] sm:$0xff] %v2732_v56   ;;  %3068 = vst [vmem:[%s3622_s4 + $0x118] sm:$0xff] %v2892_v57   ;;  %v2727_v0 = vpack.c.bf16 %v1448_v58, %v1447_v52  ;;  %v2887_v1 = vpack.c.bf16 %v1512_v59, %v1511_v53  ;;  %v965_v2 = vadd.f32 %v3607_v3, %v964_v62 }
  0xed   : > { %v1221_v4 = vadd.f32 %v3607_v3, %v1220_v63  ;;  %v3181_v5 = vpop.f32.mrf.mxu0  ;;  %v3245_v6 = vpop.f32.mrf.mxu1  ;;  %v1453_v9 = vmax.f32 %v973_v60, 0.0  ;;  %v1517_v10 = vmax.f32 %v1229_v61, 0.0 }
  0xee   : > { %3035 = vst [vmem:[%s3622_s4 + $0x10] sm:$0xff] %v2727_v0   ;;  %3067 = vst [vmem:[%s3622_s4 + $0x110] sm:$0xff] %v2887_v1   ;;  %v976_v7 = vadd.f32 %v3181_v5, %v3607_v3  ;;  %v1232_v8 = vadd.f32 %v3245_v6, %v3607_v3  ;;  %v1451_v17 = vmax.f32 %v965_v2, 0.0 }
  0xef   : > { %v967_v11 = vpop.f32.mrf.mxu0  ;;  %v1223_v12 = vpop.f32.mrf.mxu1  ;;  %v1515_v18 = vmax.f32 %v1221_v4, 0.0 }
  0xf0   : > { %v1454_v13 = vmax.f32 %v976_v7, 0.0  ;;  %v1518_v14 = vmax.f32 %v1232_v8, 0.0  ;;  %v968_v15 = vadd.f32 %v3607_v3, %v967_v11  ;;  %v1224_v16 = vadd.f32 %v3607_v3, %v1223_v12 }
  0xf1   : > { %v3184_v19 = vpop.f32.mrf.mxu0  ;;  %v3248_v20 = vpop.f32.mrf.mxu1 }
  0xf2   : > { %v2742_v21 = vpack.c.bf16 %v1454_v13, %v1453_v9  ;;  %v2902_v22 = vpack.c.bf16 %v1518_v14, %v1517_v10  ;;  %v1452_v23 = vmax.f32 %v968_v15, 0.0  ;;  %v1516_v24 = vmax.f32 %v1224_v16, 0.0 }
  0xf3   : > { %v989_v25 = vadd.f32 %v3184_v19, %v3607_v3  ;;  %v1245_v26 = vadd.f32 %v3248_v20, %v3607_v3  ;;  %v980_v27 = vpop.f32.mrf.mxu0  ;;  %v1236_v28 = vpop.f32.mrf.mxu1 }
  0xf4   : > { %3038 = vst [vmem:[%s3622_s4 + $0x28] sm:$0xff] %v2742_v21   ;;  %3070 = vst [vmem:[%s3622_s4 + $0x128] sm:$0xff] %v2902_v22   ;;  %v2737_v29 = vpack.c.bf16 %v1452_v23, %v1451_v17  ;;  %v2897_v30 = vpack.c.bf16 %v1516_v24, %v1515_v18  ;;  %v981_v31 = vadd.f32 %v3607_v3, %v980_v27 }
  0xf5   : > { %v1237_v32 = vadd.f32 %v3607_v3, %v1236_v28  ;;  %v3185_v33 = vpop.f32.mrf.mxu0  ;;  %v3249_v34 = vpop.f32.mrf.mxu1  ;;  %v1457_v37 = vmax.f32 %v989_v25, 0.0  ;;  %v1521_v38 = vmax.f32 %v1245_v26, 0.0 }
  0xf6   : > { %3037 = vst [vmem:[%s3622_s4 + $0x20] sm:$0xff] %v2737_v29   ;;  %3069 = vst [vmem:[%s3622_s4 + $0x120] sm:$0xff] %v2897_v30   ;;  %v992_v35 = vadd.f32 %v3185_v33, %v3607_v3  ;;  %v1248_v36 = vadd.f32 %v3249_v34, %v3607_v3  ;;  %v1455_v45 = vmax.f32 %v981_v31, 0.0 }
  0xf7   : > { %v983_v39 = vpop.f32.mrf.mxu0  ;;  %v1239_v40 = vpop.f32.mrf.mxu1  ;;  %v1519_v46 = vmax.f32 %v1237_v32, 0.0 }
  0xf8   : > { %v1458_v41 = vmax.f32 %v992_v35, 0.0  ;;  %v1522_v42 = vmax.f32 %v1248_v36, 0.0  ;;  %v984_v43 = vadd.f32 %v3607_v3, %v983_v39  ;;  %v1240_v44 = vadd.f32 %v3607_v3, %v1239_v40 }
  0xf9   : > { %v3188_v47 = vpop.f32.mrf.mxu0  ;;  %v3252_v48 = vpop.f32.mrf.mxu1 }
  0xfa   : > { %v2752_v49 = vpack.c.bf16 %v1458_v41, %v1457_v37  ;;  %v2912_v50 = vpack.c.bf16 %v1522_v42, %v1521_v38  ;;  %v1456_v51 = vmax.f32 %v984_v43, 0.0  ;;  %v1520_v52 = vmax.f32 %v1240_v44, 0.0 }
  0xfb   : > { %v1005_v53 = vadd.f32 %v3188_v47, %v3607_v3  ;;  %v1261_v54 = vadd.f32 %v3252_v48, %v3607_v3  ;;  %v996_v55 = vpop.f32.mrf.mxu0  ;;  %v1252_v56 = vpop.f32.mrf.mxu1 }
  0xfc   : > { %3040 = vst [vmem:[%s3622_s4 + $0x38] sm:$0xff] %v2752_v49   ;;  %3072 = vst [vmem:[%s3622_s4 + $0x138] sm:$0xff] %v2912_v50   ;;  %v2747_v57 = vpack.c.bf16 %v1456_v51, %v1455_v45  ;;  %v2907_v58 = vpack.c.bf16 %v1520_v52, %v1519_v46  ;;  %v997_v59 = vadd.f32 %v3607_v3, %v996_v55 }
  0xfd   : > { %v1253_v60 = vadd.f32 %v3607_v3, %v1252_v56  ;;  %v3189_v61 = vpop.f32.mrf.mxu0  ;;  %v3253_v62 = vpop.f32.mrf.mxu1  ;;  %v1461_v1 = vmax.f32 %v1005_v53, 0.0  ;;  %v1525_v2 = vmax.f32 %v1261_v54, 0.0 }
  0xfe   : > { %3039 = vst [vmem:[%s3622_s4 + $0x30] sm:$0xff] %v2747_v57   ;;  %3071 = vst [vmem:[%s3622_s4 + $0x130] sm:$0xff] %v2907_v58   ;;  %v1008_v63 = vadd.f32 %v3189_v61, %v3607_v3  ;;  %v1264_v0 = vadd.f32 %v3253_v62, %v3607_v3  ;;  %v1459_v10 = vmax.f32 %v997_v59, 0.0 }
  0xff   : > { %v999_v4 = vpop.f32.mrf.mxu0  ;;  %v1255_v5 = vpop.f32.mrf.mxu1  ;;  %v1523_v11 = vmax.f32 %v1253_v60, 0.0 }
 0x100   : > { %v1462_v6 = vmax.f32 %v1008_v63, 0.0  ;;  %v1526_v7 = vmax.f32 %v1264_v0, 0.0  ;;  %v1000_v8 = vadd.f32 %v3607_v3, %v999_v4  ;;  %v1256_v9 = vadd.f32 %v3607_v3, %v1255_v5 }
 0x101   : > { %v3192_v12 = vpop.f32.mrf.mxu0  ;;  %v3256_v13 = vpop.f32.mrf.mxu1 }
 0x102   : > { %v2762_v14 = vpack.c.bf16 %v1462_v6, %v1461_v1  ;;  %v2922_v15 = vpack.c.bf16 %v1526_v7, %v1525_v2  ;;  %v1460_v16 = vmax.f32 %v1000_v8, 0.0  ;;  %v1524_v17 = vmax.f32 %v1256_v9, 0.0 }
 0x103   : > { %v1021_v18 = vadd.f32 %v3192_v12, %v3607_v3  ;;  %v1277_v19 = vadd.f32 %v3256_v13, %v3607_v3  ;;  %v1012_v20 = vpop.f32.mrf.mxu0  ;;  %v1268_v21 = vpop.f32.mrf.mxu1 }
 0x104   : > { %3042 = vst [vmem:[%s3622_s4 + $0x48] sm:$0xff] %v2762_v14   ;;  %3074 = vst [vmem:[%s3622_s4 + $0x148] sm:$0xff] %v2922_v15   ;;  %v2757_v22 = vpack.c.bf16 %v1460_v16, %v1459_v10  ;;  %v2917_v23 = vpack.c.bf16 %v1524_v17, %v1523_v11  ;;  %v1013_v24 = vadd.f32 %v3607_v3, %v1012_v20 }
 0x105   : > { %v1269_v25 = vadd.f32 %v3607_v3, %v1268_v21  ;;  %v3193_v26 = vpop.f32.mrf.mxu0  ;;  %v3257_v27 = vpop.f32.mrf.mxu1  ;;  %v1465_v30 = vmax.f32 %v1021_v18, 0.0  ;;  %v1529_v31 = vmax.f32 %v1277_v19, 0.0 }
 0x106   : > { %3041 = vst [vmem:[%s3622_s4 + $0x40] sm:$0xff] %v2757_v22   ;;  %3073 = vst [vmem:[%s3622_s4 + $0x140] sm:$0xff] %v2917_v23   ;;  %v1024_v28 = vadd.f32 %v3193_v26, %v3607_v3  ;;  %v1280_v29 = vadd.f32 %v3257_v27, %v3607_v3  ;;  %v1463_v38 = vmax.f32 %v1013_v24, 0.0 }
 0x107   : > { %v1015_v32 = vpop.f32.mrf.mxu0  ;;  %v1271_v33 = vpop.f32.mrf.mxu1  ;;  %v1527_v39 = vmax.f32 %v1269_v25, 0.0 }
 0x108   : > { %v1466_v34 = vmax.f32 %v1024_v28, 0.0  ;;  %v1530_v35 = vmax.f32 %v1280_v29, 0.0  ;;  %v1016_v36 = vadd.f32 %v3607_v3, %v1015_v32  ;;  %v1272_v37 = vadd.f32 %v3607_v3, %v1271_v33 }
 0x109   : > { %v3196_v40 = vpop.f32.mrf.mxu0  ;;  %v3260_v41 = vpop.f32.mrf.mxu1 }
 0x10a   : > { %v2772_v42 = vpack.c.bf16 %v1466_v34, %v1465_v30  ;;  %v2932_v43 = vpack.c.bf16 %v1530_v35, %v1529_v31  ;;  %v1464_v44 = vmax.f32 %v1016_v36, 0.0  ;;  %v1528_v45 = vmax.f32 %v1272_v37, 0.0 }
 0x10b   : > { %v1037_v46 = vadd.f32 %v3196_v40, %v3607_v3  ;;  %v1293_v47 = vadd.f32 %v3260_v41, %v3607_v3  ;;  %v1028_v48 = vpop.f32.mrf.mxu0  ;;  %v1284_v49 = vpop.f32.mrf.mxu1 }
 0x10c   : > { %3044 = vst [vmem:[%s3622_s4 + $0x58] sm:$0xff] %v2772_v42   ;;  %3076 = vst [vmem:[%s3622_s4 + $0x158] sm:$0xff] %v2932_v43   ;;  %v2767_v50 = vpack.c.bf16 %v1464_v44, %v1463_v38  ;;  %v2927_v51 = vpack.c.bf16 %v1528_v45, %v1527_v39  ;;  %v1029_v52 = vadd.f32 %v3607_v3, %v1028_v48 }
 0x10d   : > { %v1285_v53 = vadd.f32 %v3607_v3, %v1284_v49  ;;  %v3197_v54 = vpop.f32.mrf.mxu0  ;;  %v3261_v55 = vpop.f32.mrf.mxu1  ;;  %v1469_v58 = vmax.f32 %v1037_v46, 0.0  ;;  %v1533_v59 = vmax.f32 %v1293_v47, 0.0 }
 0x10e   : > { %3043 = vst [vmem:[%s3622_s4 + $0x50] sm:$0xff] %v2767_v50   ;;  %3075 = vst [vmem:[%s3622_s4 + $0x150] sm:$0xff] %v2927_v51   ;;  %v1040_v56 = vadd.f32 %v3197_v54, %v3607_v3  ;;  %v1296_v57 = vadd.f32 %v3261_v55, %v3607_v3  ;;  %v1467_v2 = vmax.f32 %v1029_v52, 0.0 }
 0x10f   : > { %v1031_v60 = vpop.f32.mrf.mxu0  ;;  %v1287_v61 = vpop.f32.mrf.mxu1  ;;  %v1531_v4 = vmax.f32 %v1285_v53, 0.0 }
 0x110   : > { %v1470_v62 = vmax.f32 %v1040_v56, 0.0  ;;  %v1534_v63 = vmax.f32 %v1296_v57, 0.0  ;;  %v1032_v0 = vadd.f32 %v3607_v3, %v1031_v60  ;;  %v1288_v1 = vadd.f32 %v3607_v3, %v1287_v61 }
 0x111   : > { %v3200_v5 = vpop.f32.mrf.mxu0  ;;  %v3264_v6 = vpop.f32.mrf.mxu1 }
 0x112   : > { %v2782_v7 = vpack.c.bf16 %v1470_v62, %v1469_v58  ;;  %v2942_v8 = vpack.c.bf16 %v1534_v63, %v1533_v59  ;;  %v1468_v9 = vmax.f32 %v1032_v0, 0.0  ;;  %v1532_v10 = vmax.f32 %v1288_v1, 0.0 }
 0x113   : > { %v1053_v11 = vadd.f32 %v3200_v5, %v3607_v3  ;;  %v1309_v12 = vadd.f32 %v3264_v6, %v3607_v3  ;;  %v1044_v13 = vpop.f32.mrf.mxu0  ;;  %v1300_v14 = vpop.f32.mrf.mxu1 }
 0x114   : > { %3046 = vst [vmem:[%s3622_s4 + $0x68] sm:$0xff] %v2782_v7   ;;  %3078 = vst [vmem:[%s3622_s4 + $0x168] sm:$0xff] %v2942_v8   ;;  %v2777_v15 = vpack.c.bf16 %v1468_v9, %v1467_v2  ;;  %v2937_v16 = vpack.c.bf16 %v1532_v10, %v1531_v4  ;;  %v1045_v17 = vadd.f32 %v3607_v3, %v1044_v13 }
 0x115   : > { %v1301_v18 = vadd.f32 %v3607_v3, %v1300_v14  ;;  %v3201_v19 = vpop.f32.mrf.mxu0  ;;  %v3265_v20 = vpop.f32.mrf.mxu1  ;;  %v1473_v23 = vmax.f32 %v1053_v11, 0.0  ;;  %v1537_v24 = vmax.f32 %v1309_v12, 0.0 }
 0x116   : > { %3045 = vst [vmem:[%s3622_s4 + $0x60] sm:$0xff] %v2777_v15   ;;  %3077 = vst [vmem:[%s3622_s4 + $0x160] sm:$0xff] %v2937_v16   ;;  %v1056_v21 = vadd.f32 %v3201_v19, %v3607_v3  ;;  %v1312_v22 = vadd.f32 %v3265_v20, %v3607_v3  ;;  %v1471_v31 = vmax.f32 %v1045_v17, 0.0 }
 0x117   : > { %v1047_v25 = vpop.f32.mrf.mxu0  ;;  %v1303_v26 = vpop.f32.mrf.mxu1  ;;  %v1535_v32 = vmax.f32 %v1301_v18, 0.0 }
 0x118   : > { %v1474_v27 = vmax.f32 %v1056_v21, 0.0  ;;  %v1538_v28 = vmax.f32 %v1312_v22, 0.0  ;;  %v1048_v29 = vadd.f32 %v3607_v3, %v1047_v25  ;;  %v1304_v30 = vadd.f32 %v3607_v3, %v1303_v26 }
 0x119   : > { %v3204_v33 = vpop.f32.mrf.mxu0  ;;  %v3268_v34 = vpop.f32.mrf.mxu1 }
 0x11a   : > { %v2792_v35 = vpack.c.bf16 %v1474_v27, %v1473_v23  ;;  %v2952_v36 = vpack.c.bf16 %v1538_v28, %v1537_v24  ;;  %v1472_v37 = vmax.f32 %v1048_v29, 0.0  ;;  %v1536_v38 = vmax.f32 %v1304_v30, 0.0 }
 0x11b   : > { %v1069_v39 = vadd.f32 %v3204_v33, %v3607_v3  ;;  %v1325_v40 = vadd.f32 %v3268_v34, %v3607_v3  ;;  %v1060_v41 = vpop.f32.mrf.mxu0  ;;  %v1316_v42 = vpop.f32.mrf.mxu1 }
 0x11c   : > { %3048 = vst [vmem:[%s3622_s4 + $0x78] sm:$0xff] %v2792_v35   ;;  %3080 = vst [vmem:[%s3622_s4 + $0x178] sm:$0xff] %v2952_v36   ;;  %v2787_v43 = vpack.c.bf16 %v1472_v37, %v1471_v31  ;;  %v2947_v44 = vpack.c.bf16 %v1536_v38, %v1535_v32  ;;  %v1061_v45 = vadd.f32 %v3607_v3, %v1060_v41 }
 0x11d   : > { %v1317_v46 = vadd.f32 %v3607_v3, %v1316_v42  ;;  %v3205_v47 = vpop.f32.mrf.mxu0  ;;  %v3269_v48 = vpop.f32.mrf.mxu1  ;;  %v1477_v51 = vmax.f32 %v1069_v39, 0.0  ;;  %v1541_v52 = vmax.f32 %v1325_v40, 0.0 }
 0x11e   : > { %3047 = vst [vmem:[%s3622_s4 + $0x70] sm:$0xff] %v2787_v43   ;;  %3079 = vst [vmem:[%s3622_s4 + $0x170] sm:$0xff] %v2947_v44   ;;  %v1072_v49 = vadd.f32 %v3205_v47, %v3607_v3  ;;  %v1328_v50 = vadd.f32 %v3269_v48, %v3607_v3  ;;  %v1475_v59 = vmax.f32 %v1061_v45, 0.0 }
 0x11f   : > { %v1063_v53 = vpop.f32.mrf.mxu0  ;;  %v1319_v54 = vpop.f32.mrf.mxu1  ;;  %v1539_v60 = vmax.f32 %v1317_v46, 0.0 }
 0x120   : > { %v1478_v55 = vmax.f32 %v1072_v49, 0.0  ;;  %v1542_v56 = vmax.f32 %v1328_v50, 0.0  ;;  %v1064_v57 = vadd.f32 %v3607_v3, %v1063_v53  ;;  %v1320_v58 = vadd.f32 %v3607_v3, %v1319_v54 }
 0x121   : > { %v3208_v61 = vpop.f32.mrf.mxu0  ;;  %v3272_v62 = vpop.f32.mrf.mxu1 }
 0x122   : > { %v2802_v63 = vpack.c.bf16 %v1478_v55, %v1477_v51  ;;  %v2962_v0 = vpack.c.bf16 %v1542_v56, %v1541_v52  ;;  %v1476_v1 = vmax.f32 %v1064_v57, 0.0  ;;  %v1540_v2 = vmax.f32 %v1320_v58, 0.0 }
 0x123   : > { %v1085_v4 = vadd.f32 %v3208_v61, %v3607_v3  ;;  %v1341_v5 = vadd.f32 %v3272_v62, %v3607_v3  ;;  %v1076_v6 = vpop.f32.mrf.mxu0  ;;  %v1332_v7 = vpop.f32.mrf.mxu1 }
 0x124   : > { %3050 = vst [vmem:[%s3622_s4 + $0x88] sm:$0xff] %v2802_v63   ;;  %3082 = vst [vmem:[%s3622_s4 + $0x188] sm:$0xff] %v2962_v0   ;;  %v2797_v8 = vpack.c.bf16 %v1476_v1, %v1475_v59  ;;  %v2957_v9 = vpack.c.bf16 %v1540_v2, %v1539_v60  ;;  %v1077_v10 = vadd.f32 %v3607_v3, %v1076_v6 }
 0x125   : > { %v1333_v11 = vadd.f32 %v3607_v3, %v1332_v7  ;;  %v3209_v12 = vpop.f32.mrf.mxu0  ;;  %v3273_v13 = vpop.f32.mrf.mxu1  ;;  %v1481_v16 = vmax.f32 %v1085_v4, 0.0  ;;  %v1545_v17 = vmax.f32 %v1341_v5, 0.0 }
 0x126   : > { %3049 = vst [vmem:[%s3622_s4 + $0x80] sm:$0xff] %v2797_v8   ;;  %3081 = vst [vmem:[%s3622_s4 + $0x180] sm:$0xff] %v2957_v9   ;;  %v1088_v14 = vadd.f32 %v3209_v12, %v3607_v3  ;;  %v1344_v15 = vadd.f32 %v3273_v13, %v3607_v3  ;;  %v1479_v24 = vmax.f32 %v1077_v10, 0.0 }
 0x127   : > { %v1079_v18 = vpop.f32.mrf.mxu0  ;;  %v1335_v19 = vpop.f32.mrf.mxu1  ;;  %v1543_v25 = vmax.f32 %v1333_v11, 0.0 }
 0x128   : > { %v1482_v20 = vmax.f32 %v1088_v14, 0.0  ;;  %v1546_v21 = vmax.f32 %v1344_v15, 0.0  ;;  %v1080_v22 = vadd.f32 %v3607_v3, %v1079_v18  ;;  %v1336_v23 = vadd.f32 %v3607_v3, %v1335_v19 }
 0x129   : > { %v3212_v26 = vpop.f32.mrf.mxu0  ;;  %v3276_v27 = vpop.f32.mrf.mxu1 }
 0x12a   : > { %v2812_v28 = vpack.c.bf16 %v1482_v20, %v1481_v16  ;;  %v2972_v29 = vpack.c.bf16 %v1546_v21, %v1545_v17  ;;  %v1480_v30 = vmax.f32 %v1080_v22, 0.0  ;;  %v1544_v31 = vmax.f32 %v1336_v23, 0.0 }
 0x12b   : > { %v1101_v32 = vadd.f32 %v3212_v26, %v3607_v3  ;;  %v1357_v33 = vadd.f32 %v3276_v27, %v3607_v3  ;;  %v1092_v34 = vpop.f32.mrf.mxu0  ;;  %v1348_v35 = vpop.f32.mrf.mxu1 }
 0x12c   : > { %3052 = vst [vmem:[%s3622_s4 + $0x98] sm:$0xff] %v2812_v28   ;;  %3084 = vst [vmem:[%s3622_s4 + $0x198] sm:$0xff] %v2972_v29   ;;  %v2807_v36 = vpack.c.bf16 %v1480_v30, %v1479_v24  ;;  %v2967_v37 = vpack.c.bf16 %v1544_v31, %v1543_v25  ;;  %v1093_v38 = vadd.f32 %v3607_v3, %v1092_v34 }
 0x12d   : > { %v1349_v39 = vadd.f32 %v3607_v3, %v1348_v35  ;;  %v3213_v40 = vpop.f32.mrf.mxu0  ;;  %v3277_v41 = vpop.f32.mrf.mxu1  ;;  %v1485_v44 = vmax.f32 %v1101_v32, 0.0  ;;  %v1549_v45 = vmax.f32 %v1357_v33, 0.0 }
 0x12e   : > { %3051 = vst [vmem:[%s3622_s4 + $0x90] sm:$0xff] %v2807_v36   ;;  %3083 = vst [vmem:[%s3622_s4 + $0x190] sm:$0xff] %v2967_v37   ;;  %v1104_v42 = vadd.f32 %v3213_v40, %v3607_v3  ;;  %v1360_v43 = vadd.f32 %v3277_v41, %v3607_v3  ;;  %v1483_v52 = vmax.f32 %v1093_v38, 0.0 }
 0x12f   : > { %v1095_v46 = vpop.f32.mrf.mxu0  ;;  %v1351_v47 = vpop.f32.mrf.mxu1  ;;  %v1547_v53 = vmax.f32 %v1349_v39, 0.0 }
 0x130   : > { %v1486_v48 = vmax.f32 %v1104_v42, 0.0  ;;  %v1550_v49 = vmax.f32 %v1360_v43, 0.0  ;;  %v1096_v50 = vadd.f32 %v3607_v3, %v1095_v46  ;;  %v1352_v51 = vadd.f32 %v3607_v3, %v1351_v47 }
 0x131   : > { %v3216_v54 = vpop.f32.mrf.mxu0  ;;  %v3280_v55 = vpop.f32.mrf.mxu1 }
 0x132   : > { %v2822_v56 = vpack.c.bf16 %v1486_v48, %v1485_v44  ;;  %v2982_v57 = vpack.c.bf16 %v1550_v49, %v1549_v45  ;;  %v1484_v58 = vmax.f32 %v1096_v50, 0.0  ;;  %v1548_v59 = vmax.f32 %v1352_v51, 0.0 }
 0x133   : > { %v1117_v60 = vadd.f32 %v3216_v54, %v3607_v3  ;;  %v1373_v61 = vadd.f32 %v3280_v55, %v3607_v3  ;;  %v1108_v62 = vpop.f32.mrf.mxu0  ;;  %v1364_v63 = vpop.f32.mrf.mxu1 }
 0x134   : > { %3054 = vst [vmem:[%s3622_s4 + $0xa8] sm:$0xff] %v2822_v56   ;;  %3086 = vst [vmem:[%s3622_s4 + $0x1a8] sm:$0xff] %v2982_v57   ;;  %v2817_v0 = vpack.c.bf16 %v1484_v58, %v1483_v52  ;;  %v2977_v1 = vpack.c.bf16 %v1548_v59, %v1547_v53  ;;  %v1109_v2 = vadd.f32 %v3607_v3, %v1108_v62 }
 0x135   : > { %v1365_v4 = vadd.f32 %v3607_v3, %v1364_v63  ;;  %v3217_v5 = vpop.f32.mrf.mxu0  ;;  %v3281_v6 = vpop.f32.mrf.mxu1  ;;  %v1489_v9 = vmax.f32 %v1117_v60, 0.0  ;;  %v1553_v10 = vmax.f32 %v1373_v61, 0.0 }
 0x136   : > { %3053 = vst [vmem:[%s3622_s4 + $0xa0] sm:$0xff] %v2817_v0   ;;  %3085 = vst [vmem:[%s3622_s4 + $0x1a0] sm:$0xff] %v2977_v1   ;;  %v1120_v7 = vadd.f32 %v3217_v5, %v3607_v3  ;;  %v1376_v8 = vadd.f32 %v3281_v6, %v3607_v3  ;;  %v1487_v17 = vmax.f32 %v1109_v2, 0.0 }
 0x137   : > { %v1111_v11 = vpop.f32.mrf.mxu0  ;;  %v1367_v12 = vpop.f32.mrf.mxu1  ;;  %v1551_v18 = vmax.f32 %v1365_v4, 0.0 }
 0x138   : > { %v1490_v13 = vmax.f32 %v1120_v7, 0.0  ;;  %v1554_v14 = vmax.f32 %v1376_v8, 0.0  ;;  %v1112_v15 = vadd.f32 %v3607_v3, %v1111_v11  ;;  %v1368_v16 = vadd.f32 %v3607_v3, %v1367_v12 }
 0x139   : > { %v3220_v19 = vpop.f32.mrf.mxu0  ;;  %v3284_v20 = vpop.f32.mrf.mxu1 }
 0x13a   : > { %v2832_v21 = vpack.c.bf16 %v1490_v13, %v1489_v9  ;;  %v2992_v22 = vpack.c.bf16 %v1554_v14, %v1553_v10  ;;  %v1488_v23 = vmax.f32 %v1112_v15, 0.0  ;;  %v1552_v24 = vmax.f32 %v1368_v16, 0.0 }
 0x13b   : > { %v1133_v25 = vadd.f32 %v3220_v19, %v3607_v3  ;;  %v1389_v26 = vadd.f32 %v3284_v20, %v3607_v3  ;;  %v1124_v27 = vpop.f32.mrf.mxu0  ;;  %v1380_v28 = vpop.f32.mrf.mxu1 }
 0x13c   : > { %3056 = vst [vmem:[%s3622_s4 + $0xb8] sm:$0xff] %v2832_v21   ;;  %3088 = vst [vmem:[%s3622_s4 + $0x1b8] sm:$0xff] %v2992_v22   ;;  %v2827_v29 = vpack.c.bf16 %v1488_v23, %v1487_v17  ;;  %v2987_v30 = vpack.c.bf16 %v1552_v24, %v1551_v18  ;;  %v1125_v31 = vadd.f32 %v3607_v3, %v1124_v27 }
 0x13d   : > { %v1381_v32 = vadd.f32 %v3607_v3, %v1380_v28  ;;  %v3221_v33 = vpop.f32.mrf.mxu0  ;;  %v3285_v34 = vpop.f32.mrf.mxu1  ;;  %v1493_v37 = vmax.f32 %v1133_v25, 0.0  ;;  %v1557_v38 = vmax.f32 %v1389_v26, 0.0 }
 0x13e   : > { %3055 = vst [vmem:[%s3622_s4 + $0xb0] sm:$0xff] %v2827_v29   ;;  %3087 = vst [vmem:[%s3622_s4 + $0x1b0] sm:$0xff] %v2987_v30   ;;  %v1136_v35 = vadd.f32 %v3221_v33, %v3607_v3  ;;  %v1392_v36 = vadd.f32 %v3285_v34, %v3607_v3  ;;  %v1491_v45 = vmax.f32 %v1125_v31, 0.0 }
 0x13f   : > { %v1127_v39 = vpop.f32.mrf.mxu0  ;;  %v1383_v40 = vpop.f32.mrf.mxu1  ;;  %v1555_v46 = vmax.f32 %v1381_v32, 0.0 }
 0x140   : > { %v1494_v41 = vmax.f32 %v1136_v35, 0.0  ;;  %v1558_v42 = vmax.f32 %v1392_v36, 0.0  ;;  %v1128_v43 = vadd.f32 %v3607_v3, %v1127_v39  ;;  %v1384_v44 = vadd.f32 %v3607_v3, %v1383_v40 }
 0x141   : > { %v3224_v47 = vpop.f32.mrf.mxu0  ;;  %v3288_v48 = vpop.f32.mrf.mxu1 }
 0x142   : > { %v2842_v49 = vpack.c.bf16 %v1494_v41, %v1493_v37  ;;  %v3002_v50 = vpack.c.bf16 %v1558_v42, %v1557_v38  ;;  %v1492_v51 = vmax.f32 %v1128_v43, 0.0  ;;  %v1556_v52 = vmax.f32 %v1384_v44, 0.0 }
 0x143   : > { %v1149_v53 = vadd.f32 %v3224_v47, %v3607_v3  ;;  %v1405_v54 = vadd.f32 %v3288_v48, %v3607_v3  ;;  %v1140_v55 = vpop.f32.mrf.mxu0  ;;  %v1396_v56 = vpop.f32.mrf.mxu1 }
 0x144   : > { %3058 = vst [vmem:[%s3622_s4 + $0xc8] sm:$0xff] %v2842_v49   ;;  %3090 = vst [vmem:[%s3622_s4 + $0x1c8] sm:$0xff] %v3002_v50   ;;  %v2837_v57 = vpack.c.bf16 %v1492_v51, %v1491_v45  ;;  %v2997_v58 = vpack.c.bf16 %v1556_v52, %v1555_v46  ;;  %v1141_v59 = vadd.f32 %v3607_v3, %v1140_v55 }
 0x145   : > { %v1397_v60 = vadd.f32 %v3607_v3, %v1396_v56  ;;  %v3225_v61 = vpop.f32.mrf.mxu0  ;;  %v3289_v62 = vpop.f32.mrf.mxu1  ;;  %v1497_v1 = vmax.f32 %v1149_v53, 0.0  ;;  %v1561_v2 = vmax.f32 %v1405_v54, 0.0 }
 0x146   : > { %3057 = vst [vmem:[%s3622_s4 + $0xc0] sm:$0xff] %v2837_v57   ;;  %3089 = vst [vmem:[%s3622_s4 + $0x1c0] sm:$0xff] %v2997_v58   ;;  %v1152_v63 = vadd.f32 %v3225_v61, %v3607_v3  ;;  %v1408_v0 = vadd.f32 %v3289_v62, %v3607_v3  ;;  %v1495_v10 = vmax.f32 %v1141_v59, 0.0 }
 0x147   : > { %v1143_v4 = vpop.f32.mrf.mxu0  ;;  %v1399_v5 = vpop.f32.mrf.mxu1  ;;  %v1559_v11 = vmax.f32 %v1397_v60, 0.0 }
 0x148   : > { %v1498_v6 = vmax.f32 %v1152_v63, 0.0  ;;  %v1562_v7 = vmax.f32 %v1408_v0, 0.0  ;;  %v1144_v8 = vadd.f32 %v3607_v3, %v1143_v4  ;;  %v1400_v9 = vadd.f32 %v3607_v3, %v1399_v5 }
 0x149   : > { %v3228_v12 = vpop.f32.mrf.mxu0  ;;  %v3292_v13 = vpop.f32.mrf.mxu1 }
 0x14a   : > { %v2852_v14 = vpack.c.bf16 %v1498_v6, %v1497_v1  ;;  %v3012_v15 = vpack.c.bf16 %v1562_v7, %v1561_v2  ;;  %v1496_v16 = vmax.f32 %v1144_v8, 0.0  ;;  %v1560_v17 = vmax.f32 %v1400_v9, 0.0 }
 0x14b   : > { %v1165_v18 = vadd.f32 %v3228_v12, %v3607_v3  ;;  %v1421_v19 = vadd.f32 %v3292_v13, %v3607_v3  ;;  %v1156_v20 = vpop.f32.mrf.mxu0  ;;  %v1412_v21 = vpop.f32.mrf.mxu1 }
 0x14c   : > { %3060 = vst [vmem:[%s3622_s4 + $0xd8] sm:$0xff] %v2852_v14   ;;  %3092 = vst [vmem:[%s3622_s4 + $0x1d8] sm:$0xff] %v3012_v15   ;;  %v2847_v22 = vpack.c.bf16 %v1496_v16, %v1495_v10  ;;  %v3007_v23 = vpack.c.bf16 %v1560_v17, %v1559_v11  ;;  %v1157_v24 = vadd.f32 %v3607_v3, %v1156_v20 }
 0x14d   : > { %v1413_v25 = vadd.f32 %v3607_v3, %v1412_v21  ;;  %v3229_v26 = vpop.f32.mrf.mxu0  ;;  %v3293_v27 = vpop.f32.mrf.mxu1  ;;  %v1501_v30 = vmax.f32 %v1165_v18, 0.0  ;;  %v1565_v31 = vmax.f32 %v1421_v19, 0.0 }
 0x14e   : > { %3059 = vst [vmem:[%s3622_s4 + $0xd0] sm:$0xff] %v2847_v22   ;;  %3091 = vst [vmem:[%s3622_s4 + $0x1d0] sm:$0xff] %v3007_v23   ;;  %v1168_v28 = vadd.f32 %v3229_v26, %v3607_v3  ;;  %v1424_v29 = vadd.f32 %v3293_v27, %v3607_v3  ;;  %v1499_v38 = vmax.f32 %v1157_v24, 0.0 }
 0x14f   : > { %v1159_v32 = vpop.f32.mrf.mxu0  ;;  %v1415_v33 = vpop.f32.mrf.mxu1  ;;  %v1563_v39 = vmax.f32 %v1413_v25, 0.0 }
 0x150   : > { %v1502_v34 = vmax.f32 %v1168_v28, 0.0  ;;  %v1566_v35 = vmax.f32 %v1424_v29, 0.0  ;;  %v1160_v36 = vadd.f32 %v3607_v3, %v1159_v32  ;;  %v1416_v37 = vadd.f32 %v3607_v3, %v1415_v33 }
 0x151   : > { %v3232_v40 = vpop.f32.mrf.mxu0  ;;  %v3296_v41 = vpop.f32.mrf.mxu1 }
 0x152   : > { %v2862_v42 = vpack.c.bf16 %v1502_v34, %v1501_v30  ;;  %v3022_v43 = vpack.c.bf16 %v1566_v35, %v1565_v31  ;;  %v1500_v44 = vmax.f32 %v1160_v36, 0.0  ;;  %v1564_v45 = vmax.f32 %v1416_v37, 0.0 }
 0x153   : > { %v1181_v46 = vadd.f32 %v3232_v40, %v3607_v3  ;;  %v1437_v47 = vadd.f32 %v3296_v41, %v3607_v3  ;;  %v1172_v48 = vpop.f32.mrf.mxu0  ;;  %v1428_v49 = vpop.f32.mrf.mxu1 }
 0x154   : > { %3062 = vst [vmem:[%s3622_s4 + $0xe8] sm:$0xff] %v2862_v42   ;;  %3094 = vst [vmem:[%s3622_s4 + $0x1e8] sm:$0xff] %v3022_v43   ;;  %v2857_v50 = vpack.c.bf16 %v1500_v44, %v1499_v38  ;;  %v3017_v51 = vpack.c.bf16 %v1564_v45, %v1563_v39  ;;  %v1173_v52 = vadd.f32 %v3607_v3, %v1172_v48 }
 0x155   : > { %v1429_v53 = vadd.f32 %v3607_v3, %v1428_v49  ;;  %v3233_v54 = vpop.f32.mrf.mxu0  ;;  %v3297_v55 = vpop.f32.mrf.mxu1  ;;  %v1505_v58 = vmax.f32 %v1181_v46, 0.0  ;;  %v1569_v59 = vmax.f32 %v1437_v47, 0.0 }
 0x156   : > { %3061 = vst [vmem:[%s3622_s4 + $0xe0] sm:$0xff] %v2857_v50   ;;  %3093 = vst [vmem:[%s3622_s4 + $0x1e0] sm:$0xff] %v3017_v51   ;;  %v1184_v56 = vadd.f32 %v3233_v54, %v3607_v3  ;;  %v1440_v57 = vadd.f32 %v3297_v55, %v3607_v3  ;;  %v1503_v2 = vmax.f32 %v1173_v52, 0.0 }
 0x157   : > { %v1175_v60 = vpop.f32.mrf.mxu0  ;;  %v1431_v61 = vpop.f32.mrf.mxu1  ;;  %v1567_v4 = vmax.f32 %v1429_v53, 0.0 }
 0x158   : > { %v1506_v62 = vmax.f32 %v1184_v56, 0.0  ;;  %v1570_v63 = vmax.f32 %v1440_v57, 0.0  ;;  %v1176_v0 = vadd.f32 %v3607_v3, %v1175_v60  ;;  %v1432_v1 = vadd.f32 %v3607_v3, %v1431_v61 }
 0x15a   : > { %v2872_v5 = vpack.c.bf16 %v1506_v62, %v1505_v58  ;;  %v3032_v6 = vpack.c.bf16 %v1570_v63, %v1569_v59  ;;  %v1504_v7 = vmax.f32 %v1176_v0, 0.0  ;;  %v1568_v8 = vmax.f32 %v1432_v1, 0.0 }
 0x15c   : > { %3064 = vst [vmem:[%s3622_s4 + $0xf8] sm:$0xff] %v2872_v5   ;;  %3096 = vst [vmem:[%s3622_s4 + $0x1f8] sm:$0xff] %v3032_v6   ;;  %v2867_v9 = vpack.c.bf16 %v1504_v7, %v1503_v2  ;;  %v3027_v10 = vpack.c.bf16 %v1568_v8, %v1567_v4 }
 0x15e   : > { %3063 = vst [vmem:[%s3622_s4 + $0xf0] sm:$0xff] %v2867_v9   ;;  %3095 = vst [vmem:[%s3622_s4 + $0x1f0] sm:$0xff] %v3027_v10  }
 0x15f PF: > { %s13_s14 = sadd.s32 1, %s3417_s14   ;;  %s3821_s12 = smov %s3413_s13 }
 0x160   : > { %p10_p5 = scmp.ge.s32.totalorder %s13_s14, 14   ;;  %s3822_s13 = smov %s3824_s15 }
 0x162   :  { %12 = sbr.rel (!%p10_p5) target bundleno = 2 (0x2), region = 68 }

// kernel: ppo_forward.6
= control target key start
LH: loop header
LB: loop body
LE: loop exit
PB: predicated region body
PF: predicated region fallthrough
CT: control target
= control target key end

     0   :  { %v6032_v0 = vmov 0   ;;  %s7527_s1 = inlined_call_operand.vmem [shape: bf16[512,128], index: 1, kind: input, shape index: {}]   ;;  %s7528_s0 = inlined_call_operand.vmem [shape: bf16[1248,512], index: 0, kind: input, shape index: {}]   ;;  %s7529_s2 = inlined_call_operand.vmem [shape: f32[1,128], index: 2, kind: input, shape index: {}]   ;;  %s7530_s3 = inlined_call_operand.vmem [shape: bf16[1248,128], index: 3, kind: output, shape index: {}]  }
   0x1   :  { %2150 = vmatprep.subr.bf16.mxu0 %v6032_v0  ;;  %2807 = vmatprep.subr.bf16.mxu1 %v6032_v0  ;;  %v5529_v1 = vld [vmem:[%s7527_s1 + $0x38] sm:$0xff]   ;;  %v5531_v3 = vld [vmem:[%s7527_s1 + $0x30] sm:$0xff]   ;;  %v5533_v5 = vld [vmem:[%s7527_s1 + $0x28] sm:$0xff]  }
   0x2   :  { %v5530_v2 = vld [vmem:[%s7527_s1 + $0xb8] sm:$0xff]   ;;  %2151 = vmatpush1.bf16.msra.mxu0 %v5529_v1  ;;  %v5532_v4 = vld [vmem:[%s7527_s1 + $0xb0] sm:$0xff]   ;;  %v5534_v6 = vld [vmem:[%s7527_s1 + $0xa8] sm:$0xff]  }
   0x3   :  { %2808 = vmatpush1.bf16.msra.mxu1 %v5530_v2  ;;  %2152 = vmatprep.subr.bf16.mxu0 %v6032_v0  ;;  %v5535_v7 = vld [vmem:[%s7527_s1 + $0x20] sm:$0xff]   ;;  %v5537_v9 = vld [vmem:[%s7527_s1 + $0x18] sm:$0xff]   ;;  %v5539_v11 = vld [vmem:[%s7527_s1 + $0x10] sm:$0xff]  }
   0x4   :  { %2809 = vmatprep.subr.bf16.mxu1 %v6032_v0  ;;  %v5536_v8 = vld [vmem:[%s7527_s1 + $0xa0] sm:$0xff]   ;;  %v5538_v10 = vld [vmem:[%s7527_s1 + $0x98] sm:$0xff]   ;;  %v5540_v12 = vld [vmem:[%s7527_s1 + $0x90] sm:$0xff]  }
   0x5   :  { %v5541_v13 = vld [vmem:[%s7527_s1 + $0x8] sm:$0xff]   ;;  %v5543_v15 = vld [vmem:[%s7527_s1] sm:$0xff]   ;;  %v5545_v17 = vld [vmem:[%s7527_s1 + $0x78] sm:$0xff]  }
   0x6   :  { %2153 = vmatpush1.bf16.msra.mxu0 %v5531_v3  ;;  %v5542_v14 = vld [vmem:[%s7527_s1 + $0x88] sm:$0xff]   ;;  %v5544_v16 = vld [vmem:[%s7527_s1 + $0x80] sm:$0xff]   ;;  %v5546_v18 = vld [vmem:[%s7527_s1 + $0xf8] sm:$0xff]  }
   0x7   :  { %2810 = vmatpush1.bf16.msra.mxu1 %v5532_v4  ;;  %2154 = vmatprep.subr.bf16.mxu0 %v6032_v0  ;;  %v5563_v19 = vld [vmem:[%s7528_s0 + $0x4] ss:$16 sps:$4 sm:$0xff]   ;;  %v5566_v21 = vld [vmem:[%s7528_s0 + $0xc] ss:$16 sps:$4 sm:$0xff]   ;;  %v5561_v35 = vld [vmem:[%s7528_s0] ss:$16 sps:$4 sm:$0xff]  }
   0x8   :  { %2811 = vmatprep.subr.bf16.mxu1 %v6032_v0  ;;  %v5547_v20 = vld [vmem:[%s7527_s1 + $0x70] sm:$0xff]   ;;  %2182 = vmatprep.mubr.bf16.mxu0 %v5563_v19  ;;  %v5549_v23 = vld [vmem:[%s7527_s1 + $0x68] sm:$0xff]   ;;  %v5551_v25 = vld [vmem:[%s7527_s1 + $0x60] sm:$0xff]  }
   0x9   :  { %v5548_v22 = vld [vmem:[%s7527_s1 + $0xf0] sm:$0xff]   ;;  %2839 = vmatprep.mubr.bf16.mxu1 %v5566_v21  ;;  %v5550_v24 = vld [vmem:[%s7527_s1 + $0xe8] sm:$0xff]   ;;  %v5552_v26 = vld [vmem:[%s7527_s1 + $0xe0] sm:$0xff]  }
   0xa   :  { %2155 = vmatpush1.bf16.msra.mxu0 %v5533_v5  ;;  %v5553_v27 = vld [vmem:[%s7527_s1 + $0x58] sm:$0xff]   ;;  %v5555_v29 = vld [vmem:[%s7527_s1 + $0x50] sm:$0xff]   ;;  %v5557_v31 = vld [vmem:[%s7527_s1 + $0x48] sm:$0xff]  }
   0xb   :  { %2812 = vmatpush1.bf16.msra.mxu1 %v5534_v6  ;;  %2156 = vmatprep.subr.bf16.mxu0 %v6032_v0  ;;  %v5554_v28 = vld [vmem:[%s7527_s1 + $0xd8] sm:$0xff]   ;;  %v5556_v30 = vld [vmem:[%s7527_s1 + $0xd0] sm:$0xff]   ;;  %v5558_v32 = vld [vmem:[%s7527_s1 + $0xc8] sm:$0xff]  }
   0xc   :  { %2813 = vmatprep.subr.bf16.mxu1 %v6032_v0  ;;  %v5559_v33 = vld [vmem:[%s7527_s1 + $0x40] sm:$0xff]   ;;  %v5564_v36 = vld [vmem:[%s7528_s0 + $0x8] ss:$16 sps:$4 sm:$0xff]   ;;  %v5569_v38 = vld [vmem:[%s7528_s0 + $0x2c] ss:$16 sps:$4 sm:$0xff]  }
   0xd   :  { %v5560_v34 = vld [vmem:[%s7527_s1 + $0xc0] sm:$0xff]   ;;  %v5572_v40 = vld [vmem:[%s7528_s0 + $0x28] ss:$16 sps:$4 sm:$0xff]   ;;  %v5575_v42 = vld [vmem:[%s7528_s0 + $0x4c] ss:$16 sps:$4 sm:$0xff]  }
   0xe   :  { %2157 = vmatpush1.bf16.msra.mxu0 %v5535_v7  ;;  %v5567_v37 = vld [vmem:[%s7528_s0 + $0x24] ss:$16 sps:$4 sm:$0xff]   ;;  %v5571_v39 = vld [vmem:[%s7528_s0 + $0x20] ss:$16 sps:$4 sm:$0xff]   ;;  %v5578_v44 = vld [vmem:[%s7528_s0 + $0x48] ss:$16 sps:$4 sm:$0xff]  }
   0xf   :  { %2814 = vmatpush1.bf16.msra.mxu1 %v5536_v8  ;;  %2158 = vmatprep.subr.bf16.mxu0 %v6032_v0  ;;  %v5573_v41 = vld [vmem:[%s7528_s0 + $0x44] ss:$16 sps:$4 sm:$0xff]   ;;  %v5577_v43 = vld [vmem:[%s7528_s0 + $0x40] ss:$16 sps:$4 sm:$0xff]   ;;  %v5581_v46 = vld [vmem:[%s7528_s0 + $0x6c] ss:$16 sps:$4 sm:$0xff]  }
  0x10   :  { %2815 = vmatprep.subr.bf16.mxu1 %v6032_v0  ;;  %v5579_v45 = vld [vmem:[%s7528_s0 + $0x64] ss:$16 sps:$4 sm:$0xff]   ;;  %v5583_v47 = vld [vmem:[%s7528_s0 + $0x60] ss:$16 sps:$4 sm:$0xff]   ;;  %v5584_v48 = vld [vmem:[%s7528_s0 + $0x68] ss:$16 sps:$4 sm:$0xff]  }
  0x11   :  { %v5585_v49 = vld [vmem:[%s7528_s0 + $0x84] ss:$16 sps:$4 sm:$0xff]   ;;  %v5587_v50 = vld [vmem:[%s7528_s0 + $0x8c] ss:$16 sps:$4 sm:$0xff]   ;;  %v5589_v51 = vld [vmem:[%s7528_s0 + $0x80] ss:$16 sps:$4 sm:$0xff]  }
  0x12   :  { %2159 = vmatpush1.bf16.msra.mxu0 %v5537_v9  ;;  %v5590_v52 = vld [vmem:[%s7528_s0 + $0x88] ss:$16 sps:$4 sm:$0xff]   ;;  %v5591_v53 = vld [vmem:[%s7528_s0 + $0xa4] ss:$16 sps:$4 sm:$0xff]   ;;  %v5593_v54 = vld [vmem:[%s7528_s0 + $0xac] ss:$16 sps:$4 sm:$0xff]  }
  0x13   :  { %2816 = vmatpush1.bf16.msra.mxu1 %v5538_v10  ;;  %2160 = vmatprep.subr.bf16.mxu0 %v6032_v0  ;;  %v5595_v55 = vld [vmem:[%s7528_s0 + $0xa0] ss:$16 sps:$4 sm:$0xff]   ;;  %v5596_v56 = vld [vmem:[%s7528_s0 + $0xa8] ss:$16 sps:$4 sm:$0xff]   ;;  %v5597_v57 = vld [vmem:[%s7528_s0 + $0xc4] ss:$16 sps:$4 sm:$0xff]  }
  0x14   :  { %2817 = vmatprep.subr.bf16.mxu1 %v6032_v0  ;;  %v5599_v58 = vld [vmem:[%s7528_s0 + $0xcc] ss:$16 sps:$4 sm:$0xff]   ;;  %v5601_v59 = vld [vmem:[%s7528_s0 + $0xc0] ss:$16 sps:$4 sm:$0xff]   ;;  %v5602_v60 = vld [vmem:[%s7528_s0 + $0xc8] ss:$16 sps:$4 sm:$0xff]  }
  0x15   :  { %v5603_v61 = vld [vmem:[%s7528_s0 + $0xe4] ss:$16 sps:$4 sm:$0xff]   ;;  %v5605_v62 = vld [vmem:[%s7528_s0 + $0xec] ss:$16 sps:$4 sm:$0xff]   ;;  %v5607_v63 = vld [vmem:[%s7528_s0 + $0xe0] ss:$16 sps:$4 sm:$0xff]  }
  0x16   :  { %2161 = vmatpush1.bf16.msra.mxu0 %v5539_v11  ;;  %v5609_v1 = vld [vmem:[%s7528_s0 + $0x104] ss:$16 sps:$4 sm:$0xff]   ;;  %v5611_v2 = vld [vmem:[%s7528_s0 + $0x10c] ss:$16 sps:$4 sm:$0xff]   ;;  %v5613_v3 = vld [vmem:[%s7528_s0 + $0x100] ss:$16 sps:$4 sm:$0xff]  }
  0x17   :  { %2818 = vmatpush1.bf16.msra.mxu1 %v5540_v12  ;;  %2162 = vmatprep.subr.bf16.mxu0 %v6032_v0  ;;  %v5614_v4 = vld [vmem:[%s7528_s0 + $0x108] ss:$16 sps:$4 sm:$0xff]   ;;  %v5615_v5 = vld [vmem:[%s7528_s0 + $0x124] ss:$16 sps:$4 sm:$0xff]   ;;  %v5617_v6 = vld [vmem:[%s7528_s0 + $0x12c] ss:$16 sps:$4 sm:$0xff]  }
  0x18   :  { %2819 = vmatprep.subr.bf16.mxu1 %v6032_v0  ;;  %v5619_v7 = vld [vmem:[%s7528_s0 + $0x120] ss:$16 sps:$4 sm:$0xff]   ;;  %v5620_v8 = vld [vmem:[%s7528_s0 + $0x128] ss:$16 sps:$4 sm:$0xff]   ;;  %v5621_v9 = vld [vmem:[%s7528_s0 + $0x144] ss:$16 sps:$4 sm:$0xff]  }
  0x19   :  { %v5623_v10 = vld [vmem:[%s7528_s0 + $0x14c] ss:$16 sps:$4 sm:$0xff]   ;;  %v5625_v11 = vld [vmem:[%s7528_s0 + $0x140] ss:$16 sps:$4 sm:$0xff]   ;;  %v5626_v12 = vld [vmem:[%s7528_s0 + $0x148] ss:$16 sps:$4 sm:$0xff]  }
  0x1a   :  { %2163 = vmatpush1.bf16.msra.mxu0 %v5541_v13  ;;  %v5627_v13 = vld [vmem:[%s7528_s0 + $0x164] ss:$16 sps:$4 sm:$0xff]   ;;  %v5637_v19 = vld [vmem:[%s7528_s0 + $0x180] ss:$16 sps:$4 sm:$0xff]  }
  0x1b   :  { %2820 = vmatpush1.bf16.msra.mxu1 %v5542_v14  ;;  %2164 = vmatprep.subr.bf16.mxu0 %v6032_v0  ;;  %v5629_v14 = vld [vmem:[%s7528_s0 + $0x16c] ss:$16 sps:$4 sm:$0xff]   ;;  %v5639_v21 = vld [vmem:[%s7528_s0 + $0x1a4] ss:$16 sps:$4 sm:$0xff]  }
  0x1c   :  { %2821 = vmatprep.subr.bf16.mxu1 %v6032_v0 }
  0x1e   :  { %2165 = vmatpush1.bf16.msra.mxu0 %v5543_v15  ;;  %v5631_v15 = vld [vmem:[%s7528_s0 + $0x160] ss:$16 sps:$4 sm:$0xff]  }
  0x1f   :  { %2822 = vmatpush1.bf16.msra.mxu1 %v5544_v16  ;;  %2166 = vmatprep.subr.bf16.mxu0 %v6032_v0  ;;  %v5632_v16 = vld [vmem:[%s7528_s0 + $0x168] ss:$16 sps:$4 sm:$0xff]  }
  0x20   :  { %2823 = vmatprep.subr.bf16.mxu1 %v6032_v0 }
  0x22   :  { %2167 = vmatpush2.bf16.msra.mxu0 %v5545_v17  ;;  %v5633_v17 = vld [vmem:[%s7528_s0 + $0x184] ss:$16 sps:$4 sm:$0xff]  }
  0x23   :  { %2824 = vmatpush2.bf16.msra.mxu1 %v5546_v18  ;;  %2168 = vmatprep.subr.bf16.mxu0 %v6032_v0  ;;  %v5635_v18 = vld [vmem:[%s7528_s0 + $0x18c] ss:$16 sps:$4 sm:$0xff]  }
  0x24   :  { %2825 = vmatprep.subr.bf16.mxu1 %v6032_v0 }
  0x26   :  { %2169 = vmatpush2.bf16.msra.mxu0 %v5547_v20  ;;  %v5638_v20 = vld [vmem:[%s7528_s0 + $0x188] ss:$16 sps:$4 sm:$0xff]  }
  0x27   :  { %2826 = vmatpush2.bf16.msra.mxu1 %v5548_v22  ;;  %2170 = vmatprep.subr.bf16.mxu0 %v6032_v0  ;;  %v5641_v22 = vld [vmem:[%s7528_s0 + $0x1ac] ss:$16 sps:$4 sm:$0xff]  }
  0x28   :  { %2827 = vmatprep.subr.bf16.mxu1 %v6032_v0 }
  0x2a   :  { %2171 = vmatpush2.bf16.msra.mxu0 %v5549_v23  ;;  %v5643_v23 = vld [vmem:[%s7528_s0 + $0x1a0] ss:$16 sps:$4 sm:$0xff]  }
  0x2b   :  { %2828 = vmatpush2.bf16.msra.mxu1 %v5550_v24  ;;  %2172 = vmatprep.subr.bf16.mxu0 %v6032_v0  ;;  %v5644_v24 = vld [vmem:[%s7528_s0 + $0x1a8] ss:$16 sps:$4 sm:$0xff]  }
  0x2c   :  { %2829 = vmatprep.subr.bf16.mxu1 %v6032_v0 }
  0x2e   :  { %2173 = vmatpush2.bf16.msra.mxu0 %v5551_v25  ;;  %v5645_v25 = vld [vmem:[%s7528_s0 + $0x1c4] ss:$16 sps:$4 sm:$0xff]  }
  0x2f   :  { %2830 = vmatpush2.bf16.msra.mxu1 %v5552_v26  ;;  %2174 = vmatprep.subr.bf16.mxu0 %v6032_v0  ;;  %v5647_v26 = vld [vmem:[%s7528_s0 + $0x1cc] ss:$16 sps:$4 sm:$0xff]  }
  0x30   :  { %2831 = vmatprep.subr.bf16.mxu1 %v6032_v0 }
  0x32   :  { %2175 = vmatpush2.bf16.msra.mxu0 %v5553_v27  ;;  %v5649_v27 = vld [vmem:[%s7528_s0 + $0x1c0] ss:$16 sps:$4 sm:$0xff]  }
  0x33   :  { %2832 = vmatpush2.bf16.msra.mxu1 %v5554_v28  ;;  %2176 = vmatprep.subr.bf16.mxu0 %v6032_v0  ;;  %v5650_v28 = vld [vmem:[%s7528_s0 + $0x1c8] ss:$16 sps:$4 sm:$0xff]  }
  0x34   :  { %2833 = vmatprep.subr.bf16.mxu1 %v6032_v0 }
  0x36   :  { %2177 = vmatpush2.bf16.msra.mxu0 %v5555_v29  ;;  %v5651_v29 = vld [vmem:[%s7528_s0 + $0x1e4] ss:$16 sps:$4 sm:$0xff]  }
  0x37   :  { %2834 = vmatpush2.bf16.msra.mxu1 %v5556_v30  ;;  %2178 = vmatprep.subr.bf16.mxu0 %v6032_v0  ;;  %v5653_v30 = vld [vmem:[%s7528_s0 + $0x1ec] ss:$16 sps:$4 sm:$0xff]  }
  0x38   :  { %2835 = vmatprep.subr.bf16.mxu1 %v6032_v0 }
  0x3a   :  { %2179 = vmatpush2.bf16.msra.mxu0 %v5557_v31  ;;  %v5655_v31 = vld [vmem:[%s7528_s0 + $0x1e0] ss:$16 sps:$4 sm:$0xff]  }
  0x3b   :  { %2836 = vmatpush2.bf16.msra.mxu1 %v5558_v32  ;;  %2180 = vmatprep.subr.bf16.mxu0 %v6032_v0  ;;  %v5656_v32 = vld [vmem:[%s7528_s0 + $0x1e8] ss:$16 sps:$4 sm:$0xff]  }
  0x3c   :  { %2837 = vmatprep.subr.bf16.mxu1 %v6032_v0  ;;  %v5608_v0 = vld [vmem:[%s7528_s0 + $0xe8] ss:$16 sps:$4 sm:$0xff]  }
  0x3e   :  { %2181 = vmatpush2.bf16.msra.mxu0 %v5559_v33  ;;  %v5657_v33 = vld [vmem:[%s7528_s0 + $0x204] ss:$16 sps:$4 sm:$0xff]  }
  0x3f   :  { %2838 = vmatpush2.bf16.msra.mxu1 %v5560_v34  ;;  %v5659_v34 = vld [vmem:[%s7528_s0 + $0x20c] ss:$16 sps:$4 sm:$0xff]  }
  0x41   :  { %2183 = vmatmul.mubr.bf16.vlgmr.msra.gmra.mxu0 %v5561_v35  ;;  %v5661_v35 = vld [vmem:[%s7528_s0 + $0x200] ss:$16 sps:$4 sm:$0xff]  }
  0x42   :  { %2840 = vmatmul.mubr.bf16.vlgmr.msra.gmra.mxu1 %v5564_v36  ;;  %2190 = vmatprep.mubr.bf16.mxu0 %v5567_v37  ;;  %v5662_v36 = vld [vmem:[%s7528_s0 + $0x208] ss:$16 sps:$4 sm:$0xff]   ;;  %v5663_v37 = vld [vmem:[%s7528_s0 + $0x224] ss:$16 sps:$4 sm:$0xff]  }
  0x43   :  { %2847 = vmatprep.mubr.bf16.mxu1 %v5569_v38  ;;  %v5665_v38 = vld [vmem:[%s7528_s0 + $0x22c] ss:$16 sps:$4 sm:$0xff]  }
  0x49   :  { %2191 = vmatmul.mubr.bf16.gmra.mxu0 %v5571_v39  ;;  %v5667_v39 = vld [vmem:[%s7528_s0 + $0x220] ss:$16 sps:$4 sm:$0xff]  }
  0x4a   :  { %2848 = vmatmul.mubr.bf16.gmra.mxu1 %v5572_v40  ;;  %2198 = vmatprep.mubr.bf16.mxu0 %v5573_v41  ;;  %v5668_v40 = vld [vmem:[%s7528_s0 + $0x228] ss:$16 sps:$4 sm:$0xff]   ;;  %v5669_v41 = vld [vmem:[%s7528_s0 + $0x244] ss:$16 sps:$4 sm:$0xff]  }
  0x4b   :  { %2855 = vmatprep.mubr.bf16.mxu1 %v5575_v42  ;;  %v5671_v42 = vld [vmem:[%s7528_s0 + $0x24c] ss:$16 sps:$4 sm:$0xff]  }
  0x51   :  { %2199 = vmatmul.mubr.bf16.gmra.mxu0 %v5577_v43  ;;  %v5673_v43 = vld [vmem:[%s7528_s0 + $0x240] ss:$16 sps:$4 sm:$0xff]  }
  0x52   :  { %2856 = vmatmul.mubr.bf16.gmra.mxu1 %v5578_v44  ;;  %2206 = vmatprep.mubr.bf16.mxu0 %v5579_v45  ;;  %v5674_v44 = vld [vmem:[%s7528_s0 + $0x248] ss:$16 sps:$4 sm:$0xff]   ;;  %v5675_v45 = vld [vmem:[%s7528_s0 + $0x264] ss:$16 sps:$4 sm:$0xff]  }
  0x53   :  { %2863 = vmatprep.mubr.bf16.mxu1 %v5581_v46  ;;  %v5677_v46 = vld [vmem:[%s7528_s0 + $0x26c] ss:$16 sps:$4 sm:$0xff]  }
  0x59   :  { %2207 = vmatmul.mubr.bf16.gmra.mxu0 %v5583_v47  ;;  %v5679_v47 = vld [vmem:[%s7528_s0 + $0x260] ss:$16 sps:$4 sm:$0xff]  }
  0x5a   :  { %2864 = vmatmul.mubr.bf16.gmra.mxu1 %v5584_v48  ;;  %2214 = vmatprep.mubr.bf16.mxu0 %v5585_v49  ;;  %v5680_v48 = vld [vmem:[%s7528_s0 + $0x268] ss:$16 sps:$4 sm:$0xff]   ;;  %v5681_v49 = vld [vmem:[%s7528_s0 + $0x284] ss:$16 sps:$4 sm:$0xff]  }
  0x5b   :  { %2871 = vmatprep.mubr.bf16.mxu1 %v5587_v50  ;;  %v5683_v50 = vld [vmem:[%s7528_s0 + $0x28c] ss:$16 sps:$4 sm:$0xff]  }
  0x61   :  { %2215 = vmatmul.mubr.bf16.gmra.mxu0 %v5589_v51  ;;  %v5685_v51 = vld [vmem:[%s7528_s0 + $0x280] ss:$16 sps:$4 sm:$0xff]  }
  0x62   :  { %2872 = vmatmul.mubr.bf16.gmra.mxu1 %v5590_v52  ;;  %2222 = vmatprep.mubr.bf16.mxu0 %v5591_v53  ;;  %v5686_v52 = vld [vmem:[%s7528_s0 + $0x288] ss:$16 sps:$4 sm:$0xff]   ;;  %v5687_v53 = vld [vmem:[%s7528_s0 + $0x2a4] ss:$16 sps:$4 sm:$0xff]  }
  0x63   :  { %2879 = vmatprep.mubr.bf16.mxu1 %v5593_v54  ;;  %v5689_v54 = vld [vmem:[%s7528_s0 + $0x2ac] ss:$16 sps:$4 sm:$0xff]  }
  0x69   :  { %2223 = vmatmul.mubr.bf16.gmra.mxu0 %v5595_v55  ;;  %v5691_v55 = vld [vmem:[%s7528_s0 + $0x2a0] ss:$16 sps:$4 sm:$0xff]  }
  0x6a   :  { %2880 = vmatmul.mubr.bf16.gmra.mxu1 %v5596_v56  ;;  %2230 = vmatprep.mubr.bf16.mxu0 %v5597_v57  ;;  %v5692_v56 = vld [vmem:[%s7528_s0 + $0x2a8] ss:$16 sps:$4 sm:$0xff]   ;;  %v5693_v57 = vld [vmem:[%s7528_s0 + $0x2c4] ss:$16 sps:$4 sm:$0xff]  }
  0x6b   :  { %2887 = vmatprep.mubr.bf16.mxu1 %v5599_v58  ;;  %v5695_v58 = vld [vmem:[%s7528_s0 + $0x2cc] ss:$16 sps:$4 sm:$0xff]  }
  0x71   :  { %2231 = vmatmul.mubr.bf16.gmra.mxu0 %v5601_v59  ;;  %v5697_v59 = vld [vmem:[%s7528_s0 + $0x2c0] ss:$16 sps:$4 sm:$0xff]  }
  0x72   :  { %2888 = vmatmul.mubr.bf16.gmra.mxu1 %v5602_v60  ;;  %2238 = vmatprep.mubr.bf16.mxu0 %v5603_v61  ;;  %v5698_v60 = vld [vmem:[%s7528_s0 + $0x2c8] ss:$16 sps:$4 sm:$0xff]   ;;  %v5699_v61 = vld [vmem:[%s7528_s0 + $0x2e4] ss:$16 sps:$4 sm:$0xff]  }
  0x73   :  { %2895 = vmatprep.mubr.bf16.mxu1 %v5605_v62  ;;  %v5701_v62 = vld [vmem:[%s7528_s0 + $0x2ec] ss:$16 sps:$4 sm:$0xff]  }
  0x79   :  { %2239 = vmatmul.mubr.bf16.gmra.mxu0 %v5607_v63  ;;  %v5703_v63 = vld [vmem:[%s7528_s0 + $0x2e0] ss:$16 sps:$4 sm:$0xff]  }
  0x7a   :  { %2896 = vmatmul.mubr.bf16.gmra.mxu1 %v5608_v0  ;;  %2246 = vmatprep.mubr.bf16.mxu0 %v5609_v1  ;;  %v5704_v0 = vld [vmem:[%s7528_s0 + $0x2e8] ss:$16 sps:$4 sm:$0xff]   ;;  %v5705_v1 = vld [vmem:[%s7528_s0 + $0x304] ss:$16 sps:$4 sm:$0xff]  }
  0x7b   :  { %2903 = vmatprep.mubr.bf16.mxu1 %v5611_v2  ;;  %v5707_v2 = vld [vmem:[%s7528_s0 + $0x30c] ss:$16 sps:$4 sm:$0xff]  }
  0x81   :  { %2247 = vmatmul.mubr.bf16.gmra.mxu0 %v5613_v3  ;;  %v5709_v3 = vld [vmem:[%s7528_s0 + $0x300] ss:$16 sps:$4 sm:$0xff]  }
  0x82   :  { %2904 = vmatmul.mubr.bf16.gmra.mxu1 %v5614_v4  ;;  %2254 = vmatprep.mubr.bf16.mxu0 %v5615_v5  ;;  %v5710_v4 = vld [vmem:[%s7528_s0 + $0x308] ss:$16 sps:$4 sm:$0xff]   ;;  %v5711_v5 = vld [vmem:[%s7528_s0 + $0x324] ss:$16 sps:$4 sm:$0xff]  }
  0x83   :  { %2911 = vmatprep.mubr.bf16.mxu1 %v5617_v6  ;;  %v6487_v6 = vld [vmem:[%s7529_s2] ss:$0 sm:$0xff] }
  0x89   :  { %2255 = vmatmul.mubr.bf16.gmra.mxu0 %v5619_v7  ;;  %v5713_v7 = vld [vmem:[%s7528_s0 + $0x32c] ss:$16 sps:$4 sm:$0xff]  }
  0x8a   :  { %2912 = vmatmul.mubr.bf16.gmra.mxu1 %v5620_v8  ;;  %2262 = vmatprep.mubr.bf16.mxu0 %v5621_v9 }
  0x8b   :  { %2919 = vmatprep.mubr.bf16.mxu1 %v5623_v10 }
  0x91   :  { %2263 = vmatmul.mubr.bf16.gmra.mxu0 %v5625_v11 }
  0x92   :  { %2920 = vmatmul.mubr.bf16.gmra.mxu1 %v5626_v12  ;;  %2270 = vmatprep.mubr.bf16.mxu0 %v5627_v13 }
  0x93   :  { %2927 = vmatprep.mubr.bf16.mxu1 %v5629_v14  ;;  %v5715_v14 = vld [vmem:[%s7528_s0 + $0x320] ss:$16 sps:$4 sm:$0xff]  }
  0x99   :  { %2271 = vmatmul.mubr.bf16.gmra.mxu0 %v5631_v15 }
  0x9a   :  { %2928 = vmatmul.mubr.bf16.gmra.mxu1 %v5632_v16  ;;  %2278 = vmatprep.mubr.bf16.mxu0 %v5633_v17 }
  0x9b   :  { %2935 = vmatprep.mubr.bf16.mxu1 %v5635_v18  ;;  %v5716_v18 = vld [vmem:[%s7528_s0 + $0x328] ss:$16 sps:$4 sm:$0xff]  }
  0xa1   :  { %2279 = vmatmul.mubr.bf16.gmra.mxu0 %v5637_v19  ;;  %v5717_v19 = vld [vmem:[%s7528_s0 + $0x344] ss:$16 sps:$4 sm:$0xff]  }
  0xa2   :  { %2936 = vmatmul.mubr.bf16.gmra.mxu1 %v5638_v20  ;;  %2286 = vmatprep.mubr.bf16.mxu0 %v5639_v21  ;;  %v5719_v21 = vld [vmem:[%s7528_s0 + $0x34c] ss:$16 sps:$4 sm:$0xff]  }
  0xa3   :  { %2943 = vmatprep.mubr.bf16.mxu1 %v5641_v22 }
  0xa9   :  { %2287 = vmatmul.mubr.bf16.gmra.mxu0 %v5643_v23 }
  0xaa   :  { %2944 = vmatmul.mubr.bf16.gmra.mxu1 %v5644_v24  ;;  %2294 = vmatprep.mubr.bf16.mxu0 %v5645_v25 }
  0xab   :  { %2951 = vmatprep.mubr.bf16.mxu1 %v5647_v26 }
  0xb1   :  { %2295 = vmatmul.mubr.bf16.gmra.mxu0 %v5649_v27 }
  0xb2   :  { %2952 = vmatmul.mubr.bf16.gmra.mxu1 %v5650_v28  ;;  %2302 = vmatprep.mubr.bf16.mxu0 %v5651_v29 }
  0xb3   :  { %2959 = vmatprep.mubr.bf16.mxu1 %v5653_v30 }
  0xb9   :  { %2303 = vmatmul.mubr.bf16.gmra.mxu0 %v5655_v31 }
  0xba   :  { %2960 = vmatmul.mubr.bf16.gmra.mxu1 %v5656_v32  ;;  %2310 = vmatprep.mubr.bf16.mxu0 %v5657_v33  ;;  %v5721_v33 = vld [vmem:[%s7528_s0 + $0x340] ss:$16 sps:$4 sm:$0xff]  }
  0xbb   :  { %2967 = vmatprep.mubr.bf16.mxu1 %v5659_v34 }
  0xc1   :  { %2311 = vmatmul.mubr.bf16.gmra.mxu0 %v5661_v35 }
  0xc2   :  { %2968 = vmatmul.mubr.bf16.gmra.mxu1 %v5662_v36  ;;  %2318 = vmatprep.mubr.bf16.mxu0 %v5663_v37  ;;  %v5722_v37 = vld [vmem:[%s7528_s0 + $0x348] ss:$16 sps:$4 sm:$0xff]  }
  0xc3   :  { %2975 = vmatprep.mubr.bf16.mxu1 %v5665_v38  ;;  %v5723_v38 = vld [vmem:[%s7528_s0 + $0x364] ss:$16 sps:$4 sm:$0xff]  }
  0xc9   :  { %2319 = vmatmul.mubr.bf16.gmra.mxu0 %v5667_v39 }
  0xca   :  { %2976 = vmatmul.mubr.bf16.gmra.mxu1 %v5668_v40  ;;  %2326 = vmatprep.mubr.bf16.mxu0 %v5669_v41  ;;  %v5725_v40 = vld [vmem:[%s7528_s0 + $0x36c] ss:$16 sps:$4 sm:$0xff]  }
  0xcb   :  { %2983 = vmatprep.mubr.bf16.mxu1 %v5671_v42 }
  0xd1   :  { %2327 = vmatmul.mubr.bf16.gmra.mxu0 %v5673_v43 }
  0xd2   :  { %2984 = vmatmul.mubr.bf16.gmra.mxu1 %v5674_v44  ;;  %2334 = vmatprep.mubr.bf16.mxu0 %v5675_v45 }
  0xd3   :  { %2991 = vmatprep.mubr.bf16.mxu1 %v5677_v46 }
  0xd9   :  { %2335 = vmatmul.mubr.bf16.gmra.mxu0 %v5679_v47 }
  0xda   :  { %2992 = vmatmul.mubr.bf16.gmra.mxu1 %v5680_v48  ;;  %2342 = vmatprep.mubr.bf16.mxu0 %v5681_v49 }
  0xdb   :  { %2999 = vmatprep.mubr.bf16.mxu1 %v5683_v50 }
  0xe1   :  { %2343 = vmatmul.mubr.bf16.gmra.mxu0 %v5685_v51 }
  0xe2   :  { %3000 = vmatmul.mubr.bf16.gmra.mxu1 %v5686_v52  ;;  %2350 = vmatprep.mubr.bf16.mxu0 %v5687_v53  ;;  %v5727_v52 = vld [vmem:[%s7528_s0 + $0x360] ss:$16 sps:$4 sm:$0xff]  }
  0xe3   :  { %3007 = vmatprep.mubr.bf16.mxu1 %v5689_v54 }
  0xe9   :  { %2351 = vmatmul.mubr.bf16.gmra.mxu0 %v5691_v55 }
  0xea   :  { %3008 = vmatmul.mubr.bf16.gmra.mxu1 %v5692_v56  ;;  %2358 = vmatprep.mubr.bf16.mxu0 %v5693_v57  ;;  %v5728_v56 = vld [vmem:[%s7528_s0 + $0x368] ss:$16 sps:$4 sm:$0xff]   ;;  %v5731_v57 = vld [vmem:[%s7528_s0 + $0x384] ss:$16 sps:$4 sm:$0xff]  }
  0xeb   :  { %3015 = vmatprep.mubr.bf16.mxu1 %v5695_v58 }
  0xf1   :  { %2359 = vmatmul.mubr.bf16.gmra.mxu0 %v5697_v59  ;;  %v5734_v59 = vld [vmem:[%s7528_s0 + $0x38c] ss:$16 sps:$4 sm:$0xff]  }
  0xf2   :  { %3016 = vmatmul.mubr.bf16.gmra.mxu1 %v5698_v60  ;;  %2366 = vmatprep.mubr.bf16.mxu0 %v5699_v61 }
  0xf3   :  { %3023 = vmatprep.mubr.bf16.mxu1 %v5701_v62 }
  0xf9   :  { %2367 = vmatmul.mubr.bf16.gmra.mxu0 %v5703_v63 }
  0xfa   :  { %3024 = vmatmul.mubr.bf16.gmra.mxu1 %v5704_v0  ;;  %2374 = vmatprep.mubr.bf16.mxu0 %v5705_v1 }
  0xfb   :  { %3031 = vmatprep.mubr.bf16.mxu1 %v5707_v2 }
 0x101   :  { %v2184_v8 = vpop.f32.mrf.mxu0  ;;  %2375 = vmatmul.mubr.bf16.gmra.mxu0 %v5709_v3 }
 0x102   :  { %v2185_v9 = vadd.f32 %v6487_v6, %v2184_v8  ;;  %v2841_v10 = vpop.f32.mrf.mxu1  ;;  %3032 = vmatmul.mubr.bf16.gmra.mxu1 %v5710_v4  ;;  %2382 = vmatprep.mubr.bf16.mxu0 %v5711_v5  ;;  %v5729_v8 = vld [vmem:[%s7528_s0 + $0x380] ss:$16 sps:$4 sm:$0xff]  }
 0x103   :  { %v2186_v11 = vpop.f32.mrf.mxu0  ;;  %3039 = vmatprep.mubr.bf16.mxu1 %v5713_v7 }
 0x104   :  { %v2843_v12 = vpop.f32.mrf.mxu1  ;;  %v2842_v15 = vadd.f32 %v2841_v10, %v2185_v9 }
 0x105   :  { %v2187_v13 = vpop.f32.mrf.mxu0  ;;  %v5732_v12 = vld [vmem:[%s7528_s0 + $0x388] ss:$16 sps:$4 sm:$0xff]  }
 0x106   :  { %v2188_v16 = vadd.f32 %v6487_v6, %v2187_v13  ;;  %v2844_v17 = vpop.f32.mrf.mxu1  ;;  %v3464_v25 = vmax.f32 %v2842_v15, 0.0  ;;  %v5737_v13 = vld [vmem:[%s7528_s0 + $0x3a4] ss:$16 sps:$4 sm:$0xff]   ;;  %v5740_v15 = vld [vmem:[%s7528_s0 + $0x3ac] ss:$16 sps:$4 sm:$0xff]  }
 0x107   :  { %v2189_v20 = vpop.f32.mrf.mxu0 }
 0x108   :  { %v2845_v22 = vadd.f32 %v2844_v17, %v2188_v16  ;;  %v2846_v23 = vpop.f32.mrf.mxu1 }
 0x109   :  { %v2192_v24 = vpop.f32.mrf.mxu0  ;;  %2383 = vmatmul.mubr.bf16.gmra.mxu0 %v5715_v14 }
 0x10a   :  { %v3465_v26 = vmax.f32 %v2845_v22, 0.0  ;;  %v2193_v27 = vadd.f32 %v6487_v6, %v2192_v24  ;;  %v2849_v28 = vpop.f32.mrf.mxu1  ;;  %3040 = vmatmul.mubr.bf16.gmra.mxu1 %v5716_v18  ;;  %2390 = vmatprep.mubr.bf16.mxu0 %v5717_v19 }
 0x10b   :  { %v2194_v29 = vpop.f32.mrf.mxu0  ;;  %3047 = vmatprep.mubr.bf16.mxu1 %v5719_v21 }
 0x10c   :  { %v5064_v30 = vpack.c.bf16 %v3465_v26, %v3464_v25  ;;  %v2851_v31 = vpop.f32.mrf.mxu1  ;;  %v2850_v34 = vadd.f32 %v2849_v28, %v2193_v27  ;;  %v5735_v27 = vld [vmem:[%s7528_s0 + $0x3a0] ss:$16 sps:$4 sm:$0xff]  }
 0x10d   :  { %v2195_v32 = vpop.f32.mrf.mxu0  ;;  %v5738_v31 = vld [vmem:[%s7528_s0 + $0x3a8] ss:$16 sps:$4 sm:$0xff]  }
 0x10e   :  { %5065 = vst [vmem:[%s7530_s3] sm:$0xff] %v5064_v30   ;;  %v2196_v35 = vadd.f32 %v6487_v6, %v2195_v32  ;;  %v2852_v36 = vpop.f32.mrf.mxu1  ;;  %v3466_v44 = vmax.f32 %v2850_v34, 0.0  ;;  %v5743_v32 = vld [vmem:[%s7528_s0 + $0x3c4] ss:$16 sps:$4 sm:$0xff]   ;;  %v5746_v34 = vld [vmem:[%s7528_s0 + $0x3cc] ss:$16 sps:$4 sm:$0xff]  }
 0x10f   :  { %v2197_v39 = vpop.f32.mrf.mxu0 }
 0x110   :  { %v2853_v41 = vadd.f32 %v2852_v36, %v2196_v35  ;;  %v2854_v42 = vpop.f32.mrf.mxu1 }
 0x111   :  { %v2200_v43 = vpop.f32.mrf.mxu0  ;;  %2391 = vmatmul.mubr.bf16.gmra.mxu0 %v5721_v33 }
 0x112   :  { %v3467_v45 = vmax.f32 %v2853_v41, 0.0  ;;  %v2201_v46 = vadd.f32 %v6487_v6, %v2200_v43  ;;  %v2857_v47 = vpop.f32.mrf.mxu1  ;;  %3048 = vmatmul.mubr.bf16.gmra.mxu1 %v5722_v37  ;;  %2398 = vmatprep.mubr.bf16.mxu0 %v5723_v38 }
 0x113   :  { %v2202_v48 = vpop.f32.mrf.mxu0  ;;  %3055 = vmatprep.mubr.bf16.mxu1 %v5725_v40 }
 0x114   :  { %v5069_v49 = vpack.c.bf16 %v3467_v45, %v3466_v44  ;;  %v2859_v50 = vpop.f32.mrf.mxu1  ;;  %v2858_v53 = vadd.f32 %v2857_v47, %v2201_v46  ;;  %v5741_v46 = vld [vmem:[%s7528_s0 + $0x3c0] ss:$16 sps:$4 sm:$0xff]  }
 0x115   :  { %v2203_v51 = vpop.f32.mrf.mxu0  ;;  %v5744_v50 = vld [vmem:[%s7528_s0 + $0x3c8] ss:$16 sps:$4 sm:$0xff]  }
 0x116   :  { %5451 = vst [vmem:[%s7530_s3 + $0x8] sm:$0xff] %v5069_v49   ;;  %v2204_v54 = vadd.f32 %v6487_v6, %v2203_v51  ;;  %v2860_v55 = vpop.f32.mrf.mxu1  ;;  %v3468_v63 = vmax.f32 %v2858_v53, 0.0  ;;  %v5749_v51 = vld [vmem:[%s7528_s0 + $0x3e4] ss:$16 sps:$4 sm:$0xff]   ;;  %v5752_v53 = vld [vmem:[%s7528_s0 + $0x3ec] ss:$16 sps:$4 sm:$0xff]  }
 0x117   :  { %v2205_v58 = vpop.f32.mrf.mxu0 }
 0x118   :  { %v2861_v60 = vadd.f32 %v2860_v55, %v2204_v54  ;;  %v2862_v61 = vpop.f32.mrf.mxu1 }
 0x119   :  { %v2208_v62 = vpop.f32.mrf.mxu0  ;;  %2399 = vmatmul.mubr.bf16.gmra.mxu0 %v5727_v52 }
 0x11a   :  { %v3469_v0 = vmax.f32 %v2861_v60, 0.0  ;;  %v2209_v1 = vadd.f32 %v6487_v6, %v2208_v62  ;;  %v2865_v2 = vpop.f32.mrf.mxu1  ;;  %3056 = vmatmul.mubr.bf16.gmra.mxu1 %v5728_v56  ;;  %2406 = vmatprep.mubr.bf16.mxu0 %v5731_v57 }
 0x11b   :  { %v2210_v3 = vpop.f32.mrf.mxu0  ;;  %3063 = vmatprep.mubr.bf16.mxu1 %v5734_v59 }
 0x11c   :  { %v5074_v4 = vpack.c.bf16 %v3469_v0, %v3468_v63  ;;  %v2867_v5 = vpop.f32.mrf.mxu1  ;;  %v2866_v9 = vadd.f32 %v2865_v2, %v2209_v1  ;;  %v5747_v1 = vld [vmem:[%s7528_s0 + $0x3e0] ss:$16 sps:$4 sm:$0xff]  }
 0x11d   :  { %v2211_v7 = vpop.f32.mrf.mxu0  ;;  %v5750_v5 = vld [vmem:[%s7528_s0 + $0x3e8] ss:$16 sps:$4 sm:$0xff]  }
 0x11e   :  { %5452 = vst [vmem:[%s7530_s3 + $0x10] sm:$0xff] %v5074_v4   ;;  %v2212_v10 = vadd.f32 %v6487_v6, %v2211_v7  ;;  %v2868_v11 = vpop.f32.mrf.mxu1  ;;  %v3470_v19 = vmax.f32 %v2866_v9, 0.0  ;;  %v5755_v7 = vld [vmem:[%s7528_s0 + $0x404] ss:$16 sps:$4 sm:$0xff]   ;;  %v5758_v9 = vld [vmem:[%s7528_s0 + $0x40c] ss:$16 sps:$4 sm:$0xff]  }
 0x11f   :  { %v2213_v14 = vpop.f32.mrf.mxu0 }
 0x120   :  { %v2869_v16 = vadd.f32 %v2868_v11, %v2212_v10  ;;  %v2870_v17 = vpop.f32.mrf.mxu1 }
 0x121   :  { %v2216_v18 = vpop.f32.mrf.mxu0  ;;  %2407 = vmatmul.mubr.bf16.gmra.mxu0 %v5729_v8 }
 0x122   :  { %v3471_v20 = vmax.f32 %v2869_v16, 0.0  ;;  %v2217_v21 = vadd.f32 %v6487_v6, %v2216_v18  ;;  %v2873_v22 = vpop.f32.mrf.mxu1  ;;  %3064 = vmatmul.mubr.bf16.gmra.mxu1 %v5732_v12  ;;  %2414 = vmatprep.mubr.bf16.mxu0 %v5737_v13 }
 0x123   :  { %v2218_v23 = vpop.f32.mrf.mxu0  ;;  %3071 = vmatprep.mubr.bf16.mxu1 %v5740_v15 }
 0x124   :  { %v5079_v24 = vpack.c.bf16 %v3471_v20, %v3470_v19  ;;  %v2875_v25 = vpop.f32.mrf.mxu1  ;;  %v2874_v28 = vadd.f32 %v2873_v22, %v2217_v21  ;;  %v5753_v21 = vld [vmem:[%s7528_s0 + $0x400] ss:$16 sps:$4 sm:$0xff]  }
 0x125   :  { %v2219_v26 = vpop.f32.mrf.mxu0  ;;  %v5756_v25 = vld [vmem:[%s7528_s0 + $0x408] ss:$16 sps:$4 sm:$0xff]  }
 0x126   :  { %5453 = vst [vmem:[%s7530_s3 + $0x18] sm:$0xff] %v5079_v24   ;;  %v2220_v29 = vadd.f32 %v6487_v6, %v2219_v26  ;;  %v2876_v30 = vpop.f32.mrf.mxu1  ;;  %v3472_v38 = vmax.f32 %v2874_v28, 0.0  ;;  %v5761_v26 = vld [vmem:[%s7528_s0 + $0x424] ss:$16 sps:$4 sm:$0xff]   ;;  %v5764_v28 = vld [vmem:[%s7528_s0 + $0x42c] ss:$16 sps:$4 sm:$0xff]  }
 0x127   :  { %v2221_v33 = vpop.f32.mrf.mxu0 }
 0x128   :  { %v2877_v35 = vadd.f32 %v2876_v30, %v2220_v29  ;;  %v2878_v36 = vpop.f32.mrf.mxu1 }
 0x129   :  { %v2224_v37 = vpop.f32.mrf.mxu0  ;;  %2415 = vmatmul.mubr.bf16.gmra.mxu0 %v5735_v27 }
 0x12a   :  { %v3473_v39 = vmax.f32 %v2877_v35, 0.0  ;;  %v2225_v40 = vadd.f32 %v6487_v6, %v2224_v37  ;;  %v2881_v41 = vpop.f32.mrf.mxu1  ;;  %3072 = vmatmul.mubr.bf16.gmra.mxu1 %v5738_v31  ;;  %2422 = vmatprep.mubr.bf16.mxu0 %v5743_v32 }
 0x12b   :  { %v2226_v42 = vpop.f32.mrf.mxu0  ;;  %3079 = vmatprep.mubr.bf16.mxu1 %v5746_v34 }
 0x12c   :  { %v5084_v43 = vpack.c.bf16 %v3473_v39, %v3472_v38  ;;  %v2883_v44 = vpop.f32.mrf.mxu1  ;;  %v2882_v47 = vadd.f32 %v2881_v41, %v2225_v40  ;;  %v5759_v40 = vld [vmem:[%s7528_s0 + $0x420] ss:$16 sps:$4 sm:$0xff]  }
 0x12d   :  { %v2227_v45 = vpop.f32.mrf.mxu0  ;;  %v5762_v44 = vld [vmem:[%s7528_s0 + $0x428] ss:$16 sps:$4 sm:$0xff]  }
 0x12e   :  { %5454 = vst [vmem:[%s7530_s3 + $0x20] sm:$0xff] %v5084_v43   ;;  %v2228_v48 = vadd.f32 %v6487_v6, %v2227_v45  ;;  %v2884_v49 = vpop.f32.mrf.mxu1  ;;  %v3474_v57 = vmax.f32 %v2882_v47, 0.0  ;;  %v5767_v45 = vld [vmem:[%s7528_s0 + $0x444] ss:$16 sps:$4 sm:$0xff]   ;;  %v5770_v47 = vld [vmem:[%s7528_s0 + $0x44c] ss:$16 sps:$4 sm:$0xff]  }
 0x12f   :  { %v2229_v52 = vpop.f32.mrf.mxu0 }
 0x130   :  { %v2885_v54 = vadd.f32 %v2884_v49, %v2228_v48  ;;  %v2886_v55 = vpop.f32.mrf.mxu1 }
 0x131   :  { %v2232_v56 = vpop.f32.mrf.mxu0  ;;  %2423 = vmatmul.mubr.bf16.gmra.mxu0 %v5741_v46 }
 0x132   :  { %v3475_v58 = vmax.f32 %v2885_v54, 0.0  ;;  %v2233_v59 = vadd.f32 %v6487_v6, %v2232_v56  ;;  %v2889_v60 = vpop.f32.mrf.mxu1  ;;  %3080 = vmatmul.mubr.bf16.gmra.mxu1 %v5744_v50  ;;  %2430 = vmatprep.mubr.bf16.mxu0 %v5749_v51 }
 0x133   :  { %v2234_v61 = vpop.f32.mrf.mxu0  ;;  %3087 = vmatprep.mubr.bf16.mxu1 %v5752_v53 }
 0x134   :  { %v5089_v62 = vpack.c.bf16 %v3475_v58, %v3474_v57  ;;  %v2891_v63 = vpop.f32.mrf.mxu1  ;;  %v2890_v2 = vadd.f32 %v2889_v60, %v2233_v59  ;;  %v5765_v59 = vld [vmem:[%s7528_s0 + $0x440] ss:$16 sps:$4 sm:$0xff]  }
 0x135   :  { %v2235_v0 = vpop.f32.mrf.mxu0  ;;  %v5768_v63 = vld [vmem:[%s7528_s0 + $0x448] ss:$16 sps:$4 sm:$0xff]  }
 0x136   :  { %5455 = vst [vmem:[%s7530_s3 + $0x28] sm:$0xff] %v5089_v62   ;;  %v2236_v3 = vadd.f32 %v6487_v6, %v2235_v0  ;;  %v2892_v4 = vpop.f32.mrf.mxu1  ;;  %v3476_v13 = vmax.f32 %v2890_v2, 0.0  ;;  %v5773_v0 = vld [vmem:[%s7528_s0 + $0x464] ss:$16 sps:$4 sm:$0xff]   ;;  %v5776_v2 = vld [vmem:[%s7528_s0 + $0x46c] ss:$16 sps:$4 sm:$0xff]  }
 0x137   :  { %v2237_v8 = vpop.f32.mrf.mxu0 }
 0x138   :  { %v2893_v10 = vadd.f32 %v2892_v4, %v2236_v3  ;;  %v2894_v11 = vpop.f32.mrf.mxu1 }
 0x139   :  { %v2240_v12 = vpop.f32.mrf.mxu0  ;;  %2431 = vmatmul.mubr.bf16.gmra.mxu0 %v5747_v1 }
 0x13a   :  { %v3477_v14 = vmax.f32 %v2893_v10, 0.0  ;;  %v2241_v15 = vadd.f32 %v6487_v6, %v2240_v12  ;;  %v2897_v16 = vpop.f32.mrf.mxu1  ;;  %3088 = vmatmul.mubr.bf16.gmra.mxu1 %v5750_v5  ;;  %2438 = vmatprep.mubr.bf16.mxu0 %v5755_v7 }
 0x13b   :  { %v2242_v17 = vpop.f32.mrf.mxu0  ;;  %3095 = vmatprep.mubr.bf16.mxu1 %v5758_v9 }
 0x13c   :  { %v5094_v18 = vpack.c.bf16 %v3477_v14, %v3476_v13  ;;  %v2899_v19 = vpop.f32.mrf.mxu1  ;;  %v2898_v22 = vadd.f32 %v2897_v16, %v2241_v15  ;;  %v5771_v15 = vld [vmem:[%s7528_s0 + $0x460] ss:$16 sps:$4 sm:$0xff]  }
 0x13d   :  { %v2243_v20 = vpop.f32.mrf.mxu0  ;;  %v5774_v19 = vld [vmem:[%s7528_s0 + $0x468] ss:$16 sps:$4 sm:$0xff]  }
 0x13e   :  { %5456 = vst [vmem:[%s7530_s3 + $0x30] sm:$0xff] %v5094_v18   ;;  %v2244_v23 = vadd.f32 %v6487_v6, %v2243_v20  ;;  %v2900_v24 = vpop.f32.mrf.mxu1  ;;  %v3478_v32 = vmax.f32 %v2898_v22, 0.0  ;;  %v5779_v20 = vld [vmem:[%s7528_s0 + $0x484] ss:$16 sps:$4 sm:$0xff]   ;;  %v5782_v22 = vld [vmem:[%s7528_s0 + $0x48c] ss:$16 sps:$4 sm:$0xff]  }
 0x13f   :  { %v2245_v27 = vpop.f32.mrf.mxu0 }
 0x140   :  { %v2901_v29 = vadd.f32 %v2900_v24, %v2244_v23  ;;  %v2902_v30 = vpop.f32.mrf.mxu1 }
 0x141   :  { %v2248_v31 = vpop.f32.mrf.mxu0  ;;  %2439 = vmatmul.mubr.bf16.gmra.mxu0 %v5753_v21 }
 0x142   :  { %v3479_v33 = vmax.f32 %v2901_v29, 0.0  ;;  %v2249_v34 = vadd.f32 %v6487_v6, %v2248_v31  ;;  %v2905_v35 = vpop.f32.mrf.mxu1  ;;  %3096 = vmatmul.mubr.bf16.gmra.mxu1 %v5756_v25  ;;  %2446 = vmatprep.mubr.bf16.mxu0 %v5761_v26 }
 0x143   :  { %v2250_v36 = vpop.f32.mrf.mxu0  ;;  %3103 = vmatprep.mubr.bf16.mxu1 %v5764_v28 }
 0x144   :  { %v5099_v37 = vpack.c.bf16 %v3479_v33, %v3478_v32  ;;  %v2907_v38 = vpop.f32.mrf.mxu1  ;;  %v2906_v41 = vadd.f32 %v2905_v35, %v2249_v34  ;;  %v5777_v34 = vld [vmem:[%s7528_s0 + $0x480] ss:$16 sps:$4 sm:$0xff]  }
 0x145   :  { %v2251_v39 = vpop.f32.mrf.mxu0  ;;  %v5780_v38 = vld [vmem:[%s7528_s0 + $0x488] ss:$16 sps:$4 sm:$0xff]  }
 0x146   :  { %5457 = vst [vmem:[%s7530_s3 + $0x38] sm:$0xff] %v5099_v37   ;;  %v2252_v42 = vadd.f32 %v6487_v6, %v2251_v39  ;;  %v2908_v43 = vpop.f32.mrf.mxu1  ;;  %v3480_v51 = vmax.f32 %v2906_v41, 0.0  ;;  %v5785_v39 = vld [vmem:[%s7528_s0 + $0x4a4] ss:$16 sps:$4 sm:$0xff]   ;;  %v5788_v41 = vld [vmem:[%s7528_s0 + $0x4ac] ss:$16 sps:$4 sm:$0xff]  }
 0x147   :  { %v2253_v46 = vpop.f32.mrf.mxu0 }
 0x148   :  { %v2909_v48 = vadd.f32 %v2908_v43, %v2252_v42  ;;  %v2910_v49 = vpop.f32.mrf.mxu1 }
 0x149   :  { %v2256_v50 = vpop.f32.mrf.mxu0  ;;  %2447 = vmatmul.mubr.bf16.gmra.mxu0 %v5759_v40 }
 0x14a   :  { %v3481_v52 = vmax.f32 %v2909_v48, 0.0  ;;  %v2257_v53 = vadd.f32 %v6487_v6, %v2256_v50  ;;  %v2913_v54 = vpop.f32.mrf.mxu1  ;;  %3104 = vmatmul.mubr.bf16.gmra.mxu1 %v5762_v44  ;;  %2454 = vmatprep.mubr.bf16.mxu0 %v5767_v45 }
 0x14b   :  { %v2258_v55 = vpop.f32.mrf.mxu0  ;;  %3111 = vmatprep.mubr.bf16.mxu1 %v5770_v47 }
 0x14c   :  { %v5104_v56 = vpack.c.bf16 %v3481_v52, %v3480_v51  ;;  %v2915_v57 = vpop.f32.mrf.mxu1  ;;  %v2914_v60 = vadd.f32 %v2913_v54, %v2257_v53  ;;  %v5783_v53 = vld [vmem:[%s7528_s0 + $0x4a0] ss:$16 sps:$4 sm:$0xff]  }
 0x14d   :  { %v2259_v58 = vpop.f32.mrf.mxu0  ;;  %v5786_v57 = vld [vmem:[%s7528_s0 + $0x4a8] ss:$16 sps:$4 sm:$0xff]  }
 0x14e   :  { %5458 = vst [vmem:[%s7530_s3 + $0x40] sm:$0xff] %v5104_v56   ;;  %v2260_v61 = vadd.f32 %v6487_v6, %v2259_v58  ;;  %v2916_v62 = vpop.f32.mrf.mxu1  ;;  %v3482_v7 = vmax.f32 %v2914_v60, 0.0  ;;  %v5791_v58 = vld [vmem:[%s7528_s0 + $0x4c4] ss:$16 sps:$4 sm:$0xff]   ;;  %v5794_v60 = vld [vmem:[%s7528_s0 + $0x4cc] ss:$16 sps:$4 sm:$0xff]  }
 0x14f   :  { %v2261_v1 = vpop.f32.mrf.mxu0 }
 0x150   :  { %v2917_v3 = vadd.f32 %v2916_v62, %v2260_v61  ;;  %v2918_v4 = vpop.f32.mrf.mxu1 }
 0x151   :  { %v2264_v5 = vpop.f32.mrf.mxu0  ;;  %2455 = vmatmul.mubr.bf16.gmra.mxu0 %v5765_v59 }
 0x152   :  { %v3483_v8 = vmax.f32 %v2917_v3, 0.0  ;;  %v2265_v9 = vadd.f32 %v6487_v6, %v2264_v5  ;;  %v2921_v10 = vpop.f32.mrf.mxu1  ;;  %3112 = vmatmul.mubr.bf16.gmra.mxu1 %v5768_v63  ;;  %2462 = vmatprep.mubr.bf16.mxu0 %v5773_v0 }
 0x153   :  { %v2266_v11 = vpop.f32.mrf.mxu0  ;;  %3119 = vmatprep.mubr.bf16.mxu1 %v5776_v2 }
 0x154   :  { %v5109_v12 = vpack.c.bf16 %v3483_v8, %v3482_v7  ;;  %v2923_v13 = vpop.f32.mrf.mxu1  ;;  %v2922_v16 = vadd.f32 %v2921_v10, %v2265_v9  ;;  %v5789_v9 = vld [vmem:[%s7528_s0 + $0x4c0] ss:$16 sps:$4 sm:$0xff]  }
 0x155   :  { %v2267_v14 = vpop.f32.mrf.mxu0  ;;  %v5792_v13 = vld [vmem:[%s7528_s0 + $0x4c8] ss:$16 sps:$4 sm:$0xff]  }
 0x156   :  { %5459 = vst [vmem:[%s7530_s3 + $0x48] sm:$0xff] %v5109_v12   ;;  %v2268_v17 = vadd.f32 %v6487_v6, %v2267_v14  ;;  %v2924_v18 = vpop.f32.mrf.mxu1  ;;  %v3484_v26 = vmax.f32 %v2922_v16, 0.0  ;;  %v5797_v14 = vld [vmem:[%s7528_s0 + $0x4e4] ss:$16 sps:$4 sm:$0xff]   ;;  %v5800_v16 = vld [vmem:[%s7528_s0 + $0x4ec] ss:$16 sps:$4 sm:$0xff]  }
 0x157   :  { %v2269_v21 = vpop.f32.mrf.mxu0 }
 0x158   :  { %v2925_v23 = vadd.f32 %v2924_v18, %v2268_v17  ;;  %v2926_v24 = vpop.f32.mrf.mxu1 }
 0x159   :  { %v2272_v25 = vpop.f32.mrf.mxu0  ;;  %2463 = vmatmul.mubr.bf16.gmra.mxu0 %v5771_v15 }
 0x15a   :  { %v3485_v27 = vmax.f32 %v2925_v23, 0.0  ;;  %v2273_v28 = vadd.f32 %v6487_v6, %v2272_v25  ;;  %v2929_v29 = vpop.f32.mrf.mxu1  ;;  %3120 = vmatmul.mubr.bf16.gmra.mxu1 %v5774_v19  ;;  %2470 = vmatprep.mubr.bf16.mxu0 %v5779_v20 }
 0x15b   :  { %v2274_v30 = vpop.f32.mrf.mxu0  ;;  %3127 = vmatprep.mubr.bf16.mxu1 %v5782_v22 }
 0x15c   :  { %v5114_v31 = vpack.c.bf16 %v3485_v27, %v3484_v26  ;;  %v2931_v32 = vpop.f32.mrf.mxu1  ;;  %v2930_v35 = vadd.f32 %v2929_v29, %v2273_v28  ;;  %v5795_v28 = vld [vmem:[%s7528_s0 + $0x4e0] ss:$16 sps:$4 sm:$0xff]  }
 0x15d   :  { %v2275_v33 = vpop.f32.mrf.mxu0  ;;  %v5798_v32 = vld [vmem:[%s7528_s0 + $0x4e8] ss:$16 sps:$4 sm:$0xff]  }
 0x15e   :  { %5460 = vst [vmem:[%s7530_s3 + $0x50] sm:$0xff] %v5114_v31   ;;  %v2276_v36 = vadd.f32 %v6487_v6, %v2275_v33  ;;  %v2932_v37 = vpop.f32.mrf.mxu1  ;;  %v3486_v45 = vmax.f32 %v2930_v35, 0.0  ;;  %v5803_v33 = vld [vmem:[%s7528_s0 + $0x504] ss:$16 sps:$4 sm:$0xff]   ;;  %v5806_v35 = vld [vmem:[%s7528_s0 + $0x50c] ss:$16 sps:$4 sm:$0xff]  }
 0x15f   :  { %v2277_v40 = vpop.f32.mrf.mxu0 }
 0x160   :  { %v2933_v42 = vadd.f32 %v2932_v37, %v2276_v36  ;;  %v2934_v43 = vpop.f32.mrf.mxu1 }
 0x161   :  { %v2280_v44 = vpop.f32.mrf.mxu0  ;;  %2471 = vmatmul.mubr.bf16.gmra.mxu0 %v5777_v34 }
 0x162   :  { %v3487_v46 = vmax.f32 %v2933_v42, 0.0  ;;  %v2281_v47 = vadd.f32 %v6487_v6, %v2280_v44  ;;  %v2937_v48 = vpop.f32.mrf.mxu1  ;;  %3128 = vmatmul.mubr.bf16.gmra.mxu1 %v5780_v38  ;;  %2478 = vmatprep.mubr.bf16.mxu0 %v5785_v39 }
 0x163   :  { %v2282_v49 = vpop.f32.mrf.mxu0  ;;  %3135 = vmatprep.mubr.bf16.mxu1 %v5788_v41 }
 0x164   :  { %v5119_v50 = vpack.c.bf16 %v3487_v46, %v3486_v45  ;;  %v2939_v51 = vpop.f32.mrf.mxu1  ;;  %v2938_v54 = vadd.f32 %v2937_v48, %v2281_v47  ;;  %v5801_v47 = vld [vmem:[%s7528_s0 + $0x500] ss:$16 sps:$4 sm:$0xff]  }
 0x165   :  { %v2283_v52 = vpop.f32.mrf.mxu0  ;;  %v5804_v51 = vld [vmem:[%s7528_s0 + $0x508] ss:$16 sps:$4 sm:$0xff]  }
 0x166   :  { %5461 = vst [vmem:[%s7530_s3 + $0x58] sm:$0xff] %v5119_v50   ;;  %v2284_v55 = vadd.f32 %v6487_v6, %v2283_v52  ;;  %v2940_v56 = vpop.f32.mrf.mxu1  ;;  %v3488_v0 = vmax.f32 %v2938_v54, 0.0  ;;  %v5809_v52 = vld [vmem:[%s7528_s0 + $0x524] ss:$16 sps:$4 sm:$0xff]   ;;  %v5812_v54 = vld [vmem:[%s7528_s0 + $0x52c] ss:$16 sps:$4 sm:$0xff]  }
 0x167   :  { %v2285_v59 = vpop.f32.mrf.mxu0 }
 0x168   :  { %v2941_v61 = vadd.f32 %v2940_v56, %v2284_v55  ;;  %v2942_v62 = vpop.f32.mrf.mxu1 }
 0x169   :  { %v2288_v63 = vpop.f32.mrf.mxu0  ;;  %2479 = vmatmul.mubr.bf16.gmra.mxu0 %v5783_v53 }
 0x16a   :  { %v3489_v1 = vmax.f32 %v2941_v61, 0.0  ;;  %v2289_v2 = vadd.f32 %v6487_v6, %v2288_v63  ;;  %v2945_v3 = vpop.f32.mrf.mxu1  ;;  %3136 = vmatmul.mubr.bf16.gmra.mxu1 %v5786_v57  ;;  %2486 = vmatprep.mubr.bf16.mxu0 %v5791_v58 }
 0x16b   :  { %v2290_v4 = vpop.f32.mrf.mxu0  ;;  %3143 = vmatprep.mubr.bf16.mxu1 %v5794_v60 }
 0x16c   :  { %v5124_v5 = vpack.c.bf16 %v3489_v1, %v3488_v0  ;;  %v2947_v7 = vpop.f32.mrf.mxu1  ;;  %v2946_v10 = vadd.f32 %v2945_v3, %v2289_v2  ;;  %v5807_v2 = vld [vmem:[%s7528_s0 + $0x520] ss:$16 sps:$4 sm:$0xff]  }
 0x16d   :  { %v2291_v8 = vpop.f32.mrf.mxu0  ;;  %v5810_v7 = vld [vmem:[%s7528_s0 + $0x528] ss:$16 sps:$4 sm:$0xff]  }
 0x16e   :  { %5462 = vst [vmem:[%s7530_s3 + $0x60] sm:$0xff] %v5124_v5   ;;  %v2292_v11 = vadd.f32 %v6487_v6, %v2291_v8  ;;  %v2948_v12 = vpop.f32.mrf.mxu1  ;;  %v3490_v20 = vmax.f32 %v2946_v10, 0.0  ;;  %v5815_v8 = vld [vmem:[%s7528_s0 + $0x544] ss:$16 sps:$4 sm:$0xff]   ;;  %v5818_v10 = vld [vmem:[%s7528_s0 + $0x54c] ss:$16 sps:$4 sm:$0xff]  }
 0x16f   :  { %v2293_v15 = vpop.f32.mrf.mxu0 }
 0x170   :  { %v2949_v17 = vadd.f32 %v2948_v12, %v2292_v11  ;;  %v2950_v18 = vpop.f32.mrf.mxu1 }
 0x171   :  { %v2296_v19 = vpop.f32.mrf.mxu0  ;;  %2487 = vmatmul.mubr.bf16.gmra.mxu0 %v5789_v9 }
 0x172   :  { %v3491_v21 = vmax.f32 %v2949_v17, 0.0  ;;  %v2297_v22 = vadd.f32 %v6487_v6, %v2296_v19  ;;  %v2953_v23 = vpop.f32.mrf.mxu1  ;;  %3144 = vmatmul.mubr.bf16.gmra.mxu1 %v5792_v13  ;;  %2494 = vmatprep.mubr.bf16.mxu0 %v5797_v14 }
 0x173   :  { %v2298_v24 = vpop.f32.mrf.mxu0  ;;  %3151 = vmatprep.mubr.bf16.mxu1 %v5800_v16 }
 0x174   :  { %v5129_v25 = vpack.c.bf16 %v3491_v21, %v3490_v20  ;;  %v2955_v26 = vpop.f32.mrf.mxu1  ;;  %v2954_v29 = vadd.f32 %v2953_v23, %v2297_v22  ;;  %v5813_v22 = vld [vmem:[%s7528_s0 + $0x540] ss:$16 sps:$4 sm:$0xff]  }
 0x175   :  { %v2299_v27 = vpop.f32.mrf.mxu0  ;;  %v5816_v26 = vld [vmem:[%s7528_s0 + $0x548] ss:$16 sps:$4 sm:$0xff]  }
 0x176   :  { %5463 = vst [vmem:[%s7530_s3 + $0x68] sm:$0xff] %v5129_v25   ;;  %v2300_v30 = vadd.f32 %v6487_v6, %v2299_v27  ;;  %v2956_v31 = vpop.f32.mrf.mxu1  ;;  %v3492_v39 = vmax.f32 %v2954_v29, 0.0  ;;  %v5821_v27 = vld [vmem:[%s7528_s0 + $0x564] ss:$16 sps:$4 sm:$0xff]   ;;  %v5824_v29 = vld [vmem:[%s7528_s0 + $0x56c] ss:$16 sps:$4 sm:$0xff]  }
 0x177   :  { %v2301_v34 = vpop.f32.mrf.mxu0 }
 0x178   :  { %v2957_v36 = vadd.f32 %v2956_v31, %v2300_v30  ;;  %v2958_v37 = vpop.f32.mrf.mxu1 }
 0x179   :  { %v2304_v38 = vpop.f32.mrf.mxu0  ;;  %2495 = vmatmul.mubr.bf16.gmra.mxu0 %v5795_v28 }
 0x17a   :  { %v3493_v40 = vmax.f32 %v2957_v36, 0.0  ;;  %v2305_v41 = vadd.f32 %v6487_v6, %v2304_v38  ;;  %v2961_v42 = vpop.f32.mrf.mxu1  ;;  %3152 = vmatmul.mubr.bf16.gmra.mxu1 %v5798_v32  ;;  %2502 = vmatprep.mubr.bf16.mxu0 %v5803_v33 }
 0x17b   :  { %v2306_v43 = vpop.f32.mrf.mxu0  ;;  %3159 = vmatprep.mubr.bf16.mxu1 %v5806_v35 }
 0x17c   :  { %v5134_v44 = vpack.c.bf16 %v3493_v40, %v3492_v39  ;;  %v2963_v45 = vpop.f32.mrf.mxu1  ;;  %v2962_v48 = vadd.f32 %v2961_v42, %v2305_v41  ;;  %v5819_v41 = vld [vmem:[%s7528_s0 + $0x560] ss:$16 sps:$4 sm:$0xff]  }
 0x17d   :  { %v2307_v46 = vpop.f32.mrf.mxu0  ;;  %v5822_v45 = vld [vmem:[%s7528_s0 + $0x568] ss:$16 sps:$4 sm:$0xff]  }
 0x17e   :  { %5464 = vst [vmem:[%s7530_s3 + $0x70] sm:$0xff] %v5134_v44   ;;  %v2308_v49 = vadd.f32 %v6487_v6, %v2307_v46  ;;  %v2964_v50 = vpop.f32.mrf.mxu1  ;;  %v3494_v58 = vmax.f32 %v2962_v48, 0.0  ;;  %v5827_v46 = vld [vmem:[%s7528_s0 + $0x584] ss:$16 sps:$4 sm:$0xff]   ;;  %v5830_v48 = vld [vmem:[%s7528_s0 + $0x58c] ss:$16 sps:$4 sm:$0xff]  }
 0x17f   :  { %v2309_v53 = vpop.f32.mrf.mxu0 }
 0x180   :  { %v2965_v55 = vadd.f32 %v2964_v50, %v2308_v49  ;;  %v2966_v56 = vpop.f32.mrf.mxu1 }
 0x181   :  { %v2312_v57 = vpop.f32.mrf.mxu0  ;;  %2503 = vmatmul.mubr.bf16.gmra.mxu0 %v5801_v47 }
 0x182   :  { %v3495_v59 = vmax.f32 %v2965_v55, 0.0  ;;  %v2313_v60 = vadd.f32 %v6487_v6, %v2312_v57  ;;  %v2969_v61 = vpop.f32.mrf.mxu1  ;;  %3160 = vmatmul.mubr.bf16.gmra.mxu1 %v5804_v51  ;;  %2510 = vmatprep.mubr.bf16.mxu0 %v5809_v52 }
 0x183   :  { %v2314_v62 = vpop.f32.mrf.mxu0  ;;  %3167 = vmatprep.mubr.bf16.mxu1 %v5812_v54 }
 0x184   :  { %v5139_v63 = vpack.c.bf16 %v3495_v59, %v3494_v58  ;;  %v2971_v0 = vpop.f32.mrf.mxu1  ;;  %v2970_v3 = vadd.f32 %v2969_v61, %v2313_v60  ;;  %v5825_v60 = vld [vmem:[%s7528_s0 + $0x580] ss:$16 sps:$4 sm:$0xff]  }
 0x185   :  { %v2315_v1 = vpop.f32.mrf.mxu0  ;;  %v5828_v0 = vld [vmem:[%s7528_s0 + $0x588] ss:$16 sps:$4 sm:$0xff]  }
 0x186   :  { %5465 = vst [vmem:[%s7530_s3 + $0x78] sm:$0xff] %v5139_v63   ;;  %v2316_v4 = vadd.f32 %v6487_v6, %v2315_v1  ;;  %v2972_v5 = vpop.f32.mrf.mxu1  ;;  %v3496_v14 = vmax.f32 %v2970_v3, 0.0  ;;  %v5833_v1 = vld [vmem:[%s7528_s0 + $0x5a4] ss:$16 sps:$4 sm:$0xff]   ;;  %v5836_v3 = vld [vmem:[%s7528_s0 + $0x5ac] ss:$16 sps:$4 sm:$0xff]  }
 0x187   :  { %v2317_v9 = vpop.f32.mrf.mxu0 }
 0x188   :  { %v2973_v11 = vadd.f32 %v2972_v5, %v2316_v4  ;;  %v2974_v12 = vpop.f32.mrf.mxu1 }
 0x189   :  { %v2320_v13 = vpop.f32.mrf.mxu0  ;;  %2511 = vmatmul.mubr.bf16.gmra.mxu0 %v5807_v2 }
 0x18a   :  { %v3497_v15 = vmax.f32 %v2973_v11, 0.0  ;;  %v2321_v16 = vadd.f32 %v6487_v6, %v2320_v13  ;;  %v2977_v17 = vpop.f32.mrf.mxu1  ;;  %3168 = vmatmul.mubr.bf16.gmra.mxu1 %v5810_v7  ;;  %2518 = vmatprep.mubr.bf16.mxu0 %v5815_v8 }
 0x18b   :  { %v2322_v18 = vpop.f32.mrf.mxu0  ;;  %3175 = vmatprep.mubr.bf16.mxu1 %v5818_v10 }
 0x18c   :  { %v5144_v19 = vpack.c.bf16 %v3497_v15, %v3496_v14  ;;  %v2979_v20 = vpop.f32.mrf.mxu1  ;;  %v2978_v23 = vadd.f32 %v2977_v17, %v2321_v16  ;;  %v5831_v16 = vld [vmem:[%s7528_s0 + $0x5a0] ss:$16 sps:$4 sm:$0xff]  }
 0x18d   :  { %v2323_v21 = vpop.f32.mrf.mxu0  ;;  %v5834_v20 = vld [vmem:[%s7528_s0 + $0x5a8] ss:$16 sps:$4 sm:$0xff]  }
 0x18e   :  { %5466 = vst [vmem:[%s7530_s3 + $0x80] sm:$0xff] %v5144_v19   ;;  %v2324_v24 = vadd.f32 %v6487_v6, %v2323_v21  ;;  %v2980_v25 = vpop.f32.mrf.mxu1  ;;  %v3498_v33 = vmax.f32 %v2978_v23, 0.0  ;;  %v5839_v21 = vld [vmem:[%s7528_s0 + $0x5c4] ss:$16 sps:$4 sm:$0xff]   ;;  %v5842_v23 = vld [vmem:[%s7528_s0 + $0x5cc] ss:$16 sps:$4 sm:$0xff]  }
 0x18f   :  { %v2325_v28 = vpop.f32.mrf.mxu0 }
 0x190   :  { %v2981_v30 = vadd.f32 %v2980_v25, %v2324_v24  ;;  %v2982_v31 = vpop.f32.mrf.mxu1 }
 0x191   :  { %v2328_v32 = vpop.f32.mrf.mxu0  ;;  %2519 = vmatmul.mubr.bf16.gmra.mxu0 %v5813_v22 }
 0x192   :  { %v3499_v34 = vmax.f32 %v2981_v30, 0.0  ;;  %v2329_v35 = vadd.f32 %v6487_v6, %v2328_v32  ;;  %v2985_v36 = vpop.f32.mrf.mxu1  ;;  %3176 = vmatmul.mubr.bf16.gmra.mxu1 %v5816_v26  ;;  %2526 = vmatprep.mubr.bf16.mxu0 %v5821_v27 }
 0x193   :  { %v2330_v37 = vpop.f32.mrf.mxu0  ;;  %3183 = vmatprep.mubr.bf16.mxu1 %v5824_v29 }
 0x194   :  { %v5149_v38 = vpack.c.bf16 %v3499_v34, %v3498_v33  ;;  %v2987_v39 = vpop.f32.mrf.mxu1  ;;  %v2986_v42 = vadd.f32 %v2985_v36, %v2329_v35  ;;  %v5837_v35 = vld [vmem:[%s7528_s0 + $0x5c0] ss:$16 sps:$4 sm:$0xff]  }
 0x195   :  { %v2331_v40 = vpop.f32.mrf.mxu0  ;;  %v5840_v39 = vld [vmem:[%s7528_s0 + $0x5c8] ss:$16 sps:$4 sm:$0xff]  }
 0x196   :  { %5467 = vst [vmem:[%s7530_s3 + $0x88] sm:$0xff] %v5149_v38   ;;  %v2332_v43 = vadd.f32 %v6487_v6, %v2331_v40  ;;  %v2988_v44 = vpop.f32.mrf.mxu1  ;;  %v3500_v52 = vmax.f32 %v2986_v42, 0.0  ;;  %v5845_v40 = vld [vmem:[%s7528_s0 + $0x5e4] ss:$16 sps:$4 sm:$0xff]   ;;  %v5848_v42 = vld [vmem:[%s7528_s0 + $0x5ec] ss:$16 sps:$4 sm:$0xff]  }
 0x197   :  { %v2333_v47 = vpop.f32.mrf.mxu0 }
 0x198   :  { %v2989_v49 = vadd.f32 %v2988_v44, %v2332_v43  ;;  %v2990_v50 = vpop.f32.mrf.mxu1 }
 0x199   :  { %v2336_v51 = vpop.f32.mrf.mxu0  ;;  %2527 = vmatmul.mubr.bf16.gmra.mxu0 %v5819_v41 }
 0x19a   :  { %v3501_v53 = vmax.f32 %v2989_v49, 0.0  ;;  %v2337_v54 = vadd.f32 %v6487_v6, %v2336_v51  ;;  %v2993_v55 = vpop.f32.mrf.mxu1  ;;  %3184 = vmatmul.mubr.bf16.gmra.mxu1 %v5822_v45  ;;  %2534 = vmatprep.mubr.bf16.mxu0 %v5827_v46 }
 0x19b   :  { %v2338_v56 = vpop.f32.mrf.mxu0  ;;  %3191 = vmatprep.mubr.bf16.mxu1 %v5830_v48 }
 0x19c   :  { %v5154_v57 = vpack.c.bf16 %v3501_v53, %v3500_v52  ;;  %v2995_v58 = vpop.f32.mrf.mxu1  ;;  %v2994_v61 = vadd.f32 %v2993_v55, %v2337_v54  ;;  %v5843_v54 = vld [vmem:[%s7528_s0 + $0x5e0] ss:$16 sps:$4 sm:$0xff]  }
 0x19d   :  { %v2339_v59 = vpop.f32.mrf.mxu0  ;;  %v5846_v58 = vld [vmem:[%s7528_s0 + $0x5e8] ss:$16 sps:$4 sm:$0xff]  }
 0x19e   :  { %5468 = vst [vmem:[%s7530_s3 + $0x90] sm:$0xff] %v5154_v57   ;;  %v2340_v62 = vadd.f32 %v6487_v6, %v2339_v59  ;;  %v2996_v63 = vpop.f32.mrf.mxu1  ;;  %v3502_v8 = vmax.f32 %v2994_v61, 0.0  ;;  %v5851_v59 = vld [vmem:[%s7528_s0 + $0x604] ss:$16 sps:$4 sm:$0xff]   ;;  %v5854_v61 = vld [vmem:[%s7528_s0 + $0x60c] ss:$16 sps:$4 sm:$0xff]  }
 0x19f   :  { %v2341_v2 = vpop.f32.mrf.mxu0 }
 0x1a0   :  { %v2997_v4 = vadd.f32 %v2996_v63, %v2340_v62  ;;  %v2998_v5 = vpop.f32.mrf.mxu1 }
 0x1a1   :  { %v2344_v7 = vpop.f32.mrf.mxu0  ;;  %2535 = vmatmul.mubr.bf16.gmra.mxu0 %v5825_v60 }
 0x1a2   :  { %v3503_v9 = vmax.f32 %v2997_v4, 0.0  ;;  %v2345_v10 = vadd.f32 %v6487_v6, %v2344_v7  ;;  %v3001_v11 = vpop.f32.mrf.mxu1  ;;  %3192 = vmatmul.mubr.bf16.gmra.mxu1 %v5828_v0  ;;  %2542 = vmatprep.mubr.bf16.mxu0 %v5833_v1 }
 0x1a3   :  { %v2346_v12 = vpop.f32.mrf.mxu0  ;;  %3199 = vmatprep.mubr.bf16.mxu1 %v5836_v3 }
 0x1a4   :  { %v5159_v13 = vpack.c.bf16 %v3503_v9, %v3502_v8  ;;  %v3003_v14 = vpop.f32.mrf.mxu1  ;;  %v3002_v17 = vadd.f32 %v3001_v11, %v2345_v10  ;;  %v5849_v10 = vld [vmem:[%s7528_s0 + $0x600] ss:$16 sps:$4 sm:$0xff]  }
 0x1a5   :  { %v2347_v15 = vpop.f32.mrf.mxu0  ;;  %v5852_v14 = vld [vmem:[%s7528_s0 + $0x608] ss:$16 sps:$4 sm:$0xff]  }
 0x1a6   :  { %5469 = vst [vmem:[%s7530_s3 + $0x98] sm:$0xff] %v5159_v13   ;;  %v2348_v18 = vadd.f32 %v6487_v6, %v2347_v15  ;;  %v3004_v19 = vpop.f32.mrf.mxu1  ;;  %v3504_v27 = vmax.f32 %v3002_v17, 0.0  ;;  %v5857_v15 = vld [vmem:[%s7528_s0 + $0x624] ss:$16 sps:$4 sm:$0xff]   ;;  %v5860_v17 = vld [vmem:[%s7528_s0 + $0x62c] ss:$16 sps:$4 sm:$0xff]  }
 0x1a7   :  { %v2349_v22 = vpop.f32.mrf.mxu0 }
 0x1a8   :  { %v3005_v24 = vadd.f32 %v3004_v19, %v2348_v18  ;;  %v3006_v25 = vpop.f32.mrf.mxu1 }
 0x1a9   :  { %v2352_v26 = vpop.f32.mrf.mxu0  ;;  %2543 = vmatmul.mubr.bf16.gmra.mxu0 %v5831_v16 }
 0x1aa   :  { %v3505_v28 = vmax.f32 %v3005_v24, 0.0  ;;  %v2353_v29 = vadd.f32 %v6487_v6, %v2352_v26  ;;  %v3009_v30 = vpop.f32.mrf.mxu1  ;;  %3200 = vmatmul.mubr.bf16.gmra.mxu1 %v5834_v20  ;;  %2550 = vmatprep.mubr.bf16.mxu0 %v5839_v21  ;;  %v6856_v6 = vld [vmem:[%s7529_s2] ss:$0 sm:$0xff] }
 0x1ab   :  { %v2354_v31 = vpop.f32.mrf.mxu0  ;;  %3207 = vmatprep.mubr.bf16.mxu1 %v5842_v23 }
 0x1ac   :  { %v5164_v32 = vpack.c.bf16 %v3505_v28, %v3504_v27  ;;  %v3011_v33 = vpop.f32.mrf.mxu1  ;;  %v3010_v36 = vadd.f32 %v3009_v30, %v2353_v29  ;;  %v5855_v29 = vld [vmem:[%s7528_s0 + $0x620] ss:$16 sps:$4 sm:$0xff]  }
 0x1ad   :  { %v2355_v34 = vpop.f32.mrf.mxu0  ;;  %v5858_v33 = vld [vmem:[%s7528_s0 + $0x628] ss:$16 sps:$4 sm:$0xff]  }
 0x1ae   :  { %5470 = vst [vmem:[%s7530_s3 + $0xa0] sm:$0xff] %v5164_v32   ;;  %v2356_v37 = vadd.f32 %v6856_v6, %v2355_v34  ;;  %v3012_v38 = vpop.f32.mrf.mxu1  ;;  %v3506_v46 = vmax.f32 %v3010_v36, 0.0  ;;  %v5863_v34 = vld [vmem:[%s7528_s0 + $0x644] ss:$16 sps:$4 sm:$0xff]   ;;  %v5866_v36 = vld [vmem:[%s7528_s0 + $0x64c] ss:$16 sps:$4 sm:$0xff]  }
 0x1af   :  { %v2357_v41 = vpop.f32.mrf.mxu0 }
 0x1b0   :  { %v3013_v43 = vadd.f32 %v3012_v38, %v2356_v37  ;;  %v3014_v44 = vpop.f32.mrf.mxu1 }
 0x1b1   :  { %v2360_v45 = vpop.f32.mrf.mxu0  ;;  %2551 = vmatmul.mubr.bf16.gmra.mxu0 %v5837_v35 }
 0x1b2   :  { %v3507_v47 = vmax.f32 %v3013_v43, 0.0  ;;  %v2361_v48 = vadd.f32 %v6856_v6, %v2360_v45  ;;  %v3017_v49 = vpop.f32.mrf.mxu1  ;;  %3208 = vmatmul.mubr.bf16.gmra.mxu1 %v5840_v39  ;;  %2558 = vmatprep.mubr.bf16.mxu0 %v5845_v40 }
 0x1b3   :  { %v2362_v50 = vpop.f32.mrf.mxu0  ;;  %3215 = vmatprep.mubr.bf16.mxu1 %v5848_v42 }
 0x1b4   :  { %v5169_v51 = vpack.c.bf16 %v3507_v47, %v3506_v46  ;;  %v3019_v52 = vpop.f32.mrf.mxu1  ;;  %v3018_v55 = vadd.f32 %v3017_v49, %v2361_v48  ;;  %v5861_v48 = vld [vmem:[%s7528_s0 + $0x640] ss:$16 sps:$4 sm:$0xff]  }
 0x1b5   :  { %v2363_v53 = vpop.f32.mrf.mxu0  ;;  %v5864_v52 = vld [vmem:[%s7528_s0 + $0x648] ss:$16 sps:$4 sm:$0xff]  }
 0x1b6   :  { %5471 = vst [vmem:[%s7530_s3 + $0xa8] sm:$0xff] %v5169_v51   ;;  %v2364_v56 = vadd.f32 %v6856_v6, %v2363_v53  ;;  %v3020_v57 = vpop.f32.mrf.mxu1  ;;  %v3508_v1 = vmax.f32 %v3018_v55, 0.0  ;;  %v5869_v53 = vld [vmem:[%s7528_s0 + $0x664] ss:$16 sps:$4 sm:$0xff]   ;;  %v5872_v55 = vld [vmem:[%s7528_s0 + $0x66c] ss:$16 sps:$4 sm:$0xff]  }
 0x1b7   :  { %v2365_v60 = vpop.f32.mrf.mxu0 }
 0x1b8   :  { %v3021_v62 = vadd.f32 %v3020_v57, %v2364_v56  ;;  %v3022_v63 = vpop.f32.mrf.mxu1 }
 0x1b9   :  { %v2368_v0 = vpop.f32.mrf.mxu0  ;;  %2559 = vmatmul.mubr.bf16.gmra.mxu0 %v5843_v54 }
 0x1ba   :  { %v3509_v2 = vmax.f32 %v3021_v62, 0.0  ;;  %v2369_v3 = vadd.f32 %v6856_v6, %v2368_v0  ;;  %v3025_v4 = vpop.f32.mrf.mxu1  ;;  %3216 = vmatmul.mubr.bf16.gmra.mxu1 %v5846_v58  ;;  %2566 = vmatprep.mubr.bf16.mxu0 %v5851_v59 }
 0x1bb   :  { %v2370_v5 = vpop.f32.mrf.mxu0  ;;  %3223 = vmatprep.mubr.bf16.mxu1 %v5854_v61 }
 0x1bc   :  { %v5174_v7 = vpack.c.bf16 %v3509_v2, %v3508_v1  ;;  %v3027_v8 = vpop.f32.mrf.mxu1  ;;  %v3026_v11 = vadd.f32 %v3025_v4, %v2369_v3  ;;  %v5867_v3 = vld [vmem:[%s7528_s0 + $0x660] ss:$16 sps:$4 sm:$0xff]  }
 0x1bd   :  { %v2371_v9 = vpop.f32.mrf.mxu0  ;;  %v5870_v8 = vld [vmem:[%s7528_s0 + $0x668] ss:$16 sps:$4 sm:$0xff]  }
 0x1be   :  { %5472 = vst [vmem:[%s7530_s3 + $0xb0] sm:$0xff] %v5174_v7   ;;  %v2372_v12 = vadd.f32 %v6856_v6, %v2371_v9  ;;  %v3028_v13 = vpop.f32.mrf.mxu1  ;;  %v3510_v21 = vmax.f32 %v3026_v11, 0.0  ;;  %v5875_v9 = vld [vmem:[%s7528_s0 + $0x684] ss:$16 sps:$4 sm:$0xff]   ;;  %v5878_v11 = vld [vmem:[%s7528_s0 + $0x68c] ss:$16 sps:$4 sm:$0xff]  }
 0x1bf   :  { %v2373_v16 = vpop.f32.mrf.mxu0 }
 0x1c0   :  { %v3029_v18 = vadd.f32 %v3028_v13, %v2372_v12  ;;  %v3030_v19 = vpop.f32.mrf.mxu1 }
 0x1c1   :  { %v2376_v20 = vpop.f32.mrf.mxu0  ;;  %2567 = vmatmul.mubr.bf16.gmra.mxu0 %v5849_v10 }
 0x1c2   :  { %v3511_v22 = vmax.f32 %v3029_v18, 0.0  ;;  %v2377_v23 = vadd.f32 %v6856_v6, %v2376_v20  ;;  %v3033_v24 = vpop.f32.mrf.mxu1  ;;  %3224 = vmatmul.mubr.bf16.gmra.mxu1 %v5852_v14  ;;  %2574 = vmatprep.mubr.bf16.mxu0 %v5857_v15 }
 0x1c3   :  { %v2378_v25 = vpop.f32.mrf.mxu0  ;;  %3231 = vmatprep.mubr.bf16.mxu1 %v5860_v17 }
 0x1c4   :  { %v5179_v26 = vpack.c.bf16 %v3511_v22, %v3510_v21  ;;  %v3035_v27 = vpop.f32.mrf.mxu1  ;;  %v3034_v30 = vadd.f32 %v3033_v24, %v2377_v23  ;;  %v5873_v23 = vld [vmem:[%s7528_s0 + $0x680] ss:$16 sps:$4 sm:$0xff]  }
 0x1c5   :  { %v2379_v28 = vpop.f32.mrf.mxu0  ;;  %v5876_v27 = vld [vmem:[%s7528_s0 + $0x688] ss:$16 sps:$4 sm:$0xff]  }
 0x1c6   :  { %5473 = vst [vmem:[%s7530_s3 + $0xb8] sm:$0xff] %v5179_v26   ;;  %v2380_v31 = vadd.f32 %v6856_v6, %v2379_v28  ;;  %v3036_v32 = vpop.f32.mrf.mxu1  ;;  %v3512_v40 = vmax.f32 %v3034_v30, 0.0  ;;  %v5881_v28 = vld [vmem:[%s7528_s0 + $0x6a4] ss:$16 sps:$4 sm:$0xff]   ;;  %v5884_v30 = vld [vmem:[%s7528_s0 + $0x6ac] ss:$16 sps:$4 sm:$0xff]  }
 0x1c7   :  { %v2381_v35 = vpop.f32.mrf.mxu0 }
 0x1c8   :  { %v3037_v37 = vadd.f32 %v3036_v32, %v2380_v31  ;;  %v3038_v38 = vpop.f32.mrf.mxu1 }
 0x1c9   :  { %v2384_v39 = vpop.f32.mrf.mxu0  ;;  %2575 = vmatmul.mubr.bf16.gmra.mxu0 %v5855_v29 }
 0x1ca   :  { %v3513_v41 = vmax.f32 %v3037_v37, 0.0  ;;  %v2385_v42 = vadd.f32 %v6856_v6, %v2384_v39  ;;  %v3041_v43 = vpop.f32.mrf.mxu1  ;;  %3232 = vmatmul.mubr.bf16.gmra.mxu1 %v5858_v33  ;;  %2582 = vmatprep.mubr.bf16.mxu0 %v5863_v34 }
 0x1cb   :  { %v2386_v44 = vpop.f32.mrf.mxu0  ;;  %3239 = vmatprep.mubr.bf16.mxu1 %v5866_v36 }
 0x1cc   :  { %v5184_v45 = vpack.c.bf16 %v3513_v41, %v3512_v40  ;;  %v3043_v46 = vpop.f32.mrf.mxu1  ;;  %v3042_v49 = vadd.f32 %v3041_v43, %v2385_v42  ;;  %v5879_v42 = vld [vmem:[%s7528_s0 + $0x6a0] ss:$16 sps:$4 sm:$0xff]  }
 0x1cd   :  { %v2387_v47 = vpop.f32.mrf.mxu0  ;;  %v5882_v46 = vld [vmem:[%s7528_s0 + $0x6a8] ss:$16 sps:$4 sm:$0xff]  }
 0x1ce   :  { %5474 = vst [vmem:[%s7530_s3 + $0xc0] sm:$0xff] %v5184_v45   ;;  %v2388_v50 = vadd.f32 %v6856_v6, %v2387_v47  ;;  %v3044_v51 = vpop.f32.mrf.mxu1  ;;  %v3514_v59 = vmax.f32 %v3042_v49, 0.0  ;;  %v5887_v47 = vld [vmem:[%s7528_s0 + $0x6c4] ss:$16 sps:$4 sm:$0xff]   ;;  %v5890_v49 = vld [vmem:[%s7528_s0 + $0x6cc] ss:$16 sps:$4 sm:$0xff]  }
 0x1cf   :  { %v2389_v54 = vpop.f32.mrf.mxu0 }
 0x1d0   :  { %v3045_v56 = vadd.f32 %v3044_v51, %v2388_v50  ;;  %v3046_v57 = vpop.f32.mrf.mxu1 }
 0x1d1   :  { %v2392_v58 = vpop.f32.mrf.mxu0  ;;  %2583 = vmatmul.mubr.bf16.gmra.mxu0 %v5861_v48 }
 0x1d2   :  { %v3515_v60 = vmax.f32 %v3045_v56, 0.0  ;;  %v2393_v61 = vadd.f32 %v6856_v6, %v2392_v58  ;;  %v3049_v62 = vpop.f32.mrf.mxu1  ;;  %3240 = vmatmul.mubr.bf16.gmra.mxu1 %v5864_v52  ;;  %2590 = vmatprep.mubr.bf16.mxu0 %v5869_v53 }
 0x1d3   :  { %v2394_v63 = vpop.f32.mrf.mxu0  ;;  %3247 = vmatprep.mubr.bf16.mxu1 %v5872_v55 }
 0x1d4   :  { %v5189_v0 = vpack.c.bf16 %v3515_v60, %v3514_v59  ;;  %v3051_v1 = vpop.f32.mrf.mxu1  ;;  %v3050_v4 = vadd.f32 %v3049_v62, %v2393_v61  ;;  %v5885_v61 = vld [vmem:[%s7528_s0 + $0x6c0] ss:$16 sps:$4 sm:$0xff]  }
 0x1d5   :  { %v2395_v2 = vpop.f32.mrf.mxu0  ;;  %v5888_v1 = vld [vmem:[%s7528_s0 + $0x6c8] ss:$16 sps:$4 sm:$0xff]  }
 0x1d6   :  { %5475 = vst [vmem:[%s7530_s3 + $0xc8] sm:$0xff] %v5189_v0   ;;  %v2396_v5 = vadd.f32 %v6856_v6, %v2395_v2  ;;  %v3052_v7 = vpop.f32.mrf.mxu1  ;;  %v3516_v15 = vmax.f32 %v3050_v4, 0.0  ;;  %v5893_v2 = vld [vmem:[%s7528_s0 + $0x6e4] ss:$16 sps:$4 sm:$0xff]   ;;  %v5896_v4 = vld [vmem:[%s7528_s0 + $0x6ec] ss:$16 sps:$4 sm:$0xff]  }
 0x1d7   :  { %v2397_v10 = vpop.f32.mrf.mxu0 }
 0x1d8   :  { %v3053_v12 = vadd.f32 %v3052_v7, %v2396_v5  ;;  %v3054_v13 = vpop.f32.mrf.mxu1 }
 0x1d9   :  { %v2400_v14 = vpop.f32.mrf.mxu0  ;;  %2591 = vmatmul.mubr.bf16.gmra.mxu0 %v5867_v3 }
 0x1da   :  { %v3517_v16 = vmax.f32 %v3053_v12, 0.0  ;;  %v2401_v17 = vadd.f32 %v6856_v6, %v2400_v14  ;;  %v3057_v18 = vpop.f32.mrf.mxu1  ;;  %3248 = vmatmul.mubr.bf16.gmra.mxu1 %v5870_v8  ;;  %2598 = vmatprep.mubr.bf16.mxu0 %v5875_v9 }
 0x1db   :  { %v2402_v19 = vpop.f32.mrf.mxu0  ;;  %3255 = vmatprep.mubr.bf16.mxu1 %v5878_v11 }
 0x1dc   :  { %v5194_v20 = vpack.c.bf16 %v3517_v16, %v3516_v15  ;;  %v3059_v21 = vpop.f32.mrf.mxu1  ;;  %v3058_v24 = vadd.f32 %v3057_v18, %v2401_v17  ;;  %v5891_v17 = vld [vmem:[%s7528_s0 + $0x6e0] ss:$16 sps:$4 sm:$0xff]  }
 0x1dd   :  { %v2403_v22 = vpop.f32.mrf.mxu0  ;;  %v5894_v21 = vld [vmem:[%s7528_s0 + $0x6e8] ss:$16 sps:$4 sm:$0xff]  }
 0x1de   :  { %5476 = vst [vmem:[%s7530_s3 + $0xd0] sm:$0xff] %v5194_v20   ;;  %v2404_v25 = vadd.f32 %v6856_v6, %v2403_v22  ;;  %v3060_v26 = vpop.f32.mrf.mxu1  ;;  %v3518_v34 = vmax.f32 %v3058_v24, 0.0  ;;  %v5899_v22 = vld [vmem:[%s7528_s0 + $0x704] ss:$16 sps:$4 sm:$0xff]   ;;  %v5902_v24 = vld [vmem:[%s7528_s0 + $0x70c] ss:$16 sps:$4 sm:$0xff]  }
 0x1df   :  { %v2405_v29 = vpop.f32.mrf.mxu0 }
 0x1e0   :  { %v3061_v31 = vadd.f32 %v3060_v26, %v2404_v25  ;;  %v3062_v32 = vpop.f32.mrf.mxu1 }
 0x1e1   :  { %v2408_v33 = vpop.f32.mrf.mxu0  ;;  %2599 = vmatmul.mubr.bf16.gmra.mxu0 %v5873_v23 }
 0x1e2   :  { %v3519_v35 = vmax.f32 %v3061_v31, 0.0  ;;  %v2409_v36 = vadd.f32 %v6856_v6, %v2408_v33  ;;  %v3065_v37 = vpop.f32.mrf.mxu1  ;;  %3256 = vmatmul.mubr.bf16.gmra.mxu1 %v5876_v27  ;;  %2606 = vmatprep.mubr.bf16.mxu0 %v5881_v28 }
 0x1e3   :  { %v2410_v38 = vpop.f32.mrf.mxu0  ;;  %3263 = vmatprep.mubr.bf16.mxu1 %v5884_v30 }
 0x1e4   :  { %v5199_v39 = vpack.c.bf16 %v3519_v35, %v3518_v34  ;;  %v3067_v40 = vpop.f32.mrf.mxu1  ;;  %v3066_v43 = vadd.f32 %v3065_v37, %v2409_v36  ;;  %v5897_v36 = vld [vmem:[%s7528_s0 + $0x700] ss:$16 sps:$4 sm:$0xff]  }
 0x1e5   :  { %v2411_v41 = vpop.f32.mrf.mxu0  ;;  %v5900_v40 = vld [vmem:[%s7528_s0 + $0x708] ss:$16 sps:$4 sm:$0xff]  }
 0x1e6   :  { %5477 = vst [vmem:[%s7530_s3 + $0xd8] sm:$0xff] %v5199_v39   ;;  %v2412_v44 = vadd.f32 %v6856_v6, %v2411_v41  ;;  %v3068_v45 = vpop.f32.mrf.mxu1  ;;  %v3520_v53 = vmax.f32 %v3066_v43, 0.0  ;;  %v5905_v41 = vld [vmem:[%s7528_s0 + $0x724] ss:$16 sps:$4 sm:$0xff]   ;;  %v5908_v43 = vld [vmem:[%s7528_s0 + $0x72c] ss:$16 sps:$4 sm:$0xff]  }
 0x1e7   :  { %v2413_v48 = vpop.f32.mrf.mxu0 }
 0x1e8   :  { %v3069_v50 = vadd.f32 %v3068_v45, %v2412_v44  ;;  %v3070_v51 = vpop.f32.mrf.mxu1 }
 0x1e9   :  { %v2416_v52 = vpop.f32.mrf.mxu0  ;;  %2607 = vmatmul.mubr.bf16.gmra.mxu0 %v5879_v42 }
 0x1ea   :  { %v3521_v54 = vmax.f32 %v3069_v50, 0.0  ;;  %v2417_v55 = vadd.f32 %v6856_v6, %v2416_v52  ;;  %v3073_v56 = vpop.f32.mrf.mxu1  ;;  %3264 = vmatmul.mubr.bf16.gmra.mxu1 %v5882_v46  ;;  %2614 = vmatprep.mubr.bf16.mxu0 %v5887_v47 }
 0x1eb   :  { %v2418_v57 = vpop.f32.mrf.mxu0  ;;  %3271 = vmatprep.mubr.bf16.mxu1 %v5890_v49 }
 0x1ec   :  { %v5204_v58 = vpack.c.bf16 %v3521_v54, %v3520_v53  ;;  %v3075_v59 = vpop.f32.mrf.mxu1  ;;  %v3074_v62 = vadd.f32 %v3073_v56, %v2417_v55  ;;  %v5903_v55 = vld [vmem:[%s7528_s0 + $0x720] ss:$16 sps:$4 sm:$0xff]  }
 0x1ed   :  { %v2419_v60 = vpop.f32.mrf.mxu0  ;;  %v5906_v59 = vld [vmem:[%s7528_s0 + $0x728] ss:$16 sps:$4 sm:$0xff]  }
 0x1ee   :  { %5478 = vst [vmem:[%s7530_s3 + $0xe0] sm:$0xff] %v5204_v58   ;;  %v2420_v63 = vadd.f32 %v6856_v6, %v2419_v60  ;;  %v3076_v0 = vpop.f32.mrf.mxu1  ;;  %v3522_v9 = vmax.f32 %v3074_v62, 0.0  ;;  %v5911_v60 = vld [vmem:[%s7528_s0 + $0x744] ss:$16 sps:$4 sm:$0xff]   ;;  %v5914_v62 = vld [vmem:[%s7528_s0 + $0x74c] ss:$16 sps:$4 sm:$0xff]  }
 0x1ef   :  { %v2421_v3 = vpop.f32.mrf.mxu0 }
 0x1f0   :  { %v3077_v5 = vadd.f32 %v3076_v0, %v2420_v63  ;;  %v3078_v7 = vpop.f32.mrf.mxu1 }
 0x1f1   :  { %v2424_v8 = vpop.f32.mrf.mxu0  ;;  %2615 = vmatmul.mubr.bf16.gmra.mxu0 %v5885_v61 }
 0x1f2   :  { %v3523_v10 = vmax.f32 %v3077_v5, 0.0  ;;  %v2425_v11 = vadd.f32 %v6856_v6, %v2424_v8  ;;  %v3081_v12 = vpop.f32.mrf.mxu1  ;;  %3272 = vmatmul.mubr.bf16.gmra.mxu1 %v5888_v1  ;;  %2622 = vmatprep.mubr.bf16.mxu0 %v5893_v2 }
 0x1f3   :  { %v2426_v13 = vpop.f32.mrf.mxu0  ;;  %3279 = vmatprep.mubr.bf16.mxu1 %v5896_v4 }
 0x1f4   :  { %v5209_v14 = vpack.c.bf16 %v3523_v10, %v3522_v9  ;;  %v3083_v15 = vpop.f32.mrf.mxu1  ;;  %v3082_v18 = vadd.f32 %v3081_v12, %v2425_v11  ;;  %v5909_v11 = vld [vmem:[%s7528_s0 + $0x740] ss:$16 sps:$4 sm:$0xff]  }
 0x1f5   :  { %v2427_v16 = vpop.f32.mrf.mxu0  ;;  %v5912_v15 = vld [vmem:[%s7528_s0 + $0x748] ss:$16 sps:$4 sm:$0xff]  }
 0x1f6   :  { %5479 = vst [vmem:[%s7530_s3 + $0xe8] sm:$0xff] %v5209_v14   ;;  %v2428_v19 = vadd.f32 %v6856_v6, %v2427_v16  ;;  %v3084_v20 = vpop.f32.mrf.mxu1  ;;  %v3524_v28 = vmax.f32 %v3082_v18, 0.0  ;;  %v5917_v16 = vld [vmem:[%s7528_s0 + $0x764] ss:$16 sps:$4 sm:$0xff]   ;;  %v5920_v18 = vld [vmem:[%s7528_s0 + $0x76c] ss:$16 sps:$4 sm:$0xff]  }
 0x1f7   :  { %v2429_v23 = vpop.f32.mrf.mxu0 }
 0x1f8   :  { %v3085_v25 = vadd.f32 %v3084_v20, %v2428_v19  ;;  %v3086_v26 = vpop.f32.mrf.mxu1 }
 0x1f9   :  { %v2432_v27 = vpop.f32.mrf.mxu0  ;;  %2623 = vmatmul.mubr.bf16.gmra.mxu0 %v5891_v17 }
 0x1fa   :  { %v3525_v29 = vmax.f32 %v3085_v25, 0.0  ;;  %v2433_v30 = vadd.f32 %v6856_v6, %v2432_v27  ;;  %v3089_v31 = vpop.f32.mrf.mxu1  ;;  %3280 = vmatmul.mubr.bf16.gmra.mxu1 %v5894_v21  ;;  %2630 = vmatprep.mubr.bf16.mxu0 %v5899_v22 }
 0x1fb   :  { %v2434_v32 = vpop.f32.mrf.mxu0  ;;  %3287 = vmatprep.mubr.bf16.mxu1 %v5902_v24 }
 0x1fc   :  { %v5214_v33 = vpack.c.bf16 %v3525_v29, %v3524_v28  ;;  %v3091_v34 = vpop.f32.mrf.mxu1  ;;  %v3090_v37 = vadd.f32 %v3089_v31, %v2433_v30  ;;  %v5915_v30 = vld [vmem:[%s7528_s0 + $0x760] ss:$16 sps:$4 sm:$0xff]  }
 0x1fd   :  { %v2435_v35 = vpop.f32.mrf.mxu0  ;;  %v5918_v34 = vld [vmem:[%s7528_s0 + $0x768] ss:$16 sps:$4 sm:$0xff]  }
 0x1fe   :  { %5480 = vst [vmem:[%s7530_s3 + $0xf0] sm:$0xff] %v5214_v33   ;;  %v2436_v38 = vadd.f32 %v6856_v6, %v2435_v35  ;;  %v3092_v39 = vpop.f32.mrf.mxu1  ;;  %v3526_v47 = vmax.f32 %v3090_v37, 0.0  ;;  %v5923_v35 = vld [vmem:[%s7528_s0 + $0x784] ss:$16 sps:$4 sm:$0xff]   ;;  %v5926_v37 = vld [vmem:[%s7528_s0 + $0x78c] ss:$16 sps:$4 sm:$0xff]  }
 0x1ff   :  { %v2437_v42 = vpop.f32.mrf.mxu0 }
 0x200   :  { %v3093_v44 = vadd.f32 %v3092_v39, %v2436_v38  ;;  %v3094_v45 = vpop.f32.mrf.mxu1 }
 0x201   :  { %v2440_v46 = vpop.f32.mrf.mxu0  ;;  %2631 = vmatmul.mubr.bf16.gmra.mxu0 %v5897_v36 }
 0x202   :  { %v3527_v48 = vmax.f32 %v3093_v44, 0.0  ;;  %v2441_v49 = vadd.f32 %v6856_v6, %v2440_v46  ;;  %v3097_v50 = vpop.f32.mrf.mxu1  ;;  %3288 = vmatmul.mubr.bf16.gmra.mxu1 %v5900_v40  ;;  %2638 = vmatprep.mubr.bf16.mxu0 %v5905_v41 }
 0x203   :  { %v2442_v51 = vpop.f32.mrf.mxu0  ;;  %3295 = vmatprep.mubr.bf16.mxu1 %v5908_v43 }
 0x204   :  { %v5219_v52 = vpack.c.bf16 %v3527_v48, %v3526_v47  ;;  %v3099_v53 = vpop.f32.mrf.mxu1  ;;  %v3098_v56 = vadd.f32 %v3097_v50, %v2441_v49  ;;  %v5921_v49 = vld [vmem:[%s7528_s0 + $0x780] ss:$16 sps:$4 sm:$0xff]  }
 0x205   :  { %v2443_v54 = vpop.f32.mrf.mxu0  ;;  %v5924_v53 = vld [vmem:[%s7528_s0 + $0x788] ss:$16 sps:$4 sm:$0xff]  }
 0x206   :  { %5481 = vst [vmem:[%s7530_s3 + $0xf8] sm:$0xff] %v5219_v52   ;;  %v2444_v57 = vadd.f32 %v6856_v6, %v2443_v54  ;;  %v3100_v58 = vpop.f32.mrf.mxu1  ;;  %v3528_v2 = vmax.f32 %v3098_v56, 0.0  ;;  %v5929_v54 = vld [vmem:[%s7528_s0 + $0x7a4] ss:$16 sps:$4 sm:$0xff]   ;;  %v5932_v56 = vld [vmem:[%s7528_s0 + $0x7ac] ss:$16 sps:$4 sm:$0xff]  }
 0x207   :  { %v2445_v61 = vpop.f32.mrf.mxu0 }
 0x208   :  { %v3101_v63 = vadd.f32 %v3100_v58, %v2444_v57  ;;  %v3102_v0 = vpop.f32.mrf.mxu1 }
 0x209   :  { %v2448_v1 = vpop.f32.mrf.mxu0  ;;  %2639 = vmatmul.mubr.bf16.gmra.mxu0 %v5903_v55 }
 0x20a   :  { %v3529_v3 = vmax.f32 %v3101_v63, 0.0  ;;  %v2449_v4 = vadd.f32 %v6856_v6, %v2448_v1  ;;  %v3105_v5 = vpop.f32.mrf.mxu1  ;;  %3296 = vmatmul.mubr.bf16.gmra.mxu1 %v5906_v59  ;;  %2646 = vmatprep.mubr.bf16.mxu0 %v5911_v60 }
 0x20b   :  { %v2450_v7 = vpop.f32.mrf.mxu0  ;;  %3303 = vmatprep.mubr.bf16.mxu1 %v5914_v62 }
 0x20c   :  { %v5224_v8 = vpack.c.bf16 %v3529_v3, %v3528_v2  ;;  %v3107_v9 = vpop.f32.mrf.mxu1  ;;  %v3106_v12 = vadd.f32 %v3105_v5, %v2449_v4  ;;  %v5927_v4 = vld [vmem:[%s7528_s0 + $0x7a0] ss:$16 sps:$4 sm:$0xff]  }
 0x20d   :  { %v2451_v10 = vpop.f32.mrf.mxu0  ;;  %v5930_v9 = vld [vmem:[%s7528_s0 + $0x7a8] ss:$16 sps:$4 sm:$0xff]  }
 0x20e   :  { %5482 = vst [vmem:[%s7530_s3 + $0x100] sm:$0xff] %v5224_v8   ;;  %v2452_v13 = vadd.f32 %v6856_v6, %v2451_v10  ;;  %v3108_v14 = vpop.f32.mrf.mxu1  ;;  %v3530_v22 = vmax.f32 %v3106_v12, 0.0  ;;  %v5935_v10 = vld [vmem:[%s7528_s0 + $0x7c4] ss:$16 sps:$4 sm:$0xff]   ;;  %v5938_v12 = vld [vmem:[%s7528_s0 + $0x7cc] ss:$16 sps:$4 sm:$0xff]  }
 0x20f   :  { %v2453_v17 = vpop.f32.mrf.mxu0 }
 0x210   :  { %v3109_v19 = vadd.f32 %v3108_v14, %v2452_v13  ;;  %v3110_v20 = vpop.f32.mrf.mxu1 }
 0x211   :  { %v2456_v21 = vpop.f32.mrf.mxu0  ;;  %2647 = vmatmul.mubr.bf16.gmra.mxu0 %v5909_v11 }
 0x212   :  { %v3531_v23 = vmax.f32 %v3109_v19, 0.0  ;;  %v2457_v24 = vadd.f32 %v6856_v6, %v2456_v21  ;;  %v3113_v25 = vpop.f32.mrf.mxu1  ;;  %3304 = vmatmul.mubr.bf16.gmra.mxu1 %v5912_v15  ;;  %2654 = vmatprep.mubr.bf16.mxu0 %v5917_v16 }
 0x213   :  { %v2458_v26 = vpop.f32.mrf.mxu0  ;;  %3311 = vmatprep.mubr.bf16.mxu1 %v5920_v18 }
 0x214   :  { %v5229_v27 = vpack.c.bf16 %v3531_v23, %v3530_v22  ;;  %v3115_v28 = vpop.f32.mrf.mxu1  ;;  %v3114_v31 = vadd.f32 %v3113_v25, %v2457_v24  ;;  %v5933_v24 = vld [vmem:[%s7528_s0 + $0x7c0] ss:$16 sps:$4 sm:$0xff]  }
 0x215   :  { %v2459_v29 = vpop.f32.mrf.mxu0  ;;  %v5936_v28 = vld [vmem:[%s7528_s0 + $0x7c8] ss:$16 sps:$4 sm:$0xff]  }
 0x216   :  { %5483 = vst [vmem:[%s7530_s3 + $0x108] sm:$0xff] %v5229_v27   ;;  %v2460_v32 = vadd.f32 %v6856_v6, %v2459_v29  ;;  %v3116_v33 = vpop.f32.mrf.mxu1  ;;  %v3532_v41 = vmax.f32 %v3114_v31, 0.0  ;;  %v5941_v29 = vld [vmem:[%s7528_s0 + $0x7e4] ss:$16 sps:$4 sm:$0xff]   ;;  %v5944_v31 = vld [vmem:[%s7528_s0 + $0x7ec] ss:$16 sps:$4 sm:$0xff]  }
 0x217   :  { %v2461_v36 = vpop.f32.mrf.mxu0 }
 0x218   :  { %v3117_v38 = vadd.f32 %v3116_v33, %v2460_v32  ;;  %v3118_v39 = vpop.f32.mrf.mxu1 }
 0x219   :  { %v2464_v40 = vpop.f32.mrf.mxu0  ;;  %2655 = vmatmul.mubr.bf16.gmra.mxu0 %v5915_v30 }
 0x21a   :  { %v3533_v42 = vmax.f32 %v3117_v38, 0.0  ;;  %v2465_v43 = vadd.f32 %v6856_v6, %v2464_v40  ;;  %v3121_v44 = vpop.f32.mrf.mxu1  ;;  %3312 = vmatmul.mubr.bf16.gmra.mxu1 %v5918_v34  ;;  %2662 = vmatprep.mubr.bf16.mxu0 %v5923_v35 }
 0x21b   :  { %v2466_v45 = vpop.f32.mrf.mxu0  ;;  %3319 = vmatprep.mubr.bf16.mxu1 %v5926_v37 }
 0x21c   :  { %v5234_v46 = vpack.c.bf16 %v3533_v42, %v3532_v41  ;;  %v3123_v47 = vpop.f32.mrf.mxu1  ;;  %v3122_v50 = vadd.f32 %v3121_v44, %v2465_v43  ;;  %v5939_v43 = vld [vmem:[%s7528_s0 + $0x7e0] ss:$16 sps:$4 sm:$0xff]  }
 0x21d   :  { %v2467_v48 = vpop.f32.mrf.mxu0  ;;  %v5942_v47 = vld [vmem:[%s7528_s0 + $0x7e8] ss:$16 sps:$4 sm:$0xff]  }
 0x21e   :  { %5484 = vst [vmem:[%s7530_s3 + $0x110] sm:$0xff] %v5234_v46   ;;  %v2468_v51 = vadd.f32 %v6856_v6, %v2467_v48  ;;  %v3124_v52 = vpop.f32.mrf.mxu1  ;;  %v3534_v60 = vmax.f32 %v3122_v50, 0.0  ;;  %v5947_v48 = vld [vmem:[%s7528_s0 + $0x804] ss:$16 sps:$4 sm:$0xff]   ;;  %v5950_v50 = vld [vmem:[%s7528_s0 + $0x80c] ss:$16 sps:$4 sm:$0xff]  }
 0x21f   :  { %v2469_v55 = vpop.f32.mrf.mxu0 }
 0x220   :  { %v3125_v57 = vadd.f32 %v3124_v52, %v2468_v51  ;;  %v3126_v58 = vpop.f32.mrf.mxu1 }
 0x221   :  { %v2472_v59 = vpop.f32.mrf.mxu0  ;;  %2663 = vmatmul.mubr.bf16.gmra.mxu0 %v5921_v49 }
 0x222   :  { %v3535_v61 = vmax.f32 %v3125_v57, 0.0  ;;  %v2473_v62 = vadd.f32 %v6856_v6, %v2472_v59  ;;  %v3129_v63 = vpop.f32.mrf.mxu1  ;;  %3320 = vmatmul.mubr.bf16.gmra.mxu1 %v5924_v53  ;;  %2670 = vmatprep.mubr.bf16.mxu0 %v5929_v54 }
 0x223   :  { %v2474_v0 = vpop.f32.mrf.mxu0  ;;  %3327 = vmatprep.mubr.bf16.mxu1 %v5932_v56 }
 0x224   :  { %v5239_v1 = vpack.c.bf16 %v3535_v61, %v3534_v60  ;;  %v3131_v2 = vpop.f32.mrf.mxu1  ;;  %v3130_v5 = vadd.f32 %v3129_v63, %v2473_v62  ;;  %v5945_v62 = vld [vmem:[%s7528_s0 + $0x800] ss:$16 sps:$4 sm:$0xff]  }
 0x225   :  { %v2475_v3 = vpop.f32.mrf.mxu0  ;;  %v5948_v2 = vld [vmem:[%s7528_s0 + $0x808] ss:$16 sps:$4 sm:$0xff]  }
 0x226   :  { %5485 = vst [vmem:[%s7530_s3 + $0x118] sm:$0xff] %v5239_v1   ;;  %v2476_v7 = vadd.f32 %v6856_v6, %v2475_v3  ;;  %v3132_v8 = vpop.f32.mrf.mxu1  ;;  %v3536_v16 = vmax.f32 %v3130_v5, 0.0  ;;  %v5953_v3 = vld [vmem:[%s7528_s0 + $0x824] ss:$16 sps:$4 sm:$0xff]   ;;  %v5956_v5 = vld [vmem:[%s7528_s0 + $0x82c] ss:$16 sps:$4 sm:$0xff]  }
 0x227   :  { %v2477_v11 = vpop.f32.mrf.mxu0 }
 0x228   :  { %v3133_v13 = vadd.f32 %v3132_v8, %v2476_v7  ;;  %v3134_v14 = vpop.f32.mrf.mxu1 }
 0x229   :  { %v2480_v15 = vpop.f32.mrf.mxu0  ;;  %2671 = vmatmul.mubr.bf16.gmra.mxu0 %v5927_v4 }
 0x22a   :  { %v3537_v17 = vmax.f32 %v3133_v13, 0.0  ;;  %v2481_v18 = vadd.f32 %v6856_v6, %v2480_v15  ;;  %v3137_v19 = vpop.f32.mrf.mxu1  ;;  %3328 = vmatmul.mubr.bf16.gmra.mxu1 %v5930_v9  ;;  %2678 = vmatprep.mubr.bf16.mxu0 %v5935_v10 }
 0x22b   :  { %v2482_v20 = vpop.f32.mrf.mxu0  ;;  %3335 = vmatprep.mubr.bf16.mxu1 %v5938_v12 }
 0x22c   :  { %v5244_v21 = vpack.c.bf16 %v3537_v17, %v3536_v16  ;;  %v3139_v22 = vpop.f32.mrf.mxu1  ;;  %v3138_v25 = vadd.f32 %v3137_v19, %v2481_v18  ;;  %v5951_v18 = vld [vmem:[%s7528_s0 + $0x820] ss:$16 sps:$4 sm:$0xff]  }
 0x22d   :  { %v2483_v23 = vpop.f32.mrf.mxu0  ;;  %v5954_v22 = vld [vmem:[%s7528_s0 + $0x828] ss:$16 sps:$4 sm:$0xff]  }
 0x22e   :  { %5486 = vst [vmem:[%s7530_s3 + $0x120] sm:$0xff] %v5244_v21   ;;  %v2484_v26 = vadd.f32 %v6856_v6, %v2483_v23  ;;  %v3140_v27 = vpop.f32.mrf.mxu1  ;;  %v3538_v35 = vmax.f32 %v3138_v25, 0.0  ;;  %v5959_v23 = vld [vmem:[%s7528_s0 + $0x844] ss:$16 sps:$4 sm:$0xff]   ;;  %v5962_v25 = vld [vmem:[%s7528_s0 + $0x84c] ss:$16 sps:$4 sm:$0xff]  }
 0x22f   :  { %v2485_v30 = vpop.f32.mrf.mxu0 }
 0x230   :  { %v3141_v32 = vadd.f32 %v3140_v27, %v2484_v26  ;;  %v3142_v33 = vpop.f32.mrf.mxu1 }
 0x231   :  { %v2488_v34 = vpop.f32.mrf.mxu0  ;;  %2679 = vmatmul.mubr.bf16.gmra.mxu0 %v5933_v24 }
 0x232   :  { %v3539_v36 = vmax.f32 %v3141_v32, 0.0  ;;  %v2489_v37 = vadd.f32 %v6856_v6, %v2488_v34  ;;  %v3145_v38 = vpop.f32.mrf.mxu1  ;;  %3336 = vmatmul.mubr.bf16.gmra.mxu1 %v5936_v28  ;;  %2686 = vmatprep.mubr.bf16.mxu0 %v5941_v29 }
 0x233   :  { %v2490_v39 = vpop.f32.mrf.mxu0  ;;  %3343 = vmatprep.mubr.bf16.mxu1 %v5944_v31 }
 0x234   :  { %v5249_v40 = vpack.c.bf16 %v3539_v36, %v3538_v35  ;;  %v3147_v41 = vpop.f32.mrf.mxu1  ;;  %v3146_v44 = vadd.f32 %v3145_v38, %v2489_v37  ;;  %v5957_v37 = vld [vmem:[%s7528_s0 + $0x840] ss:$16 sps:$4 sm:$0xff]  }
 0x235   :  { %v2491_v42 = vpop.f32.mrf.mxu0  ;;  %v5960_v41 = vld [vmem:[%s7528_s0 + $0x848] ss:$16 sps:$4 sm:$0xff]  }
 0x236   :  { %5487 = vst [vmem:[%s7530_s3 + $0x128] sm:$0xff] %v5249_v40   ;;  %v2492_v45 = vadd.f32 %v6856_v6, %v2491_v42  ;;  %v3148_v46 = vpop.f32.mrf.mxu1  ;;  %v3540_v54 = vmax.f32 %v3146_v44, 0.0  ;;  %v5965_v42 = vld [vmem:[%s7528_s0 + $0x864] ss:$16 sps:$4 sm:$0xff]   ;;  %v5968_v44 = vld [vmem:[%s7528_s0 + $0x86c] ss:$16 sps:$4 sm:$0xff]  }
 0x237   :  { %v2493_v49 = vpop.f32.mrf.mxu0 }
 0x238   :  { %v3149_v51 = vadd.f32 %v3148_v46, %v2492_v45  ;;  %v3150_v52 = vpop.f32.mrf.mxu1 }
 0x239   :  { %v2496_v53 = vpop.f32.mrf.mxu0  ;;  %2687 = vmatmul.mubr.bf16.gmra.mxu0 %v5939_v43 }
 0x23a   :  { %v3541_v55 = vmax.f32 %v3149_v51, 0.0  ;;  %v2497_v56 = vadd.f32 %v6856_v6, %v2496_v53  ;;  %v3153_v57 = vpop.f32.mrf.mxu1  ;;  %3344 = vmatmul.mubr.bf16.gmra.mxu1 %v5942_v47  ;;  %2694 = vmatprep.mubr.bf16.mxu0 %v5947_v48 }
 0x23b   :  { %v2498_v58 = vpop.f32.mrf.mxu0  ;;  %3351 = vmatprep.mubr.bf16.mxu1 %v5950_v50 }
 0x23c   :  { %v5254_v59 = vpack.c.bf16 %v3541_v55, %v3540_v54  ;;  %v3155_v60 = vpop.f32.mrf.mxu1  ;;  %v3154_v63 = vadd.f32 %v3153_v57, %v2497_v56  ;;  %v5963_v56 = vld [vmem:[%s7528_s0 + $0x860] ss:$16 sps:$4 sm:$0xff]  }
 0x23d   :  { %v2499_v61 = vpop.f32.mrf.mxu0  ;;  %v5966_v60 = vld [vmem:[%s7528_s0 + $0x868] ss:$16 sps:$4 sm:$0xff]  }
 0x23e   :  { %5488 = vst [vmem:[%s7530_s3 + $0x130] sm:$0xff] %v5254_v59   ;;  %v2500_v0 = vadd.f32 %v6856_v6, %v2499_v61  ;;  %v3156_v1 = vpop.f32.mrf.mxu1  ;;  %v3542_v10 = vmax.f32 %v3154_v63, 0.0  ;;  %v5971_v61 = vld [vmem:[%s7528_s0 + $0x884] ss:$16 sps:$4 sm:$0xff]   ;;  %v5974_v63 = vld [vmem:[%s7528_s0 + $0x88c] ss:$16 sps:$4 sm:$0xff]  }
 0x23f   :  { %v2501_v4 = vpop.f32.mrf.mxu0 }
 0x240   :  { %v3157_v7 = vadd.f32 %v3156_v1, %v2500_v0  ;;  %v3158_v8 = vpop.f32.mrf.mxu1  ;;  %v7228_v4 = vld [vmem:[%s7529_s2] ss:$0 sm:$0xff] }
 0x241   :  { %v2504_v9 = vpop.f32.mrf.mxu0  ;;  %2695 = vmatmul.mubr.bf16.gmra.mxu0 %v5945_v62 }
 0x242   :  { %v3543_v11 = vmax.f32 %v3157_v7, 0.0  ;;  %v2505_v12 = vadd.f32 %v6856_v6, %v2504_v9  ;;  %v3161_v13 = vpop.f32.mrf.mxu1  ;;  %3352 = vmatmul.mubr.bf16.gmra.mxu1 %v5948_v2  ;;  %2702 = vmatprep.mubr.bf16.mxu0 %v5953_v3 }
 0x243   :  { %v2506_v14 = vpop.f32.mrf.mxu0  ;;  %3359 = vmatprep.mubr.bf16.mxu1 %v5956_v5 }
 0x244   :  { %v5259_v15 = vpack.c.bf16 %v3543_v11, %v3542_v10  ;;  %v3163_v16 = vpop.f32.mrf.mxu1  ;;  %v3162_v19 = vadd.f32 %v3161_v13, %v2505_v12  ;;  %v5969_v12 = vld [vmem:[%s7528_s0 + $0x880] ss:$16 sps:$4 sm:$0xff]  }
 0x245   :  { %v2507_v17 = vpop.f32.mrf.mxu0  ;;  %v5972_v16 = vld [vmem:[%s7528_s0 + $0x888] ss:$16 sps:$4 sm:$0xff]  }
 0x246   :  { %5489 = vst [vmem:[%s7530_s3 + $0x138] sm:$0xff] %v5259_v15   ;;  %v2508_v20 = vadd.f32 %v6856_v6, %v2507_v17  ;;  %v3164_v21 = vpop.f32.mrf.mxu1  ;;  %v3544_v29 = vmax.f32 %v3162_v19, 0.0  ;;  %v5977_v17 = vld [vmem:[%s7528_s0 + $0x8a4] ss:$16 sps:$4 sm:$0xff]   ;;  %v5980_v19 = vld [vmem:[%s7528_s0 + $0x8ac] ss:$16 sps:$4 sm:$0xff]  }
 0x247   :  { %v2509_v24 = vpop.f32.mrf.mxu0 }
 0x248   :  { %v3165_v26 = vadd.f32 %v3164_v21, %v2508_v20  ;;  %v3166_v27 = vpop.f32.mrf.mxu1 }
 0x249   :  { %v2512_v28 = vpop.f32.mrf.mxu0  ;;  %2703 = vmatmul.mubr.bf16.gmra.mxu0 %v5951_v18 }
 0x24a   :  { %v3545_v30 = vmax.f32 %v3165_v26, 0.0  ;;  %v2513_v31 = vadd.f32 %v6856_v6, %v2512_v28  ;;  %v3169_v32 = vpop.f32.mrf.mxu1  ;;  %3360 = vmatmul.mubr.bf16.gmra.mxu1 %v5954_v22  ;;  %2710 = vmatprep.mubr.bf16.mxu0 %v5959_v23 }
 0x24b   :  { %v2514_v33 = vpop.f32.mrf.mxu0  ;;  %3367 = vmatprep.mubr.bf16.mxu1 %v5962_v25 }
 0x24c   :  { %v5264_v34 = vpack.c.bf16 %v3545_v30, %v3544_v29  ;;  %v3171_v35 = vpop.f32.mrf.mxu1  ;;  %v3170_v38 = vadd.f32 %v3169_v32, %v2513_v31  ;;  %v5975_v31 = vld [vmem:[%s7528_s0 + $0x8a0] ss:$16 sps:$4 sm:$0xff]  }
 0x24d   :  { %v2515_v36 = vpop.f32.mrf.mxu0  ;;  %v5978_v35 = vld [vmem:[%s7528_s0 + $0x8a8] ss:$16 sps:$4 sm:$0xff]  }
 0x24e   :  { %5490 = vst [vmem:[%s7530_s3 + $0x140] sm:$0xff] %v5264_v34   ;;  %v2516_v39 = vadd.f32 %v6856_v6, %v2515_v36  ;;  %v3172_v40 = vpop.f32.mrf.mxu1  ;;  %v3546_v48 = vmax.f32 %v3170_v38, 0.0  ;;  %v5983_v36 = vld [vmem:[%s7528_s0 + $0x8c4] ss:$16 sps:$4 sm:$0xff]   ;;  %v5986_v38 = vld [vmem:[%s7528_s0 + $0x8cc] ss:$16 sps:$4 sm:$0xff]  }
 0x24f   :  { %v2517_v43 = vpop.f32.mrf.mxu0 }
 0x250   :  { %v3173_v45 = vadd.f32 %v3172_v40, %v2516_v39  ;;  %v3174_v46 = vpop.f32.mrf.mxu1 }
 0x251   :  { %v2520_v47 = vpop.f32.mrf.mxu0  ;;  %2711 = vmatmul.mubr.bf16.gmra.mxu0 %v5957_v37 }
 0x252   :  { %v3547_v49 = vmax.f32 %v3173_v45, 0.0  ;;  %v2521_v50 = vadd.f32 %v6856_v6, %v2520_v47  ;;  %v3177_v51 = vpop.f32.mrf.mxu1  ;;  %3368 = vmatmul.mubr.bf16.gmra.mxu1 %v5960_v41  ;;  %2718 = vmatprep.mubr.bf16.mxu0 %v5965_v42 }
 0x253   :  { %v2522_v52 = vpop.f32.mrf.mxu0  ;;  %3375 = vmatprep.mubr.bf16.mxu1 %v5968_v44 }
 0x254   :  { %v5269_v53 = vpack.c.bf16 %v3547_v49, %v3546_v48  ;;  %v3179_v54 = vpop.f32.mrf.mxu1  ;;  %v3178_v57 = vadd.f32 %v3177_v51, %v2521_v50  ;;  %v5981_v50 = vld [vmem:[%s7528_s0 + $0x8c0] ss:$16 sps:$4 sm:$0xff]  }
 0x255   :  { %v2523_v55 = vpop.f32.mrf.mxu0  ;;  %v5984_v54 = vld [vmem:[%s7528_s0 + $0x8c8] ss:$16 sps:$4 sm:$0xff]  }
 0x256   :  { %5491 = vst [vmem:[%s7530_s3 + $0x148] sm:$0xff] %v5269_v53   ;;  %v2524_v58 = vadd.f32 %v6856_v6, %v2523_v55  ;;  %v3180_v59 = vpop.f32.mrf.mxu1  ;;  %v3548_v3 = vmax.f32 %v3178_v57, 0.0  ;;  %v5989_v55 = vld [vmem:[%s7528_s0 + $0x8e4] ss:$16 sps:$4 sm:$0xff]   ;;  %v5992_v57 = vld [vmem:[%s7528_s0 + $0x8ec] ss:$16 sps:$4 sm:$0xff]  }
 0x257   :  { %v2525_v62 = vpop.f32.mrf.mxu0 }
 0x258   :  { %v3181_v0 = vadd.f32 %v3180_v59, %v2524_v58  ;;  %v3182_v1 = vpop.f32.mrf.mxu1 }
 0x259   :  { %v2528_v2 = vpop.f32.mrf.mxu0  ;;  %2719 = vmatmul.mubr.bf16.gmra.mxu0 %v5963_v56 }
 0x25a   :  { %v3549_v6 = vmax.f32 %v3181_v0, 0.0  ;;  %v2529_v5 = vadd.f32 %v7228_v4, %v2528_v2  ;;  %v3185_v7 = vpop.f32.mrf.mxu1  ;;  %3376 = vmatmul.mubr.bf16.gmra.mxu1 %v5966_v60  ;;  %2726 = vmatprep.mubr.bf16.mxu0 %v5971_v61 }
 0x25b   :  { %v2530_v8 = vpop.f32.mrf.mxu0  ;;  %3383 = vmatprep.mubr.bf16.mxu1 %v5974_v63 }
 0x25c   :  { %v5274_v9 = vpack.c.bf16 %v3549_v6, %v3548_v3  ;;  %v3187_v10 = vpop.f32.mrf.mxu1  ;;  %v3186_v13 = vadd.f32 %v3185_v7, %v2529_v5  ;;  %v5987_v5 = vld [vmem:[%s7528_s0 + $0x8e0] ss:$16 sps:$4 sm:$0xff]  }
 0x25d   :  { %v2531_v11 = vpop.f32.mrf.mxu0  ;;  %v5990_v10 = vld [vmem:[%s7528_s0 + $0x8e8] ss:$16 sps:$4 sm:$0xff]  }
 0x25e   :  { %5492 = vst [vmem:[%s7530_s3 + $0x150] sm:$0xff] %v5274_v9   ;;  %v2532_v14 = vadd.f32 %v7228_v4, %v2531_v11  ;;  %v3188_v15 = vpop.f32.mrf.mxu1  ;;  %v3550_v23 = vmax.f32 %v3186_v13, 0.0  ;;  %v5995_v11 = vld [vmem:[%s7528_s0 + $0x904] ss:$16 sps:$4 sm:$0xff]   ;;  %v5998_v13 = vld [vmem:[%s7528_s0 + $0x90c] ss:$16 sps:$4 sm:$0xff]  }
 0x25f   :  { %v2533_v18 = vpop.f32.mrf.mxu0 }
 0x260   :  { %v3189_v20 = vadd.f32 %v3188_v15, %v2532_v14  ;;  %v3190_v21 = vpop.f32.mrf.mxu1 }
 0x261   :  { %v2536_v22 = vpop.f32.mrf.mxu0  ;;  %2727 = vmatmul.mubr.bf16.gmra.mxu0 %v5969_v12 }
 0x262   :  { %v3551_v24 = vmax.f32 %v3189_v20, 0.0  ;;  %v2537_v25 = vadd.f32 %v7228_v4, %v2536_v22  ;;  %v3193_v26 = vpop.f32.mrf.mxu1  ;;  %3384 = vmatmul.mubr.bf16.gmra.mxu1 %v5972_v16  ;;  %2734 = vmatprep.mubr.bf16.mxu0 %v5977_v17 }
 0x263   :  { %v2538_v27 = vpop.f32.mrf.mxu0  ;;  %3391 = vmatprep.mubr.bf16.mxu1 %v5980_v19 }
 0x264   :  { %v5279_v28 = vpack.c.bf16 %v3551_v24, %v3550_v23  ;;  %v3195_v29 = vpop.f32.mrf.mxu1  ;;  %v3194_v32 = vadd.f32 %v3193_v26, %v2537_v25  ;;  %v5993_v25 = vld [vmem:[%s7528_s0 + $0x900] ss:$16 sps:$4 sm:$0xff]  }
 0x265   :  { %v2539_v30 = vpop.f32.mrf.mxu0  ;;  %v5996_v29 = vld [vmem:[%s7528_s0 + $0x908] ss:$16 sps:$4 sm:$0xff]  }
 0x266   :  { %5493 = vst [vmem:[%s7530_s3 + $0x158] sm:$0xff] %v5279_v28   ;;  %v2540_v33 = vadd.f32 %v7228_v4, %v2539_v30  ;;  %v3196_v34 = vpop.f32.mrf.mxu1  ;;  %v3552_v42 = vmax.f32 %v3194_v32, 0.0  ;;  %v6001_v30 = vld [vmem:[%s7528_s0 + $0x924] ss:$16 sps:$4 sm:$0xff]   ;;  %v6004_v32 = vld [vmem:[%s7528_s0 + $0x92c] ss:$16 sps:$4 sm:$0xff]  }
 0x267   :  { %v2541_v37 = vpop.f32.mrf.mxu0 }
 0x268   :  { %v3197_v39 = vadd.f32 %v3196_v34, %v2540_v33  ;;  %v3198_v40 = vpop.f32.mrf.mxu1 }
 0x269   :  { %v2544_v41 = vpop.f32.mrf.mxu0  ;;  %2735 = vmatmul.mubr.bf16.gmra.mxu0 %v5975_v31 }
 0x26a   :  { %v3553_v43 = vmax.f32 %v3197_v39, 0.0  ;;  %v2545_v44 = vadd.f32 %v7228_v4, %v2544_v41  ;;  %v3201_v45 = vpop.f32.mrf.mxu1  ;;  %3392 = vmatmul.mubr.bf16.gmra.mxu1 %v5978_v35  ;;  %2742 = vmatprep.mubr.bf16.mxu0 %v5983_v36 }
 0x26b   :  { %v2546_v46 = vpop.f32.mrf.mxu0  ;;  %3399 = vmatprep.mubr.bf16.mxu1 %v5986_v38 }
 0x26c   :  { %v5284_v47 = vpack.c.bf16 %v3553_v43, %v3552_v42  ;;  %v3203_v48 = vpop.f32.mrf.mxu1  ;;  %v3202_v51 = vadd.f32 %v3201_v45, %v2545_v44  ;;  %v5999_v44 = vld [vmem:[%s7528_s0 + $0x920] ss:$16 sps:$4 sm:$0xff]  }
 0x26d   :  { %v2547_v49 = vpop.f32.mrf.mxu0  ;;  %v6002_v48 = vld [vmem:[%s7528_s0 + $0x928] ss:$16 sps:$4 sm:$0xff]  }
 0x26e   :  { %5494 = vst [vmem:[%s7530_s3 + $0x160] sm:$0xff] %v5284_v47   ;;  %v2548_v52 = vadd.f32 %v7228_v4, %v2547_v49  ;;  %v3204_v53 = vpop.f32.mrf.mxu1  ;;  %v3554_v61 = vmax.f32 %v3202_v51, 0.0  ;;  %v6007_v49 = vld [vmem:[%s7528_s0 + $0x944] ss:$16 sps:$4 sm:$0xff]   ;;  %v6010_v51 = vld [vmem:[%s7528_s0 + $0x94c] ss:$16 sps:$4 sm:$0xff]  }
 0x26f   :  { %v2549_v56 = vpop.f32.mrf.mxu0 }
 0x270   :  { %v3205_v58 = vadd.f32 %v3204_v53, %v2548_v52  ;;  %v3206_v59 = vpop.f32.mrf.mxu1 }
 0x271   :  { %v2552_v60 = vpop.f32.mrf.mxu0  ;;  %2743 = vmatmul.mubr.bf16.gmra.mxu0 %v5981_v50 }
 0x272   :  { %v3555_v62 = vmax.f32 %v3205_v58, 0.0  ;;  %v2553_v63 = vadd.f32 %v7228_v4, %v2552_v60  ;;  %v3209_v0 = vpop.f32.mrf.mxu1  ;;  %3400 = vmatmul.mubr.bf16.gmra.mxu1 %v5984_v54  ;;  %2750 = vmatprep.mubr.bf16.mxu0 %v5989_v55 }
 0x273   :  { %v2554_v1 = vpop.f32.mrf.mxu0  ;;  %3407 = vmatprep.mubr.bf16.mxu1 %v5992_v57 }
 0x274   :  { %v5289_v2 = vpack.c.bf16 %v3555_v62, %v3554_v61  ;;  %v3211_v3 = vpop.f32.mrf.mxu1  ;;  %v3210_v7 = vadd.f32 %v3209_v0, %v2553_v63  ;;  %v6005_v63 = vld [vmem:[%s7528_s0 + $0x940] ss:$16 sps:$4 sm:$0xff]  }
 0x275   :  { %v2555_v6 = vpop.f32.mrf.mxu0  ;;  %v6008_v3 = vld [vmem:[%s7528_s0 + $0x948] ss:$16 sps:$4 sm:$0xff]  }
 0x276   :  { %5495 = vst [vmem:[%s7530_s3 + $0x168] sm:$0xff] %v5289_v2   ;;  %v2556_v8 = vadd.f32 %v7228_v4, %v2555_v6  ;;  %v3212_v9 = vpop.f32.mrf.mxu1  ;;  %v3556_v17 = vmax.f32 %v3210_v7, 0.0  ;;  %v6013_v6 = vld [vmem:[%s7528_s0 + $0x964] ss:$16 sps:$4 sm:$0xff]   ;;  %v6016_v7 = vld [vmem:[%s7528_s0 + $0x96c] ss:$16 sps:$4 sm:$0xff]  }
 0x277   :  { %v2557_v12 = vpop.f32.mrf.mxu0 }
 0x278   :  { %v3213_v14 = vadd.f32 %v3212_v9, %v2556_v8  ;;  %v3214_v15 = vpop.f32.mrf.mxu1 }
 0x279   :  { %v2560_v16 = vpop.f32.mrf.mxu0  ;;  %2751 = vmatmul.mubr.bf16.gmra.mxu0 %v5987_v5 }
 0x27a   :  { %v3557_v18 = vmax.f32 %v3213_v14, 0.0  ;;  %v2561_v19 = vadd.f32 %v7228_v4, %v2560_v16  ;;  %v3217_v20 = vpop.f32.mrf.mxu1  ;;  %3408 = vmatmul.mubr.bf16.gmra.mxu1 %v5990_v10  ;;  %2758 = vmatprep.mubr.bf16.mxu0 %v5995_v11 }
 0x27b   :  { %v2562_v21 = vpop.f32.mrf.mxu0  ;;  %3415 = vmatprep.mubr.bf16.mxu1 %v5998_v13 }
 0x27c   :  { %v5294_v22 = vpack.c.bf16 %v3557_v18, %v3556_v17  ;;  %v3219_v23 = vpop.f32.mrf.mxu1  ;;  %v3218_v26 = vadd.f32 %v3217_v20, %v2561_v19  ;;  %v6011_v19 = vld [vmem:[%s7528_s0 + $0x960] ss:$16 sps:$4 sm:$0xff]  }
 0x27d   :  { %v2563_v24 = vpop.f32.mrf.mxu0  ;;  %v6014_v23 = vld [vmem:[%s7528_s0 + $0x968] ss:$16 sps:$4 sm:$0xff]  }
 0x27e   :  { %5496 = vst [vmem:[%s7530_s3 + $0x170] sm:$0xff] %v5294_v22   ;;  %v2564_v27 = vadd.f32 %v7228_v4, %v2563_v24  ;;  %v3220_v28 = vpop.f32.mrf.mxu1  ;;  %v3558_v36 = vmax.f32 %v3218_v26, 0.0  ;;  %v6019_v24 = vld [vmem:[%s7528_s0 + $0x984] ss:$16 sps:$4 sm:$0xff]   ;;  %v6022_v26 = vld [vmem:[%s7528_s0 + $0x98c] ss:$16 sps:$4 sm:$0xff]  }
 0x27f   :  { %v2565_v31 = vpop.f32.mrf.mxu0 }
 0x280   :  { %v3221_v33 = vadd.f32 %v3220_v28, %v2564_v27  ;;  %v3222_v34 = vpop.f32.mrf.mxu1 }
 0x281   :  { %v2568_v35 = vpop.f32.mrf.mxu0  ;;  %2759 = vmatmul.mubr.bf16.gmra.mxu0 %v5993_v25 }
 0x282   :  { %v3559_v37 = vmax.f32 %v3221_v33, 0.0  ;;  %v2569_v38 = vadd.f32 %v7228_v4, %v2568_v35  ;;  %v3225_v39 = vpop.f32.mrf.mxu1  ;;  %3416 = vmatmul.mubr.bf16.gmra.mxu1 %v5996_v29  ;;  %2766 = vmatprep.mubr.bf16.mxu0 %v6001_v30 }
 0x283   :  { %v2570_v40 = vpop.f32.mrf.mxu0  ;;  %3423 = vmatprep.mubr.bf16.mxu1 %v6004_v32 }
 0x284   :  { %v5299_v41 = vpack.c.bf16 %v3559_v37, %v3558_v36  ;;  %v3227_v42 = vpop.f32.mrf.mxu1  ;;  %v3226_v45 = vadd.f32 %v3225_v39, %v2569_v38  ;;  %v6017_v38 = vld [vmem:[%s7528_s0 + $0x980] ss:$16 sps:$4 sm:$0xff]  }
 0x285   :  { %v2571_v43 = vpop.f32.mrf.mxu0  ;;  %v6020_v42 = vld [vmem:[%s7528_s0 + $0x988] ss:$16 sps:$4 sm:$0xff]  }
 0x286   :  { %5497 = vst [vmem:[%s7530_s3 + $0x178] sm:$0xff] %v5299_v41   ;;  %v2572_v46 = vadd.f32 %v7228_v4, %v2571_v43  ;;  %v3228_v47 = vpop.f32.mrf.mxu1  ;;  %v3560_v55 = vmax.f32 %v3226_v45, 0.0  ;;  %v6025_v43 = vld [vmem:[%s7528_s0 + $0x9a4] ss:$16 sps:$4 sm:$0xff]   ;;  %v6028_v45 = vld [vmem:[%s7528_s0 + $0x9ac] ss:$16 sps:$4 sm:$0xff]  }
 0x287   :  { %v2573_v50 = vpop.f32.mrf.mxu0 }
 0x288   :  { %v3229_v52 = vadd.f32 %v3228_v47, %v2572_v46  ;;  %v3230_v53 = vpop.f32.mrf.mxu1 }
 0x289   :  { %v2576_v54 = vpop.f32.mrf.mxu0  ;;  %2767 = vmatmul.mubr.bf16.gmra.mxu0 %v5999_v44 }
 0x28a   :  { %v3561_v56 = vmax.f32 %v3229_v52, 0.0  ;;  %v2577_v57 = vadd.f32 %v7228_v4, %v2576_v54  ;;  %v3233_v58 = vpop.f32.mrf.mxu1  ;;  %3424 = vmatmul.mubr.bf16.gmra.mxu1 %v6002_v48  ;;  %2774 = vmatprep.mubr.bf16.mxu0 %v6007_v49 }
 0x28b   :  { %v2578_v59 = vpop.f32.mrf.mxu0  ;;  %3431 = vmatprep.mubr.bf16.mxu1 %v6010_v51 }
 0x28c   :  { %v5304_v60 = vpack.c.bf16 %v3561_v56, %v3560_v55  ;;  %v3235_v61 = vpop.f32.mrf.mxu1  ;;  %v3234_v0 = vadd.f32 %v3233_v58, %v2577_v57  ;;  %v6023_v57 = vld [vmem:[%s7528_s0 + $0x9a0] ss:$16 sps:$4 sm:$0xff]  }
 0x28d   :  { %v2579_v62 = vpop.f32.mrf.mxu0  ;;  %v6026_v61 = vld [vmem:[%s7528_s0 + $0x9a8] ss:$16 sps:$4 sm:$0xff]  }
 0x28e   :  { %5498 = vst [vmem:[%s7530_s3 + $0x180] sm:$0xff] %v5304_v60   ;;  %v2580_v1 = vadd.f32 %v7228_v4, %v2579_v62  ;;  %v3236_v2 = vpop.f32.mrf.mxu1  ;;  %v3562_v11 = vmax.f32 %v3234_v0, 0.0 }
 0x28f   :  { %v2581_v5 = vpop.f32.mrf.mxu0 }
 0x290   :  { %v3237_v8 = vadd.f32 %v3236_v2, %v2580_v1  ;;  %v3238_v9 = vpop.f32.mrf.mxu1 }
 0x291   :  { %v2584_v10 = vpop.f32.mrf.mxu0  ;;  %2775 = vmatmul.mubr.bf16.gmra.mxu0 %v6005_v63 }
 0x292   :  { %v3563_v12 = vmax.f32 %v3237_v8, 0.0  ;;  %v2585_v13 = vadd.f32 %v7228_v4, %v2584_v10  ;;  %v3241_v14 = vpop.f32.mrf.mxu1  ;;  %3432 = vmatmul.mubr.bf16.gmra.mxu1 %v6008_v3  ;;  %2782 = vmatprep.mubr.bf16.mxu0 %v6013_v6 }
 0x293   :  { %v2586_v15 = vpop.f32.mrf.mxu0  ;;  %3439 = vmatprep.mubr.bf16.mxu1 %v6016_v7 }
 0x294   :  { %v5309_v16 = vpack.c.bf16 %v3563_v12, %v3562_v11  ;;  %v3243_v17 = vpop.f32.mrf.mxu1  ;;  %v3242_v20 = vadd.f32 %v3241_v14, %v2585_v13 }
 0x295   :  { %v2587_v18 = vpop.f32.mrf.mxu0 }
 0x296   :  { %5499 = vst [vmem:[%s7530_s3 + $0x188] sm:$0xff] %v5309_v16   ;;  %v2588_v21 = vadd.f32 %v7228_v4, %v2587_v18  ;;  %v3244_v22 = vpop.f32.mrf.mxu1  ;;  %v3564_v30 = vmax.f32 %v3242_v20, 0.0 }
 0x297   :  { %v2589_v25 = vpop.f32.mrf.mxu0 }
 0x298   :  { %v3245_v27 = vadd.f32 %v3244_v22, %v2588_v21  ;;  %v3246_v28 = vpop.f32.mrf.mxu1 }
 0x299   :  { %v2592_v29 = vpop.f32.mrf.mxu0  ;;  %2783 = vmatmul.mubr.bf16.gmra.mxu0 %v6011_v19 }
 0x29a   :  { %v3565_v31 = vmax.f32 %v3245_v27, 0.0  ;;  %v2593_v32 = vadd.f32 %v7228_v4, %v2592_v29  ;;  %v3249_v33 = vpop.f32.mrf.mxu1  ;;  %3440 = vmatmul.mubr.bf16.gmra.mxu1 %v6014_v23  ;;  %2790 = vmatprep.mubr.bf16.mxu0 %v6019_v24 }
 0x29b   :  { %v2594_v34 = vpop.f32.mrf.mxu0  ;;  %3447 = vmatprep.mubr.bf16.mxu1 %v6022_v26 }
 0x29c   :  { %v5314_v35 = vpack.c.bf16 %v3565_v31, %v3564_v30  ;;  %v3251_v36 = vpop.f32.mrf.mxu1  ;;  %v3250_v39 = vadd.f32 %v3249_v33, %v2593_v32 }
 0x29d   :  { %v2595_v37 = vpop.f32.mrf.mxu0 }
 0x29e   :  { %5500 = vst [vmem:[%s7530_s3 + $0x190] sm:$0xff] %v5314_v35   ;;  %v2596_v40 = vadd.f32 %v7228_v4, %v2595_v37  ;;  %v3252_v41 = vpop.f32.mrf.mxu1  ;;  %v3566_v49 = vmax.f32 %v3250_v39, 0.0 }
 0x29f   :  { %v2597_v44 = vpop.f32.mrf.mxu0 }
 0x2a0   :  { %v3253_v46 = vadd.f32 %v3252_v41, %v2596_v40  ;;  %v3254_v47 = vpop.f32.mrf.mxu1 }
 0x2a1   :  { %v2600_v48 = vpop.f32.mrf.mxu0  ;;  %2791 = vmatmul.mubr.bf16.gmra.mxu0 %v6017_v38 }
 0x2a2   :  { %v3567_v50 = vmax.f32 %v3253_v46, 0.0  ;;  %v2601_v51 = vadd.f32 %v7228_v4, %v2600_v48  ;;  %v3257_v52 = vpop.f32.mrf.mxu1  ;;  %3448 = vmatmul.mubr.bf16.gmra.mxu1 %v6020_v42  ;;  %2798 = vmatprep.mubr.bf16.mxu0 %v6025_v43 }
 0x2a3   :  { %v2602_v53 = vpop.f32.mrf.mxu0  ;;  %3455 = vmatprep.mubr.bf16.mxu1 %v6028_v45 }
 0x2a4   :  { %v5319_v54 = vpack.c.bf16 %v3567_v50, %v3566_v49  ;;  %v3259_v55 = vpop.f32.mrf.mxu1  ;;  %v3258_v58 = vadd.f32 %v3257_v52, %v2601_v51 }
 0x2a5   :  { %v2603_v56 = vpop.f32.mrf.mxu0 }
 0x2a6   :  { %5501 = vst [vmem:[%s7530_s3 + $0x198] sm:$0xff] %v5319_v54   ;;  %v2604_v59 = vadd.f32 %v7228_v4, %v2603_v56  ;;  %v3260_v60 = vpop.f32.mrf.mxu1  ;;  %v3568_v2 = vmax.f32 %v3258_v58, 0.0 }
 0x2a7   :  { %v2605_v62 = vpop.f32.mrf.mxu0 }
 0x2a8   :  { %v3261_v63 = vadd.f32 %v3260_v60, %v2604_v59  ;;  %v3262_v0 = vpop.f32.mrf.mxu1 }
 0x2a9   :  { %v2608_v1 = vpop.f32.mrf.mxu0  ;;  %2799 = vmatmul.mubr.bf16.gmra.mxu0 %v6023_v57 }
 0x2aa   :  { %v3569_v3 = vmax.f32 %v3261_v63, 0.0  ;;  %v2609_v6 = vadd.f32 %v7228_v4, %v2608_v1  ;;  %v3265_v5 = vpop.f32.mrf.mxu1  ;;  %3456 = vmatmul.mubr.bf16.gmra.mxu1 %v6026_v61 }
 0x2ab   :  { %v2610_v7 = vpop.f32.mrf.mxu0 }
 0x2ac   :  { %v5324_v8 = vpack.c.bf16 %v3569_v3, %v3568_v2  ;;  %v3267_v9 = vpop.f32.mrf.mxu1  ;;  %v3266_v11 = vadd.f32 %v3265_v5, %v2609_v6 }
 0x2ad   :  { %v2611_v10 = vpop.f32.mrf.mxu0 }
 0x2ae   :  { %5502 = vst [vmem:[%s7530_s3 + $0x1a0] sm:$0xff] %v5324_v8   ;;  %v2612_v12 = vadd.f32 %v7228_v4, %v2611_v10  ;;  %v3268_v13 = vpop.f32.mrf.mxu1  ;;  %v3570_v18 = vmax.f32 %v3266_v11, 0.0 }
 0x2af   :  { %v2613_v14 = vpop.f32.mrf.mxu0 }
 0x2b0   :  { %v3269_v15 = vadd.f32 %v3268_v13, %v2612_v12  ;;  %v3270_v16 = vpop.f32.mrf.mxu1 }
 0x2b1   :  { %v2616_v17 = vpop.f32.mrf.mxu0 }
 0x2b2   :  { %v3571_v19 = vmax.f32 %v3269_v15, 0.0  ;;  %v2617_v20 = vadd.f32 %v7228_v4, %v2616_v17  ;;  %v3273_v21 = vpop.f32.mrf.mxu1 }
 0x2b3   :  { %v2618_v22 = vpop.f32.mrf.mxu0 }
 0x2b4   :  { %v5329_v23 = vpack.c.bf16 %v3571_v19, %v3570_v18  ;;  %v3275_v24 = vpop.f32.mrf.mxu1  ;;  %v3274_v26 = vadd.f32 %v3273_v21, %v2617_v20 }
 0x2b5   :  { %v2619_v25 = vpop.f32.mrf.mxu0 }
 0x2b6   :  { %5503 = vst [vmem:[%s7530_s3 + $0x1a8] sm:$0xff] %v5329_v23   ;;  %v2620_v27 = vadd.f32 %v7228_v4, %v2619_v25  ;;  %v3276_v28 = vpop.f32.mrf.mxu1  ;;  %v3572_v33 = vmax.f32 %v3274_v26, 0.0 }
 0x2b7   :  { %v2621_v29 = vpop.f32.mrf.mxu0 }
 0x2b8   :  { %v3277_v30 = vadd.f32 %v3276_v28, %v2620_v27  ;;  %v3278_v31 = vpop.f32.mrf.mxu1 }
 0x2b9   :  { %v2624_v32 = vpop.f32.mrf.mxu0 }
 0x2ba   :  { %v3573_v34 = vmax.f32 %v3277_v30, 0.0  ;;  %v2625_v35 = vadd.f32 %v7228_v4, %v2624_v32  ;;  %v3281_v36 = vpop.f32.mrf.mxu1 }
 0x2bb   :  { %v2626_v37 = vpop.f32.mrf.mxu0 }
 0x2bc   :  { %v5334_v38 = vpack.c.bf16 %v3573_v34, %v3572_v33  ;;  %v3283_v39 = vpop.f32.mrf.mxu1  ;;  %v3282_v41 = vadd.f32 %v3281_v36, %v2625_v35 }
 0x2bd   :  { %v2627_v40 = vpop.f32.mrf.mxu0 }
 0x2be   :  { %5504 = vst [vmem:[%s7530_s3 + $0x1b0] sm:$0xff] %v5334_v38   ;;  %v2628_v42 = vadd.f32 %v7228_v4, %v2627_v40  ;;  %v3284_v43 = vpop.f32.mrf.mxu1  ;;  %v3574_v48 = vmax.f32 %v3282_v41, 0.0 }
 0x2bf   :  { %v2629_v44 = vpop.f32.mrf.mxu0 }
 0x2c0   :  { %v3285_v45 = vadd.f32 %v3284_v43, %v2628_v42  ;;  %v3286_v46 = vpop.f32.mrf.mxu1 }
 0x2c1   :  { %v2632_v47 = vpop.f32.mrf.mxu0 }
 0x2c2   :  { %v3575_v49 = vmax.f32 %v3285_v45, 0.0  ;;  %v2633_v50 = vadd.f32 %v7228_v4, %v2632_v47  ;;  %v3289_v51 = vpop.f32.mrf.mxu1 }
 0x2c3   :  { %v2634_v52 = vpop.f32.mrf.mxu0 }
 0x2c4   :  { %v5339_v53 = vpack.c.bf16 %v3575_v49, %v3574_v48  ;;  %v3291_v54 = vpop.f32.mrf.mxu1  ;;  %v3290_v56 = vadd.f32 %v3289_v51, %v2633_v50 }
 0x2c5   :  { %v2635_v55 = vpop.f32.mrf.mxu0 }
 0x2c6   :  { %5505 = vst [vmem:[%s7530_s3 + $0x1b8] sm:$0xff] %v5339_v53   ;;  %v2636_v57 = vadd.f32 %v7228_v4, %v2635_v55  ;;  %v3292_v58 = vpop.f32.mrf.mxu1  ;;  %v3576_v63 = vmax.f32 %v3290_v56, 0.0 }
 0x2c7   :  { %v2637_v59 = vpop.f32.mrf.mxu0 }
 0x2c8   :  { %v3293_v60 = vadd.f32 %v3292_v58, %v2636_v57  ;;  %v3294_v61 = vpop.f32.mrf.mxu1 }
 0x2c9   :  { %v2640_v62 = vpop.f32.mrf.mxu0 }
 0x2ca   :  { %v3577_v0 = vmax.f32 %v3293_v60, 0.0  ;;  %v2641_v1 = vadd.f32 %v7228_v4, %v2640_v62  ;;  %v3297_v2 = vpop.f32.mrf.mxu1 }
 0x2cb   :  { %v2642_v3 = vpop.f32.mrf.mxu0 }
 0x2cc   :  { %v5344_v6 = vpack.c.bf16 %v3577_v0, %v3576_v63  ;;  %v3299_v5 = vpop.f32.mrf.mxu1  ;;  %v3298_v8 = vadd.f32 %v3297_v2, %v2641_v1 }
 0x2cd   :  { %v2643_v7 = vpop.f32.mrf.mxu0 }
 0x2ce   :  { %5506 = vst [vmem:[%s7530_s3 + $0x1c0] sm:$0xff] %v5344_v6   ;;  %v2644_v9 = vadd.f32 %v7228_v4, %v2643_v7  ;;  %v3300_v10 = vpop.f32.mrf.mxu1  ;;  %v3578_v15 = vmax.f32 %v3298_v8, 0.0 }
 0x2cf   :  { %v2645_v11 = vpop.f32.mrf.mxu0 }
 0x2d0   :  { %v3301_v12 = vadd.f32 %v3300_v10, %v2644_v9  ;;  %v3302_v13 = vpop.f32.mrf.mxu1 }
 0x2d1   :  { %v2648_v14 = vpop.f32.mrf.mxu0 }
 0x2d2   :  { %v3579_v16 = vmax.f32 %v3301_v12, 0.0  ;;  %v2649_v17 = vadd.f32 %v7228_v4, %v2648_v14  ;;  %v3305_v18 = vpop.f32.mrf.mxu1 }
 0x2d3   :  { %v2650_v19 = vpop.f32.mrf.mxu0 }
 0x2d4   :  { %v5349_v20 = vpack.c.bf16 %v3579_v16, %v3578_v15  ;;  %v3307_v21 = vpop.f32.mrf.mxu1  ;;  %v3306_v23 = vadd.f32 %v3305_v18, %v2649_v17 }
 0x2d5   :  { %v2651_v22 = vpop.f32.mrf.mxu0 }
 0x2d6   :  { %5507 = vst [vmem:[%s7530_s3 + $0x1c8] sm:$0xff] %v5349_v20   ;;  %v2652_v24 = vadd.f32 %v7228_v4, %v2651_v22  ;;  %v3308_v25 = vpop.f32.mrf.mxu1  ;;  %v3580_v30 = vmax.f32 %v3306_v23, 0.0 }
 0x2d7   :  { %v2653_v26 = vpop.f32.mrf.mxu0 }
 0x2d8   :  { %v3309_v27 = vadd.f32 %v3308_v25, %v2652_v24  ;;  %v3310_v28 = vpop.f32.mrf.mxu1 }
 0x2d9   :  { %v2656_v29 = vpop.f32.mrf.mxu0 }
 0x2da   :  { %v3581_v31 = vmax.f32 %v3309_v27, 0.0  ;;  %v2657_v32 = vadd.f32 %v7228_v4, %v2656_v29  ;;  %v3313_v33 = vpop.f32.mrf.mxu1 }
 0x2db   :  { %v2658_v34 = vpop.f32.mrf.mxu0 }
 0x2dc   :  { %v5354_v35 = vpack.c.bf16 %v3581_v31, %v3580_v30  ;;  %v3315_v36 = vpop.f32.mrf.mxu1  ;;  %v3314_v38 = vadd.f32 %v3313_v33, %v2657_v32 }
 0x2dd   :  { %v2659_v37 = vpop.f32.mrf.mxu0 }
 0x2de   :  { %5508 = vst [vmem:[%s7530_s3 + $0x1d0] sm:$0xff] %v5354_v35   ;;  %v2660_v39 = vadd.f32 %v7228_v4, %v2659_v37  ;;  %v3316_v40 = vpop.f32.mrf.mxu1  ;;  %v3582_v45 = vmax.f32 %v3314_v38, 0.0 }
 0x2df   :  { %v2661_v41 = vpop.f32.mrf.mxu0 }
 0x2e0   :  { %v3317_v42 = vadd.f32 %v3316_v40, %v2660_v39  ;;  %v3318_v43 = vpop.f32.mrf.mxu1 }
 0x2e1   :  { %v2664_v44 = vpop.f32.mrf.mxu0 }
 0x2e2   :  { %v3583_v46 = vmax.f32 %v3317_v42, 0.0  ;;  %v2665_v47 = vadd.f32 %v7228_v4, %v2664_v44  ;;  %v3321_v48 = vpop.f32.mrf.mxu1 }
 0x2e3   :  { %v2666_v49 = vpop.f32.mrf.mxu0 }
 0x2e4   :  { %v5359_v50 = vpack.c.bf16 %v3583_v46, %v3582_v45  ;;  %v3323_v51 = vpop.f32.mrf.mxu1  ;;  %v3322_v53 = vadd.f32 %v3321_v48, %v2665_v47 }
 0x2e5   :  { %v2667_v52 = vpop.f32.mrf.mxu0 }
 0x2e6   :  { %5509 = vst [vmem:[%s7530_s3 + $0x1d8] sm:$0xff] %v5359_v50   ;;  %v2668_v54 = vadd.f32 %v7228_v4, %v2667_v52  ;;  %v3324_v55 = vpop.f32.mrf.mxu1  ;;  %v3584_v60 = vmax.f32 %v3322_v53, 0.0 }
 0x2e7   :  { %v2669_v56 = vpop.f32.mrf.mxu0 }
 0x2e8   :  { %v3325_v57 = vadd.f32 %v3324_v55, %v2668_v54  ;;  %v3326_v58 = vpop.f32.mrf.mxu1 }
 0x2e9   :  { %v2672_v59 = vpop.f32.mrf.mxu0 }
 0x2ea   :  { %v3585_v61 = vmax.f32 %v3325_v57, 0.0  ;;  %v2673_v62 = vadd.f32 %v7228_v4, %v2672_v59  ;;  %v3329_v63 = vpop.f32.mrf.mxu1 }
 0x2eb   :  { %v2674_v0 = vpop.f32.mrf.mxu0 }
 0x2ec   :  { %v5364_v1 = vpack.c.bf16 %v3585_v61, %v3584_v60  ;;  %v3331_v2 = vpop.f32.mrf.mxu1  ;;  %v3330_v6 = vadd.f32 %v3329_v63, %v2673_v62 }
 0x2ed   :  { %v2675_v3 = vpop.f32.mrf.mxu0 }
 0x2ee   :  { %5510 = vst [vmem:[%s7530_s3 + $0x1e0] sm:$0xff] %v5364_v1   ;;  %v2676_v5 = vadd.f32 %v7228_v4, %v2675_v3  ;;  %v3332_v7 = vpop.f32.mrf.mxu1  ;;  %v3586_v12 = vmax.f32 %v3330_v6, 0.0 }
 0x2ef   :  { %v2677_v8 = vpop.f32.mrf.mxu0 }
 0x2f0   :  { %v3333_v9 = vadd.f32 %v3332_v7, %v2676_v5  ;;  %v3334_v10 = vpop.f32.mrf.mxu1 }
 0x2f1   :  { %v2680_v11 = vpop.f32.mrf.mxu0 }
 0x2f2   :  { %v3587_v13 = vmax.f32 %v3333_v9, 0.0  ;;  %v2681_v14 = vadd.f32 %v7228_v4, %v2680_v11  ;;  %v3337_v15 = vpop.f32.mrf.mxu1 }
 0x2f3   :  { %v2682_v16 = vpop.f32.mrf.mxu0 }
 0x2f4   :  { %v5369_v17 = vpack.c.bf16 %v3587_v13, %v3586_v12  ;;  %v3339_v18 = vpop.f32.mrf.mxu1  ;;  %v3338_v20 = vadd.f32 %v3337_v15, %v2681_v14 }
 0x2f5   :  { %v2683_v19 = vpop.f32.mrf.mxu0 }
 0x2f6   :  { %5511 = vst [vmem:[%s7530_s3 + $0x1e8] sm:$0xff] %v5369_v17   ;;  %v2684_v21 = vadd.f32 %v7228_v4, %v2683_v19  ;;  %v3340_v22 = vpop.f32.mrf.mxu1  ;;  %v3588_v27 = vmax.f32 %v3338_v20, 0.0 }
 0x2f7   :  { %v2685_v23 = vpop.f32.mrf.mxu0 }
 0x2f8   :  { %v3341_v24 = vadd.f32 %v3340_v22, %v2684_v21  ;;  %v3342_v25 = vpop.f32.mrf.mxu1 }
 0x2f9   :  { %v2688_v26 = vpop.f32.mrf.mxu0 }
 0x2fa   :  { %v3589_v28 = vmax.f32 %v3341_v24, 0.0  ;;  %v2689_v29 = vadd.f32 %v7228_v4, %v2688_v26  ;;  %v3345_v30 = vpop.f32.mrf.mxu1 }
 0x2fb   :  { %v2690_v31 = vpop.f32.mrf.mxu0 }
 0x2fc   :  { %v5374_v32 = vpack.c.bf16 %v3589_v28, %v3588_v27  ;;  %v3347_v33 = vpop.f32.mrf.mxu1  ;;  %v3346_v35 = vadd.f32 %v3345_v30, %v2689_v29 }
 0x2fd   :  { %v2691_v34 = vpop.f32.mrf.mxu0 }
 0x2fe   :  { %5512 = vst [vmem:[%s7530_s3 + $0x1f0] sm:$0xff] %v5374_v32   ;;  %v2692_v36 = vadd.f32 %v7228_v4, %v2691_v34  ;;  %v3348_v37 = vpop.f32.mrf.mxu1  ;;  %v3590_v42 = vmax.f32 %v3346_v35, 0.0 }
 0x2ff   :  { %v2693_v38 = vpop.f32.mrf.mxu0 }
 0x300   :  { %v3349_v39 = vadd.f32 %v3348_v37, %v2692_v36  ;;  %v3350_v40 = vpop.f32.mrf.mxu1 }
 0x301   :  { %v2696_v41 = vpop.f32.mrf.mxu0 }
 0x302   :  { %v3591_v43 = vmax.f32 %v3349_v39, 0.0  ;;  %v2697_v44 = vadd.f32 %v7228_v4, %v2696_v41  ;;  %v3353_v45 = vpop.f32.mrf.mxu1 }
 0x303   :  { %v2698_v46 = vpop.f32.mrf.mxu0 }
 0x304   :  { %v5379_v47 = vpack.c.bf16 %v3591_v43, %v3590_v42  ;;  %v3355_v48 = vpop.f32.mrf.mxu1  ;;  %v3354_v50 = vadd.f32 %v3353_v45, %v2697_v44 }
 0x305   :  { %v2699_v49 = vpop.f32.mrf.mxu0 }
 0x306   :  { %5513 = vst [vmem:[%s7530_s3 + $0x1f8] sm:$0xff] %v5379_v47   ;;  %v2700_v51 = vadd.f32 %v7228_v4, %v2699_v49  ;;  %v3356_v52 = vpop.f32.mrf.mxu1  ;;  %v3592_v57 = vmax.f32 %v3354_v50, 0.0 }
 0x307   :  { %v2701_v53 = vpop.f32.mrf.mxu0 }
 0x308   :  { %v3357_v54 = vadd.f32 %v3356_v52, %v2700_v51  ;;  %v3358_v55 = vpop.f32.mrf.mxu1 }
 0x309   :  { %v2704_v56 = vpop.f32.mrf.mxu0 }
 0x30a   :  { %v3593_v58 = vmax.f32 %v3357_v54, 0.0  ;;  %v2705_v59 = vadd.f32 %v7228_v4, %v2704_v56  ;;  %v3361_v60 = vpop.f32.mrf.mxu1 }
 0x30b   :  { %v2706_v61 = vpop.f32.mrf.mxu0 }
 0x30c   :  { %v5384_v62 = vpack.c.bf16 %v3593_v58, %v3592_v57  ;;  %v3363_v63 = vpop.f32.mrf.mxu1  ;;  %v3362_v1 = vadd.f32 %v3361_v60, %v2705_v59 }
 0x30d   :  { %v2707_v0 = vpop.f32.mrf.mxu0 }
 0x30e   :  { %5514 = vst [vmem:[%s7530_s3 + $0x200] sm:$0xff] %v5384_v62   ;;  %v2708_v2 = vadd.f32 %v7228_v4, %v2707_v0  ;;  %v3364_v3 = vpop.f32.mrf.mxu1  ;;  %v3594_v9 = vmax.f32 %v3362_v1, 0.0 }
 0x30f   :  { %v2709_v6 = vpop.f32.mrf.mxu0 }
 0x310   :  { %v3365_v5 = vadd.f32 %v3364_v3, %v2708_v2  ;;  %v3366_v7 = vpop.f32.mrf.mxu1 }
 0x311   :  { %v2712_v8 = vpop.f32.mrf.mxu0 }
 0x312   :  { %v3595_v10 = vmax.f32 %v3365_v5, 0.0  ;;  %v2713_v11 = vadd.f32 %v7228_v4, %v2712_v8  ;;  %v3369_v12 = vpop.f32.mrf.mxu1 }
 0x313   :  { %v2714_v13 = vpop.f32.mrf.mxu0 }
 0x314   :  { %v5389_v14 = vpack.c.bf16 %v3595_v10, %v3594_v9  ;;  %v3371_v15 = vpop.f32.mrf.mxu1  ;;  %v3370_v17 = vadd.f32 %v3369_v12, %v2713_v11 }
 0x315   :  { %v2715_v16 = vpop.f32.mrf.mxu0  ;;  %v7486_v15 = vld [vmem:[%s7529_s2] ss:$0 sm:$0xff] }
 0x316   :  { %5515 = vst [vmem:[%s7530_s3 + $0x208] sm:$0xff] %v5389_v14   ;;  %v2716_v18 = vadd.f32 %v7228_v4, %v2715_v16  ;;  %v3372_v19 = vpop.f32.mrf.mxu1  ;;  %v3596_v24 = vmax.f32 %v3370_v17, 0.0 }
 0x317   :  { %v2717_v20 = vpop.f32.mrf.mxu0 }
 0x318   :  { %v3373_v21 = vadd.f32 %v3372_v19, %v2716_v18  ;;  %v3374_v22 = vpop.f32.mrf.mxu1 }
 0x319   :  { %v2720_v23 = vpop.f32.mrf.mxu0 }
 0x31a   :  { %v3597_v25 = vmax.f32 %v3373_v21, 0.0  ;;  %v2721_v26 = vadd.f32 %v7228_v4, %v2720_v23  ;;  %v3377_v27 = vpop.f32.mrf.mxu1 }
 0x31b   :  { %v2722_v28 = vpop.f32.mrf.mxu0 }
 0x31c   :  { %v5394_v29 = vpack.c.bf16 %v3597_v25, %v3596_v24  ;;  %v3379_v30 = vpop.f32.mrf.mxu1  ;;  %v3378_v32 = vadd.f32 %v3377_v27, %v2721_v26 }
 0x31d   :  { %v2723_v31 = vpop.f32.mrf.mxu0 }
 0x31e   :  { %5516 = vst [vmem:[%s7530_s3 + $0x210] sm:$0xff] %v5394_v29   ;;  %v2724_v33 = vadd.f32 %v7228_v4, %v2723_v31  ;;  %v3380_v34 = vpop.f32.mrf.mxu1  ;;  %v3598_v39 = vmax.f32 %v3378_v32, 0.0 }
 0x31f   :  { %v2725_v35 = vpop.f32.mrf.mxu0 }
 0x320   :  { %v3381_v36 = vadd.f32 %v3380_v34, %v2724_v33  ;;  %v3382_v37 = vpop.f32.mrf.mxu1 }
 0x321   :  { %v2728_v38 = vpop.f32.mrf.mxu0 }
 0x322   :  { %v3599_v40 = vmax.f32 %v3381_v36, 0.0  ;;  %v2729_v41 = vadd.f32 %v7228_v4, %v2728_v38  ;;  %v3385_v42 = vpop.f32.mrf.mxu1 }
 0x323   :  { %v2730_v43 = vpop.f32.mrf.mxu0 }
 0x324   :  { %v5399_v44 = vpack.c.bf16 %v3599_v40, %v3598_v39  ;;  %v3387_v45 = vpop.f32.mrf.mxu1  ;;  %v3386_v47 = vadd.f32 %v3385_v42, %v2729_v41 }
 0x325   :  { %v2731_v46 = vpop.f32.mrf.mxu0 }
 0x326   :  { %5517 = vst [vmem:[%s7530_s3 + $0x218] sm:$0xff] %v5399_v44   ;;  %v2732_v48 = vadd.f32 %v7228_v4, %v2731_v46  ;;  %v3388_v49 = vpop.f32.mrf.mxu1  ;;  %v3600_v54 = vmax.f32 %v3386_v47, 0.0 }
 0x327   :  { %v2733_v50 = vpop.f32.mrf.mxu0 }
 0x328   :  { %v3389_v51 = vadd.f32 %v3388_v49, %v2732_v48  ;;  %v3390_v52 = vpop.f32.mrf.mxu1 }
 0x329   :  { %v2736_v53 = vpop.f32.mrf.mxu0 }
 0x32a   :  { %v3601_v55 = vmax.f32 %v3389_v51, 0.0  ;;  %v2737_v56 = vadd.f32 %v7228_v4, %v2736_v53  ;;  %v3393_v57 = vpop.f32.mrf.mxu1 }
 0x32b   :  { %v2738_v58 = vpop.f32.mrf.mxu0 }
 0x32c   :  { %v5404_v59 = vpack.c.bf16 %v3601_v55, %v3600_v54  ;;  %v3395_v60 = vpop.f32.mrf.mxu1  ;;  %v3394_v62 = vadd.f32 %v3393_v57, %v2737_v56 }
 0x32d   :  { %v2739_v61 = vpop.f32.mrf.mxu0 }
 0x32e   :  { %5518 = vst [vmem:[%s7530_s3 + $0x220] sm:$0xff] %v5404_v59   ;;  %v2740_v63 = vadd.f32 %v7228_v4, %v2739_v61  ;;  %v3396_v0 = vpop.f32.mrf.mxu1  ;;  %v3602_v5 = vmax.f32 %v3394_v62, 0.0 }
 0x32f   :  { %v2741_v1 = vpop.f32.mrf.mxu0 }
 0x330   :  { %v3397_v2 = vadd.f32 %v3396_v0, %v2740_v63  ;;  %v3398_v3 = vpop.f32.mrf.mxu1 }
 0x331   :  { %v2744_v6 = vpop.f32.mrf.mxu0 }
 0x332   :  { %v3603_v7 = vmax.f32 %v3397_v2, 0.0  ;;  %v2745_v8 = vadd.f32 %v7228_v4, %v2744_v6  ;;  %v3401_v9 = vpop.f32.mrf.mxu1 }
 0x333   :  { %v2746_v10 = vpop.f32.mrf.mxu0 }
 0x334   :  { %v5409_v11 = vpack.c.bf16 %v3603_v7, %v3602_v5  ;;  %v3403_v12 = vpop.f32.mrf.mxu1  ;;  %v3402_v14 = vadd.f32 %v3401_v9, %v2745_v8 }
 0x335   :  { %v2747_v13 = vpop.f32.mrf.mxu0 }
 0x336   :  { %5519 = vst [vmem:[%s7530_s3 + $0x228] sm:$0xff] %v5409_v11   ;;  %v2748_v16 = vadd.f32 %v7486_v15, %v2747_v13  ;;  %v3404_v17 = vpop.f32.mrf.mxu1  ;;  %v3604_v21 = vmax.f32 %v3402_v14, 0.0 }
 0x337   :  { %v2749_v18 = vpop.f32.mrf.mxu0 }
 0x338   :  { %v3405_v4 = vadd.f32 %v3404_v17, %v2748_v16  ;;  %v3406_v19 = vpop.f32.mrf.mxu1 }
 0x339   :  { %v2752_v20 = vpop.f32.mrf.mxu0 }
 0x33a   :  { %v3605_v22 = vmax.f32 %v3405_v4, 0.0  ;;  %v2753_v23 = vadd.f32 %v7486_v15, %v2752_v20  ;;  %v3409_v24 = vpop.f32.mrf.mxu1 }
 0x33b   :  { %v2754_v25 = vpop.f32.mrf.mxu0 }
 0x33c   :  { %v5414_v26 = vpack.c.bf16 %v3605_v22, %v3604_v21  ;;  %v3411_v27 = vpop.f32.mrf.mxu1  ;;  %v3410_v29 = vadd.f32 %v3409_v24, %v2753_v23 }
 0x33d   :  { %v2755_v28 = vpop.f32.mrf.mxu0 }
 0x33e   :  { %5520 = vst [vmem:[%s7530_s3 + $0x230] sm:$0xff] %v5414_v26   ;;  %v2756_v30 = vadd.f32 %v7486_v15, %v2755_v28  ;;  %v3412_v31 = vpop.f32.mrf.mxu1  ;;  %v3606_v36 = vmax.f32 %v3410_v29, 0.0 }
 0x33f   :  { %v2757_v32 = vpop.f32.mrf.mxu0 }
 0x340   :  { %v3413_v33 = vadd.f32 %v3412_v31, %v2756_v30  ;;  %v3414_v34 = vpop.f32.mrf.mxu1 }
 0x341   :  { %v2760_v35 = vpop.f32.mrf.mxu0 }
 0x342   :  { %v3607_v37 = vmax.f32 %v3413_v33, 0.0  ;;  %v2761_v38 = vadd.f32 %v7486_v15, %v2760_v35  ;;  %v3417_v39 = vpop.f32.mrf.mxu1 }
 0x343   :  { %v2762_v40 = vpop.f32.mrf.mxu0 }
 0x344   :  { %v5419_v41 = vpack.c.bf16 %v3607_v37, %v3606_v36  ;;  %v3419_v42 = vpop.f32.mrf.mxu1  ;;  %v3418_v44 = vadd.f32 %v3417_v39, %v2761_v38 }
 0x345   :  { %v2763_v43 = vpop.f32.mrf.mxu0 }
 0x346   :  { %5521 = vst [vmem:[%s7530_s3 + $0x238] sm:$0xff] %v5419_v41   ;;  %v2764_v45 = vadd.f32 %v7486_v15, %v2763_v43  ;;  %v3420_v46 = vpop.f32.mrf.mxu1  ;;  %v3608_v51 = vmax.f32 %v3418_v44, 0.0 }
 0x347   :  { %v2765_v47 = vpop.f32.mrf.mxu0 }
 0x348   :  { %v3421_v48 = vadd.f32 %v3420_v46, %v2764_v45  ;;  %v3422_v49 = vpop.f32.mrf.mxu1 }
 0x349   :  { %v2768_v50 = vpop.f32.mrf.mxu0 }
 0x34a   :  { %v3609_v52 = vmax.f32 %v3421_v48, 0.0  ;;  %v2769_v53 = vadd.f32 %v7486_v15, %v2768_v50  ;;  %v3425_v54 = vpop.f32.mrf.mxu1 }
 0x34b   :  { %v2770_v55 = vpop.f32.mrf.mxu0 }
 0x34c   :  { %v5424_v56 = vpack.c.bf16 %v3609_v52, %v3608_v51  ;;  %v3427_v57 = vpop.f32.mrf.mxu1  ;;  %v3426_v59 = vadd.f32 %v3425_v54, %v2769_v53 }
 0x34d   :  { %v2771_v58 = vpop.f32.mrf.mxu0 }
 0x34e   :  { %5522 = vst [vmem:[%s7530_s3 + $0x240] sm:$0xff] %v5424_v56   ;;  %v2772_v60 = vadd.f32 %v7486_v15, %v2771_v58  ;;  %v3428_v61 = vpop.f32.mrf.mxu1  ;;  %v3610_v2 = vmax.f32 %v3426_v59, 0.0 }
 0x34f   :  { %v2773_v62 = vpop.f32.mrf.mxu0 }
 0x350   :  { %v3429_v63 = vadd.f32 %v3428_v61, %v2772_v60  ;;  %v3430_v0 = vpop.f32.mrf.mxu1 }
 0x351   :  { %v2776_v1 = vpop.f32.mrf.mxu0 }
 0x352   :  { %v3611_v3 = vmax.f32 %v3429_v63, 0.0  ;;  %v2777_v6 = vadd.f32 %v7486_v15, %v2776_v1  ;;  %v3433_v5 = vpop.f32.mrf.mxu1 }
 0x353   :  { %v2778_v7 = vpop.f32.mrf.mxu0 }
 0x354   :  { %v5429_v8 = vpack.c.bf16 %v3611_v3, %v3610_v2  ;;  %v3435_v9 = vpop.f32.mrf.mxu1  ;;  %v3434_v11 = vadd.f32 %v3433_v5, %v2777_v6 }
 0x355   :  { %v2779_v10 = vpop.f32.mrf.mxu0 }
 0x356   :  { %5523 = vst [vmem:[%s7530_s3 + $0x248] sm:$0xff] %v5429_v8   ;;  %v2780_v12 = vadd.f32 %v7486_v15, %v2779_v10  ;;  %v3436_v13 = vpop.f32.mrf.mxu1  ;;  %v3612_v4 = vmax.f32 %v3434_v11, 0.0 }
 0x357   :  { %v2781_v14 = vpop.f32.mrf.mxu0 }
 0x358   :  { %v3437_v16 = vadd.f32 %v3436_v13, %v2780_v12  ;;  %v3438_v17 = vpop.f32.mrf.mxu1 }
 0x359   :  { %v2784_v18 = vpop.f32.mrf.mxu0 }
 0x35a   :  { %v3613_v19 = vmax.f32 %v3437_v16, 0.0  ;;  %v2785_v20 = vadd.f32 %v7486_v15, %v2784_v18  ;;  %v3441_v21 = vpop.f32.mrf.mxu1 }
 0x35b   :  { %v2786_v22 = vpop.f32.mrf.mxu0 }
 0x35c   :  { %v5434_v23 = vpack.c.bf16 %v3613_v19, %v3612_v4  ;;  %v3443_v24 = vpop.f32.mrf.mxu1  ;;  %v3442_v26 = vadd.f32 %v3441_v21, %v2785_v20 }
 0x35d   :  { %v2787_v25 = vpop.f32.mrf.mxu0 }
 0x35e   :  { %5524 = vst [vmem:[%s7530_s3 + $0x250] sm:$0xff] %v5434_v23   ;;  %v2788_v27 = vadd.f32 %v7486_v15, %v2787_v25  ;;  %v3444_v28 = vpop.f32.mrf.mxu1  ;;  %v3614_v33 = vmax.f32 %v3442_v26, 0.0 }
 0x35f   :  { %v2789_v29 = vpop.f32.mrf.mxu0 }
 0x360   :  { %v3445_v30 = vadd.f32 %v3444_v28, %v2788_v27  ;;  %v3446_v31 = vpop.f32.mrf.mxu1 }
 0x361   :  { %v2792_v32 = vpop.f32.mrf.mxu0 }
 0x362   :  { %v3615_v34 = vmax.f32 %v3445_v30, 0.0  ;;  %v2793_v35 = vadd.f32 %v7486_v15, %v2792_v32  ;;  %v3449_v36 = vpop.f32.mrf.mxu1 }
 0x363   :  { %v2794_v37 = vpop.f32.mrf.mxu0 }
 0x364   :  { %v5439_v38 = vpack.c.bf16 %v3615_v34, %v3614_v33  ;;  %v3451_v39 = vpop.f32.mrf.mxu1  ;;  %v3450_v41 = vadd.f32 %v3449_v36, %v2793_v35 }
 0x365   :  { %v2795_v40 = vpop.f32.mrf.mxu0 }
 0x366   :  { %5525 = vst [vmem:[%s7530_s3 + $0x258] sm:$0xff] %v5439_v38   ;;  %v2796_v42 = vadd.f32 %v7486_v15, %v2795_v40  ;;  %v3452_v43 = vpop.f32.mrf.mxu1  ;;  %v3616_v48 = vmax.f32 %v3450_v41, 0.0 }
 0x367   :  { %v2797_v44 = vpop.f32.mrf.mxu0 }
 0x368   :  { %v3453_v45 = vadd.f32 %v3452_v43, %v2796_v42  ;;  %v3454_v46 = vpop.f32.mrf.mxu1 }
 0x369   :  { %v2800_v47 = vpop.f32.mrf.mxu0 }
 0x36a   :  { %v3617_v49 = vmax.f32 %v3453_v45, 0.0  ;;  %v2801_v50 = vadd.f32 %v7486_v15, %v2800_v47  ;;  %v3457_v51 = vpop.f32.mrf.mxu1 }
 0x36b   :  { %v2802_v52 = vpop.f32.mrf.mxu0 }
 0x36c   :  { %v5444_v53 = vpack.c.bf16 %v3617_v49, %v3616_v48  ;;  %v3459_v54 = vpop.f32.mrf.mxu1  ;;  %v3458_v56 = vadd.f32 %v3457_v51, %v2801_v50 }
 0x36d   :  { %v2803_v55 = vpop.f32.mrf.mxu0 }
 0x36e   :  { %5526 = vst [vmem:[%s7530_s3 + $0x260] sm:$0xff] %v5444_v53   ;;  %v2804_v57 = vadd.f32 %v7486_v15, %v2803_v55  ;;  %v3460_v58 = vpop.f32.mrf.mxu1  ;;  %v3618_v62 = vmax.f32 %v3458_v56, 0.0 }
 0x36f   :  { %v2805_v59 = vpop.f32.mrf.mxu0 }
 0x370   :  { %v3461_v60 = vadd.f32 %v3460_v58, %v2804_v57  ;;  %v3462_v61 = vpop.f32.mrf.mxu1 }
 0x372   :  { %v3619_v63 = vmax.f32 %v3461_v60, 0.0 }
 0x374   :  { %v5449_v0 = vpack.c.bf16 %v3619_v63, %v3618_v62 }
 0x376   :  { %5527 = vst [vmem:[%s7530_s3 + $0x268] sm:$0xff] %v5449_v0  }

// kernel: ppo_forward.7
= control target key start
LH: loop header
LB: loop body
LE: loop exit
PB: predicated region body
PF: predicated region fallthrough
CT: control target
= control target key end

     0   :  { %v2235_v0 = vmov 0   ;;  %vm868_vm0 = vcmask 523264   ;;  %s2914_s1 = inlined_call_operand.vmem [shape: bf16[576,128], index: 1, kind: input, shape index: {}]   ;;  %s2915_s0 = inlined_call_operand.vmem [shape: bf16[288,576], index: 0, kind: input, shape index: {}]   ;;  %s2916_s2 = inlined_call_operand.vmem [shape: f32[1,128], index: 2, kind: input, shape index: {}]   ;;  %s2917_s3 = inlined_call_operand.vmem [shape: bf16[288,128], index: 3, kind: output, shape index: {}]  }
   0x1   :  { %923 = vmatprep.subr.bf16.mxu0 %v2235_v0  ;;  %1100 = vmatprep.subr.bf16.mxu1 %v2235_v0  ;;  %v2073_v1 = vld [vmem:[%s2914_s1 + $0x38] sm:$0xff]   ;;  %v2075_v3 = vld [vmem:[%s2914_s1 + $0x30] sm:$0xff]   ;;  %v2077_v5 = vld [vmem:[%s2914_s1 + $0x28] sm:$0xff]  }
   0x2   :  { %v2074_v2 = vld [vmem:[%s2914_s1 + $0xb8] sm:$0xff]   ;;  %924 = vmatpush1.bf16.msra.mxu0 %v2073_v1  ;;  %v2076_v4 = vld [vmem:[%s2914_s1 + $0xb0] sm:$0xff]   ;;  %v2078_v6 = vld [vmem:[%s2914_s1 + $0xa8] sm:$0xff]  }
   0x3   :  { %1101 = vmatpush1.bf16.msra.mxu1 %v2074_v2  ;;  %925 = vmatprep.subr.bf16.mxu0 %v2235_v0  ;;  %v2079_v7 = vld [vmem:[%s2914_s1 + $0x20] sm:$0xff]   ;;  %v2081_v9 = vld [vmem:[%s2914_s1 + $0x18] sm:$0xff]   ;;  %v2083_v11 = vld [vmem:[%s2914_s1 + $0x10] sm:$0xff]  }
   0x4   :  { %1102 = vmatprep.subr.bf16.mxu1 %v2235_v0  ;;  %v2080_v8 = vld [vmem:[%s2914_s1 + $0xa0] sm:$0xff]   ;;  %v2082_v10 = vld [vmem:[%s2914_s1 + $0x98] sm:$0xff]   ;;  %v2084_v12 = vld [vmem:[%s2914_s1 + $0x90] sm:$0xff]  }
   0x5   :  { %v2085_v13 = vld [vmem:[%s2914_s1 + $0x8] sm:$0xff]   ;;  %v2087_v15 = vld [vmem:[%s2914_s1] sm:$0xff]   ;;  %v2089_v17 = vld [vmem:[%s2914_s1 + $0x78] sm:$0xff]  }
   0x6   :  { %926 = vmatpush1.bf16.msra.mxu0 %v2075_v3  ;;  %v2086_v14 = vld [vmem:[%s2914_s1 + $0x88] sm:$0xff]   ;;  %v2088_v16 = vld [vmem:[%s2914_s1 + $0x80] sm:$0xff]   ;;  %v2090_v18 = vld [vmem:[%s2914_s1 + $0xf8] sm:$0xff]  }
   0x7   :  { %1103 = vmatpush1.bf16.msra.mxu1 %v2076_v4  ;;  %927 = vmatprep.subr.bf16.mxu0 %v2235_v0  ;;  %v2107_v19 = vld [vmem:[%s2915_s0 + $0x4] ss:$20 sps:$4 sm:$0xff]   ;;  %v2091_v20 = vld [vmem:[%s2914_s1 + $0x70] sm:$0xff]   ;;  %v2110_v21 = vld [vmem:[%s2915_s0 + $0xc] ss:$20 sps:$4 sm:$0xff]  }
   0x8   :  { %1104 = vmatprep.subr.bf16.mxu1 %v2235_v0  ;;  %v2092_v22 = vld [vmem:[%s2914_s1 + $0xf0] sm:$0xff]   ;;  %955 = vmatprep.mubr.bf16.mxu0 %v2107_v19  ;;  %v2093_v23 = vld [vmem:[%s2914_s1 + $0x68] sm:$0xff]   ;;  %v2095_v25 = vld [vmem:[%s2914_s1 + $0x60] sm:$0xff]  }
   0x9   :  { %1132 = vmatprep.mubr.bf16.mxu1 %v2110_v21  ;;  %v2094_v24 = vld [vmem:[%s2914_s1 + $0xe8] sm:$0xff]   ;;  %v2096_v26 = vld [vmem:[%s2914_s1 + $0xe0] sm:$0xff]   ;;  %v2097_v27 = vld [vmem:[%s2914_s1 + $0x58] sm:$0xff]  }
   0xa   :  { %928 = vmatpush1.bf16.msra.mxu0 %v2077_v5  ;;  %v2098_v28 = vld [vmem:[%s2914_s1 + $0xd8] sm:$0xff]   ;;  %v2099_v29 = vld [vmem:[%s2914_s1 + $0x50] sm:$0xff]   ;;  %v2101_v31 = vld [vmem:[%s2914_s1 + $0x48] sm:$0xff]  }
   0xb   :  { %1105 = vmatpush1.bf16.msra.mxu1 %v2078_v6  ;;  %929 = vmatprep.subr.bf16.mxu0 %v2235_v0  ;;  %v2100_v30 = vld [vmem:[%s2914_s1 + $0xd0] sm:$0xff]   ;;  %v2102_v32 = vld [vmem:[%s2914_s1 + $0xc8] sm:$0xff]   ;;  %v2103_v33 = vld [vmem:[%s2914_s1 + $0x40] sm:$0xff]  }
   0xc   :  { %1106 = vmatprep.subr.bf16.mxu1 %v2235_v0  ;;  %v2104_v34 = vld [vmem:[%s2914_s1 + $0xc0] sm:$0xff]   ;;  %v2111_v35 = vld [vmem:[%s2914_s1 + $0x118] sm:$0xff]   ;;  %v2114_v39 = vld [vmem:[%s2915_s0 + $0x34] ss:$20 sps:$4 sm:$0xff]  }
   0xd   :  { %v2105_v36 = vld [vmem:[%s2915_s0] ss:$20 sps:$4 sm:$0xff]   ;;  %v2108_v37 = vld [vmem:[%s2915_s0 + $0x8] ss:$20 sps:$4 sm:$0xff]   ;;  %v2117_v43 = vld [vmem:[%s2915_s0 + $0x30] ss:$20 sps:$4 sm:$0xff]  }
   0xe   :  { %930 = vmatpush1.bf16.msra.mxu0 %v2079_v7  ;;  %v2112_v38 = vld [vmem:[%s2915_s0 + $0x2c] ss:$20 sps:$4 sm:$0xff]   ;;  %v2136_v40 = vld [vmem:[%s2914_s1 + $0x110] sm:$0xff]   ;;  %v2116_v42 = vld [vmem:[%s2915_s0 + $0x28] ss:$20 sps:$4 sm:$0xff]  }
   0xf   :  { %1107 = vmatpush1.bf16.msra.mxu1 %v2080_v8  ;;  %931 = vmatprep.subr.bf16.mxu0 %v2235_v0  ;;  %v2167_v41 = vld [vmem:[%s2914_s1 + $0x108] sm:$0xff]   ;;  %v2120_v45 = vld [vmem:[%s2915_s0 + $0x5c] ss:$20 sps:$4 sm:$0xff]   ;;  %v2192_v46 = vld [vmem:[%s2914_s1 + $0x100] sm:$0xff]  }
  0x10   :  { %1108 = vmatprep.subr.bf16.mxu1 %v2235_v0  ;;  %v2118_v44 = vld [vmem:[%s2915_s0 + $0x54] ss:$20 sps:$4 sm:$0xff]   ;;  %v2122_v47 = vld [vmem:[%s2915_s0 + $0x50] ss:$20 sps:$4 sm:$0xff]   ;;  %v2123_v48 = vld [vmem:[%s2915_s0 + $0x58] ss:$20 sps:$4 sm:$0xff]  }
  0x11   :  { %v2124_v49 = vld [vmem:[%s2915_s0 + $0x7c] ss:$20 sps:$4 sm:$0xff]   ;;  %v2126_v50 = vld [vmem:[%s2915_s0 + $0x84] ss:$20 sps:$4 sm:$0xff]   ;;  %v2129_v52 = vld [vmem:[%s2915_s0 + $0x80] ss:$20 sps:$4 sm:$0xff]  }
  0x12   :  { %932 = vmatpush1.bf16.msra.mxu0 %v2081_v9  ;;  %v2128_v51 = vld [vmem:[%s2915_s0 + $0x78] ss:$20 sps:$4 sm:$0xff]   ;;  %v2134_v55 = vld [vmem:[%s2915_s0 + $0xa0] ss:$20 sps:$4 sm:$0xff]   ;;  %v2135_v56 = vld [vmem:[%s2915_s0 + $0xa8] ss:$20 sps:$4 sm:$0xff]  }
  0x13   :  { %1109 = vmatpush1.bf16.msra.mxu1 %v2082_v10  ;;  %933 = vmatprep.subr.bf16.mxu0 %v2235_v0  ;;  %v2130_v53 = vld [vmem:[%s2915_s0 + $0xa4] ss:$20 sps:$4 sm:$0xff]   ;;  %v2132_v54 = vld [vmem:[%s2915_s0 + $0xac] ss:$20 sps:$4 sm:$0xff]   ;;  %v2139_v58 = vld [vmem:[%s2915_s0 + $0xd4] ss:$20 sps:$4 sm:$0xff]  }
  0x14   :  { %1110 = vmatprep.subr.bf16.mxu1 %v2235_v0  ;;  %v2137_v57 = vld [vmem:[%s2915_s0 + $0xcc] ss:$20 sps:$4 sm:$0xff]   ;;  %v2141_v59 = vld [vmem:[%s2915_s0 + $0xc8] ss:$20 sps:$4 sm:$0xff]   ;;  %v2142_v60 = vld [vmem:[%s2915_s0 + $0xd0] ss:$20 sps:$4 sm:$0xff]  }
  0x15   :  { %v2143_v61 = vld [vmem:[%s2915_s0 + $0xf4] ss:$20 sps:$4 sm:$0xff]   ;;  %v2145_v62 = vld [vmem:[%s2915_s0 + $0xfc] ss:$20 sps:$4 sm:$0xff]   ;;  %v2151_v2 = vld [vmem:[%s2915_s0 + $0x124] ss:$20 sps:$4 sm:$0xff]  }
  0x16   :  { %934 = vmatpush1.bf16.msra.mxu0 %v2083_v11  ;;  %v2147_v63 = vld [vmem:[%s2915_s0 + $0xf0] ss:$20 sps:$4 sm:$0xff]   ;;  %v2153_v3 = vld [vmem:[%s2915_s0 + $0x118] ss:$20 sps:$4 sm:$0xff]   ;;  %v2154_v4 = vld [vmem:[%s2915_s0 + $0x120] ss:$20 sps:$4 sm:$0xff]  }
  0x17   :  { %1111 = vmatpush1.bf16.msra.mxu1 %v2084_v12  ;;  %935 = vmatprep.subr.bf16.mxu0 %v2235_v0  ;;  %v2149_v1 = vld [vmem:[%s2915_s0 + $0x11c] ss:$20 sps:$4 sm:$0xff]   ;;  %v2155_v5 = vld [vmem:[%s2915_s0 + $0x144] ss:$20 sps:$4 sm:$0xff]   ;;  %v2157_v6 = vld [vmem:[%s2915_s0 + $0x14c] ss:$20 sps:$4 sm:$0xff]  }
  0x18   :  { %1112 = vmatprep.subr.bf16.mxu1 %v2235_v0  ;;  %v2159_v7 = vld [vmem:[%s2915_s0 + $0x140] ss:$20 sps:$4 sm:$0xff]   ;;  %v2160_v8 = vld [vmem:[%s2915_s0 + $0x148] ss:$20 sps:$4 sm:$0xff]   ;;  %v2166_v12 = vld [vmem:[%s2915_s0 + $0x170] ss:$20 sps:$4 sm:$0xff]  }
  0x19   :  { %v2161_v9 = vld [vmem:[%s2915_s0 + $0x16c] ss:$20 sps:$4 sm:$0xff]   ;;  %v2163_v10 = vld [vmem:[%s2915_s0 + $0x174] ss:$20 sps:$4 sm:$0xff]   ;;  %v2180_v21 = vld [vmem:[%s2915_s0 + $0x1e4] ss:$20 sps:$4 sm:$0xff]  }
  0x1a   :  { %936 = vmatpush1.bf16.msra.mxu0 %v2085_v13  ;;  %v2165_v11 = vld [vmem:[%s2915_s0 + $0x168] ss:$20 sps:$4 sm:$0xff]   ;;  %v2178_v19 = vld [vmem:[%s2915_s0 + $0x1b8] ss:$20 sps:$4 sm:$0xff]  }
  0x1b   :  { %1113 = vmatpush1.bf16.msra.mxu1 %v2086_v14  ;;  %937 = vmatprep.subr.bf16.mxu0 %v2235_v0  ;;  %v2168_v13 = vld [vmem:[%s2915_s0 + $0x194] ss:$20 sps:$4 sm:$0xff]   ;;  %v2170_v14 = vld [vmem:[%s2915_s0 + $0x19c] ss:$20 sps:$4 sm:$0xff]  }
  0x1c   :  { %1114 = vmatprep.subr.bf16.mxu1 %v2235_v0 }
  0x1e   :  { %938 = vmatpush1.bf16.msra.mxu0 %v2087_v15  ;;  %v2172_v15 = vld [vmem:[%s2915_s0 + $0x190] ss:$20 sps:$4 sm:$0xff]  }
  0x1f   :  { %1115 = vmatpush1.bf16.msra.mxu1 %v2088_v16  ;;  %939 = vmatprep.subr.bf16.mxu0 %v2235_v0  ;;  %v2173_v16 = vld [vmem:[%s2915_s0 + $0x198] ss:$20 sps:$4 sm:$0xff]  }
  0x20   :  { %1116 = vmatprep.subr.bf16.mxu1 %v2235_v0 }
  0x22   :  { %940 = vmatpush2.bf16.msra.mxu0 %v2089_v17  ;;  %v2174_v17 = vld [vmem:[%s2915_s0 + $0x1bc] ss:$20 sps:$4 sm:$0xff]  }
  0x23   :  { %1117 = vmatpush2.bf16.msra.mxu1 %v2090_v18  ;;  %941 = vmatprep.subr.bf16.mxu0 %v2235_v0  ;;  %v2176_v18 = vld [vmem:[%s2915_s0 + $0x1c4] ss:$20 sps:$4 sm:$0xff]  }
  0x24   :  { %1118 = vmatprep.subr.bf16.mxu1 %v2235_v0 }
  0x26   :  { %942 = vmatpush2.bf16.msra.mxu0 %v2091_v20  ;;  %v2179_v20 = vld [vmem:[%s2915_s0 + $0x1c0] ss:$20 sps:$4 sm:$0xff]  }
  0x27   :  { %1119 = vmatpush2.bf16.msra.mxu1 %v2092_v22  ;;  %943 = vmatprep.subr.bf16.mxu0 %v2235_v0  ;;  %v2182_v22 = vld [vmem:[%s2915_s0 + $0x1ec] ss:$20 sps:$4 sm:$0xff]  }
  0x28   :  { %1120 = vmatprep.subr.bf16.mxu1 %v2235_v0 }
  0x2a   :  { %944 = vmatpush2.bf16.msra.mxu0 %v2093_v23  ;;  %v2184_v23 = vld [vmem:[%s2915_s0 + $0x1e0] ss:$20 sps:$4 sm:$0xff]  }
  0x2b   :  { %1121 = vmatpush2.bf16.msra.mxu1 %v2094_v24  ;;  %945 = vmatprep.subr.bf16.mxu0 %v2235_v0  ;;  %v2185_v24 = vld [vmem:[%s2915_s0 + $0x1e8] ss:$20 sps:$4 sm:$0xff]  }
  0x2c   :  { %1122 = vmatprep.subr.bf16.mxu1 %v2235_v0 }
  0x2e   :  { %946 = vmatpush2.bf16.msra.mxu0 %v2095_v25  ;;  %v2186_v25 = vld [vmem:[%s2915_s0 + $0x20c] ss:$20 sps:$4 sm:$0xff]  }
  0x2f   :  { %1123 = vmatpush2.bf16.msra.mxu1 %v2096_v26  ;;  %947 = vmatprep.subr.bf16.mxu0 %v2235_v0  ;;  %v2188_v26 = vld [vmem:[%s2915_s0 + $0x214] ss:$20 sps:$4 sm:$0xff]  }
  0x30   :  { %1124 = vmatprep.subr.bf16.mxu1 %v2235_v0 }
  0x32   :  { %948 = vmatpush2.bf16.msra.mxu0 %v2097_v27  ;;  %v2190_v27 = vld [vmem:[%s2915_s0 + $0x208] ss:$20 sps:$4 sm:$0xff]  }
  0x33   :  { %1125 = vmatpush2.bf16.msra.mxu1 %v2098_v28  ;;  %949 = vmatprep.subr.bf16.mxu0 %v2235_v0  ;;  %v2191_v28 = vld [vmem:[%s2915_s0 + $0x210] ss:$20 sps:$4 sm:$0xff]  }
  0x34   :  { %1126 = vmatprep.subr.bf16.mxu1 %v2235_v0 }
  0x36   :  { %950 = vmatpush2.bf16.msra.mxu0 %v2099_v29  ;;  %v2193_v29 = vld [vmem:[%s2915_s0 + $0x234] ss:$20 sps:$4 sm:$0xff]  }
  0x37   :  { %1127 = vmatpush2.bf16.msra.mxu1 %v2100_v30  ;;  %951 = vmatprep.subr.bf16.mxu0 %v2235_v0  ;;  %v2195_v30 = vld [vmem:[%s2915_s0 + $0x23c] ss:$20 sps:$4 sm:$0xff]  }
  0x38   :  { %1128 = vmatprep.subr.bf16.mxu1 %v2235_v0 }
  0x3a   :  { %952 = vmatpush2.bf16.msra.mxu0 %v2101_v31  ;;  %v2197_v31 = vld [vmem:[%s2915_s0 + $0x230] ss:$20 sps:$4 sm:$0xff]  }
  0x3b   :  { %1129 = vmatpush2.bf16.msra.mxu1 %v2102_v32  ;;  %953 = vmatprep.subr.bf16.mxu0 %v2235_v0  ;;  %v2198_v32 = vld [vmem:[%s2915_s0 + $0x238] ss:$20 sps:$4 sm:$0xff]  }
  0x3c   :  { %1130 = vmatprep.subr.bf16.mxu1 %v2235_v0  ;;  %v2148_v0 = vld [vmem:[%s2915_s0 + $0xf8] ss:$20 sps:$4 sm:$0xff]  }
  0x3e   :  { %954 = vmatpush2.bf16.msra.mxu0 %v2103_v33  ;;  %v2199_v33 = vld [vmem:[%s2915_s0 + $0x25c] ss:$20 sps:$4 sm:$0xff]  }
  0x3f   :  { %1131 = vmatpush2.bf16.msra.mxu1 %v2104_v34  ;;  %2020 = vmatprep.subr.bf16.mxu0 %v2111_v35  ;;  %v2201_v34 = vld [vmem:[%s2915_s0 + $0x264] ss:$20 sps:$4 sm:$0xff]  }
  0x40   :  { %2064 = vmatprep.subr.bf16.mxu1 %v2111_v35 }
  0x41   :  { %956 = vmatmul.mubr.bf16.vlgmr.msra.gmra.mxu0 %v2105_v36  ;;  %v2204_v36 = vld [vmem:[%s2915_s0 + $0x260] ss:$20 sps:$4 sm:$0xff]  }
  0x42   :  { %1133 = vmatmul.mubr.bf16.vlgmr.msra.gmra.mxu1 %v2108_v37  ;;  %2021 = vmatpush3.bf16.msra.mxu0 %v2111_v35  ;;  %v2205_v37 = vld [vmem:[%s2915_s0 + $0x284] ss:$20 sps:$4 sm:$0xff]  }
  0x43   :  { %963 = vmatprep.mubr.bf16.mxu0 %v2112_v38  ;;  %1140 = vmatprep.mubr.bf16.mxu1 %v2114_v39  ;;  %v2207_v38 = vld [vmem:[%s2915_s0 + $0x28c] ss:$20 sps:$4 sm:$0xff]  }
  0x44   :  { %2068 = vmatpush3.bf16.msra.mxu1 %v2111_v35  ;;  %2022 = vmatprep.subr.bf16.mxu0 %v2136_v40  ;;  %v2203_v35 = vld [vmem:[%s2915_s0 + $0x258] ss:$20 sps:$4 sm:$0xff]   ;;  %v2209_v39 = vld [vmem:[%s2915_s0 + $0x280] ss:$20 sps:$4 sm:$0xff]  }
  0x45   :  { %2065 = vmatprep.subr.bf16.mxu1 %v2136_v40 }
  0x46   :  { %2023 = vmatpush3.bf16.msra.mxu0 %v2136_v40 }
  0x47   :  { %2024 = vmatprep.subr.bf16.mxu0 %v2167_v41 }
  0x48   :  { %2069 = vmatpush3.bf16.msra.mxu1 %v2136_v40  ;;  %v2210_v40 = vld [vmem:[%s2915_s0 + $0x288] ss:$20 sps:$4 sm:$0xff]  }
  0x49   :  { %964 = vmatmul.mubr.bf16.gmra.mxu0 %v2116_v42  ;;  %2066 = vmatprep.subr.bf16.mxu1 %v2167_v41  ;;  %v2213_v42 = vld [vmem:[%s2915_s0 + $0x2b4] ss:$20 sps:$4 sm:$0xff]  }
  0x4a   :  { %1141 = vmatmul.mubr.bf16.gmra.mxu1 %v2117_v43  ;;  %971 = vmatprep.mubr.bf16.mxu0 %v2118_v44  ;;  %v2215_v43 = vld [vmem:[%s2915_s0 + $0x2a8] ss:$20 sps:$4 sm:$0xff]   ;;  %v2216_v44 = vld [vmem:[%s2915_s0 + $0x2b0] ss:$20 sps:$4 sm:$0xff]  }
  0x4b   :  { %1148 = vmatprep.mubr.bf16.mxu1 %v2120_v45  ;;  %2025 = vmatpush3.bf16.msra.mxu0 %v2167_v41  ;;  %v2217_v45 = vld [vmem:[%s2915_s0 + $0x10] ss:$20 sps:$4 sm:$0xff]  }
  0x4c   :  { %2070 = vmatpush3.bf16.msra.mxu1 %v2167_v41  ;;  %2026 = vmatprep.subr.bf16.mxu0 %v2192_v46  ;;  %v2211_v41 = vld [vmem:[%s2915_s0 + $0x2ac] ss:$20 sps:$4 sm:$0xff]  }
  0x4d   :  { %2067 = vmatprep.subr.bf16.mxu1 %v2192_v46 }
  0x4f   :  { %2027 = vmatpush3.bf16.msra.mxu0 %v2192_v46 }
  0x50   :  { %2071 = vmatpush3.bf16.msra.mxu1 %v2192_v46  ;;  %v2218_v46 = vld [vmem:[%s2915_s0 + $0x1a0] ss:$20 sps:$4 sm:$0xff]  }
  0x51   :  { %972 = vmatmul.mubr.bf16.gmra.mxu0 %v2122_v47  ;;  %v2219_v47 = vld [vmem:[%s2915_s0 + $0x38] ss:$20 sps:$4 sm:$0xff]  }
  0x52   :  { %1149 = vmatmul.mubr.bf16.gmra.mxu1 %v2123_v48  ;;  %979 = vmatprep.mubr.bf16.mxu0 %v2124_v49  ;;  %v2220_v48 = vld [vmem:[%s2915_s0 + $0x1c8] ss:$20 sps:$4 sm:$0xff]   ;;  %v2221_v49 = vld [vmem:[%s2915_s0 + $0x60] ss:$20 sps:$4 sm:$0xff]  }
  0x53   :  { %1156 = vmatprep.mubr.bf16.mxu1 %v2126_v50  ;;  %v2222_v50 = vld [vmem:[%s2915_s0 + $0x1f0] ss:$20 sps:$4 sm:$0xff]  }
  0x59   :  { %980 = vmatmul.mubr.bf16.gmra.mxu0 %v2128_v51  ;;  %v2223_v51 = vld [vmem:[%s2915_s0 + $0x88] ss:$20 sps:$4 sm:$0xff]  }
  0x5a   :  { %1157 = vmatmul.mubr.bf16.gmra.mxu1 %v2129_v52  ;;  %987 = vmatprep.mubr.bf16.mxu0 %v2130_v53  ;;  %v2224_v52 = vld [vmem:[%s2915_s0 + $0x218] ss:$20 sps:$4 sm:$0xff]   ;;  %v2225_v53 = vld [vmem:[%s2915_s0 + $0xb0] ss:$20 sps:$4 sm:$0xff]  }
  0x5b   :  { %1164 = vmatprep.mubr.bf16.mxu1 %v2132_v54  ;;  %v2226_v54 = vld [vmem:[%s2915_s0 + $0x240] ss:$20 sps:$4 sm:$0xff]  }
  0x61   :  { %988 = vmatmul.mubr.bf16.gmra.mxu0 %v2134_v55  ;;  %v2227_v55 = vld [vmem:[%s2915_s0 + $0xd8] ss:$20 sps:$4 sm:$0xff]  }
  0x62   :  { %1165 = vmatmul.mubr.bf16.gmra.mxu1 %v2135_v56  ;;  %995 = vmatprep.mubr.bf16.mxu0 %v2137_v57  ;;  %v2228_v56 = vld [vmem:[%s2915_s0 + $0x268] ss:$20 sps:$4 sm:$0xff]   ;;  %v2229_v57 = vld [vmem:[%s2915_s0 + $0x100] ss:$20 sps:$4 sm:$0xff]  }
  0x63   :  { %1172 = vmatprep.mubr.bf16.mxu1 %v2139_v58  ;;  %v2230_v58 = vld [vmem:[%s2915_s0 + $0x290] ss:$20 sps:$4 sm:$0xff]  }
  0x69   :  { %996 = vmatmul.mubr.bf16.gmra.mxu0 %v2141_v59  ;;  %v2231_v59 = vld [vmem:[%s2915_s0 + $0x128] ss:$20 sps:$4 sm:$0xff]  }
  0x6a   :  { %1173 = vmatmul.mubr.bf16.gmra.mxu1 %v2142_v60  ;;  %1003 = vmatprep.mubr.bf16.mxu0 %v2143_v61  ;;  %v2232_v60 = vld [vmem:[%s2915_s0 + $0x2b8] ss:$20 sps:$4 sm:$0xff]   ;;  %v2233_v61 = vld [vmem:[%s2915_s0 + $0x150] ss:$20 sps:$4 sm:$0xff]  }
  0x6b   :  { %1180 = vmatprep.mubr.bf16.mxu1 %v2145_v62  ;;  %v2234_v62 = vld [vmem:[%s2915_s0 + $0x178] ss:$20 sps:$4 sm:$0xff]  }
  0x71   :  { %1004 = vmatmul.mubr.bf16.gmra.mxu0 %v2147_v63  ;;  %v2687_v63 = vld [vmem:[%s2916_s2] ss:$0 sm:$0xff] }
  0x72   :  { %1181 = vmatmul.mubr.bf16.gmra.mxu1 %v2148_v0  ;;  %1011 = vmatprep.mubr.bf16.mxu0 %v2149_v1 }
  0x73   :  { %1188 = vmatprep.mubr.bf16.mxu1 %v2151_v2 }
  0x79   :  { %1012 = vmatmul.mubr.bf16.gmra.mxu0 %v2153_v3 }
  0x7a   :  { %1189 = vmatmul.mubr.bf16.gmra.mxu1 %v2154_v4  ;;  %1019 = vmatprep.mubr.bf16.mxu0 %v2155_v5 }
  0x7b   :  { %1196 = vmatprep.mubr.bf16.mxu1 %v2157_v6 }
  0x81   :  { %1020 = vmatmul.mubr.bf16.gmra.mxu0 %v2159_v7 }
  0x82   :  { %1197 = vmatmul.mubr.bf16.gmra.mxu1 %v2160_v8  ;;  %1027 = vmatprep.mubr.bf16.mxu0 %v2161_v9 }
  0x83   :  { %1204 = vmatprep.mubr.bf16.mxu1 %v2163_v10 }
  0x89   :  { %1028 = vmatmul.mubr.bf16.gmra.mxu0 %v2165_v11 }
  0x8a   :  { %1205 = vmatmul.mubr.bf16.gmra.mxu1 %v2166_v12  ;;  %1035 = vmatprep.mubr.bf16.mxu0 %v2168_v13 }
  0x8b   :  { %1212 = vmatprep.mubr.bf16.mxu1 %v2170_v14 }
  0x91   :  { %1036 = vmatmul.mubr.bf16.gmra.mxu0 %v2172_v15 }
  0x92   :  { %1213 = vmatmul.mubr.bf16.gmra.mxu1 %v2173_v16  ;;  %1043 = vmatprep.mubr.bf16.mxu0 %v2174_v17 }
  0x93   :  { %1220 = vmatprep.mubr.bf16.mxu1 %v2176_v18 }
  0x99   :  { %1044 = vmatmul.mubr.bf16.gmra.mxu0 %v2178_v19 }
  0x9a   :  { %1221 = vmatmul.mubr.bf16.gmra.mxu1 %v2179_v20  ;;  %1051 = vmatprep.mubr.bf16.mxu0 %v2180_v21 }
  0x9b   :  { %1228 = vmatprep.mubr.bf16.mxu1 %v2182_v22 }
  0xa1   :  { %1052 = vmatmul.mubr.bf16.gmra.mxu0 %v2184_v23 }
  0xa2   :  { %1229 = vmatmul.mubr.bf16.gmra.mxu1 %v2185_v24  ;;  %1059 = vmatprep.mubr.bf16.mxu0 %v2186_v25 }
  0xa3   :  { %1236 = vmatprep.mubr.bf16.mxu1 %v2188_v26 }
  0xa9   :  { %1060 = vmatmul.mubr.bf16.gmra.mxu0 %v2190_v27 }
  0xaa   :  { %1237 = vmatmul.mubr.bf16.gmra.mxu1 %v2191_v28  ;;  %1067 = vmatprep.mubr.bf16.mxu0 %v2193_v29 }
  0xab   :  { %1244 = vmatprep.mubr.bf16.mxu1 %v2195_v30 }
  0xb1   :  { %1068 = vmatmul.mubr.bf16.gmra.mxu0 %v2197_v31 }
  0xb2   :  { %1245 = vmatmul.mubr.bf16.gmra.mxu1 %v2198_v32  ;;  %1075 = vmatprep.mubr.bf16.mxu0 %v2199_v33 }
  0xb3   :  { %1252 = vmatprep.mubr.bf16.mxu1 %v2201_v34 }
  0xb9   :  { %1076 = vmatmul.mubr.bf16.gmra.mxu0 %v2203_v35 }
  0xba   :  { %1253 = vmatmul.mubr.bf16.gmra.mxu1 %v2204_v36  ;;  %1083 = vmatprep.mubr.bf16.mxu0 %v2205_v37 }
  0xbb   :  { %1260 = vmatprep.mubr.bf16.mxu1 %v2207_v38 }
  0xc1   :  { %1084 = vmatmul.mubr.bf16.gmra.mxu0 %v2209_v39 }
  0xc2   :  { %1261 = vmatmul.mubr.bf16.gmra.mxu1 %v2210_v40  ;;  %1091 = vmatprep.mubr.bf16.mxu0 %v2211_v41 }
  0xc3   :  { %1268 = vmatprep.mubr.bf16.mxu1 %v2213_v42 }
  0xc9   :  { %1092 = vmatmul.mubr.bf16.gmra.mxu0 %v2215_v43 }
  0xca   :  { %1269 = vmatmul.mubr.bf16.gmra.mxu1 %v2216_v44  ;;  %2028 = vmatprep.mubr.msk.bf16.mxu0 %vm868_vm0, %v2217_v45 }
  0xcb   :  { %2048 = vmatprep.mubr.msk.bf16.mxu1 %vm868_vm0, %v2218_v46 }
  0xd1   :  { %2029 = vmatmul.mubr.msk.bf16.vlgmr.msra.gmra.mxu0 %vm868_vm0, %v2219_v47 }
  0xd2   :  { %2049 = vmatmul.mubr.msk.bf16.vlgmr.msra.gmra.mxu1 %vm868_vm0, %v2220_v48  ;;  %2032 = vmatprep.mubr.msk.bf16.mxu0 %vm868_vm0, %v2221_v49 }
  0xd3   :  { %2052 = vmatprep.mubr.msk.bf16.mxu1 %vm868_vm0, %v2222_v50 }
  0xd9   :  { %2033 = vmatmul.mubr.msk.bf16.gmra.mxu0 %vm868_vm0, %v2223_v51 }
  0xda   :  { %2053 = vmatmul.mubr.msk.bf16.gmra.mxu1 %vm868_vm0, %v2224_v52  ;;  %2036 = vmatprep.mubr.msk.bf16.mxu0 %vm868_vm0, %v2225_v53 }
  0xdb   :  { %2056 = vmatprep.mubr.msk.bf16.mxu1 %vm868_vm0, %v2226_v54 }
  0xe1   :  { %2037 = vmatmul.mubr.msk.bf16.gmra.mxu0 %vm868_vm0, %v2227_v55 }
  0xe2   :  { %2057 = vmatmul.mubr.msk.bf16.gmra.mxu1 %vm868_vm0, %v2228_v56  ;;  %2040 = vmatprep.mubr.msk.bf16.mxu0 %vm868_vm0, %v2229_v57 }
  0xe3   :  { %2060 = vmatprep.mubr.msk.bf16.mxu1 %vm868_vm0, %v2230_v58 }
  0xe9   :  { %2041 = vmatmul.mubr.msk.bf16.gmra.mxu0 %vm868_vm0, %v2231_v59 }
  0xea   :  { %2061 = vmatmul.mubr.msk.bf16.gmra.mxu1 %vm868_vm0, %v2232_v60  ;;  %2044 = vmatprep.mubr.msk.bf16.mxu0 %vm868_vm0, %v2233_v61 }
  0xf1   :  { %2045 = vmatmul.mubr.msk.bf16.gmra.mxu0 %vm868_vm0, %v2234_v62 }
 0x101   :  { %v957_v0 = vpop.f32.mrf.mxu0 }
 0x102   :  { %v958_v1 = vadd.f32 %v2687_v63, %v957_v0  ;;  %v1134_v2 = vpop.f32.mrf.mxu1 }
 0x103   :  { %v959_v3 = vpop.f32.mrf.mxu0 }
 0x104   :  { %v2690_v4 = vadd.f32 %v1134_v2, %v958_v1  ;;  %v1136_v5 = vpop.f32.mrf.mxu1 }
 0x105   :  { %v960_v6 = vpop.f32.mrf.mxu0 }
 0x106   :  { %v961_v7 = vadd.f32 %v2687_v63, %v960_v6  ;;  %v1137_v8 = vpop.f32.mrf.mxu1 }
 0x107   :  { %v962_v9 = vpop.f32.mrf.mxu0 }
 0x108   :  { %v2693_v10 = vadd.f32 %v1137_v8, %v961_v7  ;;  %v1139_v11 = vpop.f32.mrf.mxu1 }
 0x109   :  { %v965_v12 = vpop.f32.mrf.mxu0 }
 0x10a   :  { %v966_v13 = vadd.f32 %v2687_v63, %v965_v12  ;;  %v1142_v14 = vpop.f32.mrf.mxu1 }
 0x10b   :  { %v967_v15 = vpop.f32.mrf.mxu0 }
 0x10c   :  { %v2696_v16 = vadd.f32 %v1142_v14, %v966_v13  ;;  %v1144_v17 = vpop.f32.mrf.mxu1 }
 0x10d   :  { %v968_v18 = vpop.f32.mrf.mxu0 }
 0x10e   :  { %v969_v19 = vadd.f32 %v2687_v63, %v968_v18  ;;  %v1145_v20 = vpop.f32.mrf.mxu1 }
 0x10f   :  { %v970_v21 = vpop.f32.mrf.mxu0 }
 0x110   :  { %v2699_v22 = vadd.f32 %v1145_v20, %v969_v19  ;;  %v1147_v23 = vpop.f32.mrf.mxu1 }
 0x111   :  { %v973_v24 = vpop.f32.mrf.mxu0 }
 0x112   :  { %v974_v25 = vadd.f32 %v2687_v63, %v973_v24  ;;  %v1150_v26 = vpop.f32.mrf.mxu1 }
 0x113   :  { %v975_v27 = vpop.f32.mrf.mxu0 }
 0x114   :  { %v2702_v28 = vadd.f32 %v1150_v26, %v974_v25  ;;  %v1152_v29 = vpop.f32.mrf.mxu1 }
 0x115   :  { %v976_v30 = vpop.f32.mrf.mxu0 }
 0x116   :  { %v977_v31 = vadd.f32 %v2687_v63, %v976_v30  ;;  %v1153_v32 = vpop.f32.mrf.mxu1 }
 0x117   :  { %v978_v33 = vpop.f32.mrf.mxu0 }
 0x118   :  { %v2705_v34 = vadd.f32 %v1153_v32, %v977_v31  ;;  %v1155_v35 = vpop.f32.mrf.mxu1 }
 0x119   :  { %v981_v36 = vpop.f32.mrf.mxu0 }
 0x11a   :  { %v982_v37 = vadd.f32 %v2687_v63, %v981_v36  ;;  %v1158_v38 = vpop.f32.mrf.mxu1 }
 0x11b   :  { %v983_v39 = vpop.f32.mrf.mxu0 }
 0x11c   :  { %v2708_v40 = vadd.f32 %v1158_v38, %v982_v37  ;;  %v1160_v41 = vpop.f32.mrf.mxu1 }
 0x11d   :  { %v984_v42 = vpop.f32.mrf.mxu0 }
 0x11e   :  { %v985_v43 = vadd.f32 %v2687_v63, %v984_v42  ;;  %v1161_v44 = vpop.f32.mrf.mxu1 }
 0x11f   :  { %v986_v45 = vpop.f32.mrf.mxu0 }
 0x120   :  { %v2711_v46 = vadd.f32 %v1161_v44, %v985_v43  ;;  %v1163_v47 = vpop.f32.mrf.mxu1 }
 0x121   :  { %v989_v48 = vpop.f32.mrf.mxu0 }
 0x122   :  { %v990_v49 = vadd.f32 %v2687_v63, %v989_v48  ;;  %v1166_v50 = vpop.f32.mrf.mxu1 }
 0x123   :  { %v991_v51 = vpop.f32.mrf.mxu0 }
 0x124   :  { %v2714_v52 = vadd.f32 %v1166_v50, %v990_v49  ;;  %v1168_v53 = vpop.f32.mrf.mxu1 }
 0x125   :  { %v992_v54 = vpop.f32.mrf.mxu0 }
 0x126   :  { %v993_v55 = vadd.f32 %v2687_v63, %v992_v54  ;;  %v1169_v56 = vpop.f32.mrf.mxu1 }
 0x127   :  { %v994_v57 = vpop.f32.mrf.mxu0 }
 0x128   :  { %v2717_v58 = vadd.f32 %v1169_v56, %v993_v55  ;;  %v1171_v59 = vpop.f32.mrf.mxu1 }
 0x129   :  { %v997_v60 = vpop.f32.mrf.mxu0 }
 0x12a   :  { %v998_v61 = vadd.f32 %v2687_v63, %v997_v60  ;;  %v1174_v62 = vpop.f32.mrf.mxu1 }
 0x12b   :  { %v999_v0 = vpop.f32.mrf.mxu0 }
 0x12c   :  { %v2720_v1 = vadd.f32 %v1174_v62, %v998_v61  ;;  %v1176_v2 = vpop.f32.mrf.mxu1 }
 0x12d   :  { %v1000_v3 = vpop.f32.mrf.mxu0 }
 0x12e   :  { %v1001_v5 = vadd.f32 %v2687_v63, %v1000_v3  ;;  %v1177_v6 = vpop.f32.mrf.mxu1 }
 0x12f   :  { %v1002_v7 = vpop.f32.mrf.mxu0 }
 0x130   :  { %v2723_v8 = vadd.f32 %v1177_v6, %v1001_v5  ;;  %v1179_v9 = vpop.f32.mrf.mxu1 }
 0x131   :  { %v1005_v11 = vpop.f32.mrf.mxu0 }
 0x132   :  { %v1006_v12 = vadd.f32 %v2687_v63, %v1005_v11  ;;  %v1182_v13 = vpop.f32.mrf.mxu1 }
 0x133   :  { %v1007_v14 = vpop.f32.mrf.mxu0 }
 0x134   :  { %v2726_v15 = vadd.f32 %v1182_v13, %v1006_v12  ;;  %v1184_v17 = vpop.f32.mrf.mxu1 }
 0x135   :  { %v1008_v18 = vpop.f32.mrf.mxu0 }
 0x136   :  { %v1009_v19 = vadd.f32 %v2687_v63, %v1008_v18  ;;  %v1185_v20 = vpop.f32.mrf.mxu1 }
 0x137   :  { %v1010_v21 = vpop.f32.mrf.mxu0 }
 0x138   :  { %v2729_v23 = vadd.f32 %v1185_v20, %v1009_v19  ;;  %v1187_v24 = vpop.f32.mrf.mxu1 }
 0x139   :  { %v1013_v25 = vpop.f32.mrf.mxu0 }
 0x13a   :  { %v1014_v26 = vadd.f32 %v2687_v63, %v1013_v25  ;;  %v1190_v27 = vpop.f32.mrf.mxu1 }
 0x13b   :  { %v1015_v29 = vpop.f32.mrf.mxu0 }
 0x13c   :  { %v2732_v30 = vadd.f32 %v1190_v27, %v1014_v26  ;;  %v1192_v31 = vpop.f32.mrf.mxu1 }
 0x13d   :  { %v1016_v32 = vpop.f32.mrf.mxu0 }
 0x13e   :  { %v1017_v33 = vadd.f32 %v2687_v63, %v1016_v32  ;;  %v1193_v35 = vpop.f32.mrf.mxu1 }
 0x13f   :  { %v1018_v36 = vpop.f32.mrf.mxu0 }
 0x140   :  { %v2735_v37 = vadd.f32 %v1193_v35, %v1017_v33  ;;  %v1195_v38 = vpop.f32.mrf.mxu1 }
 0x141   :  { %v1021_v39 = vpop.f32.mrf.mxu0 }
 0x142   :  { %v1022_v41 = vadd.f32 %v2687_v63, %v1021_v39  ;;  %v1198_v42 = vpop.f32.mrf.mxu1 }
 0x143   :  { %v1023_v43 = vpop.f32.mrf.mxu0 }
 0x144   :  { %v2738_v44 = vadd.f32 %v1198_v42, %v1022_v41  ;;  %v1200_v45 = vpop.f32.mrf.mxu1 }
 0x145   :  { %v1024_v47 = vpop.f32.mrf.mxu0 }
 0x146   :  { %2918 = vst [vmem:[#allocation2_spill] sm:$0xff] %v2738_v44  ;;  %v1025_v48 = vadd.f32 %v2687_v63, %v1024_v47  ;;  %v1201_v49 = vpop.f32.mrf.mxu1 }
 0x147   :  { %v1026_v50 = vpop.f32.mrf.mxu0 }
 0x148   :  { %v2741_v51 = vadd.f32 %v1201_v49, %v1025_v48  ;;  %v1203_v53 = vpop.f32.mrf.mxu1 }
 0x149   :  { %v1029_v54 = vpop.f32.mrf.mxu0 }
 0x14a   :  { %2919 = vst [vmem:[#allocation3_spill] sm:$0xff] %v2741_v51  ;;  %v1030_v55 = vadd.f32 %v2687_v63, %v1029_v54  ;;  %v1206_v56 = vpop.f32.mrf.mxu1 }
 0x14b   :  { %v1031_v57 = vpop.f32.mrf.mxu0 }
 0x14c   :  { %v2744_v59 = vadd.f32 %v1206_v56, %v1030_v55  ;;  %v1208_v60 = vpop.f32.mrf.mxu1 }
 0x14d   :  { %v1032_v61 = vpop.f32.mrf.mxu0 }
 0x14e   :  { %2920 = vst [vmem:[#allocation4_spill] sm:$0xff] %v2744_v59  ;;  %v1033_v62 = vadd.f32 %v2687_v63, %v1032_v61  ;;  %v1209_v0 = vpop.f32.mrf.mxu1 }
 0x14f   :  { %v1034_v2 = vpop.f32.mrf.mxu0 }
 0x150   :  { %v2747_v3 = vadd.f32 %v1209_v0, %v1033_v62  ;;  %v1211_v5 = vpop.f32.mrf.mxu1 }
 0x151   :  { %v1037_v6 = vpop.f32.mrf.mxu0 }
 0x152   :  { %2921 = vst [vmem:[#allocation5_spill] sm:$0xff] %v2747_v3  ;;  %v1038_v7 = vadd.f32 %v2687_v63, %v1037_v6  ;;  %v1214_v9 = vpop.f32.mrf.mxu1 }
 0x153   :  { %v1039_v11 = vpop.f32.mrf.mxu0 }
 0x154   :  { %v2750_v12 = vadd.f32 %v1214_v9, %v1038_v7  ;;  %v1216_v13 = vpop.f32.mrf.mxu1 }
 0x155   :  { %v2752_v14 = vpop.f32.mrf.mxu0 }
 0x156   :  { %v2754_v17 = vpop.f32.mrf.mxu1 }
 0x157   :  { %v1042_v18 = vpop.f32.mrf.mxu0 }
 0x158   :  { %v1219_v19 = vpop.f32.mrf.mxu1 }
 0x159   :  { %v1045_v20 = vpop.f32.mrf.mxu0 }
 0x15a   :  { %v1222_v21 = vpop.f32.mrf.mxu1 }
 0x15b   :  { %v1047_v24 = vpop.f32.mrf.mxu0 }
 0x15c   :  { %v1224_v25 = vpop.f32.mrf.mxu1 }
 0x15d   :  { %v1048_v26 = vpop.f32.mrf.mxu0 }
 0x15e   :  { %v1225_v27 = vpop.f32.mrf.mxu1 }
 0x15f   :  { %v1050_v29 = vpop.f32.mrf.mxu0 }
 0x160   :  { %v1227_v31 = vpop.f32.mrf.mxu1 }
 0x161   :  { %v2756_v32 = vpop.f32.mrf.mxu0 }
 0x162   :  { %v2758_v33 = vpop.f32.mrf.mxu1 }
 0x163   :  { %v1055_v35 = vpop.f32.mrf.mxu0 }
 0x164   :  { %v1232_v36 = vpop.f32.mrf.mxu1 }
 0x165   :  { %v2760_v38 = vpop.f32.mrf.mxu0 }
 0x166   :  { %v2762_v39 = vpop.f32.mrf.mxu1 }
 0x167   :  { %v1058_v41 = vpop.f32.mrf.mxu0 }
 0x168   :  { %v1235_v42 = vpop.f32.mrf.mxu1 }
 0x169   :  { %v1061_v43 = vpop.f32.mrf.mxu0 }
 0x16a   :  { %v2764_v45 = vpop.f32.mrf.mxu1 }
 0x16b   :  { %v1063_v47 = vpop.f32.mrf.mxu0 }
 0x16c   :  { %v1240_v48 = vpop.f32.mrf.mxu1 }
 0x16d   :  { %v1064_v49 = vpop.f32.mrf.mxu0 }
 0x16e   :  { %v2766_v50 = vpop.f32.mrf.mxu1 }
 0x16f   :  { %v1066_v53 = vpop.f32.mrf.mxu0 }
 0x170   :  { %v1243_v54 = vpop.f32.mrf.mxu1 }
 0x171   :  { %v2768_v55 = vpop.f32.mrf.mxu0 }
 0x172   :  { %v2770_v56 = vpop.f32.mrf.mxu1 }
 0x173   :  { %v1071_v57 = vpop.f32.mrf.mxu0 }
 0x174   :  { %v1248_v60 = vpop.f32.mrf.mxu1 }
 0x175   :  { %v2772_v61 = vpop.f32.mrf.mxu0 }
 0x176   :  { %v2774_v62 = vpop.f32.mrf.mxu1 }
 0x177   :  { %v1074_v0 = vpop.f32.mrf.mxu0 }
 0x178   :  { %v1251_v2 = vpop.f32.mrf.mxu1  ;;  %v1046_v0 = vadd.f32 %v2687_v63, %v1045_v20 }
 0x179   :  { %v2776_v5 = vpop.f32.mrf.mxu0 }
 0x17a   :  { %v2778_v6 = vpop.f32.mrf.mxu1 }
 0x17b   :  { %v1079_v7 = vpop.f32.mrf.mxu0 }
 0x17c   :  { %v1256_v9 = vpop.f32.mrf.mxu1 }
 0x17d   :  { %v2780_v11 = vpop.f32.mrf.mxu0  ;;  %v1049_v9 = vadd.f32 %v2687_v63, %v1048_v26 }
 0x17e   :  { %v2782_v13 = vpop.f32.mrf.mxu1 }
 0x17f   :  { %v1082_v18 = vpop.f32.mrf.mxu0 }
 0x180   :  { %v1259_v19 = vpop.f32.mrf.mxu1 }
 0x181   :  { %v2784_v24 = vpop.f32.mrf.mxu0 }
 0x182   :  { %v2786_v25 = vpop.f32.mrf.mxu1 }
 0x183   :  { %v1087_v29 = vpop.f32.mrf.mxu0 }
 0x184   :  { %v1264_v31 = vpop.f32.mrf.mxu1  ;;  %v1041_v29 = vadd.f32 %v2687_v63, %v2752_v14 }
 0x185   :  { %v2788_v35 = vpop.f32.mrf.mxu0  ;;  %v1223_v31 = vadd.f32 %v1222_v21, %v1046_v0 }
 0x186   :  { %v2790_v36 = vpop.f32.mrf.mxu1  ;;  %v1218_v26 = vadd.f32 %v2754_v17, %v1041_v29 }
 0x187   :  { %v1090_v41 = vpop.f32.mrf.mxu0 }
 0x188   :  { %v1267_v42 = vpop.f32.mrf.mxu1 }
 0x189   :  { %v2792_v47 = vpop.f32.mrf.mxu0 }
 0x18a   :  { %v2794_v48 = vpop.f32.mrf.mxu1 }
 0x18b   :  { %v1095_v53 = vpop.f32.mrf.mxu0 }
 0x18c   :  { %v1272_v54 = vpop.f32.mrf.mxu1 }
 0x18d   :  { %v2796_v57 = vpop.f32.mrf.mxu0  ;;  %v1226_v54 = vadd.f32 %v1225_v27, %v1049_v9 }
 0x18e   :  { %v2798_v60 = vpop.f32.mrf.mxu1 }
 0x18f   :  { %v1098_v2 = vpop.f32.mrf.mxu0 }
 0x190   :  { %v1275_v7 = vpop.f32.mrf.mxu1 }
 0x191   :  { %v2030_v18 = vpop.f32.mrf.mxu0  ;;  %v1062_v7 = vadd.f32 %v2687_v63, %v1061_v43  ;;  %v1057_v43 = vadd.f32 %v2687_v63, %v2760_v38 }
 0x192   :  { %v2050_v19 = vpop.f32.mrf.mxu1  ;;  %v1320_v42 = vadd.f32 %v2030_v18, %v2696_v16  ;;  %v1054_v16 = vadd.f32 %v2687_v63, %v2756_v32 }
 0x193   :  { %v1311_v41 = vpop.f32.mrf.mxu0  ;;  %v1400_v51 = vadd.f32 %v2050_v19, %v1223_v31  ;;  %v1239_v32 = vadd.f32 %v2764_v45, %v1062_v7 }
 0x194   :  { %v1391_v53 = vpop.f32.mrf.mxu1  ;;  %v1312_v44 = vadd.f32 %v1311_v41, %v2690_v4  ;;  %v1456_v0 = vmax.f32 %v1320_v42, 0.0  ;;  %v1065_v4 = vadd.f32 %v2687_v63, %v1064_v49  ;;  %v1231_v38 = vadd.f32 %v2758_v33, %v1054_v16 }
 0x195   :  { %v2031_v3 = vpop.f32.mrf.mxu0  ;;  %v1392_v59 = vadd.f32 %v1391_v53, %v2750_v12  ;;  %v1234_v33 = vadd.f32 %v2762_v39, %v1057_v43  ;;  %v1081_v39 = vadd.f32 %v2687_v63, %v2780_v11 }
 0x196   :  { %v1323_v20 = vadd.f32 %v2031_v3, %v2699_v22  ;;  %v2051_v2 = vpop.f32.mrf.mxu1  ;;  %v1476_v22 = vmax.f32 %v1400_v51, 0.0  ;;  %v1454_v12 = vmax.f32 %v1312_v44, 0.0  ;;  %v1242_v44 = vadd.f32 %v2766_v50, %v1065_v4 }
 0x197   :  { %v1403_v14 = vadd.f32 %v2051_v2, %v1226_v54  ;;  %v1314_v21 = vpop.f32.mrf.mxu0  ;;  %v1474_v42 = vmax.f32 %v1392_v59, 0.0  ;;  %v1078_v50 = vadd.f32 %v2687_v63, %v2776_v5 }
 0x198   :  { %v1457_v27 = vmax.f32 %v1323_v20, 0.0  ;;  %v1315_v9 = vadd.f32 %v1314_v21, %v2693_v10  ;;  %v1394_v18 = vpop.f32.mrf.mxu1 }
 0x199   :  { %v1477_v3 = vmax.f32 %v1403_v14, 0.0  ;;  %v1395_v19 = vadd.f32 %v1394_v18, %v1218_v26  ;;  %v2034_v17 = vpop.f32.mrf.mxu0 }
 0x19a   :  { %v1899_v29 = vpack.c.bf16 %v1457_v27, %v1456_v0  ;;  %v1455_v31 = vmax.f32 %v1315_v9, 0.0  ;;  %v2054_v41 = vpop.f32.mrf.mxu1  ;;  %v1336_v49 = vadd.f32 %v2034_v17, %v2708_v40  ;;  %v1070_v0 = vadd.f32 %v2687_v63, %v2768_v55 }
 0x19b   :  { %v1949_v53 = vpack.c.bf16 %v1477_v3, %v1476_v22  ;;  %v1475_v54 = vmax.f32 %v1395_v19, 0.0  ;;  %v1327_v10 = vpop.f32.mrf.mxu0  ;;  %v1416_v45 = vadd.f32 %v2054_v41, %v1239_v32  ;;  %v1073_v3 = vadd.f32 %v2687_v63, %v2772_v61 }
 0x19c   :  { %1981 = vst [vmem:[%s2917_s3 + $0x8] sm:$0xff] %v1899_v29   ;;  %v1894_v51 = vpack.c.bf16 %v1455_v31, %v1454_v12  ;;  %v1407_v20 = vpop.f32.mrf.mxu1  ;;  %v1328_v26 = vadd.f32 %v1327_v10, %v2702_v28  ;;  %v1460_v27 = vmax.f32 %v1336_v49, 0.0  ;;  %v1255_v55 = vadd.f32 %v2778_v6, %v1078_v50 }
 0x19d   :  { %1991 = vst [vmem:[%s2917_s3 + $0x58] sm:$0xff] %v1949_v53   ;;  %v1944_v59 = vpack.c.bf16 %v1475_v54, %v1474_v42  ;;  %v2035_v2 = vpop.f32.mrf.mxu0  ;;  %v1408_v14 = vadd.f32 %v1407_v20, %v1231_v38  ;;  %v1480_v18 = vmax.f32 %v1416_v45, 0.0  ;;  %v1247_v61 = vadd.f32 %v2770_v56, %v1070_v0 }
 0x19e   :  { %1895 = vst [vmem:[%s2917_s3] sm:$0xff] %v1894_v51   ;;  %v1339_v40 = vadd.f32 %v2035_v2, %v2711_v46  ;;  %v2055_v7 = vpop.f32.mrf.mxu1  ;;  %v1458_v19 = vmax.f32 %v1328_v26, 0.0  ;;  %v1258_v53 = vadd.f32 %v2782_v13, %v1081_v39  ;;  %v1250_v56 = vadd.f32 %v2774_v62, %v1073_v3 }
 0x19f   :  { %1990 = vst [vmem:[%s2917_s3 + $0x50] sm:$0xff] %v1944_v59   ;;  %v1419_v21 = vadd.f32 %v2055_v7, %v1242_v44  ;;  %v1330_v16 = vpop.f32.mrf.mxu0  ;;  %v1478_v29 = vmax.f32 %v1408_v14, 0.0  ;;  %v1094_v13 = vadd.f32 %v2687_v63, %v2792_v47  ;;  %v1086_v59 = vadd.f32 %v2687_v63, %v2784_v24 }
 0x1a0   :  { %v1461_v28 = vmax.f32 %v1339_v40, 0.0  ;;  %v1331_v46 = vadd.f32 %v1330_v16, %v2705_v34  ;;  %v1410_v9 = vpop.f32.mrf.mxu1  ;;  %v1097_v62 = vadd.f32 %v2687_v63, %v2796_v57 }
 0x1a1   :  { %v1481_v5 = vmax.f32 %v1419_v21, 0.0  ;;  %v1411_v4 = vadd.f32 %v1410_v9, %v1234_v33  ;;  %v2038_v22 = vpop.f32.mrf.mxu0  ;;  %v1089_v33 = vadd.f32 %v2687_v63, %v2788_v35  ;;  %v1271_v24 = vadd.f32 %v2794_v48, %v1094_v13 }
 0x1a2   :  { %v1909_v17 = vpack.c.bf16 %v1461_v28, %v1460_v27  ;;  %v1459_v43 = vmax.f32 %v1331_v46, 0.0  ;;  %v2058_v12 = vpop.f32.mrf.mxu1  ;;  %v1352_v32 = vadd.f32 %v2038_v22, %v2720_v1  ;;  %v1263_v63 = vadd.f32 %v2786_v25, %v1086_v59 }
 0x1a3   :  { %v1959_v31 = vpack.c.bf16 %v1481_v5, %v1480_v18  ;;  %v1479_v34 = vmax.f32 %v1411_v4, 0.0  ;;  %v1343_v41 = vpop.f32.mrf.mxu0  ;;  %v1432_v54 = vadd.f32 %v2058_v12, %v1255_v55  ;;  %v1274_v35 = vadd.f32 %v2798_v60, %v1097_v62 }
 0x1a4   :  { %1983 = vst [vmem:[%s2917_s3 + $0x18] sm:$0xff] %v1909_v17   ;;  %v1904_v11 = vpack.c.bf16 %v1459_v43, %v1458_v19  ;;  %v1423_v42 = vpop.f32.mrf.mxu1  ;;  %v1344_v51 = vadd.f32 %v1343_v41, %v2714_v52  ;;  %v1464_v45 = vmax.f32 %v1352_v32, 0.0  ;;  %v1266_v25 = vadd.f32 %v2790_v36, %v1089_v33 }
 0x1a5   :  { %1993 = vst [vmem:[%s2917_s3 + $0x68] sm:$0xff] %v1959_v31   ;;  %v1954_v6 = vpack.c.bf16 %v1479_v34, %v1478_v29  ;;  %v2039_v10 = vpop.f32.mrf.mxu0  ;;  %v1424_v20 = vadd.f32 %v1423_v42, %v1247_v61  ;;  %v1484_v26 = vmax.f32 %v1432_v54, 0.0 }
 0x1a6   :  { %1982 = vst [vmem:[%s2917_s3 + $0x10] sm:$0xff] %v1904_v11   ;;  %v1355_v1 = vadd.f32 %v2039_v10, %v2723_v8  ;;  %v2059_v49 = vpop.f32.mrf.mxu1  ;;  %v1462_v50 = vmax.f32 %v1344_v51, 0.0  ;;  %v2923_v10 = vld [vmem:[#allocation2_spill] sm:$0xff] }
 0x1a7   :  { %1992 = vst [vmem:[%s2917_s3 + $0x60] sm:$0xff] %v1954_v6   ;;  %v1435_v38 = vadd.f32 %v2059_v49, %v1258_v53  ;;  %v1346_v44 = vpop.f32.mrf.mxu0  ;;  %v1482_v0 = vmax.f32 %v1424_v20, 0.0  ;;  %v2922_v53 = vld [vmem:[#allocation4_spill] sm:$0xff] }
 0x1a8   :  { %v1465_v52 = vmax.f32 %v1355_v1, 0.0  ;;  %v1347_v8 = vadd.f32 %v1346_v44, %v2717_v58  ;;  %v1426_v2 = vpop.f32.mrf.mxu1  ;;  %v2924_v1 = vld [vmem:[#allocation5_spill] sm:$0xff] }
 0x1a9   :  { %v1485_v47 = vmax.f32 %v1435_v38, 0.0  ;;  %v1427_v40 = vadd.f32 %v1426_v2, %v1250_v56  ;;  %v2042_v7 = vpop.f32.mrf.mxu0  ;;  %v2925_v38 = vld [vmem:[#allocation3_spill] sm:$0xff] }
 0x1aa   :  { %v1919_v14 = vpack.c.bf16 %v1465_v52, %v1464_v45  ;;  %v1463_v21 = vmax.f32 %v1347_v8, 0.0  ;;  %v2062_v16 = vpop.f32.mrf.mxu1  ;;  %v1368_v46 = vadd.f32 %v2042_v7, %v2732_v30 }
 0x1ab   :  { %v1969_v27 = vpack.c.bf16 %v1485_v47, %v1484_v26  ;;  %v1483_v58 = vmax.f32 %v1427_v40, 0.0  ;;  %v1359_v28 = vpop.f32.mrf.mxu0  ;;  %v1448_v39 = vadd.f32 %v2062_v16, %v1271_v24 }
 0x1ac   :  { %1985 = vst [vmem:[%s2917_s3 + $0x28] sm:$0xff] %v1919_v14   ;;  %v1914_v57 = vpack.c.bf16 %v1463_v21, %v1462_v50  ;;  %v1439_v9 = vpop.f32.mrf.mxu1  ;;  %v1360_v5 = vadd.f32 %v1359_v28, %v2726_v15  ;;  %v1468_v19 = vmax.f32 %v1368_v46, 0.0 }
 0x1ad   :  { %1995 = vst [vmem:[%s2917_s3 + $0x78] sm:$0xff] %v1969_v27   ;;  %v1964_v48 = vpack.c.bf16 %v1483_v58, %v1482_v0  ;;  %v2043_v18 = vpop.f32.mrf.mxu0  ;;  %v1440_v60 = vadd.f32 %v1439_v9, %v1263_v63  ;;  %v1488_v55 = vmax.f32 %v1448_v39, 0.0 }
 0x1ae   :  { %1984 = vst [vmem:[%s2917_s3 + $0x20] sm:$0xff] %v1914_v57   ;;  %v1371_v30 = vadd.f32 %v2043_v18, %v2735_v37  ;;  %v2063_v4 = vpop.f32.mrf.mxu1  ;;  %v1466_v37 = vmax.f32 %v1360_v5, 0.0 }
 0x1af   :  { %1994 = vst [vmem:[%s2917_s3 + $0x70] sm:$0xff] %v1964_v48   ;;  %v1451_v22 = vadd.f32 %v2063_v4, %v1274_v35  ;;  %v1362_v3 = vpop.f32.mrf.mxu0  ;;  %v1486_v36 = vmax.f32 %v1440_v60, 0.0 }
 0x1b0   :  { %v1469_v17 = vmax.f32 %v1371_v30, 0.0  ;;  %v1363_v43 = vadd.f32 %v1362_v3, %v2729_v23  ;;  %v1442_v12 = vpop.f32.mrf.mxu1 }
 0x1b1   :  { %v1489_v29 = vmax.f32 %v1451_v22, 0.0  ;;  %v1443_v15 = vadd.f32 %v1442_v12, %v1266_v25  ;;  %v2046_v31 = vpop.f32.mrf.mxu0 }
 0x1b2   :  { %v1929_v34 = vpack.c.bf16 %v1469_v17, %v1468_v19  ;;  %v1467_v41 = vmax.f32 %v1363_v43, 0.0  ;;  %v1384_v6 = vadd.f32 %v2046_v31, %v2922_v53 }
 0x1b3   :  { %v1979_v11 = vpack.c.bf16 %v1489_v29, %v1488_v55  ;;  %v1487_v32 = vmax.f32 %v1443_v15, 0.0  ;;  %v1375_v42 = vpop.f32.mrf.mxu0 }
 0x1b4   :  { %1987 = vst [vmem:[%s2917_s3 + $0x38] sm:$0xff] %v1929_v34   ;;  %v1924_v61 = vpack.c.bf16 %v1467_v41, %v1466_v37  ;;  %v1376_v51 = vadd.f32 %v1375_v42, %v2923_v10  ;;  %v1472_v13 = vmax.f32 %v1384_v6, 0.0 }
 0x1b5   :  { %1997 = vst [vmem:[%s2917_s3 + $0x88] sm:$0xff] %v1979_v11   ;;  %v1974_v23 = vpack.c.bf16 %v1487_v32, %v1486_v36  ;;  %v2047_v54 = vpop.f32.mrf.mxu0 }
 0x1b6   :  { %1986 = vst [vmem:[%s2917_s3 + $0x30] sm:$0xff] %v1924_v61   ;;  %v1387_v49 = vadd.f32 %v2047_v54, %v2924_v1  ;;  %v1470_v59 = vmax.f32 %v1376_v51, 0.0 }
 0x1b7   :  { %1996 = vst [vmem:[%s2917_s3 + $0x80] sm:$0xff] %v1974_v23   ;;  %v1378_v56 = vpop.f32.mrf.mxu0 }
 0x1b8   :  { %v1473_v20 = vmax.f32 %v1387_v49, 0.0  ;;  %v1379_v44 = vadd.f32 %v1378_v56, %v2925_v38 }
 0x1ba   :  { %v1939_v45 = vpack.c.bf16 %v1473_v20, %v1472_v13  ;;  %v1471_v52 = vmax.f32 %v1379_v44, 0.0 }
 0x1bc   :  { %1989 = vst [vmem:[%s2917_s3 + $0x48] sm:$0xff] %v1939_v45   ;;  %v1934_v8 = vpack.c.bf16 %v1471_v52, %v1470_v59 }
 0x1be   :  { %1988 = vst [vmem:[%s2917_s3 + $0x40] sm:$0xff] %v1934_v8  }

// kernel: ppo_forward.8
= control target key start
LH: loop header
LB: loop body
LE: loop exit
PB: predicated region body
PF: predicated region fallthrough
CT: control target
= control target key end

     0   :  { %vm434_vm0 = vcmask 523264   ;;  %s1165_s1 = inlined_call_operand.vmem [shape: bf16[576,128], index: 1, kind: input, shape index: {}]   ;;  %s1166_s0 = inlined_call_operand.vmem [shape: bf16[64,576], index: 0, kind: input, shape index: {}]   ;;  %s1167_s2 = inlined_call_operand.vmem [shape: f32[1,128], index: 2, kind: input, shape index: {}]   ;;  %s1168_s3 = inlined_call_operand.vmem [shape: bf16[64,128], index: 3, kind: output, shape index: {}]  }
   0x1   :  { %v898_v0 = vld [vmem:[%s1165_s1 + $0x78] sm:$0xff]   ;;  %v902_v4 = vld [vmem:[%s1165_s1 + $0x70] sm:$0xff]   ;;  %v906_v8 = vld [vmem:[%s1165_s1 + $0x68] sm:$0xff]  }
   0x2   :  { %v899_v1 = vld [vmem:[%s1165_s1 + $0xf8] sm:$0xff]   ;;  %786 = vmatprep.subr.bf16.mxu0 %v898_v0  ;;  %v903_v5 = vld [vmem:[%s1165_s1 + $0xf0] sm:$0xff]   ;;  %v907_v9 = vld [vmem:[%s1165_s1 + $0xe8] sm:$0xff]  }
   0x3   :  { %v900_v2 = vld [vmem:[%s1165_s1 + $0x38] sm:$0xff]   ;;  %826 = vmatprep.subr.bf16.mxu1 %v899_v1  ;;  %v904_v6 = vld [vmem:[%s1165_s1 + $0x30] sm:$0xff]   ;;  %v908_v10 = vld [vmem:[%s1165_s1 + $0x28] sm:$0xff]  }
   0x4   :  { %v901_v3 = vld [vmem:[%s1165_s1 + $0xb8] sm:$0xff]   ;;  %787 = vmatpush3.bf16.msra.mxu0 %v900_v2  ;;  %v905_v7 = vld [vmem:[%s1165_s1 + $0xb0] sm:$0xff]   ;;  %v909_v11 = vld [vmem:[%s1165_s1 + $0xa8] sm:$0xff]  }
   0x5   :  { %827 = vmatpush3.bf16.msra.mxu1 %v901_v3  ;;  %788 = vmatprep.subr.bf16.mxu0 %v902_v4  ;;  %v910_v12 = vld [vmem:[%s1165_s1 + $0x60] sm:$0xff]   ;;  %v914_v16 = vld [vmem:[%s1165_s1 + $0x58] sm:$0xff]   ;;  %v918_v20 = vld [vmem:[%s1165_s1 + $0x50] sm:$0xff]  }
   0x6   :  { %828 = vmatprep.subr.bf16.mxu1 %v903_v5  ;;  %v911_v13 = vld [vmem:[%s1165_s1 + $0xe0] sm:$0xff]   ;;  %v915_v17 = vld [vmem:[%s1165_s1 + $0xd8] sm:$0xff]   ;;  %v919_v21 = vld [vmem:[%s1165_s1 + $0xd0] sm:$0xff]  }
   0x7   :  { %v912_v14 = vld [vmem:[%s1165_s1 + $0x20] sm:$0xff]   ;;  %v916_v18 = vld [vmem:[%s1165_s1 + $0x18] sm:$0xff]   ;;  %v920_v22 = vld [vmem:[%s1165_s1 + $0x10] sm:$0xff]  }
   0x8   :  { %789 = vmatpush3.bf16.msra.mxu0 %v904_v6  ;;  %v913_v15 = vld [vmem:[%s1165_s1 + $0xa0] sm:$0xff]   ;;  %v917_v19 = vld [vmem:[%s1165_s1 + $0x98] sm:$0xff]   ;;  %v921_v23 = vld [vmem:[%s1165_s1 + $0x90] sm:$0xff]  }
   0x9   :  { %829 = vmatpush3.bf16.msra.mxu1 %v905_v7  ;;  %790 = vmatprep.subr.bf16.mxu0 %v906_v8  ;;  %v922_v24 = vld [vmem:[%s1165_s1 + $0x48] sm:$0xff]   ;;  %v926_v28 = vld [vmem:[%s1165_s1 + $0x40] sm:$0xff]   ;;  %v936_v36 = vld [vmem:[%s1165_s1 + $0x118] sm:$0xff]  }
   0xa   :  { %830 = vmatprep.subr.bf16.mxu1 %v907_v9  ;;  %v923_v25 = vld [vmem:[%s1165_s1 + $0xc8] sm:$0xff]   ;;  %v927_v29 = vld [vmem:[%s1165_s1 + $0xc0] sm:$0xff]   ;;  %v943_v39 = vld [vmem:[%s1165_s1 + $0x110] sm:$0xff]  }
   0xb   :  { %v924_v26 = vld [vmem:[%s1165_s1 + $0x8] sm:$0xff]   ;;  %v928_v30 = vld [vmem:[%s1165_s1] sm:$0xff]   ;;  %v946_v43 = vld [vmem:[%s1166_s0 + $0x5c] ss:$20 sps:$4 sm:$0xff]  }
   0xc   :  { %791 = vmatpush3.bf16.msra.mxu0 %v908_v10  ;;  %v925_v27 = vld [vmem:[%s1165_s1 + $0x88] sm:$0xff]   ;;  %v929_v31 = vld [vmem:[%s1165_s1 + $0x80] sm:$0xff]   ;;  %v951_v48 = vld [vmem:[%s1166_s0 + $0x7c] ss:$20 sps:$4 sm:$0xff]  }
   0xd   :  { %831 = vmatpush3.bf16.msra.mxu1 %v909_v11  ;;  %792 = vmatprep.subr.bf16.mxu0 %v910_v12  ;;  %v930_v32 = vld [vmem:[%s1166_s0] ss:$20 sps:$4 sm:$0xff]   ;;  %v932_v33 = vld [vmem:[%s1166_s0 + $0x4] ss:$20 sps:$4 sm:$0xff]   ;;  %v933_v34 = vld [vmem:[%s1166_s0 + $0x8] ss:$20 sps:$4 sm:$0xff]  }
   0xe   :  { %832 = vmatprep.subr.bf16.mxu1 %v911_v13  ;;  %v935_v35 = vld [vmem:[%s1166_s0 + $0xc] ss:$20 sps:$4 sm:$0xff]   ;;  %479 = vmatprep.mubr.bf16.mxu0 %v932_v33  ;;  %v939_v38 = vld [vmem:[%s1166_s0 + $0x34] ss:$20 sps:$4 sm:$0xff]   ;;  %v942_v41 = vld [vmem:[%s1166_s0 + $0x30] ss:$20 sps:$4 sm:$0xff]  }
   0xf   :  { %544 = vmatprep.mubr.bf16.mxu1 %v935_v35  ;;  %v937_v37 = vld [vmem:[%s1166_s0 + $0x2c] ss:$20 sps:$4 sm:$0xff]   ;;  %v941_v40 = vld [vmem:[%s1166_s0 + $0x28] ss:$20 sps:$4 sm:$0xff]   ;;  %v948_v46 = vld [vmem:[%s1166_s0 + $0x50] ss:$20 sps:$4 sm:$0xff]  }
  0x10   :  { %793 = vmatpush3.bf16.msra.mxu0 %v912_v14  ;;  %v944_v42 = vld [vmem:[%s1166_s0 + $0x54] ss:$20 sps:$4 sm:$0xff]   ;;  %v957_v45 = vld [vmem:[%s1165_s1 + $0x100] sm:$0xff]   ;;  %v949_v47 = vld [vmem:[%s1166_s0 + $0x58] ss:$20 sps:$4 sm:$0xff]  }
  0x11   :  { %833 = vmatpush3.bf16.msra.mxu1 %v913_v15  ;;  %794 = vmatprep.subr.bf16.mxu0 %v914_v16  ;;  %v950_v44 = vld [vmem:[%s1165_s1 + $0x108] sm:$0xff]   ;;  %v953_v49 = vld [vmem:[%s1166_s0 + $0x84] ss:$20 sps:$4 sm:$0xff]   ;;  %v956_v51 = vld [vmem:[%s1166_s0 + $0x80] ss:$20 sps:$4 sm:$0xff]  }
  0x12   :  { %834 = vmatprep.subr.bf16.mxu1 %v915_v17  ;;  %v955_v50 = vld [vmem:[%s1166_s0 + $0x78] ss:$20 sps:$4 sm:$0xff]   ;;  %v958_v52 = vld [vmem:[%s1166_s0 + $0x10] ss:$20 sps:$4 sm:$0xff]   ;;  %v959_v53 = vld [vmem:[%s1166_s0 + $0x60] ss:$20 sps:$4 sm:$0xff]  }
  0x13   :  { %v960_v54 = vld [vmem:[%s1166_s0 + $0x38] ss:$20 sps:$4 sm:$0xff]   ;;  %v961_v55 = vld [vmem:[%s1166_s0 + $0x88] ss:$20 sps:$4 sm:$0xff]  }
  0x14   :  { %795 = vmatpush3.bf16.msra.mxu0 %v916_v18 }
  0x15   :  { %835 = vmatpush3.bf16.msra.mxu1 %v917_v19  ;;  %796 = vmatprep.subr.bf16.mxu0 %v918_v20 }
  0x16   :  { %836 = vmatprep.subr.bf16.mxu1 %v919_v21 }
  0x18   :  { %797 = vmatpush3.bf16.msra.mxu0 %v920_v22 }
  0x19   :  { %837 = vmatpush3.bf16.msra.mxu1 %v921_v23  ;;  %798 = vmatprep.subr.bf16.mxu0 %v922_v24 }
  0x1a   :  { %838 = vmatprep.subr.bf16.mxu1 %v923_v25 }
  0x1c   :  { %799 = vmatpush3.bf16.msra.mxu0 %v924_v26  ;;  %v686_v26 = vld [vmem:[%s1167_s2] ss:$0 sm:$0xff] }
  0x1d   :  { %839 = vmatpush3.bf16.msra.mxu1 %v925_v27  ;;  %800 = vmatprep.subr.bf16.mxu0 %v926_v28 }
  0x1e   :  { %840 = vmatprep.subr.bf16.mxu1 %v927_v29 }
  0x20   :  { %801 = vmatpush3.bf16.msra.mxu0 %v928_v30 }
  0x21   :  { %841 = vmatpush3.bf16.msra.mxu1 %v929_v31  ;;  %874 = vmatprep.subr.bf16.mxu0 %v936_v36 }
  0x22   :  { %890 = vmatprep.subr.bf16.mxu1 %v936_v36 }
  0x23   :  { %480 = vmatmul.mubr.bf16.vlgmr.msra.gmra.mxu0 %v930_v32 }
  0x24   :  { %545 = vmatmul.mubr.bf16.vlgmr.msra.gmra.mxu1 %v933_v34  ;;  %875 = vmatpush3.bf16.msra.mxu0 %v936_v36 }
  0x25   :  { %894 = vmatpush3.bf16.msra.mxu1 %v936_v36  ;;  %487 = vmatprep.mubr.bf16.mxu0 %v937_v37 }
  0x26   :  { %552 = vmatprep.mubr.bf16.mxu1 %v939_v38  ;;  %876 = vmatprep.subr.bf16.mxu0 %v943_v39 }
  0x27   :  { %891 = vmatprep.subr.bf16.mxu1 %v943_v39 }
  0x28   :  { %877 = vmatpush3.bf16.msra.mxu0 %v943_v39 }
  0x29   :  { %895 = vmatpush3.bf16.msra.mxu1 %v943_v39  ;;  %878 = vmatprep.subr.bf16.mxu0 %v950_v44 }
  0x2a   :  { %892 = vmatprep.subr.bf16.mxu1 %v950_v44 }
  0x2b   :  { %488 = vmatmul.mubr.bf16.gmra.mxu0 %v941_v40 }
  0x2c   :  { %553 = vmatmul.mubr.bf16.gmra.mxu1 %v942_v41  ;;  %495 = vmatprep.mubr.bf16.mxu0 %v944_v42 }
  0x2d   :  { %560 = vmatprep.mubr.bf16.mxu1 %v946_v43  ;;  %879 = vmatpush3.bf16.msra.mxu0 %v950_v44 }
  0x2e   :  { %896 = vmatpush3.bf16.msra.mxu1 %v950_v44  ;;  %880 = vmatprep.subr.bf16.mxu0 %v957_v45 }
  0x2f   :  { %893 = vmatprep.subr.bf16.mxu1 %v957_v45 }
  0x31   :  { %881 = vmatpush3.bf16.msra.mxu0 %v957_v45 }
  0x32   :  { %897 = vmatpush3.bf16.msra.mxu1 %v957_v45 }
  0x33   :  { %496 = vmatmul.mubr.bf16.gmra.mxu0 %v948_v46 }
  0x34   :  { %561 = vmatmul.mubr.bf16.gmra.mxu1 %v949_v47  ;;  %503 = vmatprep.mubr.bf16.mxu0 %v951_v48 }
  0x35   :  { %568 = vmatprep.mubr.bf16.mxu1 %v953_v49 }
  0x3b   :  { %504 = vmatmul.mubr.bf16.gmra.mxu0 %v955_v50 }
  0x3c   :  { %569 = vmatmul.mubr.bf16.gmra.mxu1 %v956_v51  ;;  %882 = vmatprep.mubr.msk.bf16.mxu0 %vm434_vm0, %v958_v52 }
  0x3d   :  { %886 = vmatprep.mubr.msk.bf16.mxu1 %vm434_vm0, %v959_v53 }
  0x43   :  { %883 = vmatmul.mubr.msk.bf16.vlgmr.msra.gmra.mxu0 %vm434_vm0, %v960_v54 }
  0x44   :  { %887 = vmatmul.mubr.msk.bf16.vlgmr.msra.gmra.mxu1 %vm434_vm0, %v961_v55 }
  0xe3   :  { %v802_v56 = vpop.f32.mrf.mxu0 }
  0xe4   :  { %v842_v57 = vpop.f32.mrf.mxu1 }
  0xe5   :  { %v803_v58 = vpop.f32.mrf.mxu0 }
  0xe6   :  { %v843_v59 = vpop.f32.mrf.mxu1  ;;  %v804_v23 = vadd.f32 %v803_v58, %v802_v56 }
  0xe7   :  { %v805_v60 = vpop.f32.mrf.mxu0  ;;  %v844_v45 = vadd.f32 %v843_v59, %v842_v57 }
  0xe8   :  { %v845_v61 = vpop.f32.mrf.mxu1  ;;  %v482_v36 = vadd.f32 %v804_v23, %v686_v26 }
  0xe9   :  { %v806_v62 = vpop.f32.mrf.mxu0 }
  0xea   :  { %v846_v63 = vpop.f32.mrf.mxu1  ;;  %v807_v24 = vadd.f32 %v806_v62, %v805_v60  ;;  %v547_v62 = vadd.f32 %v844_v45, %v482_v36 }
  0xeb   :  { %v808_v0 = vpop.f32.mrf.mxu0  ;;  %v847_v50 = vadd.f32 %v846_v63, %v845_v61 }
  0xec   :  { %v848_v1 = vpop.f32.mrf.mxu1  ;;  %v485_v37 = vadd.f32 %v807_v24, %v686_v26 }
  0xed   :  { %v809_v2 = vpop.f32.mrf.mxu0 }
  0xee   :  { %v849_v3 = vpop.f32.mrf.mxu1  ;;  %v810_v19 = vadd.f32 %v809_v2, %v808_v0  ;;  %v550_v2 = vadd.f32 %v847_v50, %v485_v37 }
  0xef   :  { %v811_v4 = vpop.f32.mrf.mxu0  ;;  %v850_v40 = vadd.f32 %v849_v3, %v848_v1 }
  0xf0   :  { %v851_v5 = vpop.f32.mrf.mxu1  ;;  %v490_v32 = vadd.f32 %v810_v19, %v686_v26 }
  0xf1   :  { %v812_v6 = vpop.f32.mrf.mxu0 }
  0xf2   :  { %v852_v7 = vpop.f32.mrf.mxu1  ;;  %v813_v20 = vadd.f32 %v812_v6, %v811_v4  ;;  %v555_v51 = vadd.f32 %v850_v40, %v490_v32 }
  0xf3   :  { %v814_v8 = vpop.f32.mrf.mxu0  ;;  %v853_v41 = vadd.f32 %v852_v7, %v851_v5 }
  0xf4   :  { %v854_v9 = vpop.f32.mrf.mxu1  ;;  %v493_v33 = vadd.f32 %v813_v20, %v686_v26 }
  0xf5   :  { %v815_v10 = vpop.f32.mrf.mxu0 }
  0xf6   :  { %v855_v11 = vpop.f32.mrf.mxu1  ;;  %v816_v28 = vadd.f32 %v815_v10, %v814_v8  ;;  %v558_v53 = vadd.f32 %v853_v41, %v493_v33 }
  0xf7   :  { %v817_v12 = vpop.f32.mrf.mxu0  ;;  %v856_v55 = vadd.f32 %v855_v11, %v854_v9 }
  0xf8   :  { %v857_v13 = vpop.f32.mrf.mxu1  ;;  %v498_v46 = vadd.f32 %v816_v28, %v686_v26 }
  0xf9   :  { %v818_v14 = vpop.f32.mrf.mxu0 }
  0xfa   :  { %v858_v15 = vpop.f32.mrf.mxu1  ;;  %v819_v29 = vadd.f32 %v818_v14, %v817_v12  ;;  %v563_v4 = vadd.f32 %v856_v55, %v498_v46 }
  0xfb   :  { %v820_v16 = vpop.f32.mrf.mxu0  ;;  %v859_v56 = vadd.f32 %v858_v15, %v857_v13 }
  0xfc   :  { %v860_v17 = vpop.f32.mrf.mxu1  ;;  %v501_v47 = vadd.f32 %v819_v29, %v686_v26 }
  0xfd   :  { %v821_v18 = vpop.f32.mrf.mxu0 }
  0xfe   :  { %v822_v21 = vadd.f32 %v821_v18, %v820_v16  ;;  %v861_v22 = vpop.f32.mrf.mxu1  ;;  %v566_v5 = vadd.f32 %v859_v56, %v501_v47 }
  0xff   :  { %v823_v25 = vpop.f32.mrf.mxu0  ;;  %v862_v38 = vadd.f32 %v861_v22, %v860_v17 }
 0x100   :  { %v863_v27 = vpop.f32.mrf.mxu1  ;;  %v506_v30 = vadd.f32 %v822_v21, %v686_v26 }
 0x101   :  { %v824_v31 = vpop.f32.mrf.mxu0 }
 0x102   :  { %v825_v34 = vadd.f32 %v824_v31, %v823_v25  ;;  %v864_v35 = vpop.f32.mrf.mxu1  ;;  %v571_v48 = vadd.f32 %v862_v38, %v506_v30 }
 0x103   :  { %v884_v39 = vpop.f32.mrf.mxu0  ;;  %v865_v43 = vadd.f32 %v864_v35, %v863_v27 }
 0x104   :  { %v509_v42 = vadd.f32 %v825_v34, %v686_v26  ;;  %v888_v44 = vpop.f32.mrf.mxu1  ;;  %v620_v60 = vadd.f32 %v884_v39, %v555_v51 }
 0x105   :  { %v611_v49 = vpop.f32.mrf.mxu0  ;;  %v636_v3 = vadd.f32 %v888_v44, %v571_v48 }
 0x106   :  { %v627_v52 = vpop.f32.mrf.mxu1  ;;  %v574_v54 = vadd.f32 %v865_v43, %v509_v42  ;;  %v612_v6 = vadd.f32 %v611_v49, %v547_v62 }
 0x107   :  { %v885_v58 = vpop.f32.mrf.mxu0  ;;  %v628_v8 = vadd.f32 %v627_v52, %v563_v4 }
 0x108   :  { %v623_v0 = vadd.f32 %v885_v58, %v558_v53  ;;  %v889_v1 = vpop.f32.mrf.mxu1 }
 0x109   :  { %v639_v57 = vadd.f32 %v889_v1, %v574_v54  ;;  %v614_v59 = vpop.f32.mrf.mxu0 }
 0x10a   :  { %v771_v7 = vpack.c.bf16 %v623_v0, %v620_v60  ;;  %v615_v61 = vadd.f32 %v614_v59, %v550_v2  ;;  %v630_v63 = vpop.f32.mrf.mxu1 }
 0x10b   :  { %v781_v10 = vpack.c.bf16 %v639_v57, %v636_v3  ;;  %v631_v12 = vadd.f32 %v630_v63, %v566_v5 }
 0x10c   :  { %783 = vst [vmem:[%s1168_s3 + $0x8] sm:$0xff] %v771_v7   ;;  %v766_v9 = vpack.c.bf16 %v615_v61, %v612_v6 }
 0x10d   :  { %785 = vst [vmem:[%s1168_s3 + $0x18] sm:$0xff] %v781_v10   ;;  %v776_v11 = vpack.c.bf16 %v631_v12, %v628_v8 }
 0x10e   :  { %767 = vst [vmem:[%s1168_s3] sm:$0xff] %v766_v9  }
 0x10f   :  { %784 = vst [vmem:[%s1168_s3 + $0x10] sm:$0xff] %v776_v11  }

// kernel: ppo_forward.9
= control target key start
LH: loop header
LB: loop body
LE: loop exit
PB: predicated region body
PF: predicated region fallthrough
CT: control target
= control target key end

     0   :  { %s7175_s1 = inlined_call_operand.vmem [shape: bf16[1920,512], index: 1, kind: input, shape index: {}]   ;;  %s7176_s0 = inlined_call_operand.vmem [shape: bf16[16,1920], index: 0, kind: input, shape index: {}]   ;;  %s7177_s3 = inlined_call_operand.vmem [shape: bf16[512,128], index: 3, kind: input, shape index: {}]   ;;  %s7178_s2 = inlined_call_operand.vmem [shape: f32[1,512], index: 2, kind: input, shape index: {}]   ;;  %s7179_s4 = inlined_call_operand.vmem [shape: f32[1,128], index: 4, kind: input, shape index: {}]   ;;  %s7180_s5 = inlined_call_operand.vmem [shape: f32[16,128], index: 5, kind: output, shape index: {}]  }
   0x1   :  { %v4631_v0 = vld [vmem:[%s7175_s1 + $0xe4] ss:$16 sps:$4 sm:$0xff]   ;;  %v4635_v2 = vld [vmem:[%s7175_s1 + $0xe0] ss:$16 sps:$4 sm:$0xff]   ;;  %v4732_v51 = vld [vmem:[%s7176_s0 + $0xc] ss:$60 sps:$4 sm:$0xff]  }
   0x2   :  { %v4633_v1 = vld [vmem:[%s7175_s1 + $0x2e4] ss:$16 sps:$4 sm:$0xff]   ;;  %3015 = vmatprep.subr.bf16.mxu0 %v4631_v0  ;;  %v4636_v3 = vld [vmem:[%s7175_s1 + $0x2e0] ss:$16 sps:$4 sm:$0xff]   ;;  %3090 = vmatprep.mubr.bf16.mxu1 %v4732_v51 }
   0x3   :  { %3058 = vmatprep.subr.bf16.mxu1 %v4633_v1  ;;  %v4637_v4 = vld [vmem:[%s7175_s1 + $0xc4] ss:$16 sps:$4 sm:$0xff]   ;;  %3016 = vmatpush1.bf16.msra.mxu0 %v4635_v2  ;;  %v4641_v6 = vld [vmem:[%s7175_s1 + $0xc0] ss:$16 sps:$4 sm:$0xff]  }
   0x4   :  { %3059 = vmatpush1.bf16.msra.mxu1 %v4636_v3  ;;  %v4639_v5 = vld [vmem:[%s7175_s1 + $0x2c4] ss:$16 sps:$4 sm:$0xff]   ;;  %3017 = vmatprep.subr.bf16.mxu0 %v4637_v4  ;;  %v4642_v7 = vld [vmem:[%s7175_s1 + $0x2c0] ss:$16 sps:$4 sm:$0xff]  }
   0x5   :  { %3060 = vmatprep.subr.bf16.mxu1 %v4639_v5  ;;  %v4643_v8 = vld [vmem:[%s7175_s1 + $0xa4] ss:$16 sps:$4 sm:$0xff]   ;;  %v4647_v10 = vld [vmem:[%s7175_s1 + $0xa0] ss:$16 sps:$4 sm:$0xff]  }
   0x6   :  { %v4645_v9 = vld [vmem:[%s7175_s1 + $0x2a4] ss:$16 sps:$4 sm:$0xff]   ;;  %v4648_v11 = vld [vmem:[%s7175_s1 + $0x2a0] ss:$16 sps:$4 sm:$0xff]  }
   0x7   :  { %3018 = vmatpush1.bf16.msra.mxu0 %v4641_v6  ;;  %v4649_v12 = vld [vmem:[%s7175_s1 + $0x84] ss:$16 sps:$4 sm:$0xff]   ;;  %v4653_v14 = vld [vmem:[%s7175_s1 + $0x80] ss:$16 sps:$4 sm:$0xff]  }
   0x8   :  { %3061 = vmatpush1.bf16.msra.mxu1 %v4642_v7  ;;  %3019 = vmatprep.subr.bf16.mxu0 %v4643_v8  ;;  %v4651_v13 = vld [vmem:[%s7175_s1 + $0x284] ss:$16 sps:$4 sm:$0xff]   ;;  %v4654_v15 = vld [vmem:[%s7175_s1 + $0x280] ss:$16 sps:$4 sm:$0xff]  }
   0x9   :  { %3062 = vmatprep.subr.bf16.mxu1 %v4645_v9  ;;  %v4655_v16 = vld [vmem:[%s7175_s1 + $0x64] ss:$16 sps:$4 sm:$0xff]   ;;  %v4659_v18 = vld [vmem:[%s7175_s1 + $0x60] ss:$16 sps:$4 sm:$0xff]  }
   0xa   :  { %v4657_v17 = vld [vmem:[%s7175_s1 + $0x264] ss:$16 sps:$4 sm:$0xff]   ;;  %v4660_v19 = vld [vmem:[%s7175_s1 + $0x260] ss:$16 sps:$4 sm:$0xff]  }
   0xb   :  { %3020 = vmatpush1.bf16.msra.mxu0 %v4647_v10  ;;  %v4661_v20 = vld [vmem:[%s7175_s1 + $0x44] ss:$16 sps:$4 sm:$0xff]   ;;  %v4665_v22 = vld [vmem:[%s7175_s1 + $0x40] ss:$16 sps:$4 sm:$0xff]  }
   0xc   :  { %3063 = vmatpush1.bf16.msra.mxu1 %v4648_v11  ;;  %3021 = vmatprep.subr.bf16.mxu0 %v4649_v12  ;;  %v4663_v21 = vld [vmem:[%s7175_s1 + $0x244] ss:$16 sps:$4 sm:$0xff]   ;;  %v4666_v23 = vld [vmem:[%s7175_s1 + $0x240] ss:$16 sps:$4 sm:$0xff]  }
   0xd   :  { %3064 = vmatprep.subr.bf16.mxu1 %v4651_v13  ;;  %v4667_v24 = vld [vmem:[%s7175_s1 + $0x24] ss:$16 sps:$4 sm:$0xff]   ;;  %v4671_v26 = vld [vmem:[%s7175_s1 + $0x20] ss:$16 sps:$4 sm:$0xff]  }
   0xe   :  { %v4669_v25 = vld [vmem:[%s7175_s1 + $0x224] ss:$16 sps:$4 sm:$0xff]   ;;  %v4672_v27 = vld [vmem:[%s7175_s1 + $0x220] ss:$16 sps:$4 sm:$0xff]  }
   0xf   :  { %3022 = vmatpush1.bf16.msra.mxu0 %v4653_v14  ;;  %v4673_v28 = vld [vmem:[%s7175_s1 + $0x4] ss:$16 sps:$4 sm:$0xff]   ;;  %v4677_v30 = vld [vmem:[%s7175_s1] ss:$16 sps:$4 sm:$0xff]  }
  0x10   :  { %3065 = vmatpush1.bf16.msra.mxu1 %v4654_v15  ;;  %3023 = vmatprep.subr.bf16.mxu0 %v4655_v16  ;;  %v4675_v29 = vld [vmem:[%s7175_s1 + $0x204] ss:$16 sps:$4 sm:$0xff]   ;;  %v4678_v31 = vld [vmem:[%s7175_s1 + $0x200] ss:$16 sps:$4 sm:$0xff]  }
  0x11   :  { %3066 = vmatprep.subr.bf16.mxu1 %v4657_v17  ;;  %v4679_v32 = vld [vmem:[%s7175_s1 + $0x1e4] ss:$16 sps:$4 sm:$0xff]   ;;  %v4683_v34 = vld [vmem:[%s7175_s1 + $0x1e0] ss:$16 sps:$4 sm:$0xff]  }
  0x12   :  { %v4681_v33 = vld [vmem:[%s7175_s1 + $0x3e4] ss:$16 sps:$4 sm:$0xff]   ;;  %v4684_v35 = vld [vmem:[%s7175_s1 + $0x3e0] ss:$16 sps:$4 sm:$0xff]  }
  0x13   :  { %3024 = vmatpush1.bf16.msra.mxu0 %v4659_v18  ;;  %v4685_v36 = vld [vmem:[%s7175_s1 + $0x1c4] ss:$16 sps:$4 sm:$0xff]   ;;  %v4689_v38 = vld [vmem:[%s7175_s1 + $0x1c0] ss:$16 sps:$4 sm:$0xff]  }
  0x14   :  { %3067 = vmatpush1.bf16.msra.mxu1 %v4660_v19  ;;  %3025 = vmatprep.subr.bf16.mxu0 %v4661_v20  ;;  %v4687_v37 = vld [vmem:[%s7175_s1 + $0x3c4] ss:$16 sps:$4 sm:$0xff]   ;;  %v4690_v39 = vld [vmem:[%s7175_s1 + $0x3c0] ss:$16 sps:$4 sm:$0xff]  }
  0x15   :  { %3068 = vmatprep.subr.bf16.mxu1 %v4663_v21  ;;  %v4691_v40 = vld [vmem:[%s7175_s1 + $0x1a4] ss:$16 sps:$4 sm:$0xff]   ;;  %v4695_v42 = vld [vmem:[%s7175_s1 + $0x1a0] ss:$16 sps:$4 sm:$0xff]  }
  0x16   :  { %v4693_v41 = vld [vmem:[%s7175_s1 + $0x3a4] ss:$16 sps:$4 sm:$0xff]   ;;  %v4696_v43 = vld [vmem:[%s7175_s1 + $0x3a0] ss:$16 sps:$4 sm:$0xff]  }
  0x17   :  { %3026 = vmatpush1.bf16.msra.mxu0 %v4665_v22  ;;  %v4697_v44 = vld [vmem:[%s7175_s1 + $0x184] ss:$16 sps:$4 sm:$0xff]   ;;  %v4701_v46 = vld [vmem:[%s7175_s1 + $0x180] ss:$16 sps:$4 sm:$0xff]  }
  0x18   :  { %3069 = vmatpush1.bf16.msra.mxu1 %v4666_v23  ;;  %3027 = vmatprep.subr.bf16.mxu0 %v4667_v24  ;;  %v4699_v45 = vld [vmem:[%s7175_s1 + $0x384] ss:$16 sps:$4 sm:$0xff]   ;;  %v4702_v47 = vld [vmem:[%s7175_s1 + $0x380] ss:$16 sps:$4 sm:$0xff]  }
  0x19   :  { %3070 = vmatprep.subr.bf16.mxu1 %v4669_v25  ;;  %v4703_v48 = vld [vmem:[%s7175_s1 + $0x164] ss:$16 sps:$4 sm:$0xff]   ;;  %v4707_v52 = vld [vmem:[%s7175_s1 + $0x160] ss:$16 sps:$4 sm:$0xff]  }
  0x1a   :  { %v4729_v49 = vld [vmem:[%s7176_s0 + $0x4] ss:$60 sps:$4 sm:$0xff]  }
  0x1b   :  { %3028 = vmatpush1.bf16.msra.mxu0 %v4671_v26  ;;  %v4705_v50 = vld [vmem:[%s7175_s1 + $0x364] ss:$16 sps:$4 sm:$0xff]   ;;  %3047 = vmatprep.mubr.bf16.mxu0 %v4729_v49  ;;  %v4708_v53 = vld [vmem:[%s7175_s1 + $0x360] ss:$16 sps:$4 sm:$0xff]  }
  0x1c   :  { %3071 = vmatpush1.bf16.msra.mxu1 %v4672_v27  ;;  %3029 = vmatprep.subr.bf16.mxu0 %v4673_v28  ;;  %v4709_v54 = vld [vmem:[%s7175_s1 + $0x144] ss:$16 sps:$4 sm:$0xff]   ;;  %v4713_v56 = vld [vmem:[%s7175_s1 + $0x140] ss:$16 sps:$4 sm:$0xff]  }
  0x1d   :  { %3072 = vmatprep.subr.bf16.mxu1 %v4675_v29  ;;  %v4711_v55 = vld [vmem:[%s7175_s1 + $0x344] ss:$16 sps:$4 sm:$0xff]   ;;  %v4714_v57 = vld [vmem:[%s7175_s1 + $0x340] ss:$16 sps:$4 sm:$0xff]  }
  0x1e   :  { %v4715_v58 = vld [vmem:[%s7175_s1 + $0x124] ss:$16 sps:$4 sm:$0xff]   ;;  %v4719_v60 = vld [vmem:[%s7175_s1 + $0x120] ss:$16 sps:$4 sm:$0xff]  }
  0x1f   :  { %3030 = vmatpush1.bf16.msra.mxu0 %v4677_v30  ;;  %v4717_v59 = vld [vmem:[%s7175_s1 + $0x324] ss:$16 sps:$4 sm:$0xff]   ;;  %v4720_v61 = vld [vmem:[%s7175_s1 + $0x320] ss:$16 sps:$4 sm:$0xff]  }
  0x20   :  { %3073 = vmatpush1.bf16.msra.mxu1 %v4678_v31  ;;  %3031 = vmatprep.subr.bf16.mxu0 %v4679_v32  ;;  %v4721_v62 = vld [vmem:[%s7175_s1 + $0x104] ss:$16 sps:$4 sm:$0xff]   ;;  %v4725_v0 = vld [vmem:[%s7175_s1 + $0x100] ss:$16 sps:$4 sm:$0xff]  }
  0x21   :  { %3074 = vmatprep.subr.bf16.mxu1 %v4681_v33  ;;  %v4723_v63 = vld [vmem:[%s7175_s1 + $0x304] ss:$16 sps:$4 sm:$0xff]   ;;  %v4726_v1 = vld [vmem:[%s7175_s1 + $0x300] ss:$16 sps:$4 sm:$0xff]  }
  0x22   :  { %v4735_v2 = vld [vmem:[%s7175_s1 + $0x4e4] ss:$16 sps:$4 sm:$0xff]   ;;  %v4727_v4 = vld [vmem:[%s7176_s0] ss:$60 sps:$4 sm:$0xff]  }
  0x23   :  { %3032 = vmatpush2.bf16.msra.mxu0 %v4683_v34  ;;  %v4738_v3 = vld [vmem:[%s7175_s1 + $0x6e4] ss:$16 sps:$4 sm:$0xff]   ;;  %v4733_v6 = vld [vmem:[%s7175_s1 + $0x4e0] ss:$16 sps:$4 sm:$0xff]  }
  0x24   :  { %3075 = vmatpush2.bf16.msra.mxu1 %v4684_v35  ;;  %3033 = vmatprep.subr.bf16.mxu0 %v4685_v36  ;;  %v4730_v5 = vld [vmem:[%s7176_s0 + $0x8] ss:$60 sps:$4 sm:$0xff]   ;;  %v4736_v7 = vld [vmem:[%s7175_s1 + $0x6e0] ss:$16 sps:$4 sm:$0xff]   ;;  %v4834_v35 = vld [vmem:[%s7176_s0 + $0x1c] ss:$60 sps:$4 sm:$0xff]  }
  0x25   :  { %3076 = vmatprep.subr.bf16.mxu1 %v4687_v37  ;;  %v4741_v8 = vld [vmem:[%s7175_s1 + $0x4c4] ss:$16 sps:$4 sm:$0xff]   ;;  %v4739_v10 = vld [vmem:[%s7175_s1 + $0x4c0] ss:$16 sps:$4 sm:$0xff]  }
  0x26   :  { %v4744_v9 = vld [vmem:[%s7175_s1 + $0x6c4] ss:$16 sps:$4 sm:$0xff]   ;;  %v4742_v11 = vld [vmem:[%s7175_s1 + $0x6c0] ss:$16 sps:$4 sm:$0xff]  }
  0x27   :  { %3034 = vmatpush2.bf16.msra.mxu0 %v4689_v38  ;;  %v4747_v12 = vld [vmem:[%s7175_s1 + $0x4a4] ss:$16 sps:$4 sm:$0xff]   ;;  %v4745_v14 = vld [vmem:[%s7175_s1 + $0x4a0] ss:$16 sps:$4 sm:$0xff]  }
  0x28   :  { %3077 = vmatpush2.bf16.msra.mxu1 %v4690_v39  ;;  %3035 = vmatprep.subr.bf16.mxu0 %v4691_v40  ;;  %v4750_v13 = vld [vmem:[%s7175_s1 + $0x6a4] ss:$16 sps:$4 sm:$0xff]   ;;  %v4748_v15 = vld [vmem:[%s7175_s1 + $0x6a0] ss:$16 sps:$4 sm:$0xff]  }
  0x29   :  { %3078 = vmatprep.subr.bf16.mxu1 %v4693_v41  ;;  %v4753_v16 = vld [vmem:[%s7175_s1 + $0x484] ss:$16 sps:$4 sm:$0xff]   ;;  %v4751_v18 = vld [vmem:[%s7175_s1 + $0x480] ss:$16 sps:$4 sm:$0xff]  }
  0x2a   :  { %v4756_v17 = vld [vmem:[%s7175_s1 + $0x684] ss:$16 sps:$4 sm:$0xff]   ;;  %v4754_v19 = vld [vmem:[%s7175_s1 + $0x680] ss:$16 sps:$4 sm:$0xff]  }
  0x2b   :  { %3036 = vmatpush2.bf16.msra.mxu0 %v4695_v42  ;;  %v4759_v20 = vld [vmem:[%s7175_s1 + $0x464] ss:$16 sps:$4 sm:$0xff]   ;;  %v4757_v22 = vld [vmem:[%s7175_s1 + $0x460] ss:$16 sps:$4 sm:$0xff]  }
  0x2c   :  { %3079 = vmatpush2.bf16.msra.mxu1 %v4696_v43  ;;  %3037 = vmatprep.subr.bf16.mxu0 %v4697_v44  ;;  %v4762_v21 = vld [vmem:[%s7175_s1 + $0x664] ss:$16 sps:$4 sm:$0xff]   ;;  %v4760_v23 = vld [vmem:[%s7175_s1 + $0x660] ss:$16 sps:$4 sm:$0xff]  }
  0x2d   :  { %3080 = vmatprep.subr.bf16.mxu1 %v4699_v45  ;;  %v4765_v24 = vld [vmem:[%s7175_s1 + $0x444] ss:$16 sps:$4 sm:$0xff]   ;;  %v4763_v26 = vld [vmem:[%s7175_s1 + $0x440] ss:$16 sps:$4 sm:$0xff]  }
  0x2e   :  { %v4768_v25 = vld [vmem:[%s7175_s1 + $0x644] ss:$16 sps:$4 sm:$0xff]   ;;  %v4766_v27 = vld [vmem:[%s7175_s1 + $0x640] ss:$16 sps:$4 sm:$0xff]  }
  0x2f   :  { %3038 = vmatpush2.bf16.msra.mxu0 %v4701_v46  ;;  %v4771_v28 = vld [vmem:[%s7175_s1 + $0x424] ss:$16 sps:$4 sm:$0xff]   ;;  %v4769_v30 = vld [vmem:[%s7175_s1 + $0x420] ss:$16 sps:$4 sm:$0xff]  }
  0x30   :  { %3081 = vmatpush2.bf16.msra.mxu1 %v4702_v47  ;;  %3039 = vmatprep.subr.bf16.mxu0 %v4703_v48  ;;  %v4774_v29 = vld [vmem:[%s7175_s1 + $0x624] ss:$16 sps:$4 sm:$0xff]   ;;  %v4772_v31 = vld [vmem:[%s7175_s1 + $0x620] ss:$16 sps:$4 sm:$0xff]  }
  0x31   :  { %3082 = vmatprep.subr.bf16.mxu1 %v4705_v50  ;;  %v4777_v32 = vld [vmem:[%s7175_s1 + $0x404] ss:$16 sps:$4 sm:$0xff]   ;;  %v4775_v36 = vld [vmem:[%s7175_s1 + $0x400] ss:$16 sps:$4 sm:$0xff]  }
  0x32   :  { %v4780_v33 = vld [vmem:[%s7175_s1 + $0x604] ss:$16 sps:$4 sm:$0xff]   ;;  %v4778_v37 = vld [vmem:[%s7175_s1 + $0x600] ss:$16 sps:$4 sm:$0xff]  }
  0x33   :  { %3040 = vmatpush2.bf16.msra.mxu0 %v4707_v52  ;;  %v4831_v34 = vld [vmem:[%s7176_s0 + $0x14] ss:$60 sps:$4 sm:$0xff]  }
  0x34   :  { %3083 = vmatpush2.bf16.msra.mxu1 %v4708_v53  ;;  %3041 = vmatprep.subr.bf16.mxu0 %v4709_v54  ;;  %v4783_v38 = vld [vmem:[%s7175_s1 + $0x5e4] ss:$16 sps:$4 sm:$0xff]   ;;  %v4781_v40 = vld [vmem:[%s7175_s1 + $0x5e0] ss:$16 sps:$4 sm:$0xff]  }
  0x35   :  { %3084 = vmatprep.subr.bf16.mxu1 %v4711_v55  ;;  %v4786_v39 = vld [vmem:[%s7175_s1 + $0x7e4] ss:$16 sps:$4 sm:$0xff]   ;;  %v4784_v41 = vld [vmem:[%s7175_s1 + $0x7e0] ss:$16 sps:$4 sm:$0xff]  }
  0x36   :  { %v4789_v42 = vld [vmem:[%s7175_s1 + $0x5c4] ss:$16 sps:$4 sm:$0xff]   ;;  %v4787_v44 = vld [vmem:[%s7175_s1 + $0x5c0] ss:$16 sps:$4 sm:$0xff]  }
  0x37   :  { %3042 = vmatpush2.bf16.msra.mxu0 %v4713_v56  ;;  %v4792_v43 = vld [vmem:[%s7175_s1 + $0x7c4] ss:$16 sps:$4 sm:$0xff]   ;;  %v4790_v45 = vld [vmem:[%s7175_s1 + $0x7c0] ss:$16 sps:$4 sm:$0xff]  }
  0x38   :  { %3085 = vmatpush2.bf16.msra.mxu1 %v4714_v57  ;;  %3043 = vmatprep.subr.bf16.mxu0 %v4715_v58  ;;  %v4795_v46 = vld [vmem:[%s7175_s1 + $0x5a4] ss:$16 sps:$4 sm:$0xff]   ;;  %v4793_v48 = vld [vmem:[%s7175_s1 + $0x5a0] ss:$16 sps:$4 sm:$0xff]  }
  0x39   :  { %3086 = vmatprep.subr.bf16.mxu1 %v4717_v59  ;;  %v4798_v47 = vld [vmem:[%s7175_s1 + $0x7a4] ss:$16 sps:$4 sm:$0xff]   ;;  %v4796_v49 = vld [vmem:[%s7175_s1 + $0x7a0] ss:$16 sps:$4 sm:$0xff]  }
  0x3a   :  { %v4801_v50 = vld [vmem:[%s7175_s1 + $0x584] ss:$16 sps:$4 sm:$0xff]   ;;  %v4799_v52 = vld [vmem:[%s7175_s1 + $0x580] ss:$16 sps:$4 sm:$0xff]  }
  0x3b   :  { %3044 = vmatpush2.bf16.msra.mxu0 %v4719_v60  ;;  %v4804_v51 = vld [vmem:[%s7175_s1 + $0x784] ss:$16 sps:$4 sm:$0xff]   ;;  %v4802_v53 = vld [vmem:[%s7175_s1 + $0x780] ss:$16 sps:$4 sm:$0xff]  }
  0x3c   :  { %3087 = vmatpush2.bf16.msra.mxu1 %v4720_v61  ;;  %3045 = vmatprep.subr.bf16.mxu0 %v4721_v62  ;;  %v4807_v54 = vld [vmem:[%s7175_s1 + $0x564] ss:$16 sps:$4 sm:$0xff]   ;;  %v4805_v56 = vld [vmem:[%s7175_s1 + $0x560] ss:$16 sps:$4 sm:$0xff]  }
  0x3d   :  { %3088 = vmatprep.subr.bf16.mxu1 %v4723_v63  ;;  %v4810_v55 = vld [vmem:[%s7175_s1 + $0x764] ss:$16 sps:$4 sm:$0xff]   ;;  %v4808_v57 = vld [vmem:[%s7175_s1 + $0x760] ss:$16 sps:$4 sm:$0xff]  }
  0x3e   :  { %v4813_v58 = vld [vmem:[%s7175_s1 + $0x544] ss:$16 sps:$4 sm:$0xff]   ;;  %v4811_v60 = vld [vmem:[%s7175_s1 + $0x540] ss:$16 sps:$4 sm:$0xff]  }
  0x3f   :  { %3046 = vmatpush2.bf16.msra.mxu0 %v4725_v0  ;;  %v4816_v59 = vld [vmem:[%s7175_s1 + $0x744] ss:$16 sps:$4 sm:$0xff]   ;;  %v4814_v61 = vld [vmem:[%s7175_s1 + $0x740] ss:$16 sps:$4 sm:$0xff]  }
  0x40   :  { %3089 = vmatpush2.bf16.msra.mxu1 %v4726_v1  ;;  %3101 = vmatprep.subr.bf16.mxu0 %v4735_v2  ;;  %v4819_v62 = vld [vmem:[%s7175_s1 + $0x524] ss:$16 sps:$4 sm:$0xff]   ;;  %v4817_v0 = vld [vmem:[%s7175_s1 + $0x520] ss:$16 sps:$4 sm:$0xff]  }
  0x41   :  { %3144 = vmatprep.subr.bf16.mxu1 %v4738_v3  ;;  %v4822_v63 = vld [vmem:[%s7175_s1 + $0x724] ss:$16 sps:$4 sm:$0xff]   ;;  %v4820_v1 = vld [vmem:[%s7175_s1 + $0x720] ss:$16 sps:$4 sm:$0xff]  }
  0x42   :  { %3048 = vmatmul.mubr.bf16.vlgmr.msra.gmra.mxu0 %v4727_v4  ;;  %v4825_v2 = vld [vmem:[%s7175_s1 + $0x504] ss:$16 sps:$4 sm:$0xff]   ;;  %v4823_v4 = vld [vmem:[%s7175_s1 + $0x500] ss:$16 sps:$4 sm:$0xff]  }
  0x43   :  { %3091 = vmatmul.mubr.bf16.vlgmr.msra.gmra.mxu1 %v4730_v5  ;;  %3102 = vmatpush1.bf16.msra.mxu0 %v4733_v6  ;;  %v4828_v3 = vld [vmem:[%s7175_s1 + $0x704] ss:$16 sps:$4 sm:$0xff]   ;;  %v4826_v5 = vld [vmem:[%s7175_s1 + $0x700] ss:$16 sps:$4 sm:$0xff]  }
  0x44   :  { %3145 = vmatpush1.bf16.msra.mxu1 %v4736_v7  ;;  %3103 = vmatprep.subr.bf16.mxu0 %v4741_v8  ;;  %v4837_v6 = vld [vmem:[%s7175_s1 + $0x8e4] ss:$16 sps:$4 sm:$0xff]   ;;  %v4829_v8 = vld [vmem:[%s7176_s0 + $0x10] ss:$60 sps:$4 sm:$0xff]  }
  0x45   :  { %3146 = vmatprep.subr.bf16.mxu1 %v4744_v9  ;;  %3133 = vmatprep.mubr.bf16.mxu0 %v4831_v34  ;;  %v4840_v7 = vld [vmem:[%s7175_s1 + $0xae4] ss:$16 sps:$4 sm:$0xff]  }
  0x46   :  { %3176 = vmatprep.mubr.bf16.mxu1 %v4834_v35  ;;  %v4832_v9 = vld [vmem:[%s7176_s0 + $0x18] ss:$60 sps:$4 sm:$0xff]  }
  0x47   :  { %3104 = vmatpush1.bf16.msra.mxu0 %v4739_v10  ;;  %v4835_v10 = vld [vmem:[%s7175_s1 + $0x8e0] ss:$16 sps:$4 sm:$0xff]   ;;  %v4873_v34 = vld [vmem:[%s7175_s1 + $0x824] ss:$16 sps:$4 sm:$0xff]  }
  0x48   :  { %3147 = vmatpush1.bf16.msra.mxu1 %v4742_v11  ;;  %3105 = vmatprep.subr.bf16.mxu0 %v4747_v12  ;;  %v4838_v11 = vld [vmem:[%s7175_s1 + $0xae0] ss:$16 sps:$4 sm:$0xff]   ;;  %v4843_v12 = vld [vmem:[%s7175_s1 + $0x8c4] ss:$16 sps:$4 sm:$0xff]  }
  0x49   :  { %3148 = vmatprep.subr.bf16.mxu1 %v4750_v13  ;;  %v4846_v13 = vld [vmem:[%s7175_s1 + $0xac4] ss:$16 sps:$4 sm:$0xff]  }
  0x4a   :  { %v4876_v35 = vld [vmem:[%s7175_s1 + $0xa24] ss:$16 sps:$4 sm:$0xff]  }
  0x4b   :  { %3106 = vmatpush1.bf16.msra.mxu0 %v4745_v14  ;;  %v4841_v14 = vld [vmem:[%s7175_s1 + $0x8c0] ss:$16 sps:$4 sm:$0xff]  }
  0x4c   :  { %3149 = vmatpush1.bf16.msra.mxu1 %v4748_v15  ;;  %3107 = vmatprep.subr.bf16.mxu0 %v4753_v16  ;;  %v4844_v15 = vld [vmem:[%s7175_s1 + $0xac0] ss:$16 sps:$4 sm:$0xff]   ;;  %v4849_v16 = vld [vmem:[%s7175_s1 + $0x8a4] ss:$16 sps:$4 sm:$0xff]  }
  0x4d   :  { %3150 = vmatprep.subr.bf16.mxu1 %v4756_v17  ;;  %v4852_v17 = vld [vmem:[%s7175_s1 + $0xaa4] ss:$16 sps:$4 sm:$0xff]  }
  0x4f   :  { %3108 = vmatpush1.bf16.msra.mxu0 %v4751_v18  ;;  %v4847_v18 = vld [vmem:[%s7175_s1 + $0x8a0] ss:$16 sps:$4 sm:$0xff]  }
  0x50   :  { %3151 = vmatpush1.bf16.msra.mxu1 %v4754_v19  ;;  %3109 = vmatprep.subr.bf16.mxu0 %v4759_v20  ;;  %v4933_v19 = vld [vmem:[%s7176_s0 + $0x24] ss:$60 sps:$4 sm:$0xff]  }
  0x51   :  { %3152 = vmatprep.subr.bf16.mxu1 %v4762_v21  ;;  %v4850_v20 = vld [vmem:[%s7175_s1 + $0xaa0] ss:$16 sps:$4 sm:$0xff]   ;;  %v4936_v21 = vld [vmem:[%s7176_s0 + $0x2c] ss:$60 sps:$4 sm:$0xff]  }
  0x53   :  { %3110 = vmatpush1.bf16.msra.mxu0 %v4757_v22  ;;  %v4855_v22 = vld [vmem:[%s7175_s1 + $0x884] ss:$16 sps:$4 sm:$0xff]  }
  0x54   :  { %3153 = vmatpush1.bf16.msra.mxu1 %v4760_v23  ;;  %3111 = vmatprep.subr.bf16.mxu0 %v4765_v24  ;;  %v4858_v23 = vld [vmem:[%s7175_s1 + $0xa84] ss:$16 sps:$4 sm:$0xff]   ;;  %v4853_v24 = vld [vmem:[%s7175_s1 + $0x880] ss:$16 sps:$4 sm:$0xff]  }
  0x55   :  { %3154 = vmatprep.subr.bf16.mxu1 %v4768_v25  ;;  %v4856_v25 = vld [vmem:[%s7175_s1 + $0xa80] ss:$16 sps:$4 sm:$0xff]  }
  0x57   :  { %3112 = vmatpush1.bf16.msra.mxu0 %v4763_v26  ;;  %v4861_v26 = vld [vmem:[%s7175_s1 + $0x864] ss:$16 sps:$4 sm:$0xff]  }
  0x58   :  { %3155 = vmatpush1.bf16.msra.mxu1 %v4766_v27  ;;  %3113 = vmatprep.subr.bf16.mxu0 %v4771_v28  ;;  %v4864_v27 = vld [vmem:[%s7175_s1 + $0xa64] ss:$16 sps:$4 sm:$0xff]   ;;  %v4859_v28 = vld [vmem:[%s7175_s1 + $0x860] ss:$16 sps:$4 sm:$0xff]  }
  0x59   :  { %3156 = vmatprep.subr.bf16.mxu1 %v4774_v29  ;;  %v4862_v29 = vld [vmem:[%s7175_s1 + $0xa60] ss:$16 sps:$4 sm:$0xff]  }
  0x5b   :  { %3114 = vmatpush1.bf16.msra.mxu0 %v4769_v30  ;;  %v4867_v30 = vld [vmem:[%s7175_s1 + $0x844] ss:$16 sps:$4 sm:$0xff]  }
  0x5c   :  { %3157 = vmatpush1.bf16.msra.mxu1 %v4772_v31  ;;  %3115 = vmatprep.subr.bf16.mxu0 %v4777_v32  ;;  %v4870_v31 = vld [vmem:[%s7175_s1 + $0xa44] ss:$16 sps:$4 sm:$0xff]   ;;  %v4865_v32 = vld [vmem:[%s7175_s1 + $0x840] ss:$16 sps:$4 sm:$0xff]  }
  0x5d   :  { %3158 = vmatprep.subr.bf16.mxu1 %v4780_v33  ;;  %v4868_v33 = vld [vmem:[%s7175_s1 + $0xa40] ss:$16 sps:$4 sm:$0xff]  }
  0x5f   :  { %3116 = vmatpush1.bf16.msra.mxu0 %v4775_v36  ;;  %v4871_v36 = vld [vmem:[%s7175_s1 + $0x820] ss:$16 sps:$4 sm:$0xff]  }
  0x60   :  { %3159 = vmatpush1.bf16.msra.mxu1 %v4778_v37  ;;  %3117 = vmatprep.subr.bf16.mxu0 %v4783_v38  ;;  %v4874_v37 = vld [vmem:[%s7175_s1 + $0xa20] ss:$16 sps:$4 sm:$0xff]   ;;  %v4879_v38 = vld [vmem:[%s7175_s1 + $0x804] ss:$16 sps:$4 sm:$0xff]  }
  0x61   :  { %3160 = vmatprep.subr.bf16.mxu1 %v4786_v39  ;;  %v4882_v39 = vld [vmem:[%s7175_s1 + $0xa04] ss:$16 sps:$4 sm:$0xff]  }
  0x63   :  { %3118 = vmatpush2.bf16.msra.mxu0 %v4781_v40  ;;  %v4877_v40 = vld [vmem:[%s7175_s1 + $0x800] ss:$16 sps:$4 sm:$0xff]  }
  0x64   :  { %3161 = vmatpush2.bf16.msra.mxu1 %v4784_v41  ;;  %3119 = vmatprep.subr.bf16.mxu0 %v4789_v42  ;;  %v4880_v41 = vld [vmem:[%s7175_s1 + $0xa00] ss:$16 sps:$4 sm:$0xff]   ;;  %v4885_v42 = vld [vmem:[%s7175_s1 + $0x9e4] ss:$16 sps:$4 sm:$0xff]  }
  0x65   :  { %3162 = vmatprep.subr.bf16.mxu1 %v4792_v43  ;;  %v4888_v43 = vld [vmem:[%s7175_s1 + $0xbe4] ss:$16 sps:$4 sm:$0xff]  }
  0x67   :  { %3120 = vmatpush2.bf16.msra.mxu0 %v4787_v44  ;;  %v4883_v44 = vld [vmem:[%s7175_s1 + $0x9e0] ss:$16 sps:$4 sm:$0xff]  }
  0x68   :  { %3163 = vmatpush2.bf16.msra.mxu1 %v4790_v45  ;;  %3121 = vmatprep.subr.bf16.mxu0 %v4795_v46  ;;  %v4886_v45 = vld [vmem:[%s7175_s1 + $0xbe0] ss:$16 sps:$4 sm:$0xff]   ;;  %v4891_v46 = vld [vmem:[%s7175_s1 + $0x9c4] ss:$16 sps:$4 sm:$0xff]  }
  0x69   :  { %3164 = vmatprep.subr.bf16.mxu1 %v4798_v47  ;;  %v4894_v47 = vld [vmem:[%s7175_s1 + $0xbc4] ss:$16 sps:$4 sm:$0xff]  }
  0x6b   :  { %3122 = vmatpush2.bf16.msra.mxu0 %v4793_v48  ;;  %v4889_v48 = vld [vmem:[%s7175_s1 + $0x9c0] ss:$16 sps:$4 sm:$0xff]  }
  0x6c   :  { %3165 = vmatpush2.bf16.msra.mxu1 %v4796_v49  ;;  %3123 = vmatprep.subr.bf16.mxu0 %v4801_v50  ;;  %v4892_v49 = vld [vmem:[%s7175_s1 + $0xbc0] ss:$16 sps:$4 sm:$0xff]   ;;  %v4897_v50 = vld [vmem:[%s7175_s1 + $0x9a4] ss:$16 sps:$4 sm:$0xff]  }
  0x6d   :  { %3166 = vmatprep.subr.bf16.mxu1 %v4804_v51  ;;  %v4900_v51 = vld [vmem:[%s7175_s1 + $0xba4] ss:$16 sps:$4 sm:$0xff]  }
  0x6f   :  { %3124 = vmatpush2.bf16.msra.mxu0 %v4799_v52  ;;  %v4895_v52 = vld [vmem:[%s7175_s1 + $0x9a0] ss:$16 sps:$4 sm:$0xff]  }
  0x70   :  { %3167 = vmatpush2.bf16.msra.mxu1 %v4802_v53  ;;  %3125 = vmatprep.subr.bf16.mxu0 %v4807_v54  ;;  %v4898_v53 = vld [vmem:[%s7175_s1 + $0xba0] ss:$16 sps:$4 sm:$0xff]   ;;  %v4903_v54 = vld [vmem:[%s7175_s1 + $0x984] ss:$16 sps:$4 sm:$0xff]  }
  0x71   :  { %3168 = vmatprep.subr.bf16.mxu1 %v4810_v55  ;;  %v4906_v55 = vld [vmem:[%s7175_s1 + $0xb84] ss:$16 sps:$4 sm:$0xff]  }
  0x73   :  { %3126 = vmatpush2.bf16.msra.mxu0 %v4805_v56  ;;  %v4901_v56 = vld [vmem:[%s7175_s1 + $0x980] ss:$16 sps:$4 sm:$0xff]  }
  0x74   :  { %3169 = vmatpush2.bf16.msra.mxu1 %v4808_v57  ;;  %3127 = vmatprep.subr.bf16.mxu0 %v4813_v58  ;;  %v4904_v57 = vld [vmem:[%s7175_s1 + $0xb80] ss:$16 sps:$4 sm:$0xff]   ;;  %v4909_v58 = vld [vmem:[%s7175_s1 + $0x964] ss:$16 sps:$4 sm:$0xff]  }
  0x75   :  { %3170 = vmatprep.subr.bf16.mxu1 %v4816_v59  ;;  %v4912_v59 = vld [vmem:[%s7175_s1 + $0xb64] ss:$16 sps:$4 sm:$0xff]  }
  0x77   :  { %3128 = vmatpush2.bf16.msra.mxu0 %v4811_v60  ;;  %v4907_v60 = vld [vmem:[%s7175_s1 + $0x960] ss:$16 sps:$4 sm:$0xff]  }
  0x78   :  { %3171 = vmatpush2.bf16.msra.mxu1 %v4814_v61  ;;  %3129 = vmatprep.subr.bf16.mxu0 %v4819_v62  ;;  %v4910_v61 = vld [vmem:[%s7175_s1 + $0xb60] ss:$16 sps:$4 sm:$0xff]   ;;  %v4915_v62 = vld [vmem:[%s7175_s1 + $0x944] ss:$16 sps:$4 sm:$0xff]  }
  0x79   :  { %3172 = vmatprep.subr.bf16.mxu1 %v4822_v63  ;;  %v4918_v63 = vld [vmem:[%s7175_s1 + $0xb44] ss:$16 sps:$4 sm:$0xff]  }
  0x7b   :  { %3130 = vmatpush2.bf16.msra.mxu0 %v4817_v0  ;;  %v4913_v0 = vld [vmem:[%s7175_s1 + $0x940] ss:$16 sps:$4 sm:$0xff]  }
  0x7c   :  { %3173 = vmatpush2.bf16.msra.mxu1 %v4820_v1  ;;  %3131 = vmatprep.subr.bf16.mxu0 %v4825_v2  ;;  %v4916_v1 = vld [vmem:[%s7175_s1 + $0xb40] ss:$16 sps:$4 sm:$0xff]   ;;  %v4921_v2 = vld [vmem:[%s7175_s1 + $0x924] ss:$16 sps:$4 sm:$0xff]  }
  0x7d   :  { %3174 = vmatprep.subr.bf16.mxu1 %v4828_v3  ;;  %v4924_v3 = vld [vmem:[%s7175_s1 + $0xb24] ss:$16 sps:$4 sm:$0xff]  }
  0x7f   :  { %3132 = vmatpush2.bf16.msra.mxu0 %v4823_v4  ;;  %v4919_v4 = vld [vmem:[%s7175_s1 + $0x920] ss:$16 sps:$4 sm:$0xff]  }
  0x80   :  { %3175 = vmatpush2.bf16.msra.mxu1 %v4826_v5  ;;  %3187 = vmatprep.subr.bf16.mxu0 %v4837_v6  ;;  %v4922_v5 = vld [vmem:[%s7175_s1 + $0xb20] ss:$16 sps:$4 sm:$0xff]   ;;  %v4927_v6 = vld [vmem:[%s7175_s1 + $0x904] ss:$16 sps:$4 sm:$0xff]  }
  0x81   :  { %3230 = vmatprep.subr.bf16.mxu1 %v4840_v7  ;;  %v4930_v7 = vld [vmem:[%s7175_s1 + $0xb04] ss:$16 sps:$4 sm:$0xff]  }
  0x82   :  { %3134 = vmatmul.mubr.bf16.vlgmr.msra.gmra.mxu0 %v4829_v8  ;;  %v4925_v8 = vld [vmem:[%s7175_s1 + $0x900] ss:$16 sps:$4 sm:$0xff]  }
  0x83   :  { %3177 = vmatmul.mubr.bf16.vlgmr.msra.gmra.mxu1 %v4832_v9  ;;  %3188 = vmatpush1.bf16.msra.mxu0 %v4835_v10  ;;  %v4928_v9 = vld [vmem:[%s7175_s1 + $0xb00] ss:$16 sps:$4 sm:$0xff]   ;;  %v4939_v10 = vld [vmem:[%s7175_s1 + $0xce4] ss:$16 sps:$4 sm:$0xff]  }
  0x84   :  { %3231 = vmatpush1.bf16.msra.mxu1 %v4838_v11  ;;  %3189 = vmatprep.subr.bf16.mxu0 %v4843_v12  ;;  %v4942_v11 = vld [vmem:[%s7175_s1 + $0xee4] ss:$16 sps:$4 sm:$0xff]   ;;  %v4931_v12 = vld [vmem:[%s7176_s0 + $0x20] ss:$60 sps:$4 sm:$0xff]  }
  0x85   :  { %3232 = vmatprep.subr.bf16.mxu1 %v4846_v13  ;;  %3219 = vmatprep.mubr.bf16.mxu0 %v4933_v19  ;;  %v4934_v13 = vld [vmem:[%s7176_s0 + $0x28] ss:$60 sps:$4 sm:$0xff]   ;;  %v4943_v19 = vld [vmem:[%s7175_s1 + $0xcc0] ss:$16 sps:$4 sm:$0xff]  }
  0x86   :  { %3262 = vmatprep.mubr.bf16.mxu1 %v4936_v21  ;;  %v4951_v21 = vld [vmem:[%s7175_s1 + $0xca4] ss:$16 sps:$4 sm:$0xff]  }
  0x87   :  { %3190 = vmatpush1.bf16.msra.mxu0 %v4841_v14  ;;  %v4937_v14 = vld [vmem:[%s7175_s1 + $0xce0] ss:$16 sps:$4 sm:$0xff]  }
  0x88   :  { %3233 = vmatpush1.bf16.msra.mxu1 %v4844_v15  ;;  %3191 = vmatprep.subr.bf16.mxu0 %v4849_v16  ;;  %v4940_v15 = vld [vmem:[%s7175_s1 + $0xee0] ss:$16 sps:$4 sm:$0xff]   ;;  %v4945_v16 = vld [vmem:[%s7175_s1 + $0xcc4] ss:$16 sps:$4 sm:$0xff]  }
  0x89   :  { %3234 = vmatprep.subr.bf16.mxu1 %v4852_v17  ;;  %v4948_v17 = vld [vmem:[%s7175_s1 + $0xec4] ss:$16 sps:$4 sm:$0xff]  }
  0x8b   :  { %3192 = vmatpush1.bf16.msra.mxu0 %v4847_v18  ;;  %v5036_v18 = vld [vmem:[%s7176_s0 + $0x34] ss:$60 sps:$4 sm:$0xff]  }
  0x8c   :  { %3235 = vmatpush1.bf16.msra.mxu1 %v4850_v20  ;;  %3193 = vmatprep.subr.bf16.mxu0 %v4855_v22  ;;  %v4946_v20 = vld [vmem:[%s7175_s1 + $0xec0] ss:$16 sps:$4 sm:$0xff]   ;;  %v4954_v22 = vld [vmem:[%s7175_s1 + $0xea4] ss:$16 sps:$4 sm:$0xff]  }
  0x8d   :  { %3236 = vmatprep.subr.bf16.mxu1 %v4858_v23  ;;  %v5420_v23 = vmov 0  }
  0x8f   :  { %3194 = vmatpush1.bf16.msra.mxu0 %v4853_v24  ;;  %v4949_v24 = vld [vmem:[%s7175_s1 + $0xca0] ss:$16 sps:$4 sm:$0xff]  }
  0x90   :  { %3237 = vmatpush1.bf16.msra.mxu1 %v4856_v25  ;;  %3195 = vmatprep.subr.bf16.mxu0 %v4861_v26  ;;  %v4952_v25 = vld [vmem:[%s7175_s1 + $0xea0] ss:$16 sps:$4 sm:$0xff]   ;;  %v4957_v26 = vld [vmem:[%s7175_s1 + $0xc84] ss:$16 sps:$4 sm:$0xff]  }
  0x91   :  { %3238 = vmatprep.subr.bf16.mxu1 %v4864_v27  ;;  %v4960_v27 = vld [vmem:[%s7175_s1 + $0xe84] ss:$16 sps:$4 sm:$0xff]  }
  0x93   :  { %3196 = vmatpush1.bf16.msra.mxu0 %v4859_v28  ;;  %v4955_v28 = vld [vmem:[%s7175_s1 + $0xc80] ss:$16 sps:$4 sm:$0xff]  }
  0x94   :  { %3239 = vmatpush1.bf16.msra.mxu1 %v4862_v29  ;;  %3197 = vmatprep.subr.bf16.mxu0 %v4867_v30  ;;  %v4958_v29 = vld [vmem:[%s7175_s1 + $0xe80] ss:$16 sps:$4 sm:$0xff]   ;;  %v4963_v30 = vld [vmem:[%s7175_s1 + $0xc64] ss:$16 sps:$4 sm:$0xff]  }
  0x95   :  { %3240 = vmatprep.subr.bf16.mxu1 %v4870_v31  ;;  %v4966_v31 = vld [vmem:[%s7175_s1 + $0xe64] ss:$16 sps:$4 sm:$0xff]  }
  0x97   :  { %3198 = vmatpush1.bf16.msra.mxu0 %v4865_v32  ;;  %v4961_v32 = vld [vmem:[%s7175_s1 + $0xc60] ss:$16 sps:$4 sm:$0xff]  }
  0x98   :  { %3241 = vmatpush1.bf16.msra.mxu1 %v4868_v33  ;;  %3199 = vmatprep.subr.bf16.mxu0 %v4873_v34  ;;  %v4964_v33 = vld [vmem:[%s7175_s1 + $0xe60] ss:$16 sps:$4 sm:$0xff]   ;;  %v4969_v34 = vld [vmem:[%s7175_s1 + $0xc44] ss:$16 sps:$4 sm:$0xff]  }
  0x99   :  { %3242 = vmatprep.subr.bf16.mxu1 %v4876_v35  ;;  %v4972_v35 = vld [vmem:[%s7175_s1 + $0xe44] ss:$16 sps:$4 sm:$0xff]  }
  0x9b   :  { %3200 = vmatpush1.bf16.msra.mxu0 %v4871_v36  ;;  %v4967_v36 = vld [vmem:[%s7175_s1 + $0xc40] ss:$16 sps:$4 sm:$0xff]  }
  0x9c   :  { %3243 = vmatpush1.bf16.msra.mxu1 %v4874_v37  ;;  %3201 = vmatprep.subr.bf16.mxu0 %v4879_v38  ;;  %v4970_v37 = vld [vmem:[%s7175_s1 + $0xe40] ss:$16 sps:$4 sm:$0xff]   ;;  %v4975_v38 = vld [vmem:[%s7175_s1 + $0xc24] ss:$16 sps:$4 sm:$0xff]  }
  0x9d   :  { %3244 = vmatprep.subr.bf16.mxu1 %v4882_v39  ;;  %v4978_v39 = vld [vmem:[%s7175_s1 + $0xe24] ss:$16 sps:$4 sm:$0xff]  }
  0x9f   :  { %3202 = vmatpush1.bf16.msra.mxu0 %v4877_v40  ;;  %v4973_v40 = vld [vmem:[%s7175_s1 + $0xc20] ss:$16 sps:$4 sm:$0xff]  }
  0xa0   :  { %3245 = vmatpush1.bf16.msra.mxu1 %v4880_v41  ;;  %3203 = vmatprep.subr.bf16.mxu0 %v4885_v42  ;;  %v4976_v41 = vld [vmem:[%s7175_s1 + $0xe20] ss:$16 sps:$4 sm:$0xff]   ;;  %v4981_v42 = vld [vmem:[%s7175_s1 + $0xc04] ss:$16 sps:$4 sm:$0xff]  }
  0xa1   :  { %3246 = vmatprep.subr.bf16.mxu1 %v4888_v43  ;;  %v4984_v43 = vld [vmem:[%s7175_s1 + $0xe04] ss:$16 sps:$4 sm:$0xff]  }
  0xa3   :  { %3204 = vmatpush2.bf16.msra.mxu0 %v4883_v44  ;;  %v4979_v44 = vld [vmem:[%s7175_s1 + $0xc00] ss:$16 sps:$4 sm:$0xff]  }
  0xa4   :  { %3247 = vmatpush2.bf16.msra.mxu1 %v4886_v45  ;;  %3205 = vmatprep.subr.bf16.mxu0 %v4891_v46  ;;  %v4982_v45 = vld [vmem:[%s7175_s1 + $0xe00] ss:$16 sps:$4 sm:$0xff]   ;;  %v4987_v46 = vld [vmem:[%s7175_s1 + $0xde4] ss:$16 sps:$4 sm:$0xff]  }
  0xa5   :  { %3248 = vmatprep.subr.bf16.mxu1 %v4894_v47  ;;  %v4991_v47 = vld [vmem:[%s7175_s1 + $0xec] ss:$16 sps:$4 sm:$0xff]  }
  0xa7   :  { %3206 = vmatpush2.bf16.msra.mxu0 %v4889_v48  ;;  %v4985_v48 = vld [vmem:[%s7175_s1 + $0xde0] ss:$16 sps:$4 sm:$0xff]  }
  0xa8   :  { %3249 = vmatpush2.bf16.msra.mxu1 %v4892_v49  ;;  %3207 = vmatprep.subr.bf16.mxu0 %v4897_v50  ;;  %v4988_v49 = vld [vmem:[%s7176_s0 + $0x38] ss:$60 sps:$4 sm:$0xff]  }
  0xa9   :  { %3250 = vmatprep.subr.bf16.mxu1 %v4900_v51  ;;  %v4989_v50 = vld [vmem:[%s7175_s1 + $0xe8] ss:$16 sps:$4 sm:$0xff]   ;;  %v4994_v51 = vld [vmem:[%s7175_s1 + $0xdc4] ss:$16 sps:$4 sm:$0xff]  }
  0xab   :  { %3208 = vmatpush2.bf16.msra.mxu0 %v4895_v52  ;;  %v4997_v52 = vld [vmem:[%s7175_s1 + $0xcc] ss:$16 sps:$4 sm:$0xff]  }
  0xac   :  { %3251 = vmatpush2.bf16.msra.mxu1 %v4898_v53  ;;  %3209 = vmatprep.subr.bf16.mxu0 %v4903_v54  ;;  %v4992_v53 = vld [vmem:[%s7175_s1 + $0xdc0] ss:$16 sps:$4 sm:$0xff]   ;;  %v4995_v54 = vld [vmem:[%s7175_s1 + $0xc8] ss:$16 sps:$4 sm:$0xff]  }
  0xad   :  { %3252 = vmatprep.subr.bf16.mxu1 %v4906_v55  ;;  %v5000_v55 = vld [vmem:[%s7175_s1 + $0xda4] ss:$16 sps:$4 sm:$0xff]  }
  0xaf   :  { %3210 = vmatpush2.bf16.msra.mxu0 %v4901_v56  ;;  %v5003_v56 = vld [vmem:[%s7175_s1 + $0xac] ss:$16 sps:$4 sm:$0xff]  }
  0xb0   :  { %3253 = vmatpush2.bf16.msra.mxu1 %v4904_v57  ;;  %3211 = vmatprep.subr.bf16.mxu0 %v4909_v58  ;;  %v5405_v57 = vld [vmem:[%s7176_s0 + $0x4] ss:$60 sps:$4 sm:$0xff]  }
  0xb1   :  { %3254 = vmatprep.subr.bf16.mxu1 %v4912_v59  ;;  %v4998_v58 = vld [vmem:[%s7175_s1 + $0xda0] ss:$16 sps:$4 sm:$0xff]   ;;  %v5001_v59 = vld [vmem:[%s7175_s1 + $0xa8] ss:$16 sps:$4 sm:$0xff]  }
  0xb3   :  { %3212 = vmatpush2.bf16.msra.mxu0 %v4907_v60  ;;  %v5006_v60 = vld [vmem:[%s7175_s1 + $0xd84] ss:$16 sps:$4 sm:$0xff]  }
  0xb4   :  { %3255 = vmatpush2.bf16.msra.mxu1 %v4910_v61  ;;  %3213 = vmatprep.subr.bf16.mxu0 %v4915_v62  ;;  %v5009_v61 = vld [vmem:[%s7175_s1 + $0x8c] ss:$16 sps:$4 sm:$0xff]   ;;  %v5004_v62 = vld [vmem:[%s7175_s1 + $0xd80] ss:$16 sps:$4 sm:$0xff]  }
  0xb5   :  { %3256 = vmatprep.subr.bf16.mxu1 %v4918_v63  ;;  %v5007_v63 = vld [vmem:[%s7175_s1 + $0x88] ss:$16 sps:$4 sm:$0xff]  }
  0xb7   :  { %3214 = vmatpush2.bf16.msra.mxu0 %v4913_v0  ;;  %v5012_v0 = vld [vmem:[%s7175_s1 + $0xd64] ss:$16 sps:$4 sm:$0xff]  }
  0xb8   :  { %3257 = vmatpush2.bf16.msra.mxu1 %v4916_v1  ;;  %3215 = vmatprep.subr.bf16.mxu0 %v4921_v2  ;;  %v5015_v1 = vld [vmem:[%s7175_s1 + $0x6c] ss:$16 sps:$4 sm:$0xff]   ;;  %v5010_v2 = vld [vmem:[%s7175_s1 + $0xd60] ss:$16 sps:$4 sm:$0xff]  }
  0xb9   :  { %3258 = vmatprep.subr.bf16.mxu1 %v4924_v3  ;;  %v5013_v3 = vld [vmem:[%s7175_s1 + $0x68] ss:$16 sps:$4 sm:$0xff]  }
  0xbb   :  { %3216 = vmatpush2.bf16.msra.mxu0 %v4919_v4  ;;  %v5018_v4 = vld [vmem:[%s7175_s1 + $0xd44] ss:$16 sps:$4 sm:$0xff]  }
  0xbc   :  { %3259 = vmatpush2.bf16.msra.mxu1 %v4922_v5  ;;  %3217 = vmatprep.subr.bf16.mxu0 %v4927_v6  ;;  %v5021_v5 = vld [vmem:[%s7175_s1 + $0x4c] ss:$16 sps:$4 sm:$0xff]   ;;  %v5016_v6 = vld [vmem:[%s7175_s1 + $0xd40] ss:$16 sps:$4 sm:$0xff]  }
  0xbd   :  { %3260 = vmatprep.subr.bf16.mxu1 %v4930_v7  ;;  %v5019_v7 = vld [vmem:[%s7175_s1 + $0x48] ss:$16 sps:$4 sm:$0xff]  }
  0xbf   :  { %3218 = vmatpush2.bf16.msra.mxu0 %v4925_v8  ;;  %v5024_v8 = vld [vmem:[%s7175_s1 + $0xd24] ss:$16 sps:$4 sm:$0xff]  }
  0xc0   :  { %3261 = vmatpush2.bf16.msra.mxu1 %v4928_v9  ;;  %3273 = vmatprep.subr.bf16.mxu0 %v4939_v10  ;;  %v5027_v9 = vld [vmem:[%s7175_s1 + $0x2c] ss:$16 sps:$4 sm:$0xff]   ;;  %v5022_v10 = vld [vmem:[%s7175_s1 + $0xd20] ss:$16 sps:$4 sm:$0xff]  }
  0xc1   :  { %3316 = vmatprep.subr.bf16.mxu1 %v4942_v11  ;;  %v5025_v11 = vld [vmem:[%s7175_s1 + $0x28] ss:$16 sps:$4 sm:$0xff]  }
  0xc2   :  { %3220 = vmatmul.mubr.bf16.vlgmr.msra.gmra.mxu0 %v4931_v12  ;;  %v5030_v12 = vld [vmem:[%s7175_s1 + $0xd04] ss:$16 sps:$4 sm:$0xff]  }
  0xc3   :  { %3263 = vmatmul.mubr.bf16.vlgmr.msra.gmra.mxu1 %v4934_v13  ;;  %3274 = vmatpush1.bf16.msra.mxu0 %v4937_v14  ;;  %v5033_v13 = vld [vmem:[%s7175_s1 + $0xc] ss:$16 sps:$4 sm:$0xff]   ;;  %v5028_v14 = vld [vmem:[%s7175_s1 + $0xd00] ss:$16 sps:$4 sm:$0xff]  }
  0xc4   :  { %3317 = vmatpush1.bf16.msra.mxu1 %v4940_v15  ;;  %3275 = vmatprep.subr.bf16.mxu0 %v4945_v16  ;;  %v5031_v15 = vld [vmem:[%s7175_s1 + $0x8] ss:$16 sps:$4 sm:$0xff]   ;;  %v5039_v16 = vld [vmem:[%s7175_s1 + $0x1ec] ss:$16 sps:$4 sm:$0xff]  }
  0xc5   :  { %3318 = vmatprep.subr.bf16.mxu1 %v4948_v17  ;;  %3348 = vmatprep.mubr.bf16.mxu1 %v5420_v23  ;;  %v5042_v17 = vld [vmem:[%s7175_s1 + $0x2ec] ss:$16 sps:$4 sm:$0xff]  }
  0xc6   :  { %3305 = vmatprep.mubr.bf16.mxu0 %v5036_v18  ;;  %v5034_v18 = vld [vmem:[%s7176_s0 + $0x30] ss:$60 sps:$4 sm:$0xff]  }
  0xc7   :  { %3276 = vmatpush1.bf16.msra.mxu0 %v4943_v19  ;;  %v5037_v19 = vld [vmem:[%s7175_s1 + $0x1e8] ss:$16 sps:$4 sm:$0xff]  }
  0xc8   :  { %3319 = vmatpush1.bf16.msra.mxu1 %v4946_v20  ;;  %3277 = vmatprep.subr.bf16.mxu0 %v4951_v21  ;;  %v5040_v20 = vld [vmem:[%s7175_s1 + $0x2e8] ss:$16 sps:$4 sm:$0xff]   ;;  %v5045_v21 = vld [vmem:[%s7175_s1 + $0x1cc] ss:$16 sps:$4 sm:$0xff]  }
  0xc9   :  { %3320 = vmatprep.subr.bf16.mxu1 %v4954_v22  ;;  %v5048_v22 = vld [vmem:[%s7175_s1 + $0x2cc] ss:$16 sps:$4 sm:$0xff]  }
  0xcb   :  { %3278 = vmatpush1.bf16.msra.mxu0 %v4949_v24  ;;  %v5043_v24 = vld [vmem:[%s7175_s1 + $0x1c8] ss:$16 sps:$4 sm:$0xff]  }
  0xcc   :  { %3321 = vmatpush1.bf16.msra.mxu1 %v4952_v25  ;;  %3279 = vmatprep.subr.bf16.mxu0 %v4957_v26  ;;  %v5046_v25 = vld [vmem:[%s7175_s1 + $0x2c8] ss:$16 sps:$4 sm:$0xff]   ;;  %v5051_v26 = vld [vmem:[%s7175_s1 + $0x1ac] ss:$16 sps:$4 sm:$0xff]  }
  0xcd   :  { %3322 = vmatprep.subr.bf16.mxu1 %v4960_v27  ;;  %v5054_v27 = vld [vmem:[%s7175_s1 + $0x2ac] ss:$16 sps:$4 sm:$0xff]  }
  0xcf   :  { %3280 = vmatpush1.bf16.msra.mxu0 %v4955_v28  ;;  %v5406_v28 = vld [vmem:[%s7176_s0 + $0xc] ss:$60 sps:$4 sm:$0xff]  }
  0xd0   :  { %3323 = vmatpush1.bf16.msra.mxu1 %v4958_v29  ;;  %3281 = vmatprep.subr.bf16.mxu0 %v4963_v30  ;;  %v5049_v29 = vld [vmem:[%s7175_s1 + $0x1a8] ss:$16 sps:$4 sm:$0xff]  }
  0xd1   :  { %3324 = vmatprep.subr.bf16.mxu1 %v4966_v31  ;;  %v5052_v30 = vld [vmem:[%s7175_s1 + $0x2a8] ss:$16 sps:$4 sm:$0xff]   ;;  %v5057_v31 = vld [vmem:[%s7175_s1 + $0x18c] ss:$16 sps:$4 sm:$0xff]  }
  0xd3   :  { %3282 = vmatpush1.bf16.msra.mxu0 %v4961_v32  ;;  %v5060_v32 = vld [vmem:[%s7175_s1 + $0x28c] ss:$16 sps:$4 sm:$0xff]  }
  0xd4   :  { %3325 = vmatpush1.bf16.msra.mxu1 %v4964_v33  ;;  %3283 = vmatprep.subr.bf16.mxu0 %v4969_v34  ;;  %v5055_v33 = vld [vmem:[%s7175_s1 + $0x188] ss:$16 sps:$4 sm:$0xff]  }
  0xd5   :  { %3326 = vmatprep.subr.bf16.mxu1 %v4972_v35  ;;  %v5058_v34 = vld [vmem:[%s7175_s1 + $0x288] ss:$16 sps:$4 sm:$0xff]   ;;  %v5063_v35 = vld [vmem:[%s7175_s1 + $0x16c] ss:$16 sps:$4 sm:$0xff]  }
  0xd7   :  { %3284 = vmatpush1.bf16.msra.mxu0 %v4967_v36  ;;  %v5066_v36 = vld [vmem:[%s7175_s1 + $0x26c] ss:$16 sps:$4 sm:$0xff]  }
  0xd8   :  { %3327 = vmatpush1.bf16.msra.mxu1 %v4970_v37  ;;  %3285 = vmatprep.subr.bf16.mxu0 %v4975_v38  ;;  %v5061_v37 = vld [vmem:[%s7175_s1 + $0x168] ss:$16 sps:$4 sm:$0xff]  }
  0xd9   :  { %3328 = vmatprep.subr.bf16.mxu1 %v4978_v39  ;;  %v5064_v38 = vld [vmem:[%s7175_s1 + $0x268] ss:$16 sps:$4 sm:$0xff]   ;;  %v5069_v39 = vld [vmem:[%s7175_s1 + $0x14c] ss:$16 sps:$4 sm:$0xff]  }
  0xdb   :  { %3286 = vmatpush1.bf16.msra.mxu0 %v4973_v40  ;;  %v5072_v40 = vld [vmem:[%s7175_s1 + $0x24c] ss:$16 sps:$4 sm:$0xff]  }
  0xdc   :  { %3329 = vmatpush1.bf16.msra.mxu1 %v4976_v41  ;;  %3287 = vmatprep.subr.bf16.mxu0 %v4981_v42  ;;  %v5067_v41 = vld [vmem:[%s7175_s1 + $0x148] ss:$16 sps:$4 sm:$0xff]  }
  0xdd   :  { %3330 = vmatprep.subr.bf16.mxu1 %v4984_v43  ;;  %v5070_v42 = vld [vmem:[%s7175_s1 + $0x248] ss:$16 sps:$4 sm:$0xff]   ;;  %v5075_v43 = vld [vmem:[%s7175_s1 + $0x12c] ss:$16 sps:$4 sm:$0xff]  }
  0xdf   :  { %3288 = vmatpush1.bf16.msra.mxu0 %v4979_v44  ;;  %v5078_v44 = vld [vmem:[%s7175_s1 + $0x22c] ss:$16 sps:$4 sm:$0xff]  }
  0xe0   :  { %3331 = vmatpush1.bf16.msra.mxu1 %v4982_v45  ;;  %3289 = vmatprep.subr.bf16.mxu0 %v4987_v46  ;;  %v5073_v45 = vld [vmem:[%s7175_s1 + $0x128] ss:$16 sps:$4 sm:$0xff]  }
  0xe1   :  { %3359 = vmatprep.subr.bf16.mxu1 %v4991_v47  ;;  %v5076_v46 = vld [vmem:[%s7175_s1 + $0x228] ss:$16 sps:$4 sm:$0xff]   ;;  %v5081_v47 = vld [vmem:[%s7175_s1 + $0x10c] ss:$16 sps:$4 sm:$0xff]  }
  0xe3   :  { %3349 = vmatmul.mubr.bf16.vlgmr.msra.gmra.mxu1 %v4988_v49  ;;  %3290 = vmatpush2.bf16.msra.mxu0 %v4985_v48  ;;  %v5084_v48 = vld [vmem:[%s7175_s1 + $0x20c] ss:$16 sps:$4 sm:$0xff]   ;;  %v5079_v49 = vld [vmem:[%s7175_s1 + $0x108] ss:$16 sps:$4 sm:$0xff]  }
  0xe4   :  { %3360 = vmatpush1.bf16.msra.mxu1 %v4989_v50  ;;  %3291 = vmatprep.subr.bf16.mxu0 %v4994_v51  ;;  %v5082_v50 = vld [vmem:[%s7175_s1 + $0x208] ss:$16 sps:$4 sm:$0xff]   ;;  %v5087_v51 = vld [vmem:[%s7175_s1 + $0x3ec] ss:$16 sps:$4 sm:$0xff]  }
  0xe5   :  { %3361 = vmatprep.subr.bf16.mxu1 %v4997_v52  ;;  %3391 = vmatprep.mubr.bf16.mxu1 %v5405_v57  ;;  %v5090_v52 = vld [vmem:[%s7175_s1 + $0x4ec] ss:$16 sps:$4 sm:$0xff]   ;;  %v5091_v57 = vld [vmem:[%s7175_s1 + $0x3c8] ss:$16 sps:$4 sm:$0xff]  }
  0xe7   :  { %3292 = vmatpush2.bf16.msra.mxu0 %v4992_v53  ;;  %v5085_v53 = vld [vmem:[%s7175_s1 + $0x3e8] ss:$16 sps:$4 sm:$0xff]  }
  0xe8   :  { %3362 = vmatpush1.bf16.msra.mxu1 %v4995_v54  ;;  %3293 = vmatprep.subr.bf16.mxu0 %v5000_v55  ;;  %v5088_v54 = vld [vmem:[%s7175_s1 + $0x4e8] ss:$16 sps:$4 sm:$0xff]   ;;  %v5093_v55 = vld [vmem:[%s7175_s1 + $0x3cc] ss:$16 sps:$4 sm:$0xff]  }
  0xe9   :  { %3363 = vmatprep.subr.bf16.mxu1 %v5003_v56  ;;  %v5096_v56 = vld [vmem:[%s7175_s1 + $0x4cc] ss:$16 sps:$4 sm:$0xff]  }
  0xeb   :  { %3294 = vmatpush2.bf16.msra.mxu0 %v4998_v58  ;;  %v5094_v58 = vld [vmem:[%s7175_s1 + $0x4c8] ss:$16 sps:$4 sm:$0xff]  }
  0xec   :  { %3364 = vmatpush1.bf16.msra.mxu1 %v5001_v59  ;;  %3295 = vmatprep.subr.bf16.mxu0 %v5006_v60  ;;  %v5407_v59 = vld [vmem:[%s7176_s0] ss:$60 sps:$4 sm:$0xff]  }
  0xed   :  { %3365 = vmatprep.subr.bf16.mxu1 %v5009_v61  ;;  %v5099_v60 = vld [vmem:[%s7175_s1 + $0x3ac] ss:$16 sps:$4 sm:$0xff]  }
  0xee   :  { %v5102_v61 = vld [vmem:[%s7175_s1 + $0x4ac] ss:$16 sps:$4 sm:$0xff]  }
  0xef   :  { %3296 = vmatpush2.bf16.msra.mxu0 %v5004_v62  ;;  %v5097_v62 = vld [vmem:[%s7175_s1 + $0x3a8] ss:$16 sps:$4 sm:$0xff]  }
  0xf0   :  { %3366 = vmatpush1.bf16.msra.mxu1 %v5007_v63  ;;  %3297 = vmatprep.subr.bf16.mxu0 %v5012_v0  ;;  %v5100_v63 = vld [vmem:[%s7175_s1 + $0x4a8] ss:$16 sps:$4 sm:$0xff]   ;;  %v5408_v0 = vld [vmem:[%s7176_s0 + $0x14] ss:$60 sps:$4 sm:$0xff]  }
  0xf1   :  { %3367 = vmatprep.subr.bf16.mxu1 %v5015_v1  ;;  %v5105_v1 = vld [vmem:[%s7175_s1 + $0x38c] ss:$16 sps:$4 sm:$0xff]  }
  0xf3   :  { %3298 = vmatpush2.bf16.msra.mxu0 %v5010_v2  ;;  %v5108_v2 = vld [vmem:[%s7175_s1 + $0x48c] ss:$16 sps:$4 sm:$0xff]  }
  0xf4   :  { %3368 = vmatpush1.bf16.msra.mxu1 %v5013_v3  ;;  %3299 = vmatprep.subr.bf16.mxu0 %v5018_v4  ;;  %v5103_v3 = vld [vmem:[%s7175_s1 + $0x388] ss:$16 sps:$4 sm:$0xff]  }
  0xf5   :  { %3369 = vmatprep.subr.bf16.mxu1 %v5021_v5  ;;  %v5106_v4 = vld [vmem:[%s7175_s1 + $0x488] ss:$16 sps:$4 sm:$0xff]   ;;  %v5111_v5 = vld [vmem:[%s7175_s1 + $0x36c] ss:$16 sps:$4 sm:$0xff]  }
  0xf7   :  { %3300 = vmatpush2.bf16.msra.mxu0 %v5016_v6  ;;  %v5114_v6 = vld [vmem:[%s7175_s1 + $0x46c] ss:$16 sps:$4 sm:$0xff]  }
  0xf8   :  { %3370 = vmatpush1.bf16.msra.mxu1 %v5019_v7  ;;  %3301 = vmatprep.subr.bf16.mxu0 %v5024_v8  ;;  %v5109_v7 = vld [vmem:[%s7175_s1 + $0x368] ss:$16 sps:$4 sm:$0xff]  }
  0xf9   :  { %3371 = vmatprep.subr.bf16.mxu1 %v5027_v9  ;;  %v5112_v8 = vld [vmem:[%s7175_s1 + $0x468] ss:$16 sps:$4 sm:$0xff]   ;;  %v5117_v9 = vld [vmem:[%s7175_s1 + $0x34c] ss:$16 sps:$4 sm:$0xff]  }
  0xfb   :  { %3302 = vmatpush2.bf16.msra.mxu0 %v5022_v10  ;;  %v5120_v10 = vld [vmem:[%s7175_s1 + $0x44c] ss:$16 sps:$4 sm:$0xff]  }
  0xfc   :  { %3372 = vmatpush1.bf16.msra.mxu1 %v5025_v11  ;;  %3303 = vmatprep.subr.bf16.mxu0 %v5030_v12  ;;  %v5115_v11 = vld [vmem:[%s7175_s1 + $0x348] ss:$16 sps:$4 sm:$0xff]  }
  0xfd   :  { %3373 = vmatprep.subr.bf16.mxu1 %v5033_v13  ;;  %v5118_v12 = vld [vmem:[%s7175_s1 + $0x448] ss:$16 sps:$4 sm:$0xff]   ;;  %v5123_v13 = vld [vmem:[%s7175_s1 + $0x32c] ss:$16 sps:$4 sm:$0xff]  }
  0xff   :  { %3304 = vmatpush2.bf16.msra.mxu0 %v5028_v14  ;;  %v5126_v14 = vld [vmem:[%s7175_s1 + $0x42c] ss:$16 sps:$4 sm:$0xff]  }
 0x100   :  { %3374 = vmatpush1.bf16.msra.mxu1 %v5031_v15  ;;  %3402 = vmatprep.subr.bf16.mxu0 %v5042_v17  ;;  %v5121_v15 = vld [vmem:[%s7175_s1 + $0x328] ss:$16 sps:$4 sm:$0xff]   ;;  %v5129_v17 = vld [vmem:[%s7175_s1 + $0x30c] ss:$16 sps:$4 sm:$0xff]  }
 0x101   :  { %3375 = vmatprep.subr.bf16.mxu1 %v5039_v16  ;;  %v5124_v16 = vld [vmem:[%s7175_s1 + $0x428] ss:$16 sps:$4 sm:$0xff]  }
 0x102   :  { %3306 = vmatmul.mubr.bf16.vlgmr.msra.gmra.mxu0 %v5034_v18  ;;  %v5132_v18 = vld [vmem:[%s7175_s1 + $0x40c] ss:$16 sps:$4 sm:$0xff]  }
 0x103   :  { %3403 = vmatpush1.bf16.msra.mxu0 %v5040_v20  ;;  %3434 = vmatprep.mubr.bf16.mxu0 %v5406_v28  ;;  %v5130_v20 = vld [vmem:[%s7175_s1 + $0x408] ss:$16 sps:$4 sm:$0xff]  }
 0x104   :  { %3376 = vmatpush2.bf16.msra.mxu1 %v5037_v19  ;;  %3404 = vmatprep.subr.bf16.mxu0 %v5048_v22  ;;  %v5127_v19 = vld [vmem:[%s7175_s1 + $0x308] ss:$16 sps:$4 sm:$0xff]   ;;  %v5138_v22 = vld [vmem:[%s7175_s1 + $0x6ec] ss:$16 sps:$4 sm:$0xff]  }
 0x105   :  { %3377 = vmatprep.subr.bf16.mxu1 %v5045_v21  ;;  %v5135_v21 = vld [vmem:[%s7175_s1 + $0x5ec] ss:$16 sps:$4 sm:$0xff]   ;;  %v5409_v28 = vld [vmem:[%s7176_s0 + $0x8] ss:$60 sps:$4 sm:$0xff]  }
 0x107   :  { %3405 = vmatpush1.bf16.msra.mxu0 %v5046_v25  ;;  %v5136_v25 = vld [vmem:[%s7175_s1 + $0x6e8] ss:$16 sps:$4 sm:$0xff]  }
 0x108   :  { %3378 = vmatpush2.bf16.msra.mxu1 %v5043_v24  ;;  %3406 = vmatprep.subr.bf16.mxu0 %v5054_v27  ;;  %v5133_v24 = vld [vmem:[%s7175_s1 + $0x5e8] ss:$16 sps:$4 sm:$0xff]   ;;  %v5144_v27 = vld [vmem:[%s7175_s1 + $0x6cc] ss:$16 sps:$4 sm:$0xff]  }
 0x109   :  { %3379 = vmatprep.subr.bf16.mxu1 %v5051_v26  ;;  %v5141_v26 = vld [vmem:[%s7175_s1 + $0x5cc] ss:$16 sps:$4 sm:$0xff]  }
 0x10b   :  { %3407 = vmatpush1.bf16.msra.mxu0 %v5052_v30  ;;  %v5142_v30 = vld [vmem:[%s7175_s1 + $0x6c8] ss:$16 sps:$4 sm:$0xff]  }
 0x10c   :  { %3380 = vmatpush2.bf16.msra.mxu1 %v5049_v29  ;;  %3408 = vmatprep.subr.bf16.mxu0 %v5060_v32  ;;  %v5139_v29 = vld [vmem:[%s7175_s1 + $0x5c8] ss:$16 sps:$4 sm:$0xff]   ;;  %v5150_v32 = vld [vmem:[%s7175_s1 + $0x6ac] ss:$16 sps:$4 sm:$0xff]  }
 0x10d   :  { %3381 = vmatprep.subr.bf16.mxu1 %v5057_v31  ;;  %v5147_v31 = vld [vmem:[%s7175_s1 + $0x5ac] ss:$16 sps:$4 sm:$0xff]  }
 0x10f   :  { %3409 = vmatpush1.bf16.msra.mxu0 %v5058_v34  ;;  %v5145_v34 = vld [vmem:[%s7175_s1 + $0x5a8] ss:$16 sps:$4 sm:$0xff]  }
 0x110   :  { %3382 = vmatpush2.bf16.msra.mxu1 %v5055_v33  ;;  %3410 = vmatprep.subr.bf16.mxu0 %v5066_v36  ;;  %v5410_v33 = vld [vmem:[%s7176_s0 + $0x1c] ss:$60 sps:$4 sm:$0xff]  }
 0x111   :  { %3383 = vmatprep.subr.bf16.mxu1 %v5063_v35  ;;  %v5148_v35 = vld [vmem:[%s7175_s1 + $0x6a8] ss:$16 sps:$4 sm:$0xff]   ;;  %v5153_v36 = vld [vmem:[%s7175_s1 + $0x58c] ss:$16 sps:$4 sm:$0xff]  }
 0x113   :  { %3411 = vmatpush1.bf16.msra.mxu0 %v5064_v38  ;;  %v5151_v38 = vld [vmem:[%s7175_s1 + $0x588] ss:$16 sps:$4 sm:$0xff]  }
 0x114   :  { %3384 = vmatpush2.bf16.msra.mxu1 %v5061_v37  ;;  %3412 = vmatprep.subr.bf16.mxu0 %v5072_v40  ;;  %v5156_v37 = vld [vmem:[%s7175_s1 + $0x68c] ss:$16 sps:$4 sm:$0xff]  }
 0x115   :  { %3385 = vmatprep.subr.bf16.mxu1 %v5069_v39  ;;  %v5154_v39 = vld [vmem:[%s7175_s1 + $0x688] ss:$16 sps:$4 sm:$0xff]   ;;  %v5159_v40 = vld [vmem:[%s7175_s1 + $0x56c] ss:$16 sps:$4 sm:$0xff]  }
 0x117   :  { %3413 = vmatpush1.bf16.msra.mxu0 %v5070_v42  ;;  %v5157_v42 = vld [vmem:[%s7175_s1 + $0x568] ss:$16 sps:$4 sm:$0xff]  }
 0x118   :  { %3386 = vmatpush2.bf16.msra.mxu1 %v5067_v41  ;;  %3414 = vmatprep.subr.bf16.mxu0 %v5078_v44  ;;  %v5162_v41 = vld [vmem:[%s7175_s1 + $0x66c] ss:$16 sps:$4 sm:$0xff]  }
 0x119   :  { %3387 = vmatprep.subr.bf16.mxu1 %v5075_v43  ;;  %v5160_v43 = vld [vmem:[%s7175_s1 + $0x668] ss:$16 sps:$4 sm:$0xff]   ;;  %v5165_v44 = vld [vmem:[%s7175_s1 + $0x54c] ss:$16 sps:$4 sm:$0xff]  }
 0x11b   :  { %3415 = vmatpush1.bf16.msra.mxu0 %v5076_v46  ;;  %v5163_v46 = vld [vmem:[%s7175_s1 + $0x548] ss:$16 sps:$4 sm:$0xff]  }
 0x11c   :  { %3388 = vmatpush2.bf16.msra.mxu1 %v5073_v45  ;;  %3416 = vmatprep.subr.bf16.mxu0 %v5084_v48  ;;  %v5168_v45 = vld [vmem:[%s7175_s1 + $0x64c] ss:$16 sps:$4 sm:$0xff]  }
 0x11d   :  { %3389 = vmatprep.subr.bf16.mxu1 %v5081_v47  ;;  %v5166_v47 = vld [vmem:[%s7175_s1 + $0x648] ss:$16 sps:$4 sm:$0xff]   ;;  %v5171_v48 = vld [vmem:[%s7175_s1 + $0x52c] ss:$16 sps:$4 sm:$0xff]  }
 0x11f   :  { %3417 = vmatpush1.bf16.msra.mxu0 %v5082_v50  ;;  %v5169_v50 = vld [vmem:[%s7175_s1 + $0x528] ss:$16 sps:$4 sm:$0xff]  }
 0x120   :  { %3390 = vmatpush2.bf16.msra.mxu1 %v5079_v49  ;;  %3418 = vmatprep.subr.bf16.mxu0 %v5087_v51  ;;  %v5174_v49 = vld [vmem:[%s7175_s1 + $0x62c] ss:$16 sps:$4 sm:$0xff]   ;;  %v5172_v51 = vld [vmem:[%s7175_s1 + $0x628] ss:$16 sps:$4 sm:$0xff]  }
 0x121   :  { %3445 = vmatprep.subr.bf16.mxu1 %v5090_v52  ;;  %v5177_v52 = vld [vmem:[%s7175_s1 + $0x50c] ss:$16 sps:$4 sm:$0xff]  }
 0x123   :  { %3392 = vmatmul.mubr.bf16.vlgmr.msra.gmra.mxu1 %v5407_v59  ;;  %3419 = vmatpush2.bf16.msra.mxu0 %v5085_v53  ;;  %v5180_v53 = vld [vmem:[%s7175_s1 + $0x60c] ss:$16 sps:$4 sm:$0xff]   ;;  %v5184_v59 = vld [vmem:[%s7175_s1 + $0x8e8] ss:$16 sps:$4 sm:$0xff]  }
 0x124   :  { %3446 = vmatpush1.bf16.msra.mxu1 %v5088_v54  ;;  %3420 = vmatprep.subr.bf16.mxu0 %v5093_v55  ;;  %v5175_v54 = vld [vmem:[%s7175_s1 + $0x508] ss:$16 sps:$4 sm:$0xff]  }
 0x125   :  { %3447 = vmatprep.subr.bf16.mxu1 %v5096_v56  ;;  %3477 = vmatprep.mubr.bf16.mxu1 %v5408_v0  ;;  %v5178_v55 = vld [vmem:[%s7175_s1 + $0x608] ss:$16 sps:$4 sm:$0xff]   ;;  %v5183_v56 = vld [vmem:[%s7175_s1 + $0x7ec] ss:$16 sps:$4 sm:$0xff]  }
 0x126   :  { %v5411_v0 = vld [vmem:[%s7176_s0 + $0x10] ss:$60 sps:$4 sm:$0xff]  }
 0x127   :  { %3421 = vmatpush2.bf16.msra.mxu0 %v5091_v57  ;;  %v5186_v57 = vld [vmem:[%s7175_s1 + $0x8ec] ss:$16 sps:$4 sm:$0xff]  }
 0x128   :  { %3448 = vmatpush1.bf16.msra.mxu1 %v5094_v58  ;;  %3422 = vmatprep.subr.bf16.mxu0 %v5099_v60  ;;  %v5181_v58 = vld [vmem:[%s7175_s1 + $0x7e8] ss:$16 sps:$4 sm:$0xff]   ;;  %v5189_v60 = vld [vmem:[%s7175_s1 + $0x7cc] ss:$16 sps:$4 sm:$0xff]  }
 0x129   :  { %3449 = vmatprep.subr.bf16.mxu1 %v5102_v61  ;;  %v5192_v61 = vld [vmem:[%s7175_s1 + $0x8cc] ss:$16 sps:$4 sm:$0xff]  }
 0x12b   :  { %3423 = vmatpush2.bf16.msra.mxu0 %v5097_v62  ;;  %v5187_v62 = vld [vmem:[%s7175_s1 + $0x7c8] ss:$16 sps:$4 sm:$0xff]  }
 0x12c   :  { %3450 = vmatpush1.bf16.msra.mxu1 %v5100_v63  ;;  %3424 = vmatprep.subr.bf16.mxu0 %v5105_v1  ;;  %v5190_v63 = vld [vmem:[%s7175_s1 + $0x8c8] ss:$16 sps:$4 sm:$0xff]   ;;  %v5195_v1 = vld [vmem:[%s7175_s1 + $0x7ac] ss:$16 sps:$4 sm:$0xff]  }
 0x12d   :  { %3451 = vmatprep.subr.bf16.mxu1 %v5108_v2  ;;  %v5198_v2 = vld [vmem:[%s7175_s1 + $0x8ac] ss:$16 sps:$4 sm:$0xff]  }
 0x12f   :  { %3425 = vmatpush2.bf16.msra.mxu0 %v5103_v3  ;;  %v5193_v3 = vld [vmem:[%s7175_s1 + $0x7a8] ss:$16 sps:$4 sm:$0xff]  }
 0x130   :  { %3452 = vmatpush1.bf16.msra.mxu1 %v5106_v4  ;;  %3426 = vmatprep.subr.bf16.mxu0 %v5111_v5  ;;  %v5196_v4 = vld [vmem:[%s7175_s1 + $0x8a8] ss:$16 sps:$4 sm:$0xff]   ;;  %v5412_v5 = vld [vmem:[%s7176_s0 + $0x24] ss:$60 sps:$4 sm:$0xff]  }
 0x131   :  { %3453 = vmatprep.subr.bf16.mxu1 %v5114_v6  ;;  %v5201_v6 = vld [vmem:[%s7175_s1 + $0x78c] ss:$16 sps:$4 sm:$0xff]  }
 0x133   :  { %3427 = vmatpush2.bf16.msra.mxu0 %v5109_v7  ;;  %v5204_v7 = vld [vmem:[%s7175_s1 + $0x88c] ss:$16 sps:$4 sm:$0xff]  }
 0x134   :  { %3454 = vmatpush1.bf16.msra.mxu1 %v5112_v8  ;;  %3428 = vmatprep.subr.bf16.mxu0 %v5117_v9  ;;  %v5199_v8 = vld [vmem:[%s7175_s1 + $0x788] ss:$16 sps:$4 sm:$0xff]  }
 0x135   :  { %3455 = vmatprep.subr.bf16.mxu1 %v5120_v10  ;;  %v5202_v9 = vld [vmem:[%s7175_s1 + $0x888] ss:$16 sps:$4 sm:$0xff]   ;;  %v5207_v10 = vld [vmem:[%s7175_s1 + $0x76c] ss:$16 sps:$4 sm:$0xff]  }
 0x137   :  { %3429 = vmatpush2.bf16.msra.mxu0 %v5115_v11  ;;  %v5210_v11 = vld [vmem:[%s7175_s1 + $0x86c] ss:$16 sps:$4 sm:$0xff]  }
 0x138   :  { %3456 = vmatpush1.bf16.msra.mxu1 %v5118_v12  ;;  %3430 = vmatprep.subr.bf16.mxu0 %v5123_v13  ;;  %v5205_v12 = vld [vmem:[%s7175_s1 + $0x768] ss:$16 sps:$4 sm:$0xff]  }
 0x139   :  { %3457 = vmatprep.subr.bf16.mxu1 %v5126_v14  ;;  %v5208_v13 = vld [vmem:[%s7175_s1 + $0x868] ss:$16 sps:$4 sm:$0xff]   ;;  %v5213_v14 = vld [vmem:[%s7175_s1 + $0x74c] ss:$16 sps:$4 sm:$0xff]  }
 0x13b   :  { %3431 = vmatpush2.bf16.msra.mxu0 %v5121_v15  ;;  %v5216_v15 = vld [vmem:[%s7175_s1 + $0x84c] ss:$16 sps:$4 sm:$0xff]  }
 0x13c   :  { %3458 = vmatpush1.bf16.msra.mxu1 %v5124_v16  ;;  %3432 = vmatprep.subr.bf16.mxu0 %v5129_v17  ;;  %v5211_v16 = vld [vmem:[%s7175_s1 + $0x748] ss:$16 sps:$4 sm:$0xff]  }
 0x13d   :  { %3459 = vmatprep.subr.bf16.mxu1 %v5132_v18  ;;  %v5214_v17 = vld [vmem:[%s7175_s1 + $0x848] ss:$16 sps:$4 sm:$0xff]   ;;  %v5219_v18 = vld [vmem:[%s7175_s1 + $0x72c] ss:$16 sps:$4 sm:$0xff]  }
 0x13f   :  { %3433 = vmatpush2.bf16.msra.mxu0 %v5127_v19  ;;  %v5222_v19 = vld [vmem:[%s7175_s1 + $0x82c] ss:$16 sps:$4 sm:$0xff]  }
 0x140   :  { %3460 = vmatpush1.bf16.msra.mxu1 %v5130_v20  ;;  %3488 = vmatprep.subr.bf16.mxu0 %v5138_v22  ;;  %v5217_v20 = vld [vmem:[%s7175_s1 + $0x728] ss:$16 sps:$4 sm:$0xff]   ;;  %v5225_v22 = vld [vmem:[%s7175_s1 + $0x70c] ss:$16 sps:$4 sm:$0xff]  }
 0x141   :  { %3461 = vmatprep.subr.bf16.mxu1 %v5135_v21  ;;  %v5220_v21 = vld [vmem:[%s7175_s1 + $0x828] ss:$16 sps:$4 sm:$0xff]  }
 0x142   :  { %3435 = vmatmul.mubr.bf16.vlgmr.msra.gmra.mxu0 %v5409_v28  ;;  %v5234_v28 = vld [vmem:[%s7175_s1 + $0xaec] ss:$16 sps:$4 sm:$0xff]  }
 0x143   :  { %3489 = vmatpush1.bf16.msra.mxu0 %v5136_v25  ;;  %3520 = vmatprep.mubr.bf16.mxu0 %v5410_v33  ;;  %v5223_v25 = vld [vmem:[%s7175_s1 + $0x708] ss:$16 sps:$4 sm:$0xff]  }
 0x144   :  { %3462 = vmatpush2.bf16.msra.mxu1 %v5133_v24  ;;  %3490 = vmatprep.subr.bf16.mxu0 %v5144_v27  ;;  %v5228_v24 = vld [vmem:[%s7175_s1 + $0x80c] ss:$16 sps:$4 sm:$0xff]   ;;  %v5413_v33 = vld [vmem:[%s7176_s0 + $0x18] ss:$60 sps:$4 sm:$0xff]  }
 0x145   :  { %3463 = vmatprep.subr.bf16.mxu1 %v5141_v26  ;;  %v5226_v26 = vld [vmem:[%s7175_s1 + $0x808] ss:$16 sps:$4 sm:$0xff]   ;;  %v5231_v27 = vld [vmem:[%s7175_s1 + $0x9ec] ss:$16 sps:$4 sm:$0xff]  }
 0x147   :  { %3491 = vmatpush1.bf16.msra.mxu0 %v5142_v30  ;;  %v5232_v30 = vld [vmem:[%s7175_s1 + $0xae8] ss:$16 sps:$4 sm:$0xff]  }
 0x148   :  { %3464 = vmatpush2.bf16.msra.mxu1 %v5139_v29  ;;  %3492 = vmatprep.subr.bf16.mxu0 %v5150_v32  ;;  %v5229_v29 = vld [vmem:[%s7175_s1 + $0x9e8] ss:$16 sps:$4 sm:$0xff]   ;;  %v5240_v32 = vld [vmem:[%s7175_s1 + $0xacc] ss:$16 sps:$4 sm:$0xff]  }
 0x149   :  { %3465 = vmatprep.subr.bf16.mxu1 %v5147_v31  ;;  %v5237_v31 = vld [vmem:[%s7175_s1 + $0x9cc] ss:$16 sps:$4 sm:$0xff]  }
 0x14b   :  { %3493 = vmatpush1.bf16.msra.mxu0 %v5148_v35  ;;  %v5238_v35 = vld [vmem:[%s7175_s1 + $0xac8] ss:$16 sps:$4 sm:$0xff]  }
 0x14c   :  { %3466 = vmatpush2.bf16.msra.mxu1 %v5145_v34  ;;  %3494 = vmatprep.subr.bf16.mxu0 %v5156_v37  ;;  %v5235_v34 = vld [vmem:[%s7175_s1 + $0x9c8] ss:$16 sps:$4 sm:$0xff]   ;;  %v5246_v37 = vld [vmem:[%s7175_s1 + $0xaac] ss:$16 sps:$4 sm:$0xff]  }
 0x14d   :  { %3467 = vmatprep.subr.bf16.mxu1 %v5153_v36  ;;  %v5243_v36 = vld [vmem:[%s7175_s1 + $0x9ac] ss:$16 sps:$4 sm:$0xff]  }
 0x14f   :  { %3495 = vmatpush1.bf16.msra.mxu0 %v5154_v39  ;;  %v5241_v39 = vld [vmem:[%s7175_s1 + $0x9a8] ss:$16 sps:$4 sm:$0xff]  }
 0x150   :  { %3468 = vmatpush2.bf16.msra.mxu1 %v5151_v38  ;;  %3496 = vmatprep.subr.bf16.mxu0 %v5162_v41  ;;  %v5414_v38 = vld [vmem:[%s7176_s0 + $0x2c] ss:$60 sps:$4 sm:$0xff]  }
 0x151   :  { %3469 = vmatprep.subr.bf16.mxu1 %v5159_v40  ;;  %v5244_v40 = vld [vmem:[%s7175_s1 + $0xaa8] ss:$16 sps:$4 sm:$0xff]   ;;  %v5249_v41 = vld [vmem:[%s7175_s1 + $0x98c] ss:$16 sps:$4 sm:$0xff]  }
 0x153   :  { %3497 = vmatpush1.bf16.msra.mxu0 %v5160_v43  ;;  %v5247_v43 = vld [vmem:[%s7175_s1 + $0x988] ss:$16 sps:$4 sm:$0xff]  }
 0x154   :  { %3470 = vmatpush2.bf16.msra.mxu1 %v5157_v42  ;;  %3498 = vmatprep.subr.bf16.mxu0 %v5168_v45  ;;  %v5252_v42 = vld [vmem:[%s7175_s1 + $0xa8c] ss:$16 sps:$4 sm:$0xff]  }
 0x155   :  { %3471 = vmatprep.subr.bf16.mxu1 %v5165_v44  ;;  %v5250_v44 = vld [vmem:[%s7175_s1 + $0xa88] ss:$16 sps:$4 sm:$0xff]   ;;  %v5255_v45 = vld [vmem:[%s7175_s1 + $0x96c] ss:$16 sps:$4 sm:$0xff]  }
 0x157   :  { %3499 = vmatpush1.bf16.msra.mxu0 %v5166_v47  ;;  %v5253_v47 = vld [vmem:[%s7175_s1 + $0x968] ss:$16 sps:$4 sm:$0xff]  }
 0x158   :  { %3472 = vmatpush2.bf16.msra.mxu1 %v5163_v46  ;;  %3500 = vmatprep.subr.bf16.mxu0 %v5174_v49  ;;  %v5258_v46 = vld [vmem:[%s7175_s1 + $0xa6c] ss:$16 sps:$4 sm:$0xff]  }
 0x159   :  { %3473 = vmatprep.subr.bf16.mxu1 %v5171_v48  ;;  %v5256_v48 = vld [vmem:[%s7175_s1 + $0xa68] ss:$16 sps:$4 sm:$0xff]   ;;  %v5261_v49 = vld [vmem:[%s7175_s1 + $0x94c] ss:$16 sps:$4 sm:$0xff]  }
 0x15b   :  { %3501 = vmatpush1.bf16.msra.mxu0 %v5172_v51  ;;  %v5259_v51 = vld [vmem:[%s7175_s1 + $0x948] ss:$16 sps:$4 sm:$0xff]  }
 0x15c   :  { %3474 = vmatpush2.bf16.msra.mxu1 %v5169_v50  ;;  %3502 = vmatprep.subr.bf16.mxu0 %v5180_v53  ;;  %v5264_v50 = vld [vmem:[%s7175_s1 + $0xa4c] ss:$16 sps:$4 sm:$0xff]  }
 0x15d   :  { %3475 = vmatprep.subr.bf16.mxu1 %v5177_v52  ;;  %v5262_v52 = vld [vmem:[%s7175_s1 + $0xa48] ss:$16 sps:$4 sm:$0xff]   ;;  %v5267_v53 = vld [vmem:[%s7175_s1 + $0x92c] ss:$16 sps:$4 sm:$0xff]  }
 0x15f   :  { %3503 = vmatpush1.bf16.msra.mxu0 %v5178_v55  ;;  %v5265_v55 = vld [vmem:[%s7175_s1 + $0x928] ss:$16 sps:$4 sm:$0xff]  }
 0x160   :  { %3476 = vmatpush2.bf16.msra.mxu1 %v5175_v54  ;;  %3504 = vmatprep.subr.bf16.mxu0 %v5183_v56  ;;  %v5270_v54 = vld [vmem:[%s7175_s1 + $0xa2c] ss:$16 sps:$4 sm:$0xff]   ;;  %v5268_v56 = vld [vmem:[%s7175_s1 + $0xa28] ss:$16 sps:$4 sm:$0xff]  }
 0x161   :  { %3531 = vmatprep.subr.bf16.mxu1 %v5186_v57  ;;  %v5273_v57 = vld [vmem:[%s7175_s1 + $0x90c] ss:$16 sps:$4 sm:$0xff]  }
 0x163   :  { %3478 = vmatmul.mubr.bf16.vlgmr.msra.gmra.mxu1 %v5411_v0  ;;  %3505 = vmatpush2.bf16.msra.mxu0 %v5181_v58  ;;  %v5276_v58 = vld [vmem:[%s7175_s1 + $0xa0c] ss:$16 sps:$4 sm:$0xff]   ;;  %v5280_v0 = vld [vmem:[%s7175_s1 + $0xce8] ss:$16 sps:$4 sm:$0xff]  }
 0x164   :  { %3532 = vmatpush1.bf16.msra.mxu1 %v5184_v59  ;;  %3506 = vmatprep.subr.bf16.mxu0 %v5189_v60  ;;  %v5271_v59 = vld [vmem:[%s7175_s1 + $0x908] ss:$16 sps:$4 sm:$0xff]  }
 0x165   :  { %3533 = vmatprep.subr.bf16.mxu1 %v5192_v61  ;;  %3563 = vmatprep.mubr.bf16.mxu1 %v5412_v5  ;;  %v5274_v60 = vld [vmem:[%s7175_s1 + $0xa08] ss:$16 sps:$4 sm:$0xff]   ;;  %v5279_v61 = vld [vmem:[%s7175_s1 + $0xbec] ss:$16 sps:$4 sm:$0xff]  }
 0x166   :  { %v5283_v5 = vld [vmem:[%s7175_s1 + $0xbc8] ss:$16 sps:$4 sm:$0xff]  }
 0x167   :  { %3507 = vmatpush2.bf16.msra.mxu0 %v5187_v62  ;;  %v5282_v62 = vld [vmem:[%s7175_s1 + $0xcec] ss:$16 sps:$4 sm:$0xff]  }
 0x168   :  { %3534 = vmatpush1.bf16.msra.mxu1 %v5190_v63  ;;  %3508 = vmatprep.subr.bf16.mxu0 %v5195_v1  ;;  %v5277_v63 = vld [vmem:[%s7175_s1 + $0xbe8] ss:$16 sps:$4 sm:$0xff]   ;;  %v6787_v1 = vpop.f32.mrf.mxu0 }
 0x169   :  { %3535 = vmatprep.subr.bf16.mxu1 %v5198_v2  ;;  %v5285_v2 = vld [vmem:[%s7175_s1 + $0xbcc] ss:$16 sps:$4 sm:$0xff]  }
 0x16b   :  { %3509 = vmatpush2.bf16.msra.mxu0 %v5193_v3  ;;  %v5288_v3 = vld [vmem:[%s7175_s1 + $0xccc] ss:$16 sps:$4 sm:$0xff]  }
 0x16c   :  { %3536 = vmatpush1.bf16.msra.mxu1 %v5196_v4  ;;  %3510 = vmatprep.subr.bf16.mxu0 %v5201_v6  ;;  %v5415_v4 = vld [vmem:[%s7176_s0 + $0x20] ss:$60 sps:$4 sm:$0xff]   ;;  %v5286_v6 = vld [vmem:[%s7175_s1 + $0xcc8] ss:$16 sps:$4 sm:$0xff]  }
 0x16d   :  { %3537 = vmatprep.subr.bf16.mxu1 %v5204_v7  ;;  %v6804_v7 = vpop.f32.mrf.mxu0 }
 0x16f   :  { %3511 = vmatpush2.bf16.msra.mxu0 %v5199_v8  ;;  %v5291_v8 = vld [vmem:[%s7175_s1 + $0xbac] ss:$16 sps:$4 sm:$0xff]  }
 0x170   :  { %3538 = vmatpush1.bf16.msra.mxu1 %v5202_v9  ;;  %3512 = vmatprep.subr.bf16.mxu0 %v5207_v10  ;;  %v5294_v9 = vld [vmem:[%s7175_s1 + $0xcac] ss:$16 sps:$4 sm:$0xff]   ;;  %v5416_v10 = vld [vmem:[%s7176_s0 + $0x34] ss:$60 sps:$4 sm:$0xff]  }
 0x171   :  { %3539 = vmatprep.subr.bf16.mxu1 %v5210_v11  ;;  %v6815_v11 = vpop.f32.mrf.mxu1 }
 0x173   :  { %3513 = vmatpush2.bf16.msra.mxu0 %v5205_v12  ;;  %v5289_v12 = vld [vmem:[%s7175_s1 + $0xba8] ss:$16 sps:$4 sm:$0xff]  }
 0x174   :  { %3540 = vmatpush1.bf16.msra.mxu1 %v5208_v13  ;;  %3514 = vmatprep.subr.bf16.mxu0 %v5213_v14  ;;  %v5292_v13 = vld [vmem:[%s7175_s1 + $0xca8] ss:$16 sps:$4 sm:$0xff]   ;;  %v6823_v14 = vpop.f32.mrf.mxu0 }
 0x175   :  { %3541 = vmatprep.subr.bf16.mxu1 %v5216_v15  ;;  %v5297_v15 = vld [vmem:[%s7175_s1 + $0xb8c] ss:$16 sps:$4 sm:$0xff]  }
 0x177   :  { %3515 = vmatpush2.bf16.msra.mxu0 %v5211_v16  ;;  %v5300_v16 = vld [vmem:[%s7175_s1 + $0xc8c] ss:$16 sps:$4 sm:$0xff]  }
 0x178   :  { %3542 = vmatpush1.bf16.msra.mxu1 %v5214_v17  ;;  %3516 = vmatprep.subr.bf16.mxu0 %v5219_v18  ;;  %v6831_v17 = vpop.f32.mrf.mxu1  ;;  %v5295_v18 = vld [vmem:[%s7175_s1 + $0xb88] ss:$16 sps:$4 sm:$0xff]  }
 0x179   :  { %3543 = vmatprep.subr.bf16.mxu1 %v5222_v19  ;;  %v5298_v19 = vld [vmem:[%s7175_s1 + $0xc88] ss:$16 sps:$4 sm:$0xff]  }
 0x17b   :  { %3517 = vmatpush2.bf16.msra.mxu0 %v5217_v20  ;;  %v6839_v20 = vpop.f32.mrf.mxu0 }
 0x17c   :  { %3544 = vmatpush1.bf16.msra.mxu1 %v5220_v21  ;;  %3518 = vmatprep.subr.bf16.mxu0 %v5225_v22  ;;  %v5303_v21 = vld [vmem:[%s7175_s1 + $0xb6c] ss:$16 sps:$4 sm:$0xff]  }
 0x17d   :  { %3545 = vmatprep.subr.bf16.mxu1 %v5228_v24  ;;  %v5306_v22 = vld [vmem:[%s7175_s1 + $0xc6c] ss:$16 sps:$4 sm:$0xff]   ;;  %v6847_v24 = vpop.f32.mrf.mxu1 }
 0x17f   :  { %3519 = vmatpush2.bf16.msra.mxu0 %v5223_v25  ;;  %v6849_v25 = vpop.f32.mrf.mxu0 }
 0x180   :  { %3546 = vmatpush1.bf16.msra.mxu1 %v5226_v26  ;;  %3574 = vmatprep.subr.bf16.mxu0 %v5234_v28  ;;  %v5301_v26 = vld [vmem:[%s7175_s1 + $0xb68] ss:$16 sps:$4 sm:$0xff]   ;;  %v5309_v28 = vld [vmem:[%s7175_s1 + $0xb4c] ss:$16 sps:$4 sm:$0xff]  }
 0x181   :  { %3547 = vmatprep.subr.bf16.mxu1 %v5231_v27  ;;  %v5304_v27 = vld [vmem:[%s7175_s1 + $0xc68] ss:$16 sps:$4 sm:$0xff]  }
 0x182   :  { %3521 = vmatmul.mubr.bf16.vlgmr.msra.gmra.mxu0 %v5413_v33  ;;  %v5310_v33 = vld [vmem:[%s7175_s1 + $0xc48] ss:$16 sps:$4 sm:$0xff]  }
 0x183   :  { %3575 = vmatpush1.bf16.msra.mxu0 %v5232_v30  ;;  %3606 = vmatprep.mubr.bf16.mxu0 %v5414_v38  ;;  %v6863_v30 = vpop.f32.mrf.mxu1  ;;  %v5313_v38 = vld [vmem:[%s7175_s1 + $0xb28] ss:$16 sps:$4 sm:$0xff]  }
 0x184   :  { %3548 = vmatpush2.bf16.msra.mxu1 %v5229_v29  ;;  %3576 = vmatprep.subr.bf16.mxu0 %v5240_v32  ;;  %v5312_v29 = vld [vmem:[%s7175_s1 + $0xc4c] ss:$16 sps:$4 sm:$0xff]   ;;  %v5307_v32 = vld [vmem:[%s7175_s1 + $0xb48] ss:$16 sps:$4 sm:$0xff]  }
 0x185   :  { %3549 = vmatprep.subr.bf16.mxu1 %v5237_v31  ;;  %v6865_v31 = vpop.f32.mrf.mxu0 }
 0x187   :  { %3577 = vmatpush1.bf16.msra.mxu0 %v5238_v35  ;;  %v5315_v35 = vld [vmem:[%s7175_s1 + $0xb2c] ss:$16 sps:$4 sm:$0xff]  }
 0x188   :  { %3550 = vmatpush2.bf16.msra.mxu1 %v5235_v34  ;;  %3578 = vmatprep.subr.bf16.mxu0 %v5246_v37  ;;  %v6873_v34 = vpop.f32.mrf.mxu1  ;;  %v6881_v37 = vpop.f32.mrf.mxu0 }
 0x189   :  { %3551 = vmatprep.subr.bf16.mxu1 %v5243_v36  ;;  %v5318_v36 = vld [vmem:[%s7175_s1 + $0xc2c] ss:$16 sps:$4 sm:$0xff]  }
 0x18b   :  { %3579 = vmatpush1.bf16.msra.mxu0 %v5244_v40  ;;  %v6889_v40 = vpop.f32.mrf.mxu1 }
 0x18c   :  { %3552 = vmatpush2.bf16.msra.mxu1 %v5241_v39  ;;  %3580 = vmatprep.subr.bf16.mxu0 %v5252_v42  ;;  %v5316_v39 = vld [vmem:[%s7175_s1 + $0xc28] ss:$16 sps:$4 sm:$0xff]   ;;  %v5324_v42 = vld [vmem:[%s7175_s1 + $0xc0c] ss:$16 sps:$4 sm:$0xff]  }
 0x18d   :  { %3553 = vmatprep.subr.bf16.mxu1 %v5249_v41  ;;  %v5321_v41 = vld [vmem:[%s7175_s1 + $0xb0c] ss:$16 sps:$4 sm:$0xff]  }
 0x18f   :  { %3581 = vmatpush1.bf16.msra.mxu0 %v5250_v44  ;;  %v519_v44 = vlaneseq }
 0x190   :  { %3554 = vmatpush2.bf16.msra.mxu1 %v5247_v43  ;;  %3582 = vmatprep.subr.bf16.mxu0 %v5258_v46  ;;  %v6897_v43 = vpop.f32.mrf.mxu0  ;;  %v5322_v46 = vld [vmem:[%s7175_s1 + $0xc08] ss:$16 sps:$4 sm:$0xff]  }
 0x191   :  { %3555 = vmatprep.subr.bf16.mxu1 %v5255_v45  ;;  %v5319_v45 = vld [vmem:[%s7175_s1 + $0xb08] ss:$16 sps:$4 sm:$0xff]  }
 0x193   :  { %3583 = vmatpush1.bf16.msra.mxu0 %v5256_v48  ;;  %v6907_v48 = vpop.f32.mrf.mxu0 }
 0x194   :  { %3556 = vmatpush2.bf16.msra.mxu1 %v5253_v47  ;;  %3584 = vmatprep.subr.bf16.mxu0 %v5264_v50  ;;  %v6905_v47 = vpop.f32.mrf.mxu1  ;;  %v5330_v50 = vld [vmem:[%s7175_s1 + $0xeec] ss:$16 sps:$4 sm:$0xff]  }
 0x195   :  { %3557 = vmatprep.subr.bf16.mxu1 %v5261_v49  ;;  %v5327_v49 = vld [vmem:[%s7175_s1 + $0xdec] ss:$16 sps:$4 sm:$0xff]  }
 0x197   :  { %3585 = vmatpush1.bf16.msra.mxu0 %v5262_v52  ;;  %v5325_v52 = vld [vmem:[%s7175_s1 + $0xde8] ss:$16 sps:$4 sm:$0xff]  }
 0x198   :  { %3558 = vmatpush2.bf16.msra.mxu1 %v5259_v51  ;;  %3586 = vmatprep.subr.bf16.mxu0 %v5270_v54  ;;  %v6915_v51 = vshrl.u32 %v519_v44, 7  ;;  %v3184_v54 = vpop.f32.mrf.mxu1  ;;  %v5363_v44 = vld [vmem:[%s7175_s1 + $0xd2c] ss:$16 sps:$4 sm:$0xff]  }
 0x199   :  { %3559 = vmatprep.subr.bf16.mxu1 %v5267_v53  ;;  %v5328_v53 = vld [vmem:[%s7175_s1 + $0xee8] ss:$16 sps:$4 sm:$0xff]  }
 0x19b   :  { %3587 = vmatpush1.bf16.msra.mxu0 %v5268_v56  ;;  %v5333_v56 = vld [vmem:[%s7175_s1 + $0xdcc] ss:$16 sps:$4 sm:$0xff]  }
 0x19c   :  { %3560 = vmatpush2.bf16.msra.mxu1 %v5265_v55  ;;  %3588 = vmatprep.subr.bf16.mxu0 %v5276_v58  ;;  %v6923_v55 = vpop.f32.mrf.mxu0  ;;  %v525_v58 = vsub.s32 1, %v6915_v51 }
 0x19d   :  { %3561 = vmatprep.subr.bf16.mxu1 %v5273_v57  ;;  %v5336_v57 = vld [vmem:[%s7175_s1 + $0xecc] ss:$16 sps:$4 sm:$0xff]  }
 0x19f   :  { %3589 = vmatpush1.bf16.msra.mxu0 %v5274_v60  ;;  %v5417_v60 = vld [vmem:[%s7176_s0 + $0x28] ss:$60 sps:$4 sm:$0xff]  }
 0x1a0   :  { %3562 = vmatpush2.bf16.msra.mxu1 %v5271_v59  ;;  %3590 = vmatprep.subr.bf16.mxu0 %v5279_v61  ;;  %v6932_v59 = vpop.f32.mrf.mxu1  ;;  %v5331_v61 = vld [vmem:[%s7175_s1 + $0xdc8] ss:$16 sps:$4 sm:$0xff]  }
 0x1a1   :  { %3617 = vmatprep.subr.bf16.mxu1 %v5282_v62  ;;  %v5334_v62 = vld [vmem:[%s7175_s1 + $0xec8] ss:$16 sps:$4 sm:$0xff]  }
 0x1a3   :  { %3564 = vmatmul.mubr.bf16.vlgmr.msra.gmra.mxu1 %v5415_v4  ;;  %3591 = vmatpush2.bf16.msra.mxu0 %v5277_v63  ;;  %v6946_v63 = vld [vmem:[%s7178_s2] sm:$0xf] }
 0x1a4   :  { %3618 = vmatpush1.bf16.msra.mxu1 %v5280_v0  ;;  %3592 = vmatprep.subr.bf16.mxu0 %v5285_v2  ;;  %v6948_v0 = vpop.f32.mrf.mxu0  ;;  %v5339_v2 = vld [vmem:[%s7175_s1 + $0xdac] ss:$16 sps:$4 sm:$0xff]   ;;  %v526_v4 = vrot.slane %v6946_v63, %v525_v58 }
 0x1a5   :  { %3619 = vmatprep.subr.bf16.mxu1 %v5288_v3  ;;  %3649 = vmatprep.mubr.bf16.mxu1 %v5416_v10  ;;  %v5342_v3 = vld [vmem:[%s7175_s1 + $0xeac] ss:$16 sps:$4 sm:$0xff]  }
 0x1a6   :  { %v3227_v10 = vpop.f32.mrf.mxu0 }
 0x1a7   :  { %3593 = vmatpush2.bf16.msra.mxu0 %v5283_v5  ;;  %v3266_v5 = vpop.f32.mrf.mxu1 }
 0x1a8   :  { %3620 = vmatpush1.bf16.msra.mxu1 %v5286_v6  ;;  %3594 = vmatprep.subr.bf16.mxu0 %v5291_v8  ;;  %v3056_v6 = vadd.f32 %v6839_v20, %v526_v4  ;;  %v5337_v8 = vld [vmem:[%s7175_s1 + $0xda8] ss:$16 sps:$4 sm:$0xff]  }
 0x1a9   :  { %3621 = vmatprep.subr.bf16.mxu1 %v5294_v9  ;;  %v5340_v9 = vld [vmem:[%s7175_s1 + $0xea8] ss:$16 sps:$4 sm:$0xff]  }
 0x1aa   :  { %v5346_v20 = vld [vmem:[%s7175_s1 + $0xe88] ss:$16 sps:$4 sm:$0xff]  }
 0x1ab   :  { %3595 = vmatpush2.bf16.msra.mxu0 %v5289_v12  ;;  %v5348_v12 = vld [vmem:[%s7175_s1 + $0xe8c] ss:$16 sps:$4 sm:$0xff]  }
 0x1ac   :  { %3622 = vmatpush1.bf16.msra.mxu1 %v5292_v13  ;;  %3596 = vmatprep.subr.bf16.mxu0 %v5297_v15  ;;  %v3052_v13 = vadd.f32 %v6804_v7, %v526_v4  ;;  %v6972_v15 = vpop.f32.mrf.mxu1  ;;  %v5351_v7 = vld [vmem:[%s7175_s1 + $0xd6c] ss:$16 sps:$4 sm:$0xff]  }
 0x1ad   :  { %3623 = vmatprep.subr.bf16.mxu1 %v5300_v16 }
 0x1af   :  { %3597 = vmatpush2.bf16.msra.mxu0 %v5295_v18  ;;  %v3099_v18 = vadd.f32 %v6863_v30, %v3056_v6  ;;  %v5349_v30 = vld [vmem:[%s7175_s1 + $0xd68] ss:$16 sps:$4 sm:$0xff]   ;;  %v521_v6 = vsub.s32 0, %v6915_v51 }
 0x1b0   :  { %3624 = vmatpush1.bf16.msra.mxu1 %v5298_v19  ;;  %3598 = vmatprep.subr.bf16.mxu0 %v5303_v21  ;;  %v5343_v19 = vld [vmem:[%s7175_s1 + $0xd88] ss:$16 sps:$4 sm:$0xff]   ;;  %v5354_v21 = vld [vmem:[%s7175_s1 + $0xe6c] ss:$16 sps:$4 sm:$0xff]  }
 0x1b1   :  { %3625 = vmatprep.subr.bf16.mxu1 %v5306_v22  ;;  %v3095_v22 = vadd.f32 %v6831_v17, %v3052_v13  ;;  %v5357_v17 = vld [vmem:[%s7175_s1 + $0xd4c] ss:$16 sps:$4 sm:$0xff]   ;;  %v522_v13 = vrot.slane %v6946_v63, %v521_v6 }
 0x1b3   :  { %3599 = vmatpush2.bf16.msra.mxu0 %v5301_v26  ;;  %v3142_v26 = vadd.f32 %v6897_v43, %v3099_v18  ;;  %v5377_v18 = vld [vmem:[%s7177_s3 + $0x68] sm:$0xff]  }
 0x1b4   :  { %3626 = vmatpush1.bf16.msra.mxu1 %v5304_v27  ;;  %3600 = vmatprep.subr.bf16.mxu0 %v5309_v28  ;;  %v3270_v27 = vpop.f32.mrf.mxu1 }
 0x1b5   :  { %3627 = vmatprep.subr.bf16.mxu1 %v5312_v29  ;;  %v3138_v29 = vadd.f32 %v6865_v31, %v3095_v22  ;;  %v5360_v31 = vld [vmem:[%s7175_s1 + $0xe4c] ss:$16 sps:$4 sm:$0xff]  }
 0x1b7   :  { %3601 = vmatpush2.bf16.msra.mxu0 %v5307_v32  ;;  %v5352_v32 = vld [vmem:[%s7175_s1 + $0xe68] ss:$16 sps:$4 sm:$0xff]  }
 0x1b8   :  { %3628 = vmatpush1.bf16.msra.mxu1 %v5310_v33  ;;  %3602 = vmatprep.subr.bf16.mxu0 %v5315_v35  ;;  %v6998_v33 = vpop.f32.mrf.mxu1  ;;  %v3185_v35 = vadd.f32 %v3184_v54, %v3142_v26  ;;  %v5369_v54 = vld [vmem:[%s7175_s1 + $0xd0c] ss:$16 sps:$4 sm:$0xff]   ;;  %v5380_v26 = vld [vmem:[%s7177_s3 + $0x20] sm:$0xff]  }
 0x1b9   :  { %3629 = vmatprep.subr.bf16.mxu1 %v5318_v36 }
 0x1ba   :  { %v3352_v43 = vpop.f32.mrf.mxu1 }
 0x1bb   :  { %3603 = vmatpush2.bf16.msra.mxu0 %v5313_v38  ;;  %v3181_v38 = vadd.f32 %v6889_v40, %v3138_v29  ;;  %v5366_v40 = vld [vmem:[%s7175_s1 + $0xe2c] ss:$16 sps:$4 sm:$0xff]  }
 0x1bc   :  { %3630 = vmatpush1.bf16.msra.mxu1 %v5316_v39  ;;  %3604 = vmatprep.subr.bf16.mxu0 %v5321_v41  ;;  %v3228_v39 = vadd.f32 %v3227_v10, %v3185_v35  ;;  %v5355_v41 = vld [vmem:[%s7175_s1 + $0xd48] ss:$16 sps:$4 sm:$0xff]   ;;  %v5418_v10 = vld [vmem:[%s7176_s0 + $0x30] ss:$60 sps:$4 sm:$0xff]  }
 0x1bd   :  { %3631 = vmatprep.subr.bf16.mxu1 %v5324_v42  ;;  %v5358_v42 = vld [vmem:[%s7175_s1 + $0xe48] ss:$16 sps:$4 sm:$0xff]  }
 0x1bf   :  { %3605 = vmatpush2.bf16.msra.mxu0 %v5319_v45  ;;  %v3224_v45 = vadd.f32 %v6923_v55, %v3181_v38  ;;  %v5372_v55 = vld [vmem:[%s7175_s1 + $0xe0c] ss:$16 sps:$4 sm:$0xff]  }
 0x1c0   :  { %3632 = vmatpush1.bf16.msra.mxu1 %v5322_v46  ;;  %3660 = vmatprep.subr.bf16.mxu0 %v5330_v50  ;;  %v5361_v50 = vld [vmem:[%s7175_s1 + $0xd28] ss:$16 sps:$4 sm:$0xff]  }
 0x1c1   :  { %3633 = vmatprep.subr.bf16.mxu1 %v5327_v49  ;;  %v3271_v49 = vadd.f32 %v3270_v27, %v3228_v39 }
 0x1c2   :  { %3607 = vmatmul.mubr.bf16.vlgmr.msra.gmra.mxu0 %v5417_v60  ;;  %v6974_v16 = vpop.f32.mrf.mxu0  ;;  %v5367_v60 = vld [vmem:[%s7175_s1 + $0xd08] ss:$16 sps:$4 sm:$0xff]  }
 0x1c3   :  { %3661 = vmatpush1.bf16.msra.mxu0 %v5328_v53  ;;  %3692 = vmatprep.mubr.bf16.mxu0 %v5420_v23  ;;  %v5345_v23 = vld [vmem:[%s7175_s1 + $0xd8c] ss:$16 sps:$4 sm:$0xff]   ;;  %v7028_v53 = vpop.f32.mrf.mxu1 }
 0x1c4   :  { %3634 = vmatpush2.bf16.msra.mxu1 %v5325_v52  ;;  %3662 = vmatprep.subr.bf16.mxu0 %v5336_v57  ;;  %v3309_v28 = vpop.f32.mrf.mxu0  ;;  %v5364_v52 = vld [vmem:[%s7175_s1 + $0xe28] ss:$16 sps:$4 sm:$0xff]  }
 0x1c5   :  { %3635 = vmatprep.subr.bf16.mxu1 %v5333_v56  ;;  %v3267_v56 = vadd.f32 %v3266_v5, %v3224_v45  ;;  %v5374_v5 = vld [vmem:[%s7177_s3 + $0x38] sm:$0xff]  }
 0x1c6   :  { %v7006_v36 = vpop.f32.mrf.mxu0  ;;  %v5397_v45 = vld [vmem:[%s7177_s3 + $0xd8] sm:$0xff]  }
 0x1c7   :  { %3663 = vmatpush1.bf16.msra.mxu0 %v5334_v62  ;;  %v3310_v58 = vadd.f32 %v3309_v28, %v3267_v56  ;;  %v3356_v62 = vpop.f32.mrf.mxu1 }
 0x1c8   :  { %3636 = vmatpush2.bf16.msra.mxu1 %v5331_v61  ;;  %3664 = vmatprep.subr.bf16.mxu0 %v5342_v3  ;;  %v3313_v46 = vpop.f32.mrf.mxu0  ;;  %v5370_v61 = vld [vmem:[%s7175_s1 + $0xe08] ss:$16 sps:$4 sm:$0xff]  }
 0x1c9   :  { %3637 = vmatprep.subr.bf16.mxu1 %v5339_v2  ;;  %v3314_v57 = vadd.f32 %v3313_v46, %v3271_v49  ;;  %v5373_v2 = vld [vmem:[%s7177_s3 + $0x78] sm:$0xff]   ;;  %v3353_v4 = vadd.f32 %v3352_v43, %v3310_v58  ;;  %v5394_v43 = vld [vmem:[%s7177_s3 + $0xa8] sm:$0xff]   ;;  %v5399_v49 = vld [vmem:[%s7177_s3 + $0xd0] sm:$0xff]  }
 0x1ca   :  { %v5398_v46 = vld [vmem:[%s7177_s3 + $0x98] sm:$0xff]  }
 0x1cb   :  { %3665 = vmatpush1.bf16.msra.mxu0 %v5340_v9  ;;  %v3357_v3 = vadd.f32 %v3356_v62, %v3314_v57 }
 0x1cc   :  { %3638 = vmatpush2.bf16.msra.mxu1 %v5337_v8  ;;  %3666 = vmatprep.subr.bf16.mxu0 %v5348_v12  ;;  %v5375_v8 = vld [vmem:[%s7177_s3 + $0x70] sm:$0xff]  }
 0x1cd   :  { %3639 = vmatprep.subr.bf16.mxu1 %v5345_v23  ;;  %v3704_v9 = vpack.c.bf16 %v3357_v3, %v3353_v4  ;;  %v5419_v23 = vld [vmem:[%s7176_s0 + $0x38] ss:$60 sps:$4 sm:$0xff]  }
 0x1ce   :  { %v5376_v12 = vld [vmem:[%s7177_s3 + $0x30] sm:$0xff]  }
 0x1cf   :  { %3667 = vmatpush1.bf16.msra.mxu0 %v5346_v20  ;;  %v5378_v20 = vld [vmem:[%s7177_s3 + $0x28] sm:$0xff]  }
 0x1d0   :  { %3640 = vmatpush2.bf16.msra.mxu1 %v5343_v19  ;;  %3668 = vmatprep.subr.bf16.mxu0 %v5354_v21  ;;  %v3054_v19 = vadd.f32 %v6823_v14, %v522_v13  ;;  %v5379_v21 = vld [vmem:[%s7177_s3 + $0x60] sm:$0xff]  }
 0x1d1   :  { %3641 = vmatprep.subr.bf16.mxu1 %v5351_v7  ;;  %v3050_v7 = vadd.f32 %v6787_v1, %v522_v13  ;;  %v5381_v1 = vld [vmem:[%s7177_s3 + $0x58] sm:$0xff]   ;;  %v533_v13 = vsub.s32 3, %v6915_v51 }
 0x1d2   :  { %v3097_v22 = vadd.f32 %v6847_v24, %v3054_v19  ;;  %v5382_v24 = vld [vmem:[%s7177_s3 + $0x18] sm:$0xff]  }
 0x1d3   :  { %3669 = vmatpush1.bf16.msra.mxu0 %v5352_v32  ;;  %v3093_v14 = vadd.f32 %v6815_v11, %v3050_v7  ;;  %v5383_v11 = vld [vmem:[%s7177_s3 + $0x50] sm:$0xff]   ;;  %v534_v7 = vrot.slane %v6946_v63, %v533_v13 }
 0x1d4   :  { %3642 = vmatpush2.bf16.msra.mxu1 %v5349_v30  ;;  %3670 = vmatprep.subr.bf16.mxu0 %v5360_v31  ;;  %v3140_v27 = vadd.f32 %v6881_v37, %v3097_v22 }
 0x1d5   :  { %3643 = vmatprep.subr.bf16.mxu1 %v5357_v17  ;;  %v3136_v28 = vadd.f32 %v6849_v25, %v3093_v14  ;;  %v5384_v25 = vld [vmem:[%s7177_s3 + $0x10] sm:$0xff]  }
 0x1d6   :  { %v3183_v29 = vadd.f32 %v6905_v47, %v3140_v27  ;;  %v5385_v47 = vld [vmem:[%s7177_s3 + $0x48] sm:$0xff]  }
 0x1d7   :  { %3671 = vmatpush1.bf16.msra.mxu0 %v5358_v42  ;;  %v3179_v37 = vadd.f32 %v6873_v34, %v3136_v28  ;;  %v5386_v34 = vld [vmem:[%s7177_s3 + $0x8] sm:$0xff]  }
 0x1d8   :  { %3644 = vmatpush2.bf16.msra.mxu1 %v5355_v41  ;;  %3672 = vmatprep.subr.bf16.mxu0 %v5366_v40  ;;  %v3226_v30 = vadd.f32 %v6948_v0, %v3183_v29  ;;  %v5391_v41 = vld [vmem:[%s7177_s3 + $0xf0] sm:$0xff]   ;;  %v5393_v42 = vld [vmem:[%s7177_s3 + $0xe8] sm:$0xff]   ;;  %v5396_v40 = vld [vmem:[%s7177_s3 + $0xa0] sm:$0xff]  }
 0x1d9   :  { %3645 = vmatprep.subr.bf16.mxu1 %v5363_v44  ;;  %v3222_v32 = vadd.f32 %v6907_v48, %v3179_v37  ;;  %v5387_v48 = vld [vmem:[%s7177_s3 + $0x40] sm:$0xff]  }
 0x1da   :  { %v3269_v17 = vadd.f32 %v6972_v15, %v3226_v30  ;;  %v5388_v15 = vld [vmem:[%s7177_s3] sm:$0xff]  }
 0x1db   :  { %3673 = vmatpush1.bf16.msra.mxu0 %v5364_v52  ;;  %v3265_v0 = vadd.f32 %v6932_v59, %v3222_v32  ;;  %v5395_v44 = vld [vmem:[%s7177_s3 + $0xe0] sm:$0xff]   ;;  %v5401_v52 = vld [vmem:[%s7177_s3 + $0xc8] sm:$0xff]  }
 0x1dc   :  { %3646 = vmatpush2.bf16.msra.mxu1 %v5361_v50  ;;  %3674 = vmatprep.subr.bf16.mxu0 %v5372_v55  ;;  %v3312_v31 = vadd.f32 %v7006_v36, %v3269_v17  ;;  %v5389_v36 = vld [vmem:[%s7177_s3 + $0xf8] sm:$0xff]   ;;  %v5400_v50 = vld [vmem:[%s7177_s3 + $0x90] sm:$0xff]   ;;  %v5404_v55 = vld [vmem:[%s7177_s3 + $0x80] sm:$0xff]  }
 0x1dd   :  { %3647 = vmatprep.subr.bf16.mxu1 %v5369_v54  ;;  %v3308_v35 = vadd.f32 %v6974_v16, %v3265_v0  ;;  %v5390_v16 = vld [vmem:[%s7177_s3 + $0xb8] sm:$0xff]   ;;  %v5403_v54 = vld [vmem:[%s7177_s3 + $0xc0] sm:$0xff]  }
 0x1de   :  { %v3355_v38 = vadd.f32 %v7028_v53, %v3312_v31  ;;  %v5402_v53 = vld [vmem:[%s7177_s3 + $0x88] sm:$0xff]  }
 0x1df   :  { %3675 = vmatpush1.bf16.msra.mxu0 %v5370_v61  ;;  %v3351_v39 = vadd.f32 %v6998_v33, %v3308_v35  ;;  %v5392_v33 = vld [vmem:[%s7177_s3 + $0xb0] sm:$0xff]  }
 0x1e0   :  { %3648 = vmatpush2.bf16.msra.mxu1 %v5367_v60  ;;  %4586 = vmatprep.subr.bf16.mxu0 %v5373_v2 }
 0x1e1   :  { %v3703_v59 = vpack.c.bf16 %v3355_v38, %v3351_v39  ;;  %4608 = vmatprep.subr.bf16.mxu1 %v5389_v36 }
 0x1e2   :  { %3693 = vmatmul.mubr.bf16.vlgmr.msra.gmra.mxu0 %v5419_v23 }
 0x1e3   :  { %3650 = vmatmul.mubr.bf16.vlgmr.msra.gmra.mxu1 %v5418_v10  ;;  %4587 = vmatpush3.bf16.msra.mxu0 %v5374_v5  ;;  %v3393_v56 = vpop.f32.mrf.mxu1 }
 0x1e4   :  { %4002 = vmatprep.mubr.bf16.mxu0 %v3704_v9  ;;  %4588 = vmatprep.subr.bf16.mxu0 %v5375_v8 }
 0x1e5   :  { %4609 = vmatpush3.bf16.msra.mxu1 %v5390_v16  ;;  %v3395_v58 = vpop.f32.mrf.mxu1 }
 0x1e6   :  { %4610 = vmatprep.subr.bf16.mxu1 %v5391_v41  ;;  %v3396_v14 = vadd.f32 %v3395_v58, %v534_v7 }
 0x1e7   :  { %4589 = vmatpush3.bf16.msra.mxu0 %v5376_v12  ;;  %v3397_v61 = vpop.f32.mrf.mxu1 }
 0x1e8   :  { %4590 = vmatprep.subr.bf16.mxu0 %v5377_v18  ;;  %v529_v18 = vsub.s32 2, %v6915_v51 }
 0x1e9   :  { %4611 = vmatpush3.bf16.msra.mxu1 %v5392_v33  ;;  %v3399_v2 = vpop.f32.mrf.mxu1 }
 0x1ea   :  { %4612 = vmatprep.subr.bf16.mxu1 %v5393_v42  ;;  %v3400_v29 = vadd.f32 %v3399_v2, %v534_v7 }
 0x1eb   :  { %4591 = vmatpush3.bf16.msra.mxu0 %v5378_v20 }
 0x1ec   :  { %4592 = vmatprep.subr.bf16.mxu0 %v5379_v21  ;;  %v530_v21 = vrot.slane %v6946_v63, %v529_v18 }
 0x1ed   :  { %4613 = vmatpush3.bf16.msra.mxu1 %v5394_v43 }
 0x1ee   :  { %4614 = vmatprep.subr.bf16.mxu1 %v5395_v44  ;;  %v3398_v27 = vadd.f32 %v3397_v61, %v530_v21 }
 0x1ef   :  { %4593 = vmatpush3.bf16.msra.mxu0 %v5380_v26 }
 0x1f0   :  { %4594 = vmatprep.subr.bf16.mxu0 %v5381_v1  ;;  %v3394_v1 = vadd.f32 %v3393_v56, %v530_v21 }
 0x1f1   :  { %4615 = vmatpush3.bf16.msra.mxu1 %v5396_v40 }
 0x1f2   :  { %4616 = vmatprep.subr.bf16.mxu1 %v5397_v45 }
 0x1f3   :  { %4595 = vmatpush3.bf16.msra.mxu0 %v5382_v24 }
 0x1f4   :  { %4596 = vmatprep.subr.bf16.mxu0 %v5383_v11 }
 0x1f5   :  { %4617 = vmatpush3.bf16.msra.mxu1 %v5398_v46 }
 0x1f6   :  { %4618 = vmatprep.subr.bf16.mxu1 %v5399_v49 }
 0x1f7   :  { %4597 = vmatpush3.bf16.msra.mxu0 %v5384_v25 }
 0x1f8   :  { %4598 = vmatprep.subr.bf16.mxu0 %v5385_v47 }
 0x1f9   :  { %4619 = vmatpush3.bf16.msra.mxu1 %v5400_v50 }
 0x1fa   :  { %4620 = vmatprep.subr.bf16.mxu1 %v5401_v52 }
 0x1fb   :  { %4599 = vmatpush3.bf16.msra.mxu0 %v5386_v34 }
 0x1fc   :  { %4600 = vmatprep.subr.bf16.mxu0 %v5387_v48 }
 0x1fd   :  { %4621 = vmatpush3.bf16.msra.mxu1 %v5402_v53 }
 0x1fe   :  { %4622 = vmatprep.subr.bf16.mxu1 %v5403_v54 }
 0x1ff   :  { %4601 = vmatpush3.bf16.msra.mxu0 %v5388_v15 }
 0x201   :  { %4623 = vmatpush3.bf16.msra.mxu1 %v5404_v55 }
 0x202   :  { %4003 = vmatmul.mubr.bf16.vlgmr.msra.gmra.mxu0 %v3703_v59  ;;  %v3436_v57 = vpop.f32.mrf.mxu0 }
 0x203   :  { %v3437_v30 = vadd.f32 %v3436_v57, %v3394_v1 }
 0x204   :  { %v3438_v60 = vpop.f32.mrf.mxu0 }
 0x205   :  { %v3439_v11 = vadd.f32 %v3438_v60, %v3396_v14 }
 0x206   :  { %v3440_v62 = vpop.f32.mrf.mxu0 }
 0x207   :  { %v3441_v37 = vadd.f32 %v3440_v62, %v3398_v27 }
 0x208   :  { %v3442_v3 = vpop.f32.mrf.mxu0 }
 0x209   :  { %v3443_v25 = vadd.f32 %v3442_v3, %v3400_v29 }
 0x223   :  { %v3479_v4 = vpop.f32.mrf.mxu1 }
 0x224   :  { %v3480_v47 = vadd.f32 %v3479_v4, %v3437_v30 }
 0x225   :  { %v3481_v6 = vpop.f32.mrf.mxu1 }
 0x226   :  { %v3482_v32 = vadd.f32 %v3481_v6, %v3439_v11  ;;  %v4553_v6 = vld [vmem:[%s7179_s4] ss:$0 sm:$0xff] }
 0x227   :  { %v3483_v9 = vpop.f32.mrf.mxu1 }
 0x228   :  { %v3484_v51 = vadd.f32 %v3483_v9, %v3441_v37 }
 0x229   :  { %v3485_v23 = vpop.f32.mrf.mxu1 }
 0x22a   :  { %v3486_v0 = vadd.f32 %v3485_v23, %v3443_v25 }
 0x242   :  { %v3522_v5 = vpop.f32.mrf.mxu0 }
 0x243   :  { %v3523_v48 = vadd.f32 %v3522_v5, %v3480_v47 }
 0x244   :  { %v3524_v8 = vpop.f32.mrf.mxu0 }
 0x245   :  { %v3525_v31 = vadd.f32 %v3524_v8, %v3482_v32 }
 0x246   :  { %v3526_v10 = vpop.f32.mrf.mxu0 }
 0x247   :  { %v3527_v63 = vadd.f32 %v3526_v10, %v3484_v51 }
 0x248   :  { %v3528_v12 = vpop.f32.mrf.mxu0 }
 0x249   :  { %v3529_v38 = vadd.f32 %v3528_v12, %v3486_v0 }
 0x263   :  { %v3565_v19 = vpop.f32.mrf.mxu1 }
 0x264   :  { %v3566_v36 = vadd.f32 %v3565_v19, %v3523_v48 }
 0x265   :  { %v3567_v22 = vpop.f32.mrf.mxu1 }
 0x266   :  { %v3568_v39 = vadd.f32 %v3567_v22, %v3525_v31 }
 0x267   :  { %v3569_v28 = vpop.f32.mrf.mxu1 }
 0x268   :  { %v3570_v59 = vadd.f32 %v3569_v28, %v3527_v63 }
 0x269   :  { %v3571_v17 = vpop.f32.mrf.mxu1 }
 0x26a   :  { %v3572_v33 = vadd.f32 %v3571_v17, %v3529_v38 }
 0x282   :  { %v3608_v20 = vpop.f32.mrf.mxu0 }
 0x283   :  { %v3609_v44 = vadd.f32 %v3608_v20, %v3566_v36 }
 0x284   :  { %v3610_v26 = vpop.f32.mrf.mxu0 }
 0x285   :  { %v3611_v42 = vadd.f32 %v3610_v26, %v3568_v39 }
 0x286   :  { %v3612_v24 = vpop.f32.mrf.mxu0 }
 0x287   :  { %v3613_v43 = vadd.f32 %v3612_v24, %v3570_v59 }
 0x288   :  { %v3614_v34 = vpop.f32.mrf.mxu0 }
 0x289   :  { %v3615_v46 = vadd.f32 %v3614_v34, %v3572_v33 }
 0x2a2   :  { %v3694_v15 = vpop.f32.mrf.mxu0 }
 0x2a3   :  { %v3651_v35 = vpop.f32.mrf.mxu1 }
 0x2a4   :  { %v3696_v41 = vpop.f32.mrf.mxu0  ;;  %v3652_v52 = vadd.f32 %v3651_v35, %v3609_v44 }
 0x2a5   :  { %v3653_v16 = vpop.f32.mrf.mxu1 }
 0x2a6   :  { %v3698_v45 = vpop.f32.mrf.mxu0  ;;  %v3654_v49 = vadd.f32 %v3653_v16, %v3611_v42  ;;  %v3695_v60 = vadd.f32 %v3694_v15, %v3652_v52 }
 0x2a7   :  { %v3655_v40 = vpop.f32.mrf.mxu1 }
 0x2a8   :  { %v3656_v50 = vadd.f32 %v3655_v40, %v3613_v43  ;;  %v3700_v56 = vpop.f32.mrf.mxu0  ;;  %v3697_v57 = vadd.f32 %v3696_v41, %v3654_v49 }
 0x2a9   :  { %v3657_v53 = vpop.f32.mrf.mxu1 }
 0x2aa   :  { %v3658_v54 = vadd.f32 %v3657_v53, %v3615_v46  ;;  %v3699_v55 = vadd.f32 %v3698_v45, %v3656_v50 }
 0x2ac   :  { %v3701_v58 = vadd.f32 %v3700_v56, %v3658_v54  ;;  %v3705_v62 = vpack.c.bf16 %v3699_v55, %v3695_v60 }
 0x2ae   :  { %v3706_v61 = vpack.c.bf16 %v3701_v58, %v3697_v57 }
 0x2b0   :  { %4043 = vmatprep.mubr.bf16.mxu1 %v3706_v61 }
 0x2b1   :  { %4044 = vmatmul.mubr.bf16.vlgmr.msra.gmra.mxu1 %v3705_v62 }
 0x2c2   :  { %v4602_v2 = vpop.f32.mrf.mxu0 }
 0x2c4   :  { %v4603_v3 = vpop.f32.mrf.mxu0 }
 0x2c5   :  { %v4604_v5 = vadd.f32 %v4603_v3, %v4602_v2 }
 0x2c6   :  { %v4605_v4 = vpop.f32.mrf.mxu0 }
 0x2c7   :  { %v4005_v23 = vadd.f32 %v4604_v5, %v4553_v6 }
 0x2c8   :  { %v4606_v8 = vpop.f32.mrf.mxu0 }
 0x2c9   :  { %v4607_v12 = vadd.f32 %v4606_v8, %v4605_v4 }
 0x2cb   :  { %v4008_v7 = vadd.f32 %v4607_v12, %v4553_v6 }
 0x371   :  { %v4624_v9 = vpop.f32.mrf.mxu1 }
 0x373   :  { %v4625_v10 = vpop.f32.mrf.mxu1 }
 0x374   :  { %v4626_v13 = vadd.f32 %v4625_v10, %v4624_v9 }
 0x375   :  { %v4627_v18 = vpop.f32.mrf.mxu1 }
 0x376   :  { %v4046_v19 = vadd.f32 %v4626_v13, %v4005_v23 }
 0x377   :  { %v4628_v20 = vpop.f32.mrf.mxu1 }
 0x378   :  { %4052 = vst [vmem:[%s7180_s5] sm:$0xff] %v4046_v19  ;;  %v4629_v21 = vadd.f32 %v4628_v20, %v4627_v18 }
 0x37a   :  { %v4049_v22 = vadd.f32 %v4629_v21, %v4008_v7 }
 0x37c   :  { %4053 = vst [vmem:[%s7180_s5 + $0x8] sm:$0xff] %v4049_v22 }

</bundles_post_ra>
